<compile_context>
chip_gen: v7x
topology: tpu7x:2x2x1
jax: 0.10.0
libtpu: 0.0.40
codegen_flags: <defaults>
</compile_context>

<pallas_src>
import functools

import jax
import jax.numpy as jnp
import numpy as np
from jax import lax
from jax.experimental import pallas as pl
from jax.experimental.pallas import tpu as pltpu

P = 6  # spatial padding required by the dilation-6 branch (covers 2 and 4 too)


# --------------------------------------------------------------------------- #
# Pallas kernel
# --------------------------------------------------------------------------- #
def _aspp_kernel(prelu_ref, x_ref,
                 w1_ref, b1_ref, w2_ref, b2_ref, w3_ref, b3_ref,
                 w4_ref, b4_ref, w5_ref, b5_ref, wf_ref, bf_ref,
                 out_ref, xpad_ref, *, H, W, Cin, Cd):
    HW = H * W

    def prelu(v, a):
        return jnp.where(v >= 0, v, a * v)

    a1, a2, a3, a4, a5, af = (prelu_ref[i] for i in range(6))

    # Valid image for this batch element: (H, W, Cin) bf16, channels on lanes.
    x_c = x_ref[0]

    # Zero-pad into the VMEM scratch slab (replaces an XLA jnp.pad HBM round trip).
    xpad_ref[...] = jnp.zeros_like(xpad_ref)
    xpad_ref[P:P + H, P:P + W, :] = x_c

    x_flat = x_c.reshape(HW, Cin)                                   # (HW, Cin) bf16

    # ---- branch 1: 1x1 conv (+folded BN) + PReLU ---------------------------
    c1 = prelu(jnp.dot(x_flat, w1_ref[...],
                       preferred_element_type=jnp.float32) + b1_ref[...], a1)

    # ---- branches 2-4: 3x3 dilated conv as ONE im2col matmul (K = 9*Cin) ---
    def dilated_branch(w_ref, b_ref, d, a):
        # Hoist the 3 column-shifted slabs (one sublane-shifted load each) and
        # reuse them across the 3 ky taps (leading-dim slices are cheap).
        cols = [xpad_ref[:, P - d + kx * d: P - d + kx * d + W, :]
                for kx in range(3)]                                 # (Hp, W, Cin)
        taps = []
        for ky in range(3):
            y0 = P - d + ky * d
            for kx in range(3):
                taps.append(cols[kx][y0:y0 + H].reshape(HW, Cin))
        xcat = jnp.concatenate(taps, axis=-1)                       # (HW, 9*Cin) bf16
        y = jnp.dot(xcat, w_ref[...], preferred_element_type=jnp.float32)
        return prelu(y + b_ref[...], a)

    c2 = dilated_branch(w2_ref, b2_ref, 2, a2)
    c3 = dilated_branch(w3_ref, b3_ref, 4, a3)
    c4 = dilated_branch(w4_ref, b4_ref, 6, a4)

    # ---- branch 5: global avg pool -> 1x1 conv -> bilinear-up of a 1x1 map.
    # (align_corners=True upsampling from a 1x1 source is a pure broadcast.)
    pooled = jnp.sum(x_flat.astype(jnp.float32), axis=0, keepdims=True) * (1.0 / HW)
    c5 = prelu(jnp.dot(pooled.astype(jnp.bfloat16), w5_ref[...],
                       preferred_element_type=jnp.float32) + b5_ref[...], a5)
    c5 = jnp.broadcast_to(c5, (HW, Cd))                             # (HW, Cd) f32

    # ---- fuse: concat + 1x1 conv as ONE matmul, emitted channel-major ------
    cat = jnp.concatenate([c1, c2, c3, c4, c5], axis=-1).astype(jnp.bfloat16)
    # (Cin, HW) = wf_t (Cin, 5*Cd) @ cat^T  -- MXU-native "NT" matmul; the result
    # is already flattened NCHW, so the store is lane-dense (HW = 256 lanes).
    fused_t = lax.dot_general(wf_ref[...], cat, (((1,), (1,)), ((), ())),
                              preferred_element_type=jnp.float32)   # (Cin, HW)
    out_ref[0] = prelu(fused_t + bf_ref[...], af).astype(out_ref.dtype)


# --------------------------------------------------------------------------- #
# Wrapper (layout glue + pallas_call plumbing)
# --------------------------------------------------------------------------- #
@jax.jit
def aspp_forward(x_nchw, kernel_params):
    N, Cin, H, W = x_nchw.shape
    Cd = Cin // 2
    Hp, Wp = H + 2 * P, W + 2 * P
    HW = H * W

    # Single remaining XLA data-movement pass: NCHW -> NHWC + bf16 cast (fused).
    x_nhwc = jnp.transpose(x_nchw, (0, 2, 3, 1)).astype(jnp.bfloat16)

    (prelu_vec, w1, b1, w2, b2, w3, b3, w4, b4, w5, b5, wf, bf) = kernel_params

    kern = functools.partial(_aspp_kernel, H=H, W=W, Cin=Cin, Cd=Cd)

    def const(shape):                       # grid-constant (whole-array) spec
        return pl.BlockSpec(shape, lambda n, _nd=len(shape): (0,) * _nd)

    out_flat = pl.pallas_call(
        kern,
        out_shape=jax.ShapeDtypeStruct((N, Cin, HW), jnp.float32),
        grid=(N,),
        in_specs=[
            pl.BlockSpec(memory_space=pltpu.MemorySpace.SMEM),      # PReLU slopes
            pl.BlockSpec((1, H, W, Cin), lambda n: (n, 0, 0, 0)),   # valid image
            const((Cin, Cd)), const((1, Cd)),                       # conv1
            const((9 * Cin, Cd)), const((1, Cd)),                   # conv2 (dil 2)
            const((9 * Cin, Cd)), const((1, Cd)),                   # conv3 (dil 4)
            const((9 * Cin, Cd)), const((1, Cd)),                   # conv4 (dil 6)
            const((Cin, Cd)), const((1, Cd)),                       # conv5 (pooled)
            const((Cin, 5 * Cd)), const((Cin, 1)),                  # fuse (pre-transposed)
        ],
        out_specs=pl.BlockSpec((1, Cin, HW), lambda n: (n, 0, 0)),  # flattened NCHW
        scratch_shapes=[pltpu.VMEM((Hp, Wp, Cin), jnp.bfloat16)],   # padded slab
        compiler_params=pltpu.CompilerParams(
            dimension_semantics=("parallel",),
            vmem_limit_bytes=32 * 1024 * 1024),
    )(prelu_vec, x_nhwc, w1, b1, w2, b2, w3, b3, w4, b4, w5, b5, wf, bf)

    return out_flat.reshape(N, Cin, H, W)   # pure metadata reshape: no transpose/slice


# --------------------------------------------------------------------------- #
# Deterministic parameter construction (conv + folded eval-mode BN + PReLU)
# --------------------------------------------------------------------------- #
def init_params(key, in_dim):
    down = in_dim // 2
    keys = iter(jax.random.split(key, 16))

    def conv_init(k, ks, cin, cout):
        fan_in = cin * ks * ks
        bound = 1.0 / np.sqrt(fan_in)
        kw_, kb_ = jax.random.split(k)
        w = jax.random.uniform(kw_, (ks, ks, cin, cout), jnp.float32, -bound, bound)
        b = jax.random.uniform(kb_, (cout,), jnp.float32, -bound, bound)
        return w, b

    def bn_init(k, c):
        k1, k2, k3, k4 = jax.random.split(k, 4)
        gamma = 1.0 + 0.1 * jax.random.normal(k1, (c,), jnp.float32)
        beta = 0.1 * jax.random.normal(k2, (c,), jnp.float32)
        mean = 0.1 * jax.random.normal(k3, (c,), jnp.float32)
        var = jnp.abs(jax.random.normal(k4, (c,), jnp.float32)) + 0.5
        return gamma, beta, mean, var

    def fold(w, b, gamma, beta, mean, var, eps=1e-5):
        s = gamma / jnp.sqrt(var + eps)
        return w * s, (b - mean) * s + beta

    specs = {"c1": (1, in_dim, down), "c2": (3, in_dim, down),
             "c3": (3, in_dim, down), "c4": (3, in_dim, down),
             "c5": (1, in_dim, down), "fuse": (1, 5 * down, in_dim)}
    folded = {}
    for name, (ks, cin, cout) in specs.items():
        w, b = conv_init(next(keys), ks, cin, cout)
        folded[name] = fold(w, b, *bn_init(next(keys), cout))

    prelu = jnp.full((6,), 0.25, jnp.float32)          # PyTorch nn.PReLU() default
    bf16 = jnp.bfloat16

    kernel_params = (
        prelu,
        folded["c1"][0].reshape(in_dim, down).astype(bf16),
        folded["c1"][1].reshape(1, down),
        folded["c2"][0].reshape(9 * in_dim, down).astype(bf16),      # (ky,kx,cin) order
        folded["c2"][1].reshape(1, down),
        folded["c3"][0].reshape(9 * in_dim, down).astype(bf16),
        folded["c3"][1].reshape(1, down),
        folded["c4"][0].reshape(9 * in_dim, down).astype(bf16),
        folded["c4"][1].reshape(1, down),
        folded["c5"][0].reshape(in_dim, down).astype(bf16),
        folded["c5"][1].reshape(1, down),
        folded["fuse"][0].reshape(5 * down, in_dim).T.astype(bf16),  # (Cin, 5*Cd)
        folded["fuse"][1].reshape(in_dim, 1),
    )
    return kernel_params, folded, prelu


# --------------------------------------------------------------------------- #
# Pure-JAX reference (same bf16-operand / f32-accumulate data path) for validation
# --------------------------------------------------------------------------- #
def ref_forward(x_nchw, folded, prelu_vec):
    f32 = jnp.float32

    def q(a):  # bf16 quantization (mirrors the kernel's bf16 data path)
        return a.astype(jnp.bfloat16).astype(f32)

    x = q(jnp.transpose(x_nchw, (0, 2, 3, 1)).astype(f32))
    dn = ("NHWC", "HWIO", "NHWC")

    def prelu(v, a):
        return jnp.where(v >= 0, v, a * v)

    def branch(name, dil, a):
        w, b = folded[name]
        pad = dil if w.shape[0] == 3 else 0
        y = lax.conv_general_dilated(x, q(w), (1, 1), ((pad, pad), (pad, pad)),
                                     rhs_dilation=(dil, dil), dimension_numbers=dn)
        return prelu(y + b, a)

    c1 = branch("c1", 1, prelu_vec[0])
    c2 = branch("c2", 2, prelu_vec[1])
    c3 = branch("c3", 4, prelu_vec[2])
    c4 = branch("c4", 6, prelu_vec[3])

    w5, b5 = folded["c5"]
    pooled = q(jnp.mean(x, axis=(1, 2), keepdims=True))
    c5 = prelu(lax.conv_general_dilated(pooled, q(w5), (1, 1), ((0, 0), (0, 0)),
                                        dimension_numbers=dn) + b5, prelu_vec[4])
    c5 = jnp.broadcast_to(c5, c1.shape)

    wf, bf = folded["fuse"]
    cat = q(jnp.concatenate([c1, c2, c3, c4, c5], axis=-1))
    out = prelu(lax.conv_general_dilated(cat, q(wf), (1, 1), ((0, 0), (0, 0)),
                                         dimension_numbers=dn) + bf, prelu_vec[5])
    return jnp.transpose(out, (0, 3, 1, 2))


# --------------------------------------------------------------------------- #
if __name__ == "__main__":
    key = jax.random.PRNGKey(0)
    kx_, kp_ = jax.random.split(key)

    N, Cin, H, W = 2, 8, 16, 16          # in_dim=8 -> down_dim=4
    x = jax.random.normal(kx_, (N, Cin, H, W), jnp.float32)
    kernel_params, folded, prelu_vec = init_params(kp_, Cin)

    out = jax.block_until_ready(aspp_forward(x, kernel_params))
    ref = jax.block_until_ready(ref_forward(x, folded, prelu_vec))

    assert out.shape == (N, Cin, H, W), out.shape
    if not np.allclose(np.asarray(out), np.asarray(ref), rtol=5e-3, atol=5e-3):
        raise AssertionError(
            f"kernel/reference mismatch, max abs err = {float(jnp.max(jnp.abs(out - ref)))}")
    print("KERNEL_OK")
</pallas_src>

<mosaic_0001>
module attributes {stable_mosaic.version = 11 : i64} {
  func.func @_aspp_kernel(%arg0: i32, %arg1: memref<6xf32, #tpu.memory_space<smem>>, %arg2: memref<1x16x16x8xbf16, #tpu.memory_space<vmem>>, %arg3: memref<8x4xbf16, #tpu.memory_space<vmem>>, %arg4: memref<1x4xf32, #tpu.memory_space<vmem>>, %arg5: memref<72x4xbf16, #tpu.memory_space<vmem>>, %arg6: memref<1x4xf32, #tpu.memory_space<vmem>>, %arg7: memref<72x4xbf16, #tpu.memory_space<vmem>>, %arg8: memref<1x4xf32, #tpu.memory_space<vmem>>, %arg9: memref<72x4xbf16, #tpu.memory_space<vmem>>, %arg10: memref<1x4xf32, #tpu.memory_space<vmem>>, %arg11: memref<8x4xbf16, #tpu.memory_space<vmem>>, %arg12: memref<1x4xf32, #tpu.memory_space<vmem>>, %arg13: memref<8x20xbf16, #tpu.memory_space<vmem>>, %arg14: memref<8x1xf32, #tpu.memory_space<vmem>>, %arg15: memref<1x8x256xf32, #tpu.memory_space<vmem>>, %arg16: memref<28x28x8xbf16, #tpu.memory_space<vmem>>) attributes {dimension_semantics = [#tpu.dimension_semantics<parallel>], iteration_bounds = array<i64: 2>, scalar_prefetch = 0 : i64, scratch_operands = 1 : i64, tpu.core_type = #tpu.core_type<tc>, window_params = [{transform_indices = @transform_0, window_bounds = array<i64: 6>}, {transform_indices = @transform_1, window_bounds = array<i64: 1, 16, 16, 8>}, {pipeline_mode = #tpu.pipeline_mode<synchronous>, transform_indices = @transform_2, window_bounds = array<i64: 8, 4>}, {pipeline_mode = #tpu.pipeline_mode<synchronous>, transform_indices = @transform_3, window_bounds = array<i64: 1, 4>}, {pipeline_mode = #tpu.pipeline_mode<synchronous>, transform_indices = @transform_4, window_bounds = array<i64: 72, 4>}, {pipeline_mode = #tpu.pipeline_mode<synchronous>, transform_indices = @transform_5, window_bounds = array<i64: 1, 4>}, {pipeline_mode = #tpu.pipeline_mode<synchronous>, transform_indices = @transform_6, window_bounds = array<i64: 72, 4>}, {pipeline_mode = #tpu.pipeline_mode<synchronous>, transform_indices = @transform_7, window_bounds = array<i64: 1, 4>}, {pipeline_mode = #tpu.pipeline_mode<synchronous>, transform_indices = @transform_8, window_bounds = array<i64: 72, 4>}, {pipeline_mode = #tpu.pipeline_mode<synchronous>, transform_indices = @transform_9, window_bounds = array<i64: 1, 4>}, {pipeline_mode = #tpu.pipeline_mode<synchronous>, transform_indices = @transform_10, window_bounds = array<i64: 8, 4>}, {pipeline_mode = #tpu.pipeline_mode<synchronous>, transform_indices = @transform_11, window_bounds = array<i64: 1, 4>}, {pipeline_mode = #tpu.pipeline_mode<synchronous>, transform_indices = @transform_12, window_bounds = array<i64: 8, 20>}, {pipeline_mode = #tpu.pipeline_mode<synchronous>, transform_indices = @transform_13, window_bounds = array<i64: 8, 1>}, {transform_indices = @transform_14, window_bounds = array<i64: 1, 8, 256>}]} {
    %c0 = arith.constant 0 : index
    %0 = memref.load %arg1[%c0] : memref<6xf32, #tpu.memory_space<smem>>
    %c1 = arith.constant 1 : index
    %1 = memref.load %arg1[%c1] : memref<6xf32, #tpu.memory_space<smem>>
    %c2 = arith.constant 2 : index
    %2 = memref.load %arg1[%c2] : memref<6xf32, #tpu.memory_space<smem>>
    %c3 = arith.constant 3 : index
    %3 = memref.load %arg1[%c3] : memref<6xf32, #tpu.memory_space<smem>>
    %c4 = arith.constant 4 : index
    %4 = memref.load %arg1[%c4] : memref<6xf32, #tpu.memory_space<smem>>
    %c5 = arith.constant 5 : index
    %5 = memref.load %arg1[%c5] : memref<6xf32, #tpu.memory_space<smem>>
    %c0_0 = arith.constant 0 : index
    %c0_1 = arith.constant 0 : index
    %c0_2 = arith.constant 0 : index
    %c0_3 = arith.constant 0 : index
    %6 = vector.load %arg2[%c0_0, %c0_1, %c0_2, %c0_3] : memref<1x16x16x8xbf16, #tpu.memory_space<vmem>>, vector<1x16x16x8xbf16>
    %7 = vector.shape_cast %6 : vector<1x16x16x8xbf16> to vector<16x16x8xbf16>
    %cst = arith.constant 0.000000e+00 : bf16
    %8 = vector.broadcast %cst : bf16 to vector<28x28x8xbf16>
    %c0_4 = arith.constant 0 : index
    %c0_5 = arith.constant 0 : index
    %c0_6 = arith.constant 0 : index
    %9 = vector.load %arg16[%c0_4, %c0_5, %c0_6] : memref<28x28x8xbf16, #tpu.memory_space<vmem>>, vector<28x28x8xbf16>
    tpu.vector_store %arg16[%c0_4, %c0_5, %c0_6], %8 {strides = array<i32>} : memref<28x28x8xbf16, #tpu.memory_space<vmem>>, vector<28x28x8xbf16>,
    %c6 = arith.constant 6 : index
    %c6_7 = arith.constant 6 : index
    %c0_8 = arith.constant 0 : index
    %10 = vector.load %arg16[%c6, %c6_7, %c0_8] : memref<28x28x8xbf16, #tpu.memory_space<vmem>>, vector<16x16x8xbf16>
    tpu.vector_store %arg16[%c6, %c6_7, %c0_8], %7 {strides = array<i32>} : memref<28x28x8xbf16, #tpu.memory_space<vmem>>, vector<16x16x8xbf16>,
    %11 = vector.shape_cast %7 : vector<16x16x8xbf16> to vector<256x8xbf16>
    %c0_9 = arith.constant 0 : index
    %c0_10 = arith.constant 0 : index
    %12 = vector.load %arg3[%c0_9, %c0_10] : memref<8x4xbf16, #tpu.memory_space<vmem>>, vector<8x4xbf16>
    %cst_11 = arith.constant dense<0.000000e+00> : vector<256x4xf32>
    %13 = tpu.matmul %11, %12, %cst_11 {dimension_numbers = #tpu.dot_dimension_numbers<[1], [0], [0], [1], [0, 0, 1, 1], [], []>} : vector<256x8xbf16>, vector<8x4xbf16>, vector<256x4xf32> -> vector<256x4xf32>
    %c0_12 = arith.constant 0 : index
    %c0_13 = arith.constant 0 : index
    %14 = vector.load %arg4[%c0_12, %c0_13] : memref<1x4xf32, #tpu.memory_space<vmem>>, vector<1x4xf32>
    %15 = vector.broadcast %14 : vector<1x4xf32> to vector<256x4xf32>
    %16 = arith.addf %13, %15 : vector<256x4xf32>
    %cst_14 = arith.constant 0.000000e+00 : f32
    %17 = vector.broadcast %cst_14 : f32 to vector<256x4xf32>
    %18 = arith.cmpf oge, %16, %17 : vector<256x4xf32>
    %19 = vector.broadcast %0 : f32 to vector<256x4xf32>
    %20 = arith.mulf %19, %16 : vector<256x4xf32>
    %21 = arith.select %18, %16, %20 : vector<256x4xi1>, vector<256x4xf32>
    %c0_15 = arith.constant 0 : index
    %c4_16 = arith.constant 4 : index
    %c0_17 = arith.constant 0 : index
    %22 = vector.load %arg16[%c0_15, %c4_16, %c0_17] : memref<28x28x8xbf16, #tpu.memory_space<vmem>>, vector<28x16x8xbf16>
    %c0_18 = arith.constant 0 : index
    %c6_19 = arith.constant 6 : index
    %c0_20 = arith.constant 0 : index
    %23 = vector.load %arg16[%c0_18, %c6_19, %c0_20] : memref<28x28x8xbf16, #tpu.memory_space<vmem>>, vector<28x16x8xbf16>
    %c0_21 = arith.constant 0 : index
    %c8 = arith.constant 8 : index
    %c0_22 = arith.constant 0 : index
    %24 = vector.load %arg16[%c0_21, %c8, %c0_22] : memref<28x28x8xbf16, #tpu.memory_space<vmem>>, vector<28x16x8xbf16>
    %25 = vector.extract_strided_slice %22 {offsets = [4, 0, 0], sizes = [16, 16, 8], strides = [1, 1, 1]} : vector<28x16x8xbf16> to vector<16x16x8xbf16>
    %26 = vector.shape_cast %25 : vector<16x16x8xbf16> to vector<256x8xbf16>
    %27 = vector.extract_strided_slice %23 {offsets = [4, 0, 0], sizes = [16, 16, 8], strides = [1, 1, 1]} : vector<28x16x8xbf16> to vector<16x16x8xbf16>
    %28 = vector.shape_cast %27 : vector<16x16x8xbf16> to vector<256x8xbf16>
    %29 = vector.extract_strided_slice %24 {offsets = [4, 0, 0], sizes = [16, 16, 8], strides = [1, 1, 1]} : vector<28x16x8xbf16> to vector<16x16x8xbf16>
    %30 = vector.shape_cast %29 : vector<16x16x8xbf16> to vector<256x8xbf16>
    %31 = vector.extract_strided_slice %22 {offsets = [6, 0, 0], sizes = [16, 16, 8], strides = [1, 1, 1]} : vector<28x16x8xbf16> to vector<16x16x8xbf16>
    %32 = vector.shape_cast %31 : vector<16x16x8xbf16> to vector<256x8xbf16>
    %33 = vector.extract_strided_slice %23 {offsets = [6, 0, 0], sizes = [16, 16, 8], strides = [1, 1, 1]} : vector<28x16x8xbf16> to vector<16x16x8xbf16>
    %34 = vector.shape_cast %33 : vector<16x16x8xbf16> to vector<256x8xbf16>
    %35 = vector.extract_strided_slice %24 {offsets = [6, 0, 0], sizes = [16, 16, 8], strides = [1, 1, 1]} : vector<28x16x8xbf16> to vector<16x16x8xbf16>
    %36 = vector.shape_cast %35 : vector<16x16x8xbf16> to vector<256x8xbf16>
    %37 = vector.extract_strided_slice %22 {offsets = [8, 0, 0], sizes = [16, 16, 8], strides = [1, 1, 1]} : vector<28x16x8xbf16> to vector<16x16x8xbf16>
    %38 = vector.shape_cast %37 : vector<16x16x8xbf16> to vector<256x8xbf16>
    %39 = vector.extract_strided_slice %23 {offsets = [8, 0, 0], sizes = [16, 16, 8], strides = [1, 1, 1]} : vector<28x16x8xbf16> to vector<16x16x8xbf16>
    %40 = vector.shape_cast %39 : vector<16x16x8xbf16> to vector<256x8xbf16>
    %41 = vector.extract_strided_slice %24 {offsets = [8, 0, 0], sizes = [16, 16, 8], strides = [1, 1, 1]} : vector<28x16x8xbf16> to vector<16x16x8xbf16>
    %42 = vector.shape_cast %41 : vector<16x16x8xbf16> to vector<256x8xbf16>
    %43 = tpu.concatenate %26, %28, %30, %32, %34, %36, %38, %40, %42 in 1 : vector<256x8xbf16>, vector<256x8xbf16>, vector<256x8xbf16>, vector<256x8xbf16>, vector<256x8xbf16>, vector<256x8xbf16>, vector<256x8xbf16>, vector<256x8xbf16>, vector<256x8xbf16> -> vector<256x72xbf16>
    %c0_23 = arith.constant 0 : index
    %c0_24 = arith.constant 0 : index
    %44 = vector.load %arg5[%c0_23, %c0_24] : memref<72x4xbf16, #tpu.memory_space<vmem>>, vector<72x4xbf16>
    %cst_25 = arith.constant dense<0.000000e+00> : vector<256x4xf32>
    %45 = tpu.matmul %43, %44, %cst_25 {dimension_numbers = #tpu.dot_dimension_numbers<[1], [0], [0], [1], [0, 0, 1, 1], [], []>} : vector<256x72xbf16>, vector<72x4xbf16>, vector<256x4xf32> -> vector<256x4xf32>
    %c0_26 = arith.constant 0 : index
    %c0_27 = arith.constant 0 : index
    %46 = vector.load %arg6[%c0_26, %c0_27] : memref<1x4xf32, #tpu.memory_space<vmem>>, vector<1x4xf32>
    %47 = vector.broadcast %46 : vector<1x4xf32> to vector<256x4xf32>
    %48 = arith.addf %45, %47 : vector<256x4xf32>
    %cst_28 = arith.constant 0.000000e+00 : f32
    %49 = vector.broadcast %cst_28 : f32 to vector<256x4xf32>
    %50 = arith.cmpf oge, %48, %49 : vector<256x4xf32>
    %51 = vector.broadcast %1 : f32 to vector<256x4xf32>
    %52 = arith.mulf %51, %48 : vector<256x4xf32>
    %53 = arith.select %50, %48, %52 : vector<256x4xi1>, vector<256x4xf32>
    %c0_29 = arith.constant 0 : index
    %c2_30 = arith.constant 2 : index
    %c0_31 = arith.constant 0 : index
    %54 = vector.load %arg16[%c0_29, %c2_30, %c0_31] : memref<28x28x8xbf16, #tpu.memory_space<vmem>>, vector<28x16x8xbf16>
    %c0_32 = arith.constant 0 : index
    %c6_33 = arith.constant 6 : index
    %c0_34 = arith.constant 0 : index
    %55 = vector.load %arg16[%c0_32, %c6_33, %c0_34] : memref<28x28x8xbf16, #tpu.memory_space<vmem>>, vector<28x16x8xbf16>
    %c0_35 = arith.constant 0 : index
    %c10 = arith.constant 10 : index
    %c0_36 = arith.constant 0 : index
    %56 = vector.load %arg16[%c0_35, %c10, %c0_36] : memref<28x28x8xbf16, #tpu.memory_space<vmem>>, vector<28x16x8xbf16>
    %57 = vector.extract_strided_slice %54 {offsets = [2, 0, 0], sizes = [16, 16, 8], strides = [1, 1, 1]} : vector<28x16x8xbf16> to vector<16x16x8xbf16>
    %58 = vector.shape_cast %57 : vector<16x16x8xbf16> to vector<256x8xbf16>
    %59 = vector.extract_strided_slice %55 {offsets = [2, 0, 0], sizes = [16, 16, 8], strides = [1, 1, 1]} : vector<28x16x8xbf16> to vector<16x16x8xbf16>
    %60 = vector.shape_cast %59 : vector<16x16x8xbf16> to vector<256x8xbf16>
    %61 = vector.extract_strided_slice %56 {offsets = [2, 0, 0], sizes = [16, 16, 8], strides = [1, 1, 1]} : vector<28x16x8xbf16> to vector<16x16x8xbf16>
    %62 = vector.shape_cast %61 : vector<16x16x8xbf16> to vector<256x8xbf16>
    %63 = vector.extract_strided_slice %54 {offsets = [6, 0, 0], sizes = [16, 16, 8], strides = [1, 1, 1]} : vector<28x16x8xbf16> to vector<16x16x8xbf16>
    %64 = vector.shape_cast %63 : vector<16x16x8xbf16> to vector<256x8xbf16>
    %65 = vector.extract_strided_slice %55 {offsets = [6, 0, 0], sizes = [16, 16, 8], strides = [1, 1, 1]} : vector<28x16x8xbf16> to vector<16x16x8xbf16>
    %66 = vector.shape_cast %65 : vector<16x16x8xbf16> to vector<256x8xbf16>
    %67 = vector.extract_strided_slice %56 {offsets = [6, 0, 0], sizes = [16, 16, 8], strides = [1, 1, 1]} : vector<28x16x8xbf16> to vector<16x16x8xbf16>
    %68 = vector.shape_cast %67 : vector<16x16x8xbf16> to vector<256x8xbf16>
    %69 = vector.extract_strided_slice %54 {offsets = [10, 0, 0], sizes = [16, 16, 8], strides = [1, 1, 1]} : vector<28x16x8xbf16> to vector<16x16x8xbf16>
    %70 = vector.shape_cast %69 : vector<16x16x8xbf16> to vector<256x8xbf16>
    %71 = vector.extract_strided_slice %55 {offsets = [10, 0, 0], sizes = [16, 16, 8], strides = [1, 1, 1]} : vector<28x16x8xbf16> to vector<16x16x8xbf16>
    %72 = vector.shape_cast %71 : vector<16x16x8xbf16> to vector<256x8xbf16>
    %73 = vector.extract_strided_slice %56 {offsets = [10, 0, 0], sizes = [16, 16, 8], strides = [1, 1, 1]} : vector<28x16x8xbf16> to vector<16x16x8xbf16>
    %74 = vector.shape_cast %73 : vector<16x16x8xbf16> to vector<256x8xbf16>
    %75 = tpu.concatenate %58, %60, %62, %64, %66, %68, %70, %72, %74 in 1 : vector<256x8xbf16>, vector<256x8xbf16>, vector<256x8xbf16>, vector<256x8xbf16>, vector<256x8xbf16>, vector<256x8xbf16>, vector<256x8xbf16>, vector<256x8xbf16>, vector<256x8xbf16> -> vector<256x72xbf16>
    %c0_37 = arith.constant 0 : index
    %c0_38 = arith.constant 0 : index
    %76 = vector.load %arg7[%c0_37, %c0_38] : memref<72x4xbf16, #tpu.memory_space<vmem>>, vector<72x4xbf16>
    %cst_39 = arith.constant dense<0.000000e+00> : vector<256x4xf32>
    %77 = tpu.matmul %75, %76, %cst_39 {dimension_numbers = #tpu.dot_dimension_numbers<[1], [0], [0], [1], [0, 0, 1, 1], [], []>} : vector<256x72xbf16>, vector<72x4xbf16>, vector<256x4xf32> -> vector<256x4xf32>
    %c0_40 = arith.constant 0 : index
    %c0_41 = arith.constant 0 : index
    %78 = vector.load %arg8[%c0_40, %c0_41] : memref<1x4xf32, #tpu.memory_space<vmem>>, vector<1x4xf32>
    %79 = vector.broadcast %78 : vector<1x4xf32> to vector<256x4xf32>
    %80 = arith.addf %77, %79 : vector<256x4xf32>
    %cst_42 = arith.constant 0.000000e+00 : f32
    %81 = vector.broadcast %cst_42 : f32 to vector<256x4xf32>
    %82 = arith.cmpf oge, %80, %81 : vector<256x4xf32>
    %83 = vector.broadcast %2 : f32 to vector<256x4xf32>
    %84 = arith.mulf %83, %80 : vector<256x4xf32>
    %85 = arith.select %82, %80, %84 : vector<256x4xi1>, vector<256x4xf32>
    %c0_43 = arith.constant 0 : index
    %c0_44 = arith.constant 0 : index
    %c0_45 = arith.constant 0 : index
    %86 = vector.load %arg16[%c0_43, %c0_44, %c0_45] : memref<28x28x8xbf16, #tpu.memory_space<vmem>>, vector<28x16x8xbf16>
    %c0_46 = arith.constant 0 : index
    %c6_47 = arith.constant 6 : index
    %c0_48 = arith.constant 0 : index
    %87 = vector.load %arg16[%c0_46, %c6_47, %c0_48] : memref<28x28x8xbf16, #tpu.memory_space<vmem>>, vector<28x16x8xbf16>
    %c0_49 = arith.constant 0 : index
    %c12 = arith.constant 12 : index
    %c0_50 = arith.constant 0 : index
    %88 = vector.load %arg16[%c0_49, %c12, %c0_50] : memref<28x28x8xbf16, #tpu.memory_space<vmem>>, vector<28x16x8xbf16>
    %89 = vector.extract_strided_slice %86 {offsets = [0, 0, 0], sizes = [16, 16, 8], strides = [1, 1, 1]} : vector<28x16x8xbf16> to vector<16x16x8xbf16>
    %90 = vector.shape_cast %89 : vector<16x16x8xbf16> to vector<256x8xbf16>
    %91 = vector.extract_strided_slice %87 {offsets = [0, 0, 0], sizes = [16, 16, 8], strides = [1, 1, 1]} : vector<28x16x8xbf16> to vector<16x16x8xbf16>
    %92 = vector.shape_cast %91 : vector<16x16x8xbf16> to vector<256x8xbf16>
    %93 = vector.extract_strided_slice %88 {offsets = [0, 0, 0], sizes = [16, 16, 8], strides = [1, 1, 1]} : vector<28x16x8xbf16> to vector<16x16x8xbf16>
    %94 = vector.shape_cast %93 : vector<16x16x8xbf16> to vector<256x8xbf16>
    %95 = vector.extract_strided_slice %86 {offsets = [6, 0, 0], sizes = [16, 16, 8], strides = [1, 1, 1]} : vector<28x16x8xbf16> to vector<16x16x8xbf16>
    %96 = vector.shape_cast %95 : vector<16x16x8xbf16> to vector<256x8xbf16>
    %97 = vector.extract_strided_slice %87 {offsets = [6, 0, 0], sizes = [16, 16, 8], strides = [1, 1, 1]} : vector<28x16x8xbf16> to vector<16x16x8xbf16>
    %98 = vector.shape_cast %97 : vector<16x16x8xbf16> to vector<256x8xbf16>
    %99 = vector.extract_strided_slice %88 {offsets = [6, 0, 0], sizes = [16, 16, 8], strides = [1, 1, 1]} : vector<28x16x8xbf16> to vector<16x16x8xbf16>
    %100 = vector.shape_cast %99 : vector<16x16x8xbf16> to vector<256x8xbf16>
    %101 = vector.extract_strided_slice %86 {offsets = [12, 0, 0], sizes = [16, 16, 8], strides = [1, 1, 1]} : vector<28x16x8xbf16> to vector<16x16x8xbf16>
    %102 = vector.shape_cast %101 : vector<16x16x8xbf16> to vector<256x8xbf16>
    %103 = vector.extract_strided_slice %87 {offsets = [12, 0, 0], sizes = [16, 16, 8], strides = [1, 1, 1]} : vector<28x16x8xbf16> to vector<16x16x8xbf16>
    %104 = vector.shape_cast %103 : vector<16x16x8xbf16> to vector<256x8xbf16>
    %105 = vector.extract_strided_slice %88 {offsets = [12, 0, 0], sizes = [16, 16, 8], strides = [1, 1, 1]} : vector<28x16x8xbf16> to vector<16x16x8xbf16>
    %106 = vector.shape_cast %105 : vector<16x16x8xbf16> to vector<256x8xbf16>
    %107 = tpu.concatenate %90, %92, %94, %96, %98, %100, %102, %104, %106 in 1 : vector<256x8xbf16>, vector<256x8xbf16>, vector<256x8xbf16>, vector<256x8xbf16>, vector<256x8xbf16>, vector<256x8xbf16>, vector<256x8xbf16>, vector<256x8xbf16>, vector<256x8xbf16> -> vector<256x72xbf16>
    %c0_51 = arith.constant 0 : index
    %c0_52 = arith.constant 0 : index
    %108 = vector.load %arg9[%c0_51, %c0_52] : memref<72x4xbf16, #tpu.memory_space<vmem>>, vector<72x4xbf16>
    %cst_53 = arith.constant dense<0.000000e+00> : vector<256x4xf32>
    %109 = tpu.matmul %107, %108, %cst_53 {dimension_numbers = #tpu.dot_dimension_numbers<[1], [0], [0], [1], [0, 0, 1, 1], [], []>} : vector<256x72xbf16>, vector<72x4xbf16>, vector<256x4xf32> -> vector<256x4xf32>
    %c0_54 = arith.constant 0 : index
    %c0_55 = arith.constant 0 : index
    %110 = vector.load %arg10[%c0_54, %c0_55] : memref<1x4xf32, #tpu.memory_space<vmem>>, vector<1x4xf32>
    %111 = vector.broadcast %110 : vector<1x4xf32> to vector<256x4xf32>
    %112 = arith.addf %109, %111 : vector<256x4xf32>
    %cst_56 = arith.constant 0.000000e+00 : f32
    %113 = vector.broadcast %cst_56 : f32 to vector<256x4xf32>
    %114 = arith.cmpf oge, %112, %113 : vector<256x4xf32>
    %115 = vector.broadcast %3 : f32 to vector<256x4xf32>
    %116 = arith.mulf %115, %112 : vector<256x4xf32>
    %117 = arith.select %114, %112, %116 : vector<256x4xi1>, vector<256x4xf32>
    %118 = arith.extf %11 : vector<256x8xbf16> to vector<256x8xf32>
    %cst_57 = arith.constant dense<0.000000e+00> : vector<8xf32>
    %119 = vector.multi_reduction <add>, %118, %cst_57 [0] : vector<256x8xf32> to vector<8xf32>
    %120 = vector.shape_cast %119 : vector<8xf32> to vector<1x8xf32>
    %cst_58 = arith.constant 3.906250e-03 : f32
    %121 = vector.broadcast %cst_58 : f32 to vector<1x8xf32>
    %122 = arith.mulf %120, %121 : vector<1x8xf32>
    %123 = arith.truncf %122 : vector<1x8xf32> to vector<1x8xbf16>
    %c0_59 = arith.constant 0 : index
    %c0_60 = arith.constant 0 : index
    %124 = vector.load %arg11[%c0_59, %c0_60] : memref<8x4xbf16, #tpu.memory_space<vmem>>, vector<8x4xbf16>
    %cst_61 = arith.constant dense<0.000000e+00> : vector<1x4xf32>
    %125 = tpu.matmul %123, %124, %cst_61 {dimension_numbers = #tpu.dot_dimension_numbers<[1], [0], [0], [1], [0, 0, 1, 1], [], []>} : vector<1x8xbf16>, vector<8x4xbf16>, vector<1x4xf32> -> vector<1x4xf32>
    %c0_62 = arith.constant 0 : index
    %c0_63 = arith.constant 0 : index
    %126 = vector.load %arg12[%c0_62, %c0_63] : memref<1x4xf32, #tpu.memory_space<vmem>>, vector<1x4xf32>
    %127 = arith.addf %125, %126 : vector<1x4xf32>
    %cst_64 = arith.constant 0.000000e+00 : f32
    %128 = vector.broadcast %cst_64 : f32 to vector<1x4xf32>
    %129 = arith.cmpf oge, %127, %128 : vector<1x4xf32>
    %130 = vector.broadcast %4 : f32 to vector<1x4xf32>
    %131 = arith.mulf %130, %127 : vector<1x4xf32>
    %132 = arith.select %129, %127, %131 : vector<1x4xi1>, vector<1x4xf32>
    %133 = vector.shape_cast %132 : vector<1x4xf32> to vector<1x4xf32>
    %134 = vector.broadcast %133 : vector<1x4xf32> to vector<256x4xf32>
    %135 = tpu.concatenate %21, %53, %85, %117, %134 in 1 : vector<256x4xf32>, vector<256x4xf32>, vector<256x4xf32>, vector<256x4xf32>, vector<256x4xf32> -> vector<256x20xf32>
    %136 = arith.truncf %135 : vector<256x20xf32> to vector<256x20xbf16>
    %c0_65 = arith.constant 0 : index
    %c0_66 = arith.constant 0 : index
    %137 = vector.load %arg13[%c0_65, %c0_66] : memref<8x20xbf16, #tpu.memory_space<vmem>>, vector<8x20xbf16>
    %cst_67 = arith.constant dense<0.000000e+00> : vector<8x256xf32>
    %138 = tpu.matmul %137, %136, %cst_67 {dimension_numbers = #tpu.dot_dimension_numbers<[1], [1], [0], [0], [0, 0, 1, 0], [], []>} : vector<8x20xbf16>, vector<256x20xbf16>, vector<8x256xf32> -> vector<8x256xf32>
    %c0_68 = arith.constant 0 : index
    %c0_69 = arith.constant 0 : index
    %139 = vector.load %arg14[%c0_68, %c0_69] : memref<8x1xf32, #tpu.memory_space<vmem>>, vector<8x1xf32>
    %140 = vector.broadcast %139 : vector<8x1xf32> to vector<8x256xf32>
    %141 = arith.addf %138, %140 : vector<8x256xf32>
    %cst_70 = arith.constant 0.000000e+00 : f32
    %142 = vector.broadcast %cst_70 : f32 to vector<8x256xf32>
    %143 = arith.cmpf oge, %141, %142 : vector<8x256xf32>
    %144 = vector.broadcast %5 : f32 to vector<8x256xf32>
    %145 = arith.mulf %144, %141 : vector<8x256xf32>
    %146 = arith.select %143, %141, %145 : vector<8x256xi1>, vector<8x256xf32>
    %c0_71 = arith.constant 0 : index
    %c0_72 = arith.constant 0 : index
    %c0_73 = arith.constant 0 : index
    %147 = vector.load %arg15[%c0_71, %c0_72, %c0_73] : memref<1x8x256xf32, #tpu.memory_space<vmem>>, vector<1x8x256xf32>
    %148 = vector.shape_cast %147 : vector<1x8x256xf32> to vector<8x256xf32>
    %149 = vector.shape_cast %146 : vector<8x256xf32> to vector<1x8x256xf32>
    tpu.vector_store %arg15[%c0_71, %c0_72, %c0_73], %149 {strides = array<i32>} : memref<1x8x256xf32, #tpu.memory_space<vmem>>, vector<1x8x256xf32>,
    return
  }
  func.func @transform_0(%arg0: i32) -> i32 {
    %c0_i32 = arith.constant 0 : i32
    %c0_i32_0 = arith.constant 0 : i32
    return %c0_i32 : i32
  }
  func.func @transform_1(%arg0: i32) -> (i32, i32, i32, i32) {
    %c0_i32 = arith.constant 0 : i32
    %c0_i32_0 = arith.constant 0 : i32
    %c0_i32_1 = arith.constant 0 : i32
    %c0_i32_2 = arith.constant 0 : i32
    return %arg0, %c0_i32, %c0_i32_0, %c0_i32_1 : i32, i32, i32, i32
  }
  func.func @transform_2(%arg0: i32) -> (i32, i32) {
    %c0_i32 = arith.constant 0 : i32
    %c0_i32_0 = arith.constant 0 : i32
    %c0_i32_1 = arith.constant 0 : i32
    return %c0_i32, %c0_i32_0 : i32, i32
  }
  func.func @transform_3(%arg0: i32) -> (i32, i32) {
    %c0_i32 = arith.constant 0 : i32
    %c0_i32_0 = arith.constant 0 : i32
    %c0_i32_1 = arith.constant 0 : i32
    return %c0_i32, %c0_i32_0 : i32, i32
  }
  func.func @transform_4(%arg0: i32) -> (i32, i32) {
    %c0_i32 = arith.constant 0 : i32
    %c0_i32_0 = arith.constant 0 : i32
    %c0_i32_1 = arith.constant 0 : i32
    return %c0_i32, %c0_i32_0 : i32, i32
  }
  func.func @transform_5(%arg0: i32) -> (i32, i32) {
    %c0_i32 = arith.constant 0 : i32
    %c0_i32_0 = arith.constant 0 : i32
    %c0_i32_1 = arith.constant 0 : i32
    return %c0_i32, %c0_i32_0 : i32, i32
  }
  func.func @transform_6(%arg0: i32) -> (i32, i32) {
    %c0_i32 = arith.constant 0 : i32
    %c0_i32_0 = arith.constant 0 : i32
    %c0_i32_1 = arith.constant 0 : i32
    return %c0_i32, %c0_i32_0 : i32, i32
  }
  func.func @transform_7(%arg0: i32) -> (i32, i32) {
    %c0_i32 = arith.constant 0 : i32
    %c0_i32_0 = arith.constant 0 : i32
    %c0_i32_1 = arith.constant 0 : i32
    return %c0_i32, %c0_i32_0 : i32, i32
  }
  func.func @transform_8(%arg0: i32) -> (i32, i32) {
    %c0_i32 = arith.constant 0 : i32
    %c0_i32_0 = arith.constant 0 : i32
    %c0_i32_1 = arith.constant 0 : i32
    return %c0_i32, %c0_i32_0 : i32, i32
  }
  func.func @transform_9(%arg0: i32) -> (i32, i32) {
    %c0_i32 = arith.constant 0 : i32
    %c0_i32_0 = arith.constant 0 : i32
    %c0_i32_1 = arith.constant 0 : i32
    return %c0_i32, %c0_i32_0 : i32, i32
  }
  func.func @transform_10(%arg0: i32) -> (i32, i32) {
    %c0_i32 = arith.constant 0 : i32
    %c0_i32_0 = arith.constant 0 : i32
    %c0_i32_1 = arith.constant 0 : i32
    return %c0_i32, %c0_i32_0 : i32, i32
  }
  func.func @transform_11(%arg0: i32) -> (i32, i32) {
    %c0_i32 = arith.constant 0 : i32
    %c0_i32_0 = arith.constant 0 : i32
    %c0_i32_1 = arith.constant 0 : i32
    return %c0_i32, %c0_i32_0 : i32, i32
  }
  func.func @transform_12(%arg0: i32) -> (i32, i32) {
    %c0_i32 = arith.constant 0 : i32
    %c0_i32_0 = arith.constant 0 : i32
    %c0_i32_1 = arith.constant 0 : i32
    return %c0_i32, %c0_i32_0 : i32, i32
  }
  func.func @transform_13(%arg0: i32) -> (i32, i32) {
    %c0_i32 = arith.constant 0 : i32
    %c0_i32_0 = arith.constant 0 : i32
    %c0_i32_1 = arith.constant 0 : i32
    return %c0_i32, %c0_i32_0 : i32, i32
  }
  func.func @transform_14(%arg0: i32) -> (i32, i32, i32) {
    %c0_i32 = arith.constant 0 : i32
    %c0_i32_0 = arith.constant 0 : i32
    %c0_i32_1 = arith.constant 0 : i32
    return %arg0, %c0_i32, %c0_i32_0 : i32, i32, i32
  }
}

</mosaic_0001>

<bundles_post_ra>
// kernel: aspp_forward.1
= control target key start
LH: loop header
LB: loop body
LE: loop exit
PB: predicated region body
PF: predicated region fallthrough
CT: control target
= control target key end

     0   :  { %19 = vsyncpa [#allocation4], 0  ;;  %s7827_s29 = smov 0   ;;  %s12009_s0 = inlined_call_operand.vmem [shape: f32[6], index: 0, kind: input, shape index: {}]   ;;  %s12010_s1 = inlined_call_operand.vmem [shape: bf16[2,16,16,8], index: 1, kind: input, shape index: {}]   ;;  %s12011_s2 = inlined_call_operand.vmem [shape: bf16[8,4], index: 2, kind: input, shape index: {}]   ;;  %s12012_s3 = inlined_call_operand.vmem [shape: f32[1,4], index: 3, kind: input, shape index: {}]   ;;  %s12013_s4 = inlined_call_operand.vmem [shape: bf16[72,4], index: 4, kind: input, shape index: {}]   ;;  %s12014_s5 = inlined_call_operand.vmem [shape: f32[1,4], index: 5, kind: input, shape index: {}]   ;;  %s12015_s6 = inlined_call_operand.vmem [shape: bf16[72,4], index: 6, kind: input, shape index: {}]   ;;  %s12016_s7 = inlined_call_operand.vmem [shape: f32[1,4], index: 7, kind: input, shape index: {}]   ;;  %s12017_s8 = inlined_call_operand.vmem [shape: bf16[72,4], index: 8, kind: input, shape index: {}]   ;;  %s12018_s9 = inlined_call_operand.vmem [shape: f32[1,4], index: 9, kind: input, shape index: {}]   ;;  %s12019_s10 = inlined_call_operand.vmem [shape: bf16[8,4], index: 10, kind: input, shape index: {}]   ;;  %s12020_s11 = inlined_call_operand.vmem [shape: f32[1,4], index: 11, kind: input, shape index: {}]   ;;  %s12021_s12 = inlined_call_operand.vmem [shape: bf16[8,20], index: 12, kind: input, shape index: {}]   ;;  %s12022_s13 = inlined_call_operand.vmem [shape: f32[8,1], index: 13, kind: input, shape index: {}]   ;;  %s12023_s14 = inlined_call_operand.vmem [shape: f32[2,8,256], index: 14, kind: output, shape index: {}]  }
   0x1 LB: > { %s7833_s30 = sadd.s32 4294967295, %s7736_s29   ;;  %p6573_p0 = scmp.ge.s32.totalorder %s7736_s29, 1  ;;  %s7736_s29 = sphi %s7827_s29, %s25_s29  }
   0x2   : > { %p355_p1 = scmp.lt.s32.totalorder %s7736_s29, 3  ;;  %s368_s17 = sshll.u32 %s12009_s0, 4  ;;  %s369_s17 = int_to_ptr.vmem [resolvable:$true] %s368_s17 }
   0x3   : > { %p7274_p3 = scmp.eq.s32.totalorder %s7833_s30, 0  ;;  %s7711_s19 = scalar_lea.vmem %s369_s17, 16 }
   0x4   : > { %p7840_p2 = pnand %p6573_p0, %p355_p1  ;;  %p7712_p6 = scmp.ne.s32.totalorder %s369_s17, %s7711_s19 }
   0x5   : > { %p7719_p10 = scmp.lt.s32.totalorder %s369_s17, %s369_s17  ;;  %p7720_p11 = scmp.lt.s32.totalorder %s7711_s19, %s7711_s19 }
   0x6   : > { %p7270_p4 = pneg %p7840_p2 }
   0x7   : > { %p7721_p12 = por %p7720_p11, %p7719_p10 }
   0x8   : > { %p7271_p5 = pnand %p7274_p3, %p7270_p4 }
   0xa   : > { %p7713_p7 = pneg %p7271_p5 }
   0xc   : > { %p7714_p8 = pnand %p7713_p7, %p7712_p6 }
   0xe   : > { %p7715_p9 = pneg %p7714_p8 }
  0x10   : > { %p7722_p13 = pnand %p7721_p12, %p7715_p9 }
  0x12   : > { %7725 = shalt.err (!%p7722_p13)
}
  0x13   : > { %s7738_s20 = smov [#allocation3]   ;;  %425 = sbr.rel (%p7840_p2) target bundleno = 1403 (0x57b), region = 76 }
  0x14   : > { %7273 = dma.vmem_to_smem (!%p7271_p5), %s369_s17, 16, %s7738_s20, [#allocation4]  }
  0x1a   : > { %7731 = dma.done.wait (%p7274_p3), [#allocation4], 16  }
  0x1b   : > { %7733 = vsyncadd (%p7274_p3), [#allocation4], 4294967280 }
  0x1c   : > { %431 = sfence }
  0x1d   : > { %vm521_vm0 = vcmask 60416   ;;  %p472_p0 = scmp.lt.s32.totalorder %s7833_s30, 1  ;;  %v7739_v0 = vmov 0   ;;  %vm1555_vm1 = vcmask 1040384   ;;  %vm1556_vm2 = vcmask 1044484   ;;  %s7740_s25 = smov 8  }
  0x1e   : > { %539 = vst.msk [vmem:[#allocation2 + $0x40] sm:$0xf] %vm521_vm0, %v7739_v0  ;;  %540 = vst.msk [vmem:[#allocation2 + $0x44] sm:$0xf] %vm521_vm0, %v7739_v0  ;;  %7538 = vset.pattern.permute.xlu1 %v7739_v0  ;;  %7539 = vset.pattern.permute.xlu0 %v7739_v0  ;;  %vm667_vm3 = vcmask 1042432   ;;  %vm668_vm4 = vcmask 1046532  }
  0x1f   : > { %541 = vst.msk [vmem:[#allocation2 + $0x48] sm:$0xf] %vm521_vm0, %v7739_v0  ;;  %522 = vst.msk [vmem:[#allocation2] sm:$0xf] %vm521_vm0, %v7739_v0  ;;  %s12604_s30 = smov (!%p472_p0, %s7833_s30), 1  ;;  %vm799_vm5 = vcmask 60419  }
  0x20   : > { %523 = vst.msk [vmem:[#allocation2 + $0x4] sm:$0xf] %vm521_vm0, %v7739_v0  ;;  %524 = vst.msk [vmem:[#allocation2 + $0x8] sm:$0xf] %vm521_vm0, %v7739_v0  ;;  %s6986_s21 = sshll.u32 %s12604_s30, 7  ;;  %v12170_v3 = vmov 0 }
  0x21   : > { %527 = vst.msk [vmem:[#allocation2 + $0x10] sm:$0xf] %vm521_vm0, %v7739_v0  ;;  %528 = vst.msk [vmem:[#allocation2 + $0x14] sm:$0xf] %vm521_vm0, %v7739_v0  ;;  %s8035_s24 = scalar_lea.vmem %s12010_s1, %s6986_s21  ;;  %vm802_vm7 = vcmask 59392   ;;  %s7741_s26 = smov 16  }
  0x22   : > { %529 = vst.msk [vmem:[#allocation2 + $0x18] sm:$0xf] %vm521_vm0, %v7739_v0  ;;  %531 = vst.msk [vmem:[#allocation2 + $0x20] sm:$0xf] %vm521_vm0, %v7739_v0  ;;  %v493_v1 = vld [vmem:[%s8035_s24 + $0x10] sm:$0xf] }
  0x23   : > { %532 = vst.msk [vmem:[#allocation2 + $0x24] sm:$0xf] %vm521_vm0, %v7739_v0  ;;  %533 = vst.msk [vmem:[#allocation2 + $0x28] sm:$0xf] %vm521_vm0, %v7739_v0  ;;  %v494_v2 = vld [vmem:[%s8035_s24 + $0x14] sm:$0xf] }
  0x24   : > { %535 = vst.msk [vmem:[#allocation2 + $0x30] sm:$0xf] %vm521_vm0, %v7739_v0  ;;  %536 = vst.msk [vmem:[#allocation2 + $0x34] sm:$0xf] %vm521_vm0, %v7739_v0  ;;  %v680_v4 = vrot.slane %v493_v1, 5  ;;  %v682_v5 = vrot.slane %v494_v2, 5 }
  0x25   : > { %537 = vst.msk [vmem:[#allocation2 + $0x38] sm:$0xf] %vm521_vm0, %v7739_v0  ;;  %543 = vst.msk [vmem:[#allocation2 + $0x50] sm:$0xf] %vm521_vm0, %v7739_v0  ;;  %v8043_v6 = vld [vmem:[#allocation2 + $0x44] sm:$0xf] }
  0x26   : > { %544 = vst.msk [vmem:[#allocation2 + $0x54] sm:$0xf] %vm521_vm0, %v7739_v0  ;;  %545 = vst.msk [vmem:[#allocation2 + $0x58] sm:$0xf] %vm521_vm0, %v7739_v0  ;;  %v1288_v7 = vld [vmem:[#allocation2 + $0x40] sm:$0x8] }
  0x27   : > { %547 = vst.msk [vmem:[#allocation2 + $0x60] sm:$0xf] %vm521_vm0, %v7739_v0  ;;  %548 = vst.msk [vmem:[#allocation2 + $0x64] sm:$0xf] %vm521_vm0, %v7739_v0  ;;  %v1289_v8 = vld [vmem:[#allocation2 + $0x48] sm:$0x7] }
  0x28   : > { %549 = vst.msk [vmem:[#allocation2 + $0x68] sm:$0xf] %vm521_vm0, %v7739_v0  ;;  %551 = vst.msk [vmem:[#allocation2 + $0x70] sm:$0xf] %vm521_vm0, %v7739_v0  ;;  %v489_v9 = vld [vmem:[%s8035_s24] sm:$0xf] }
  0x29   : > { %552 = vst.msk [vmem:[#allocation2 + $0x74] sm:$0xf] %vm521_vm0, %v7739_v0  ;;  %553 = vst.msk [vmem:[#allocation2 + $0x78] sm:$0xf] %vm521_vm0, %v7739_v0  ;;  %v490_v10 = vld [vmem:[%s8035_s24 + $0x4] sm:$0xf] }
  0x2a   : > { %555 = vst.msk [vmem:[#allocation2 + $0x80] sm:$0xf] %vm521_vm0, %v7739_v0  ;;  %556 = vst.msk [vmem:[#allocation2 + $0x84] sm:$0xf] %vm521_vm0, %v7739_v0  ;;  %v6636_v11 = vrot.slane %v1288_v7, 11  ;;  %v1560_v12 = vrot.slane %v8043_v6, 7 }
  0x2b   : > { %557 = vst.msk [vmem:[#allocation2 + $0x88] sm:$0xf] %vm521_vm0, %v7739_v0  ;;  %559 = vst.msk [vmem:[#allocation2 + $0x90] sm:$0xf] %vm521_vm0, %v7739_v0  ;;  %v1563_v13 = vrot.slane %v1289_v8, 7  ;;  %v681_v16 = vrot.slane %v680_v4, 4 }
  0x2c   : > { %560 = vst.msk [vmem:[#allocation2 + $0x94] sm:$0xf] %vm521_vm0, %v7739_v0  ;;  %561 = vst.msk [vmem:[#allocation2 + $0x98] sm:$0xf] %vm521_vm0, %v7739_v0  ;;  %v1290_v17 = vld [vmem:[#allocation2 + $0x50] sm:$0x8] }
  0x2d   : > { %563 = vst.msk [vmem:[#allocation2 + $0xa0] sm:$0xf] %vm521_vm0, %v7739_v0  ;;  %564 = vst.msk [vmem:[#allocation2 + $0xa4] sm:$0xf] %vm521_vm0, %v7739_v0  ;;  %v8048_v14 = vld [vmem:[#allocation2 + $0x54] sm:$0xf] }
  0x2e   : > { %565 = vst.msk [vmem:[#allocation2 + $0xa8] sm:$0xf] %vm521_vm0, %v7739_v0  ;;  %567 = vst.msk [vmem:[#allocation2 + $0xb0] sm:$0xf] %vm521_vm0, %v7739_v0  ;;  %v1291_v18 = vld [vmem:[#allocation2 + $0x58] sm:$0x7] }
  0x2f   : > { %568 = vst.msk [vmem:[#allocation2 + $0xb4] sm:$0xf] %vm521_vm0, %v7739_v0  ;;  %569 = vst.msk [vmem:[#allocation2 + $0xb8] sm:$0xf] %vm521_vm0, %v7739_v0  ;;  %v1567_v19 = vrot.slane %v8048_v14, 7  ;;  %v684_v20 = vrot.slane %v682_v5, 4 }
  0x30   : > { %571 = vst.msk [vmem:[#allocation2 + $0xc0] sm:$0xf] %vm521_vm0, %v7739_v0  ;;  %572 = vst.msk [vmem:[#allocation2 + $0xc4] sm:$0xf] %vm521_vm0, %v7739_v0  ;;  %v1562_v22 = vrot.slane %v1560_v12, 4  ;;  %v6637_v23 = vrot.slane %v1290_v17, 11 }
  0x31   : > { %573 = vst.msk [vmem:[#allocation2 + $0xc8] sm:$0xf] %vm521_vm0, %v7739_v0  ;;  %575 = vst.msk [vmem:[#allocation2 + $0xd0] sm:$0xf] %vm521_vm0, %v7739_v0  ;;  %v1570_v24 = vrot.slane %v1291_v18, 7  ;;  %v1569_v25 = vrot.slane %v1567_v19, 4 }
  0x32   : > { %576 = vst.msk [vmem:[#allocation2 + $0xd4] sm:$0xf] %vm521_vm0, %v7739_v0  ;;  %577 = vst.msk [vmem:[#allocation2 + $0xd8] sm:$0xf] %vm521_vm0, %v7739_v0  ;;  %v670_v29 = vrot.slane %v489_v9, 5  ;;  %v672_v30 = vrot.slane %v490_v10, 5 }
  0x33   : > { %579 = vst.msk [vmem:[#allocation2 + $0xe0] sm:$0xf] %vm521_vm0, %v7739_v0  ;;  %580 = vst.msk [vmem:[#allocation2 + $0xe4] sm:$0xf] %vm521_vm0, %v7739_v0  ;;  %v497_v31 = vld [vmem:[%s8035_s24 + $0x20] sm:$0xf] }
  0x34   : > { %581 = vst.msk [vmem:[#allocation2 + $0xe8] sm:$0xf] %vm521_vm0, %v7739_v0  ;;  %583 = vst.msk [vmem:[#allocation2 + $0xf0] sm:$0xf] %vm521_vm0, %v7739_v0  ;;  %v498_v32 = vld [vmem:[%s8035_s24 + $0x24] sm:$0xf] }
  0x35   : > { %584 = vst.msk [vmem:[#allocation2 + $0xf4] sm:$0xf] %vm521_vm0, %v7739_v0  ;;  %585 = vst.msk [vmem:[#allocation2 + $0xf8] sm:$0xf] %vm521_vm0, %v7739_v0  ;;  %v491_v35 = vld [vmem:[%s8035_s24 + $0x8] sm:$0xf] }
  0x36   : > { %587 = vst.msk [vmem:[#allocation2 + $0x100] sm:$0xf] %vm521_vm0, %v7739_v0  ;;  %588 = vst.msk [vmem:[#allocation2 + $0x104] sm:$0xf] %vm521_vm0, %v7739_v0  ;;  %v492_v36 = vld [vmem:[%s8035_s24 + $0xc] sm:$0xf] }
  0x37   : > { %589 = vst.msk [vmem:[#allocation2 + $0x108] sm:$0xf] %vm521_vm0, %v7739_v0  ;;  %591 = vst.msk [vmem:[#allocation2 + $0x110] sm:$0xf] %vm521_vm0, %v7739_v0  ;;  %v671_v37 = vrot.slane %v670_v29, 4  ;;  %v674_v38 = vrot.slane %v672_v30, 4 }
  0x38   : > { %592 = vst.msk [vmem:[#allocation2 + $0x114] sm:$0xf] %vm521_vm0, %v7739_v0  ;;  %593 = vst.msk [vmem:[#allocation2 + $0x118] sm:$0xf] %vm521_vm0, %v7739_v0  ;;  %v690_v41 = vrot.slane %v497_v31, 5  ;;  %v692_v42 = vrot.slane %v498_v32, 5 }
  0x39   : > { %595 = vst.msk [vmem:[#allocation2 + $0x120] sm:$0xf] %vm521_vm0, %v7739_v0  ;;  %596 = vst.msk [vmem:[#allocation2 + $0x124] sm:$0xf] %vm521_vm0, %v7739_v0  ;;  %v501_v43 = vld [vmem:[%s8035_s24 + $0x30] sm:$0xf] }
  0x3a   : > { %597 = vst.msk [vmem:[#allocation2 + $0x128] sm:$0xf] %vm521_vm0, %v7739_v0  ;;  %599 = vst.msk [vmem:[#allocation2 + $0x130] sm:$0xf] %vm521_vm0, %v7739_v0  ;;  %v675_v45 = vrot.slane %v491_v35, 5  ;;  %v677_v46 = vrot.slane %v492_v36, 5 }
  0x3b   : > { %600 = vst.msk [vmem:[#allocation2 + $0x134] sm:$0xf] %vm521_vm0, %v7739_v0  ;;  %601 = vst.msk [vmem:[#allocation2 + $0x138] sm:$0xf] %vm521_vm0, %v7739_v0  ;;  %v502_v47 = vld [vmem:[%s8035_s24 + $0x34] sm:$0xf] }
  0x3c   : > { %603 = vst.msk [vmem:[#allocation2 + $0x140] sm:$0xf] %vm521_vm0, %v7739_v0  ;;  %604 = vst.msk [vmem:[#allocation2 + $0x144] sm:$0xf] %vm521_vm0, %v7739_v0  ;;  %v691_v48 = vrot.slane %v690_v41, 4  ;;  %v694_v49 = vrot.slane %v692_v42, 4 }
  0x3d   : > { %605 = vst.msk [vmem:[#allocation2 + $0x148] sm:$0xf] %vm521_vm0, %v7739_v0  ;;  %607 = vst.msk [vmem:[#allocation2 + $0x150] sm:$0xf] %vm521_vm0, %v7739_v0  ;;  %v676_v52 = vrot.slane %v675_v45, 4  ;;  %v679_v53 = vrot.slane %v677_v46, 4 }
  0x3e   : > { %608 = vst.msk [vmem:[#allocation2 + $0x154] sm:$0xf] %vm521_vm0, %v7739_v0  ;;  %609 = vst.msk [vmem:[#allocation2 + $0x158] sm:$0xf] %vm521_vm0, %v7739_v0  ;;  %v700_v54 = vrot.slane %v501_v43, 5  ;;  %v702_v57 = vrot.slane %v502_v47, 5 }
  0x3f   : > { %611 = vst.msk [vmem:[#allocation2 + $0x160] sm:$0xf] %vm521_vm0, %v7739_v0  ;;  %612 = vst.msk [vmem:[#allocation2 + $0x164] sm:$0xf] %vm521_vm0, %v7739_v0  ;;  %v495_v61 = vld [vmem:[%s8035_s24 + $0x18] sm:$0xf] }
  0x40   : > { %613 = vst.msk [vmem:[#allocation2 + $0x168] sm:$0xf] %vm521_vm0, %v7739_v0  ;;  %615 = vst.msk [vmem:[#allocation2 + $0x170] sm:$0xf] %vm521_vm0, %v7739_v0  ;;  %v701_v63 = vrot.slane %v700_v54, 4  ;;  %v704_v1 = vrot.slane %v702_v57, 4 }
  0x41   : > { %616 = vst.msk [vmem:[#allocation2 + $0x174] sm:$0xf] %vm521_vm0, %v7739_v0  ;;  %617 = vst.msk [vmem:[#allocation2 + $0x178] sm:$0xf] %vm521_vm0, %v7739_v0  ;;  %v496_v2 = vld [vmem:[%s8035_s24 + $0x1c] sm:$0xf] }
  0x42   : > { %619 = vst.msk [vmem:[#allocation2 + $0x180] sm:$0xf] %vm521_vm0, %v7739_v0  ;;  %620 = vst.msk [vmem:[#allocation2 + $0x184] sm:$0xf] %vm521_vm0, %v7739_v0  ;;  %v685_v10 = vrot.slane %v495_v61, 5  ;;  %vm1408_vm9 = vcmask 1041408  }
  0x43   : > { %621 = vst.msk [vmem:[#allocation2 + $0x188] sm:$0xf] %vm521_vm0, %v7739_v0  ;;  %623 = vst.msk [vmem:[#allocation2 + $0x190] sm:$0xf] %vm521_vm0, %v7739_v0  ;;  %vm1409_vm10 = vcmask 1045508   ;;  %s7742_s27 = smov 24  }
  0x44   : > { %624 = vst.msk [vmem:[#allocation2 + $0x194] sm:$0xf] %vm521_vm0, %v7739_v0  ;;  %625 = vst.msk [vmem:[#allocation2 + $0x198] sm:$0xf] %vm521_vm0, %v7739_v0  ;;  %s7743_s16 = smov 32   ;;  %vm525_vm12 = vcmask 58368  }
  0x45   : > { %627 = vst.msk [vmem:[#allocation2 + $0x1a0] sm:$0xf] %vm521_vm0, %v7739_v0  ;;  %628 = vst.msk [vmem:[#allocation2 + $0x1a4] sm:$0xf] %vm521_vm0, %v7739_v0  ;;  %s7744_s19 = smov 40   ;;  %s7745_s22 = smov 48  }
  0x46   : > { %629 = vst.msk [vmem:[#allocation2 + $0x1a8] sm:$0xf] %vm521_vm0, %v7739_v0  ;;  %631 = vst.msk [vmem:[#allocation2 + $0x1b0] sm:$0xf] %vm521_vm0, %v7739_v0  ;;  %s7746_s15 = smov 56   ;;  %vm12112_vm13 = vcmask 1043456  }
  0x47   : > { %632 = vst.msk [vmem:[#allocation2 + $0x1b4] sm:$0xf] %vm521_vm0, %v7739_v0  ;;  %633 = vst.msk [vmem:[#allocation2 + $0x1b8] sm:$0xf] %vm521_vm0, %v7739_v0  ;;  %s7747_s20 = smov 64   ;;  %vm905_vm14 = vcmask 64512  }
  0x48   : > { %vm8039_vm6 = vmor %vm1555_vm1, %vm1556_vm2  ;;  %807 = vst.msk [vmem:[#allocation2 + $0x80] sm:$0x8] %vm799_vm5, %v680_v4  ;;  %vm2250_vm15 = vcmask 130048   ;;  %vm2316_vm1 = vcmask 261120   ;;  %vm2349_vm2 = vcmask 326656   ;;  %s9781_s21 = sld [smem:[#allocation3]] }
  0x49   : > { %v12171_v3 = vsel %vm8039_vm6, 4294967295, %v12170_v3  ;;  %vm8052_vm8 = vmor %vm667_vm3, %vm668_vm4  ;;  %v1561_v21 = vsel %vm8039_vm6, %v6636_v11, %v1560_v12  ;;  %809 = vst.msk [vmem:[#allocation2 + $0x88] sm:$0x7] %vm802_vm7, %v684_v20  ;;  %v1564_v27 = vsel %vm8039_vm6, %v1562_v22, %v1563_v13  ;;  %v1568_v28 = vsel %vm8039_vm6, %v6637_v23, %v1567_v19  ;;  %s9990_s28 = sld [smem:[#allocation3 + $0x1]]  ;;  %s10737_s17 = sld [smem:[#allocation3 + $0x2]] }
  0x4a   : > { %12172 = vst [vmem:[#allocation6_spill] sm:$0xff] %v12171_v3  ;;  %v683_v26 = vsel %vm8052_vm8, %v681_v16, %v682_v5  ;;  %v6676_v33 = vcombine.low %v1561_v21, %v1564_v27  ;;  %v1571_v34 = vsel %vm8039_vm6, %v1569_v25, %v1570_v24  ;;  %800 = vst.msk [vmem:[#allocation2 + $0x60] sm:$0x8] %vm799_vm5, %v670_v29  ;;  %v687_v16 = vrot.slane %v496_v2, 5  ;;  %v7613_v3 = vld [vmem:[%s8035_s24 + $0x58] sm:$0xf] }
  0x4b   : > { %808 = vst.msk [vmem:[#allocation2 + $0x84] sm:$0xf] %vm521_vm0, %v683_v26  ;;  %v6677_v39 = vcombine.low %v1568_v28, %v1571_v34  ;;  %v673_v44 = vsel %vm8052_vm8, %v671_v37, %v672_v30  ;;  %v693_v56 = vsel %vm8052_vm8, %v691_v48, %v692_v42  ;;  %v678_v60 = vsel %vm8052_vm8, %v676_v52, %v677_v46  ;;  %vm8361_vm11 = vmor %vm1408_vm9, %vm1409_vm10  ;;  %s7751_s23 = smov 12  }
  0x4c   : > { %1842 = vrot.lane.b32.xlu0 %v6676_v33, %s7740_s25  ;;  %803 = vst.msk [vmem:[#allocation2 + $0x68] sm:$0x7] %vm802_vm7, %v674_v38  ;;  %815 = vst.msk [vmem:[#allocation2 + $0xa8] sm:$0x7] %vm802_vm7, %v694_v49  ;;  %v703_v9 = vsel %vm8052_vm8, %v701_v63, %v702_v57  ;;  %v686_v21 = vrot.slane %v685_v10, 4  ;;  %v689_v24 = vrot.slane %v687_v16, 4 }
  0x4d   : > { %801 = vst.msk [vmem:[#allocation2 + $0x64] sm:$0xf] %vm521_vm0, %v673_v44  ;;  %814 = vst.msk [vmem:[#allocation2 + $0xa4] sm:$0xf] %vm521_vm0, %v693_v56  ;;  %v505_v38 = vld [vmem:[%s8035_s24 + $0x40] sm:$0xf] }
  0x4e   : > { %813 = vst.msk [vmem:[#allocation2 + $0xa0] sm:$0x8] %vm799_vm5, %v690_v41  ;;  %804 = vst.msk [vmem:[#allocation2 + $0x70] sm:$0x8] %vm799_vm5, %v675_v45  ;;  %v688_v30 = vsel %vm8052_vm8, %v686_v21, %v687_v16  ;;  %v506_v44 = vld [vmem:[%s8035_s24 + $0x44] sm:$0xf] }
  0x4f   : > { %v1296_v40 = vld [vmem:[#allocation2 + $0x80] sm:$0x8]  ;;  %806 = vst.msk [vmem:[#allocation2 + $0x78] sm:$0x7] %vm802_vm7, %v679_v53  ;;  %821 = vst.msk [vmem:[#allocation2 + $0xc8] sm:$0x7] %vm802_vm7, %v704_v1 }
  0x50   : > { %v1297_v50 = vld [vmem:[#allocation2 + $0x88] sm:$0x7]  ;;  %v6640_v51 = vrot.slane %v1296_v40, 11  ;;  %1844 = vrot.lane.b32.xlu0 %v6677_v39, %s7740_s25  ;;  %819 = vst.msk [vmem:[#allocation2 + $0xc0] sm:$0x8] %vm799_vm5, %v700_v54  ;;  %v710_v52 = vrot.slane %v505_v38, 5 }
  0x51   : > { %v1591_v59 = vrot.slane %v1297_v50, 7  ;;  %v1292_v62 = vld [vmem:[#allocation2 + $0x60] sm:$0x8]  ;;  %805 = vst.msk [vmem:[#allocation2 + $0x74] sm:$0xf] %vm521_vm0, %v678_v60  ;;  %v712_v57 = vrot.slane %v506_v44, 5 }
  0x52   : > { %v8085_v55 = vld [vmem:[#allocation2 + $0x84] sm:$0xf]  ;;  %v6638_v8 = vrot.slane %v1292_v62, 11  ;;  %820 = vst.msk [vmem:[#allocation2 + $0xc4] sm:$0xf] %vm521_vm0, %v703_v9  ;;  %v711_v61 = vrot.slane %v710_v52, 4 }
  0x53   : > { %v1588_v58 = vrot.slane %v8085_v55, 7  ;;  %v1293_v7 = vld [vmem:[#allocation2 + $0x68] sm:$0x7]  ;;  %810 = vst.msk [vmem:[#allocation2 + $0x90] sm:$0x8] %vm799_vm5, %v685_v10  ;;  %vm2382_vm3 = vcmask 392192  }
  0x54   : > { %v8106_v12 = vld [vmem:[#allocation2 + $0x64] sm:$0xf]  ;;  %v1577_v19 = vrot.slane %v1293_v7, 7  ;;  %v1301_v22 = vld [vmem:[#allocation2 + $0xa8] sm:$0x7]  ;;  %v713_v9 = vsel %vm8052_vm8, %v711_v61, %v712_v57  ;;  %vm2415_vm4 = vcmask 457728  }
  0x55   : > { %v1589_v4 = vsel %vm8039_vm6, %v6640_v51, %v1588_v58  ;;  %v1590_v5 = vrot.slane %v1588_v58, 4  ;;  %v1300_v13 = vld [vmem:[#allocation2 + $0xa0] sm:$0x8]  ;;  %v1574_v18 = vrot.slane %v8106_v12, 7  ;;  %v1294_v20 = vld [vmem:[#allocation2 + $0x70] sm:$0x8] }
  0x56   : > { %v6642_v23 = vrot.slane %v1300_v13, 11  ;;  %v8117_v27 = vld [vmem:[#allocation2 + $0xa4] sm:$0xf]  ;;  %v1295_v28 = vld [vmem:[#allocation2 + $0x78] sm:$0x7]  ;;  %v6639_v29 = vrot.slane %v1294_v20, 11 }
  0x57   : > { %v1592_v11 = vsel %vm8039_vm6, %v1590_v5, %v1591_v59  ;;  %v1575_v25 = vsel %vm8039_vm6, %v6638_v8, %v1574_v18  ;;  %v1576_v26 = vrot.slane %v1574_v18, 4  ;;  %v1602_v31 = vrot.slane %v8117_v27, 7  ;;  %v1304_v34 = vld [vmem:[#allocation2 + $0xc0] sm:$0x8]  ;;  %811 = vst.msk [vmem:[#allocation2 + $0x94] sm:$0xf] %vm521_vm0, %v688_v30 }
  0x58   : > { %v8109_v17 = vcombine.low %v1589_v4, %v1592_v11  ;;  %v1605_v32 = vrot.slane %v1301_v22, 7  ;;  %v8122_v33 = vld [vmem:[#allocation2 + $0x74] sm:$0xf]  ;;  %812 = vst.msk [vmem:[#allocation2 + $0x98] sm:$0x7] %vm802_vm7, %v689_v24  ;;  %v1584_v37 = vrot.slane %v1295_v28, 7 }
  0x59   : > { %v1578_v35 = vsel %vm8039_vm6, %v1576_v26, %v1577_v19  ;;  %v1581_v36 = vrot.slane %v8122_v33, 7  ;;  %v1603_v40 = vsel %vm8039_vm6, %v6642_v23, %v1602_v31  ;;  %v1604_v41 = vrot.slane %v1602_v31, 4  ;;  %v1305_v42 = vld [vmem:[#allocation2 + $0xc8] sm:$0x7]  ;;  %v8137_v47 = vld [vmem:[#allocation2 + $0xc4] sm:$0xf] }
  0x5a   : > { %1850 = vrot.lane.b32.xlu0 %v8109_v17, %s7740_s25  ;;  %v8130_v39 = vcombine.low %v1575_v25, %v1578_v35  ;;  %v6644_v43 = vrot.slane %v1304_v34, 11  ;;  %v1616_v49 = vrot.slane %v8137_v47, 7  ;;  %v1619_v50 = vrot.slane %v1305_v42, 7  ;;  %v1298_v51 = vld [vmem:[#allocation2 + $0x90] sm:$0x8] }
  0x5b   : > { %v1582_v45 = vsel %vm8039_vm6, %v6639_v29, %v1581_v36  ;;  %v1583_v46 = vrot.slane %v1581_v36, 4  ;;  %v1606_v48 = vsel %vm8039_vm6, %v1604_v41, %v1605_v32  ;;  %v6641_v56 = vrot.slane %v1298_v51, 11  ;;  %825 = vst.msk [vmem:[#allocation2 + $0xe0] sm:$0x8] %vm799_vm5, %v710_v52  ;;  %v499_v62 = vld [vmem:[%s8035_s24 + $0x28] sm:$0xf] }
  0x5c   : > { %1846 = vrot.lane.b32.xlu1 %v8130_v39, %s7740_s25  ;;  %v8144_v53 = vcombine.low %v1603_v40, %v1606_v48  ;;  %v1617_v59 = vsel %vm8039_vm6, %v6644_v43, %v1616_v49  ;;  %v1618_v60 = vrot.slane %v1616_v49, 4  ;;  %v500_v63 = vld [vmem:[%s8035_s24 + $0x2c] sm:$0xf]  ;;  %v714_v4 = vrot.slane %v712_v57, 4  ;;  %v509_v10 = vld [vmem:[%s8035_s24 + $0x50] sm:$0xf] }
  0x5d   : > { %v1585_v54 = vsel %vm8039_vm6, %v1583_v46, %v1584_v37  ;;  %826 = vst.msk [vmem:[#allocation2 + $0xe4] sm:$0xf] %vm521_vm0, %v713_v9  ;;  %v695_v13 = vrot.slane %v499_v62, 5  ;;  %v697_v16 = vrot.slane %v500_v63, 5  ;;  %v510_v18 = vld [vmem:[%s8035_s24 + $0x54] sm:$0xf] }
  0x5e   : > { %v8148_v58 = vcombine.low %v1582_v45, %v1585_v54  ;;  %1854 = vrot.lane.b32.xlu0 %v8144_v53, %s7740_s25  ;;  %v8157_v1 = vld [vmem:[#allocation2 + $0x94] sm:$0xf]  ;;  %v1620_v5 = vsel %vm8039_vm6, %v1618_v60, %v1619_v50  ;;  %827 = vst.msk [vmem:[#allocation2 + $0xe8] sm:$0x7] %vm802_vm7, %v714_v4  ;;  %v503_v19 = vld [vmem:[%s8035_s24 + $0x38] sm:$0xf] }
  0x5f   : > { %v1299_v2 = vld [vmem:[#allocation2 + $0x98] sm:$0x7]  ;;  %v1595_v7 = vrot.slane %v8157_v1, 7  ;;  %v8167_v11 = vcombine.low %v1617_v59, %v1620_v5  ;;  %v504_v22 = vld [vmem:[%s8035_s24 + $0x3c] sm:$0xf]  ;;  %v696_v23 = vrot.slane %v695_v13, 4 }
  0x60   : > { %1848 = vrot.lane.b32.xlu1 %v8148_v58, %s7740_s25  ;;  %v1598_v8 = vrot.slane %v1299_v2, 7  ;;  %v699_v24 = vrot.slane %v697_v16, 4  ;;  %816 = vst.msk [vmem:[#allocation2 + $0xb0] sm:$0x8] %vm799_vm5, %v695_v13  ;;  %v720_v25 = vrot.slane %v509_v10, 5  ;;  %v722_v28 = vrot.slane %v510_v18, 5 }
  0x61   : > { %v1596_v20 = vsel %vm8039_vm6, %v6641_v56, %v1595_v7  ;;  %v1597_v21 = vrot.slane %v1595_v7, 4  ;;  %v705_v29 = vrot.slane %v503_v19, 5  ;;  %v513_v30 = vld [vmem:[%s8035_s24 + $0x60] sm:$0xf]  ;;  %v698_v34 = vsel %vm8052_vm8, %v696_v23, %v697_v16  ;;  %v514_v37 = vld [vmem:[%s8035_s24 + $0x64] sm:$0xf] }
  0x62   : > { %1858 = vrot.lane.b32.xlu0 %v8167_v11, %s7740_s25  ;;  %v1308_v32 = vld [vmem:[#allocation2 + $0xe0] sm:$0x8]  ;;  %818 = vst.msk [vmem:[#allocation2 + $0xb8] sm:$0x7] %vm802_vm7, %v699_v24  ;;  %v721_v35 = vrot.slane %v720_v25, 4  ;;  %v707_v36 = vrot.slane %v504_v22, 5 }
  0x63   : > { %v1599_v26 = vsel %vm8039_vm6, %v1597_v21, %v1598_v8  ;;  %831 = vst.msk [vmem:[#allocation2 + $0x100] sm:$0x8] %vm799_vm5, %v720_v25  ;;  %v724_v38 = vrot.slane %v722_v28, 4  ;;  %v706_v40 = vrot.slane %v705_v29, 4  ;;  %822 = vst.msk [vmem:[#allocation2 + $0xd0] sm:$0x8] %vm799_vm5, %v705_v29 }
  0x64   : > { %v8182_v31 = vcombine.low %v1596_v20, %v1599_v26  ;;  %817 = vst.msk [vmem:[#allocation2 + $0xb4] sm:$0xf] %vm521_vm0, %v698_v34  ;;  %v6646_v41 = vrot.slane %v1308_v32, 11  ;;  %v723_v42 = vsel %vm8052_vm8, %v721_v35, %v722_v28  ;;  %v709_v43 = vrot.slane %v707_v36, 4  ;;  %v507_v44 = vld [vmem:[%s8035_s24 + $0x48] sm:$0xf] }
  0x65   : > { %v508_v45 = vld [vmem:[%s8035_s24 + $0x4c] sm:$0xf]  ;;  %v8197_v46 = vld [vmem:[#allocation2 + $0xe4] sm:$0xf]  ;;  %v1309_v48 = vld [vmem:[#allocation2 + $0xe8] sm:$0x7]  ;;  %v708_v49 = vsel %vm8052_vm8, %v706_v40, %v707_v36 }
  0x66   : > { %1852 = vrot.lane.b32.xlu1 %v8182_v31, %s7740_s25  ;;  %832 = vst.msk [vmem:[#allocation2 + $0x104] sm:$0xf] %vm521_vm0, %v723_v42  ;;  %v730_v50 = vrot.slane %v513_v30, 5  ;;  %v732_v51 = vrot.slane %v514_v37, 5  ;;  %v1630_v52 = vrot.slane %v8197_v46, 7  ;;  %v1633_v54 = vrot.slane %v1309_v48, 7 }
  0x67   : > { %833 = vst.msk [vmem:[#allocation2 + $0x108] sm:$0x7] %vm802_vm7, %v724_v38  ;;  %824 = vst.msk [vmem:[#allocation2 + $0xd8] sm:$0x7] %vm802_vm7, %v709_v43  ;;  %v1302_v56 = vld [vmem:[#allocation2 + $0xb0] sm:$0x8] }
  0x68   : > { %823 = vst.msk [vmem:[#allocation2 + $0xd4] sm:$0xf] %vm521_vm0, %v708_v49  ;;  %v731_v57 = vrot.slane %v730_v50, 4  ;;  %v734_v59 = vrot.slane %v732_v51, 4  ;;  %v715_v60 = vrot.slane %v507_v44, 5  ;;  %v1631_v61 = vsel %vm8039_vm6, %v6646_v41, %v1630_v52 }
  0x69   : > { %837 = vst.msk [vmem:[#allocation2 + $0x120] sm:$0x8] %vm799_vm5, %v730_v50  ;;  %v1632_v62 = vrot.slane %v1630_v52, 4  ;;  %v717_v63 = vrot.slane %v508_v45, 5  ;;  %v511_v2 = vld [vmem:[%s8035_s24 + $0x58] sm:$0xf] }
  0x6a   : > { %v1303_v4 = vld [vmem:[#allocation2 + $0xb8] sm:$0x7]  ;;  %v6643_v5 = vrot.slane %v1302_v56, 11  ;;  %v1312_v7 = vld [vmem:[#allocation2 + $0x100] sm:$0x8]  ;;  %v733_v8 = vsel %vm8052_vm8, %v731_v57, %v732_v51  ;;  %v716_v9 = vrot.slane %v715_v60, 4 }
  0x6b   : > { %839 = vst.msk [vmem:[#allocation2 + $0x128] sm:$0x7] %vm802_vm7, %v734_v59  ;;  %v1634_v10 = vsel %vm8039_vm6, %v1632_v62, %v1633_v54  ;;  %v8216_v13 = vld [vmem:[#allocation2 + $0xb4] sm:$0xf]  ;;  %v1612_v16 = vrot.slane %v1303_v4, 7  ;;  %v6648_v21 = vrot.slane %v1312_v7, 11 }
  0x6c   : > { %828 = vst.msk [vmem:[#allocation2 + $0xf0] sm:$0x8] %vm799_vm5, %v715_v60  ;;  %v1306_v18 = vld [vmem:[#allocation2 + $0xd0] sm:$0x8]  ;;  %v8219_v19 = vcombine.low %v1631_v61, %v1634_v10  ;;  %v1609_v20 = vrot.slane %v8216_v13, 7  ;;  %v718_v25 = vsel %vm8052_vm8, %v716_v9, %v717_v63  ;;  %v719_v26 = vrot.slane %v717_v63, 4 }
  0x6d   : > { %838 = vst.msk [vmem:[#allocation2 + $0x124] sm:$0xf] %vm521_vm0, %v733_v8  ;;  %v6645_v22 = vrot.slane %v1306_v18, 11  ;;  %v8222_v23 = vld [vmem:[#allocation2 + $0x104] sm:$0xf]  ;;  %v725_v29 = vrot.slane %v511_v2, 5 }
  0x6e   : > { %v1313_v24 = vld [vmem:[#allocation2 + $0x108] sm:$0x7]  ;;  %v512_v28 = vld [vmem:[%s8035_s24 + $0x5c] sm:$0xf]  ;;  %1862 = vrot.lane.b32.xlu0 %v8219_v19, %s7740_s25  ;;  %v1610_v30 = vsel %vm8039_vm6, %v6643_v5, %v1609_v20  ;;  %v1611_v32 = vrot.slane %v1609_v20, 4  ;;  %v1644_v34 = vrot.slane %v8222_v23, 7 }
  0x6f   : > { %v1647_v35 = vrot.slane %v1313_v24, 7  ;;  %v8232_v36 = vld [vmem:[#allocation2 + $0xd4] sm:$0xf]  ;;  %829 = vst.msk [vmem:[#allocation2 + $0xf4] sm:$0xf] %vm521_vm0, %v718_v25  ;;  %v726_v41 = vrot.slane %v725_v29, 4 }
  0x70   : > { %v1307_v37 = vld [vmem:[#allocation2 + $0xd8] sm:$0x7]  ;;  %v1623_v38 = vrot.slane %v8232_v36, 7  ;;  %v1316_v40 = vld [vmem:[#allocation2 + $0x120] sm:$0x8]  ;;  %v1613_v42 = vsel %vm8039_vm6, %v1611_v32, %v1612_v16  ;;  %v1645_v43 = vsel %vm8039_vm6, %v6648_v21, %v1644_v34  ;;  %v1646_v44 = vrot.slane %v1644_v34, 4 }
  0x71   : > { %830 = vst.msk [vmem:[#allocation2 + $0xf8] sm:$0x7] %vm802_vm7, %v719_v26  ;;  %v1626_v45 = vrot.slane %v1307_v37, 7  ;;  %v515_v48 = vld [vmem:[%s8035_s24 + $0x68] sm:$0xf]  ;;  %v8244_v50 = vcombine.low %v1610_v30, %v1613_v42  ;;  %v6650_v56 = vrot.slane %v1316_v40, 11 }
  0x72   : > { %834 = vst.msk [vmem:[#allocation2 + $0x110] sm:$0x8] %vm799_vm5, %v725_v29  ;;  %v516_v49 = vld [vmem:[%s8035_s24 + $0x6c] sm:$0xf]  ;;  %v1624_v51 = vsel %vm8039_vm6, %v6645_v22, %v1623_v38  ;;  %v1625_v52 = vrot.slane %v1623_v38, 4  ;;  %v1648_v59 = vsel %vm8039_vm6, %v1646_v44, %v1647_v35  ;;  %v727_v63 = vrot.slane %v512_v28, 5 }
  0x73   : > { %v1317_v54 = vld [vmem:[#allocation2 + $0x128] sm:$0x7]  ;;  %v1310_v57 = vld [vmem:[#allocation2 + $0xf0] sm:$0x8]  ;;  %1856 = vrot.lane.b32.xlu1 %v8244_v50, %s7740_s25  ;;  %v8254_v2 = vcombine.low %v1645_v43, %v1648_v59  ;;  %v735_v7 = vrot.slane %v515_v48, 5  ;;  %v737_v16 = vrot.slane %v516_v49, 5 }
  0x74   : > { %v8250_v60 = vld [vmem:[#allocation2 + $0x124] sm:$0xf]  ;;  %v1661_v61 = vrot.slane %v1317_v54, 7  ;;  %v6647_v62 = vrot.slane %v1310_v57, 11  ;;  %v1627_v4 = vsel %vm8039_vm6, %v1625_v52, %v1626_v45  ;;  %v728_v9 = vsel %vm8052_vm8, %v726_v41, %v727_v63  ;;  %v1340_v30 = vld [vmem:[#allocation2 + $0x48] sm:$0xf] }
  0x75   : > { %v1658_v5 = vrot.slane %v8250_v60, 7  ;;  %v8259_v8 = vcombine.low %v1624_v51, %v1627_v4  ;;  %v729_v10 = vrot.slane %v727_v63, 4  ;;  %1866 = vrot.lane.b32.xlu0 %v8254_v2, %s7740_s25  ;;  %835 = vst.msk [vmem:[#allocation2 + $0x114] sm:$0xf] %vm521_vm0, %v728_v9  ;;  %v736_v22 = vrot.slane %v735_v7, 4 }
  0x76   : > { %v8267_v21 = vld [vmem:[#allocation2 + $0xf4] sm:$0xf]  ;;  %840 = vst.msk [vmem:[#allocation2 + $0x130] sm:$0x8] %vm799_vm5, %v735_v7  ;;  %v739_v26 = vrot.slane %v737_v16, 4  ;;  %v6692_v41 = vcombine.low %v8043_v6, %v1340_v30 }
  0x77   : > { %v1659_v18 = vsel %vm8039_vm6, %v6650_v56, %v1658_v5  ;;  %v1660_v20 = vrot.slane %v1658_v5, 4  ;;  %v1637_v25 = vrot.slane %v8267_v21, 7  ;;  %836 = vst.msk [vmem:[#allocation2 + $0x118] sm:$0x7] %vm802_vm7, %v729_v10  ;;  %1860 = vrot.lane.b32.xlu1 %v8259_v8, %s7740_s25  ;;  %v738_v32 = vsel %vm8052_vm8, %v736_v22, %v737_v16  ;;  %v1342_v44 = vld [vmem:[#allocation2 + $0x68] sm:$0xf] }
  0x78   : > { %v1311_v24 = vld [vmem:[#allocation2 + $0xf8] sm:$0x7]  ;;  %841 = vst.msk [vmem:[#allocation2 + $0x134] sm:$0xf] %vm521_vm0, %v738_v32  ;;  %v8299_v54 = vcombine.low %v8106_v12, %v1342_v44  ;;  %v1344_v56 = vld [vmem:[#allocation2 + $0x88] sm:$0xf] }
  0x79   : > { %v1662_v28 = vsel %vm8039_vm6, %v1660_v20, %v1661_v61  ;;  %v1640_v29 = vrot.slane %v1311_v24, 7  ;;  %v1638_v35 = vsel %vm8039_vm6, %v6647_v62, %v1637_v25  ;;  %v1639_v37 = vrot.slane %v1637_v25, 4  ;;  %v1314_v38 = vld [vmem:[#allocation2 + $0x110] sm:$0x8]  ;;  %842 = vst.msk [vmem:[#allocation2 + $0x138] sm:$0x7] %vm802_vm7, %v739_v26 }
  0x7a   : > { %v8279_v34 = vcombine.low %v1659_v18, %v1662_v28  ;;  %v6649_v43 = vrot.slane %v1314_v38, 11  ;;  %v8315_v16 = vcombine.low %v8085_v55, %v1344_v56  ;;  %v1346_v18 = vld [vmem:[#allocation2 + $0xa8] sm:$0xf]  ;;  %v1341_v24 = vld [vmem:[#allocation2 + $0x58] sm:$0xf] }
  0x7b   : > { %v1641_v40 = vsel %vm8039_vm6, %v1639_v37, %v1640_v29  ;;  %v8326_v25 = vcombine.low %v8117_v27, %v1346_v18  ;;  %v1348_v26 = vld [vmem:[#allocation2 + $0xc8] sm:$0xf]  ;;  %v6693_v28 = vcombine.low %v8048_v14, %v1341_v24  ;;  %v1343_v29 = vld [vmem:[#allocation2 + $0x78] sm:$0xf]  ;;  %534 = vst.msk [vmem:[#allocation2 + $0x2c] sm:$0x3] %vm525_vm12, %v7739_v0 }
  0x7c   : > { %1870 = vrot.lane.b32.xlu0 %v8279_v34, %s7740_s25  ;;  %v8290_v42 = vcombine.low %v1638_v35, %v1641_v40  ;;  %v8292_v45 = vld [vmem:[#allocation2 + $0x114] sm:$0xf]  ;;  %v8334_v30 = vcombine.low %v8137_v47, %v1348_v26  ;;  %v1350_v32 = vld [vmem:[#allocation2 + $0xe8] sm:$0xf]  ;;  %v8338_v35 = vcombine.low %v8122_v33, %v1343_v29  ;;  %v1345_v37 = vld [vmem:[#allocation2 + $0x98] sm:$0xf] }
  0x7d   : > { %v1318_v48 = vld [vmem:[#allocation2 + $0x130] sm:$0x8]  ;;  %v1651_v51 = vrot.slane %v8292_v45, 7  ;;  %v8343_v38 = vcombine.low %v8197_v46, %v1350_v32  ;;  %v1352_v14 = vld [vmem:[#allocation2 + $0x108] sm:$0xf]  ;;  %v1427_v40 = vrot.slane %v8106_v12, 6 }
  0x7e   : > { %1864 = vrot.lane.b32.xlu1 %v8290_v42, %s7740_s25  ;;  %v1315_v49 = vld [vmem:[#allocation2 + $0x118] sm:$0x7]  ;;  %v6651_v6 = vrot.slane %v1318_v48, 11  ;;  %v1224_v44 = vld [vmem:[#allocation2 + $0x68] sm:$0x3] }
  0x7f   : > { %v1654_v52 = vrot.slane %v1315_v49, 7  ;;  %v1652_v57 = vsel %vm8039_vm6, %v6649_v43, %v1651_v51  ;;  %v1653_v59 = vrot.slane %v1651_v51, 4  ;;  %v8303_v61 = vld [vmem:[#allocation2 + $0x134] sm:$0xf]  ;;  %v1222_v43 = vld [vmem:[#allocation2 + $0x60] sm:$0xc]  ;;  %v8354_v49 = vcombine.low %v8222_v23, %v1352_v14 }
  0x80   : > { %1938 = vrot.lane.b32.xlu0 %v6692_v41, %s7741_s26  ;;  %v1319_v62 = vld [vmem:[#allocation2 + $0x138] sm:$0x7]  ;;  %v1665_v63 = vrot.slane %v8303_v61, 7  ;;  %v8349_v41 = vcombine.low %v8157_v1, %v1345_v37  ;;  %v1354_v51 = vld [vmem:[#allocation2 + $0x128] sm:$0xf]  ;;  %v1429_v12 = vrot.slane %v1427_v40, 4 }
  0x81   : > { %v1668_v4 = vrot.slane %v1319_v62, 7  ;;  %v1655_v5 = vsel %vm8039_vm6, %v1653_v59, %v1654_v52  ;;  %v1347_v48 = vld [vmem:[#allocation2 + $0xb8] sm:$0xf]  ;;  %v6622_v52 = vrot.slane %v1222_v43, 10  ;;  %v8368_v23 = vcombine.low %v8250_v60, %v1354_v51  ;;  %v1228_v60 = vld [vmem:[#allocation2 + $0x80] sm:$0xc] }
  0x82   : > { %v8308_v7 = vcombine.low %v1652_v57, %v1655_v5  ;;  %v1666_v9 = vsel %vm8039_vm6, %v6651_v6, %v1665_v63  ;;  %v1667_v10 = vrot.slane %v1665_v63, 4  ;;  %v1430_v6 = vrot.slane %v1224_v44, 6  ;;  %v1349_v59 = vld [vmem:[#allocation2 + $0xd8] sm:$0xf]  ;;  %v1230_v24 = vld [vmem:[#allocation2 + $0x88] sm:$0x3] }
  0x83   : > { %v8359_v56 = vcombine.low %v8216_v13, %v1347_v48  ;;  %v1428_v62 = vsel %vm8361_vm11, %v6622_v52, %v1427_v40  ;;  %v1351_v5 = vld [vmem:[#allocation2 + $0xf8] sm:$0xf]  ;;  %v6624_v32 = vrot.slane %v1228_v60, 10  ;;  %v1444_v14 = vrot.slane %v1230_v24, 6  ;;  %v7542_v51 = vld [vmem:[%s12013_s4 + $0x8] sm:$0xff]  }
  0x84   : > { %1942 = vrot.lane.b32.xlu0 %v8299_v54, %s7741_s26  ;;  %1868 = vrot.lane.b32.xlu1 %v8308_v7, %s7740_s25  ;;  %v1669_v20 = vsel %vm8039_vm6, %v1667_v10, %v1668_v4  ;;  %v1431_v63 = vsel %vm8361_vm11, %v1429_v12, %v1430_v6  ;;  %v8377_v4 = vcombine.low %v8232_v36, %v1349_v59  ;;  %v1441_v10 = vrot.slane %v8085_v55, 6  ;;  %v1353_v26 = vld [vmem:[#allocation2 + $0x118] sm:$0xf]  ;;  %v7541_v55 = vld [vmem:[%s12013_s4] sm:$0xff]  }
  0x85   : > { %v8321_v22 = vcombine.low %v1666_v9, %v1669_v20  ;;  %v8381_v9 = vcombine.low %v1428_v62, %v1431_v63  ;;  %v8387_v18 = vcombine.low %v8267_v21, %v1351_v5  ;;  %v1434_v20 = vrot.slane %v8122_v33, 6  ;;  %v1227_v29 = vld [vmem:[#allocation2 + $0x78] sm:$0x3]  ;;  %7122 = vmatprep.subr.bf16.mxu1 %v7541_v55  ;;  %526 = vst.msk [vmem:[#allocation2 + $0xc] sm:$0x3] %vm525_vm12, %v7739_v0 }
  0x86   : > { %v1443_v37 = vrot.slane %v1441_v10, 4  ;;  %v8398_v33 = vcombine.low %v8292_v45, %v1353_v26  ;;  %v1355_v40 = vld [vmem:[#allocation2 + $0x138] sm:$0xf]  ;;  %v1437_v48 = vrot.slane %v1227_v29, 6  ;;  %7123 = vmatpush3.bf16.msra.mxu1 %v7541_v55  ;;  %v1442_v52 = vsel %vm8361_vm11, %v6624_v32, %v1441_v10  ;;  %530 = vst.msk [vmem:[#allocation2 + $0x1c] sm:$0x3] %vm525_vm12, %v7739_v0 }
  0x87   : > { %v1436_v44 = vrot.slane %v1434_v20, 4  ;;  %538 = vst.msk [vmem:[#allocation2 + $0x3c] sm:$0x3] %vm525_vm12, %v7739_v0  ;;  %542 = vst.msk [vmem:[#allocation2 + $0x4c] sm:$0x3] %vm525_vm12, %v7739_v0  ;;  %7124 = vmatprep.subr.bf16.mxu1 %v7542_v51  ;;  %v1448_v63 = vrot.slane %v8157_v1, 6 }
  0x88   : > { %1946 = vrot.lane.b32.xlu0 %v8315_v16, %s7741_s26  ;;  %1872 = vrot.lane.b32.xlu1 %v8321_v22, %s7740_s25  ;;  %v1445_v12 = vsel %vm8361_vm11, %v1443_v37, %v1444_v14  ;;  %546 = vst.msk [vmem:[#allocation2 + $0x5c] sm:$0x3] %vm525_vm12, %v7739_v0  ;;  %550 = vst.msk [vmem:[#allocation2 + $0x6c] sm:$0x3] %vm525_vm12, %v7739_v0  ;;  %v1233_v5 = vld [vmem:[#allocation2 + $0x98] sm:$0x3] }
  0x89   : > { %554 = vst.msk [vmem:[#allocation2 + $0x7c] sm:$0x3] %vm525_vm12, %v7739_v0  ;;  %558 = vst.msk [vmem:[#allocation2 + $0x8c] sm:$0x3] %vm525_vm12, %v7739_v0  ;;  %v1438_v59 = vsel %vm8361_vm11, %v1436_v44, %v1437_v48  ;;  %v8476_v62 = vcombine.low %v1442_v52, %v1445_v12  ;;  %v7544_v60 = vld [vmem:[%s12013_s4 + $0x18] sm:$0xff]   ;;  %v1451_v24 = vrot.slane %v1233_v5, 6 }
  0x8a   : > { %562 = vst.msk [vmem:[#allocation2 + $0x9c] sm:$0x3] %vm525_vm12, %v7739_v0  ;;  %566 = vst.msk [vmem:[#allocation2 + $0xac] sm:$0x3] %vm525_vm12, %v7739_v0  ;;  %7125 = vmatpush3.bf16.msra.mxu1 %v7542_v51  ;;  %v7545_v1 = vld [vmem:[%s12013_s4 + $0x20] ss:$0 sps:$4 sm:$0xff]  }
  0x8b   : > { %570 = vst.msk [vmem:[#allocation2 + $0xbc] sm:$0x3] %vm525_vm12, %v7739_v0  ;;  %574 = vst.msk [vmem:[#allocation2 + $0xcc] sm:$0x3] %vm525_vm12, %v7739_v0  ;;  %v1234_v29 = vld [vmem:[#allocation2 + $0xa0] sm:$0xc] }
  0x8c   : > { %1950 = vrot.lane.b32.xlu0 %v8326_v25, %s7741_s26  ;;  %1940 = vrot.lane.b32.xlu1 %v6693_v28, %s7741_s26  ;;  %v1225_v28 = vld [vmem:[#allocation2 + $0x70] sm:$0xc]  ;;  %578 = vst.msk [vmem:[#allocation2 + $0xdc] sm:$0x3] %vm525_vm12, %v7739_v0  ;;  %582 = vst.msk [vmem:[#allocation2 + $0xec] sm:$0x3] %vm525_vm12, %v7739_v0 }
  0x8d   : > { %v6623_v43 = vrot.slane %v1225_v28, 10  ;;  %586 = vst.msk [vmem:[#allocation2 + $0xfc] sm:$0x3] %vm525_vm12, %v7739_v0  ;;  %590 = vst.msk [vmem:[#allocation2 + $0x10c] sm:$0x3] %vm525_vm12, %v7739_v0  ;;  %v1455_v55 = vrot.slane %v8117_v27, 6 }
  0x8e   : > { %594 = vst.msk [vmem:[#allocation2 + $0x11c] sm:$0x3] %vm525_vm12, %v7739_v0  ;;  %598 = vst.msk [vmem:[#allocation2 + $0x12c] sm:$0x3] %vm525_vm12, %v7739_v0  ;;  %v2558_v32 = vsel %vm12112_vm13, %v7545_v1, 0  ;;  %v6626_v14 = vrot.slane %v1234_v29, 10 }
  0x8f   : > { %602 = vst.msk [vmem:[#allocation2 + $0x13c] sm:$0x3] %vm525_vm12, %v7739_v0  ;;  %606 = vst.msk [vmem:[#allocation2 + $0x14c] sm:$0x3] %vm525_vm12, %v7739_v0  ;;  %v1435_v6 = vsel %vm8361_vm11, %v6623_v43, %v1434_v20  ;;  %v1450_v20 = vrot.slane %v1448_v63, 4  ;;  %v1476_v29 = vrot.slane %v8232_v36, 6 }
  0x90   : > { %1954 = vrot.lane.b32.xlu0 %v8334_v30, %s7741_s26  ;;  %1944 = vrot.lane.b32.xlu1 %v8338_v35, %s7741_s26  ;;  %610 = vst.msk [vmem:[#allocation2 + $0x15c] sm:$0x3] %vm525_vm12, %v7739_v0  ;;  %614 = vst.msk [vmem:[#allocation2 + $0x16c] sm:$0x3] %vm525_vm12, %v7739_v0  ;;  %v1236_v37 = vld [vmem:[#allocation2 + $0xa8] sm:$0x3]  ;;  %v1456_v27 = vsel %vm8361_vm11, %v6626_v14, %v1455_v55 }
  0x91   : > { %618 = vst.msk [vmem:[#allocation2 + $0x17c] sm:$0x3] %vm525_vm12, %v7739_v0  ;;  %622 = vst.msk [vmem:[#allocation2 + $0x18c] sm:$0x3] %vm525_vm12, %v7739_v0  ;;  %v1452_v28 = vsel %vm8361_vm11, %v1450_v20, %v1451_v24  ;;  %v1458_v43 = vrot.slane %v1236_v37, 6  ;;  %v1478_v14 = vrot.slane %v1476_v29, 4 }
  0x92   : > { %626 = vst.msk [vmem:[#allocation2 + $0x19c] sm:$0x3] %vm525_vm12, %v7739_v0  ;;  %630 = vst.msk [vmem:[#allocation2 + $0x1ac] sm:$0x3] %vm525_vm12, %v7739_v0  ;;  %v1237_v48 = vld [vmem:[#allocation2 + $0xb0] sm:$0xc] }
  0x93   : > { %634 = vst.msk [vmem:[#allocation2 + $0x1bc] sm:$0x3] %vm525_vm12, %v7739_v0  ;;  %v7543_v0 = vld [vmem:[%s12013_s4 + $0x10] sm:$0xff]   ;;  %v1239_v51 = vld [vmem:[#allocation2 + $0xb8] sm:$0x3]  ;;  %v6627_v12 = vrot.slane %v1237_v48, 10 }
  0x94   : > { %1958 = vrot.lane.b32.xlu0 %v8343_v38, %s7741_s26  ;;  %1948 = vrot.lane.b32.xlu1 %v8349_v41, %s7741_s26  ;;  %v1240_v5 = vld [vmem:[#allocation2 + $0xc0] sm:$0xc]  ;;  %v8603_v48 = vld [vmem:[%s8035_s24 + $0x70] sm:$0xf] }
  0x95   : > { %7126 = vmatprep.subr.bf16.mxu1 %v7543_v0 }
  0x96   : > { %7127 = vmatpush3.bf16.msra.mxu1 %v7543_v0 }
  0x97   : > { %7128 = vmatprep.subr.bf16.mxu1 %v7544_v60 }
  0x98   : > { %1962 = vrot.lane.b32.xlu0 %v8354_v49, %s7741_s26  ;;  %1952 = vrot.lane.b32.xlu1 %v8359_v56, %s7741_s26 }
  0x9a   : > { %7129 = vmatpush3.bf16.msra.mxu1 %v7544_v60 }
  0x9b   : > { %7255 = vmatprep.subr.msk.bf16.mxu1 %vm12112_vm13, %v7545_v1 }
  0x9c   : > { %1966 = vrot.lane.b32.xlu0 %v8368_v23, %s7741_s26  ;;  %1956 = vrot.lane.b32.xlu1 %v8377_v4, %s7741_s26 }
  0x9e   : > { %7131 = vmatpush3.bf16.msra.mxu1 %v2558_v32  ;;  %v1245_v32 = vld [vmem:[#allocation2 + $0xd8] sm:$0x3] }
  0xa0   : > { %1976 = vrot.lane.b32.xlu0 %v8381_v9, %s7742_s27  ;;  %1960 = vrot.lane.b32.xlu1 %v8387_v18, %s7741_s26 }
  0xa4   : > { %2014 = vrot.lane.b32.xlu0 %v8130_v39, %s7743_s16  ;;  %1964 = vrot.lane.b32.xlu1 %v8398_v33, %s7741_s26  ;;  %v8468_v39 = vcombine.low %v8303_v61, %v1355_v40  ;;  %v8483_v61 = vcombine.low %v1435_v6, %v1438_v59  ;;  %v1457_v40 = vrot.slane %v1455_v55, 4  ;;  %v1243_v55 = vld [vmem:[#allocation2 + $0xd0] sm:$0xc] }
  0xa8   : > { %2054 = vrot.lane.b32.xlu0 %v8299_v54, %s7744_s19  ;;  %1968 = vrot.lane.b32.xlu1 %v8468_v39, %s7741_s26  ;;  %v1231_v54 = vld [vmem:[#allocation2 + $0x90] sm:$0xc] }
  0xa9   : > { %v6625_v10 = vrot.slane %v1231_v54, 10 }
  0xab   : > { %v1449_v26 = vsel %vm8361_vm11, %v6625_v10, %v1448_v63  ;;  %v1469_v63 = vrot.slane %v8137_v47, 6  ;;  %v6628_v10 = vrot.slane %v1240_v5, 10 }
  0xac   : > { %2092 = vrot.lane.b32.xlu0 %v8476_v62, %s7745_s22  ;;  %1978 = vrot.lane.b32.xlu1 %v8483_v61, %s7742_s27 }
  0xad   : > { %v1471_v20 = vrot.slane %v1469_v63, 4 }
  0xb0   : > { %2130 = vrot.lane.b32.xlu0 %v8109_v17, %s7746_s15  ;;  %2016 = vrot.lane.b32.xlu1 %v8148_v58, %s7743_s16  ;;  %v8511_v58 = vcombine.low %v1449_v26, %v1452_v28 }
  0xb4   : > { %2170 = vrot.lane.b32.xlu0 %v8315_v16, %s7747_s20  ;;  %2056 = vrot.lane.b32.xlu1 %v8338_v35, %s7744_s19  ;;  %v1459_v35 = vsel %vm8361_vm11, %v1457_v40, %v1458_v43  ;;  %v1479_v40 = vrot.slane %v1245_v32, 6 }
  0xb5   : > { %v8527_v44 = vcombine.low %v1456_v27, %v1459_v35 }
  0xb6   : > { %v1480_v27 = vsel %vm8361_vm11, %v1478_v14, %v1479_v40 }
  0xb7   : > { %12177 = vst [vmem:[#allocation7_spill] sm:$0xff] %v8527_v44 }
  0xb8   : > { %1980 = vrot.lane.b32.xlu0 %v8476_v62, %s7742_s27  ;;  %2094 = vrot.lane.b32.xlu1 %v8511_v58, %s7745_s22 }
  0xbc   : > { %2018 = vrot.lane.b32.xlu0 %v8109_v17, %s7743_s16  ;;  %2132 = vrot.lane.b32.xlu1 %v8182_v31, %s7746_s15  ;;  %v1462_v17 = vrot.slane %v8216_v13, 6 }
  0xbe   : > { %v8534_v52 = vpop.permute.xlu0 %1842  ;;  %v1464_v6 = vrot.slane %v1462_v17, 4  ;;  %v1463_v13 = vsel %vm8361_vm11, %v6627_v12, %v1462_v17 }
  0xbf   : > { %12178 = vst [vmem:[#allocation8_spill] sm:$0xff] %v8534_v52 }
  0xc0   : > { %2058 = vrot.lane.b32.xlu0 %v8315_v16, %s7744_s19  ;;  %2172 = vrot.lane.b32.xlu1 %v8349_v41, %s7747_s20  ;;  %v1465_v16 = vrot.slane %v1239_v51, 6  ;;  %v740_v51 = vrot.slane %v8603_v48, 5 }
  0xc2   : > { %v1466_v59 = vsel %vm8361_vm11, %v1464_v6, %v1465_v16  ;;  %v8546_v0 = vpop.permute.xlu0 %1844  ;;  %v1246_v6 = vld [vmem:[#allocation2 + $0xe0] sm:$0xc]  ;;  %v1483_v16 = vrot.slane %v8197_v46, 6  ;;  %843 = vst.msk [vmem:[#allocation2 + $0x140] sm:$0x8] %vm799_vm5, %v740_v51 }
  0xc3   : > { %12179 = vst [vmem:[#allocation9_spill] sm:$0xff] %v8546_v0  ;;  %v8553_v54 = vcombine.low %v1463_v13, %v1466_v59  ;;  %v8618_v13 = vld [vmem:[%s8035_s24 + $0x74] sm:$0xf]  ;;  %v7587_v46 = vld [vmem:[%s8035_s24] sm:$0xf] }
  0xc4   : > { %2096 = vrot.lane.b32.xlu0 %v8527_v44, %s7745_s22  ;;  %1982 = vrot.lane.b32.xlu1 %v8511_v58, %s7742_s27  ;;  %v742_v5 = vrot.slane %v8618_v13, 5 }
  0xc5   : > { %12180 = vst [vmem:[#allocation10_spill] sm:$0xff] %v8553_v54 }
  0xc6   : > { %v744_v40 = vrot.slane %v742_v5, 4 }
  0xc8   : > { %2134 = vrot.lane.b32.xlu0 %v8144_v53, %s7746_s15  ;;  %2020 = vrot.lane.b32.xlu1 %v8182_v31, %s7743_s16  ;;  %v1242_v31 = vld [vmem:[#allocation2 + $0xc8] sm:$0x3]  ;;  %845 = vst.msk [vmem:[#allocation2 + $0x148] sm:$0x7] %vm802_vm7, %v744_v40  ;;  %v1251_v40 = vld [vmem:[#allocation2 + $0xf8] sm:$0x3] }
  0xc9   : > { %v1472_v24 = vrot.slane %v1242_v31, 6 }
  0xcb   : > { %v1473_v1 = vsel %vm8361_vm11, %v1471_v20, %v1472_v24  ;;  %v8630_v24 = vld [vmem:[%s8035_s24 + $0x78] sm:$0xf] }
  0xcc   : > { %2174 = vrot.lane.b32.xlu0 %v8326_v25, %s7747_s20  ;;  %2060 = vrot.lane.b32.xlu1 %v8349_v41, %s7744_s19  ;;  %v8557_v60 = vpop.permute.xlu0 %1850  ;;  %v1470_v41 = vsel %vm8361_vm11, %v6628_v10, %v1469_v63  ;;  %v741_v63 = vrot.slane %v740_v51, 4  ;;  %v7588_v10 = vld [vmem:[%s8035_s24 + $0x4] sm:$0xf] }
  0xcd   : > { %12181 = vst [vmem:[#allocation11_spill] sm:$0xff] %v8557_v60  ;;  %v8575_v28 = vcombine.low %v1470_v41, %v1473_v1  ;;  %v6588_v20 = vcombine.low %v7587_v46, %v7588_v10  ;;  %v6630_v41 = vrot.slane %v1246_v6, 10  ;;  %v7589_v1 = vld [vmem:[%s8035_s24 + $0x8] sm:$0xf]  ;;  %v7591_v46 = vld [vmem:[%s8035_s24 + $0x10] sm:$0xf] }
  0xce   : > { %v8563_v47 = vpop.permute.xlu1 %1846  ;;  %v743_v32 = vsel %vm8052_vm8, %v741_v63, %v742_v5  ;;  %v7592_v10 = vld [vmem:[%s8035_s24 + $0x14] sm:$0xf] }
  0xcf   : > { %12182 = vst [vmem:[#allocation12_spill] sm:$0xff] %v8563_v47  ;;  %12184 = vst [vmem:[#allocation14_spill] sm:$0xff] %v8575_v28  ;;  %7090 = vmatprep.mubr.msk.bf16.mxu0 %vm905_vm14, %v6588_v20  ;;  %v6590_v20 = vcombine.low %v7591_v46, %v7592_v10 }
  0xd0   : > { %1984 = vrot.lane.b32.xlu0 %v8527_v44, %s7742_s27  ;;  %2098 = vrot.lane.b32.xlu1 %v8553_v54, %s7745_s22  ;;  %v8571_v26 = vpop.permute.xlu0 %1854  ;;  %844 = vst.msk [vmem:[#allocation2 + $0x144] sm:$0xf] %vm521_vm0, %v743_v32  ;;  %v1504_v44 = vrot.slane %v8292_v45, 6 }
  0xd1   : > { %12183 = vst [vmem:[#allocation13_spill] sm:$0xff] %v8571_v26 }
  0xd4   : > { %2022 = vrot.lane.b32.xlu0 %v8144_v53, %s7743_s16  ;;  %2136 = vrot.lane.b32.xlu1 %v8244_v50, %s7746_s15  ;;  %v8579_v53 = vpop.permute.xlu1 %1848  ;;  %v8584_v37 = vpop.permute.xlu0 %1858 }
  0xd5   : > { %12185 = vst [vmem:[#allocation15_spill] sm:$0xff] %v8579_v53  ;;  %12186 = vst [vmem:[#allocation16_spill] sm:$0xff] %v8584_v37  ;;  %v7607_v37 = vld [vmem:[#allocation2 + $0x74] sm:$0xf] }
  0xd8   : > { %2062 = vrot.lane.b32.xlu0 %v8326_v25, %s7744_s19  ;;  %2176 = vrot.lane.b32.xlu1 %v8359_v56, %s7747_s20  ;;  %v6629_v25 = vrot.slane %v1243_v55, 10  ;;  %v8590_v43 = vpop.permute.xlu1 %1852 }
  0xd9   : > { %12187 = vst [vmem:[#allocation17_spill] sm:$0xff] %v8590_v43 }
  0xda   : > { %v1477_v36 = vsel %vm8361_vm11, %v6629_v25, %v1476_v29  ;;  %v7590_v29 = vld [vmem:[%s8035_s24 + $0xc] sm:$0xf]  ;;  %v1485_v25 = vrot.slane %v1483_v16, 4 }
  0xdb   : > { %v8607_v17 = vcombine.low %v1477_v36, %v1480_v27  ;;  %v6589_v55 = vcombine.low %v7589_v1, %v7590_v29  ;;  %v8641_v36 = vld [vmem:[%s8035_s24 + $0x7c] sm:$0xf]  ;;  %v745_v27 = vrot.slane %v8630_v24, 5  ;;  %v7593_v29 = vld [vmem:[%s8035_s24 + $0x18] sm:$0xf] }
  0xdc   : > { %2100 = vrot.lane.b32.xlu0 %v8575_v28, %s7745_s22  ;;  %1986 = vrot.lane.b32.xlu1 %v8553_v54, %s7742_s27  ;;  %v747_v51 = vrot.slane %v8641_v36, 5  ;;  %v2827_v54 = vld [vmem:[#allocation2 + $0x68] sm:$0x1] }
  0xdd   : > { %12189 = vst [vmem:[#allocation19_spill] sm:$0xff] %v8607_v17  ;;  %v746_v6 = vrot.slane %v745_v27, 4  ;;  %846 = vst.msk [vmem:[#allocation2 + $0x150] sm:$0x8] %vm799_vm5, %v745_v27  ;;  %v1286_v27 = vld [vmem:[#allocation2 + $0x34] sm:$0xf] }
  0xde   : > { %v749_v5 = vrot.slane %v747_v51, 4  ;;  %vm12140_vm5 = vcmask 523264  }
  0xdf   : > { %v748_v63 = vsel %vm8052_vm8, %v746_v6, %v747_v51 }
  0xe0   : > { %2138 = vrot.lane.b32.xlu0 %v8167_v11, %s7746_s15  ;;  %2024 = vrot.lane.b32.xlu1 %v8244_v50, %s7743_s16  ;;  %v8598_v35 = vpop.permute.xlu0 %1862  ;;  %v849_v50 = vld [vmem:[%s12011_s2] sm:$0xf]  ;;  %847 = vst.msk [vmem:[#allocation2 + $0x154] sm:$0xf] %vm521_vm0, %v748_v63  ;;  %v3097_v63 = vrot.slane %v1286_v27, 7  ;;  %vm2283_vm0 = vcmask 195584  }
  0xe1   : > { %12188 = vst [vmem:[#allocation18_spill] sm:$0xff] %v8598_v35  ;;  %7254 = vmatprep.subr.msk.bf16.mxu0 %vm12112_vm13, %v849_v50  ;;  %v956_v59 = vsel %vm12112_vm13, %v849_v50, 0  ;;  %848 = vst.msk [vmem:[#allocation2 + $0x158] sm:$0x7] %vm802_vm7, %v749_v5  ;;  %v7595_v5 = vld [vmem:[%s8035_s24 + $0x20] sm:$0xf] }
  0xe2   : > { %7089 = vmatpush3.bf16.msra.mxu0 %v956_v59  ;;  %v1484_v59 = vsel %vm8361_vm11, %v6630_v41, %v1483_v16  ;;  %v7602_v35 = vld [vmem:[%s8035_s24 + $0x3c] sm:$0xf]  ;;  %vm12113_vm7 = vcmask 588800  }
  0xe4   : > { %2178 = vrot.lane.b32.xlu0 %v8334_v30, %s7747_s20  ;;  %2064 = vrot.lane.b32.xlu1 %v8359_v56, %s7744_s19  ;;  %v1248_v56 = vld [vmem:[#allocation2 + $0xe8] sm:$0x3] }
  0xe5   : > { %v8613_v12 = vpop.permute.xlu1 %1856  ;;  %v1486_v14 = vrot.slane %v1248_v56, 6  ;;  %7091 = vmatmul.mubr.msk.bf16.vlgmr.msra.gmra.mrb[0].mxu0 %vm905_vm14, %v6589_v55  ;;  %v7594_v55 = vld [vmem:[%s8035_s24 + $0x1c] sm:$0xf] }
  0xe6   : > { %12190 = vst [vmem:[#allocation20_spill] sm:$0xff] %v8613_v12  ;;  %v6591_v32 = vcombine.low %v7593_v29, %v7594_v55  ;;  %7094 = vmatprep.mubr.msk.bf16.mxu0 %vm905_vm14, %v6590_v20  ;;  %v1285_v20 = vld [vmem:[#allocation2 + $0x30] sm:$0x8]  ;;  %v1287_v29 = vld [vmem:[#allocation2 + $0x38] sm:$0x7] }
  0xe7   : > { %v8625_v31 = vpop.permute.xlu0 %1866  ;;  %v7597_v55 = vld [vmem:[%s8035_s24 + $0x28] sm:$0xf]  ;;  %v6759_v27 = vrot.slane %v1285_v20, 11 }
  0xe8   : > { %1988 = vrot.lane.b32.xlu0 %v8575_v28, %s7742_s27  ;;  %12191 = vst [vmem:[#allocation21_spill] sm:$0xff] %v8625_v31  ;;  %2102 = vrot.lane.b32.xlu1 %v8607_v17, %s7745_s22  ;;  %v2871_v31 = vld [vmem:[#allocation2 + $0x3c] sm:$0x1] }
  0xe9   : > { %v8644_v50 = vpop.permute.xlu1 %1860  ;;  %v3098_v20 = vsel %vm8039_vm6, %v6759_v27, %v3097_v63 }
  0xea   : > { %12192 = vst [vmem:[#allocation22_spill] sm:$0xff] %v8644_v50 }
  0xec   : > { %2026 = vrot.lane.b32.xlu0 %v8167_v11, %s7743_s16  ;;  %2140 = vrot.lane.b32.xlu1 %v8259_v8, %s7746_s15  ;;  %v1487_v11 = vsel %vm8361_vm11, %v1485_v25, %v1486_v14  ;;  %v1490_v25 = vrot.slane %v8267_v21, 6  ;;  %v7596_v21 = vld [vmem:[%s8035_s24 + $0x24] sm:$0xf] }
  0xed   : > { %v8674_v1 = vcombine.low %v1484_v59, %v1487_v11  ;;  %7095 = vmatmul.mubr.msk.bf16.gmra.mrb[4].mxu0 %vm905_vm14, %v6591_v32  ;;  %v1493_v11 = vrot.slane %v1251_v40, 6  ;;  %v6592_v46 = vcombine.low %v7595_v5, %v7596_v21  ;;  %v7598_v32 = vld [vmem:[%s8035_s24 + $0x2c] sm:$0xf]  ;;  %v1283_v40 = vld [vmem:[#allocation2 + $0x24] sm:$0xf]  ;;  %v3099_v5 = vrot.slane %v3097_v63, 4 }
  0xee   : > { %v8654_v56 = vpop.permute.xlu0 %1870  ;;  %v1492_v59 = vrot.slane %v1490_v25, 4  ;;  %v3100_v21 = vrot.slane %v1287_v29, 7 }
  0xef   : > { %12193 = vst [vmem:[#allocation23_spill] sm:$0xff] %v8654_v56  ;;  %12195 = vst [vmem:[#allocation25_spill] sm:$0xff] %v8674_v1  ;;  %v6593_v56 = vcombine.low %v7597_v55, %v7598_v32  ;;  %7098 = vmatprep.mubr.msk.bf16.mxu0 %vm905_vm14, %v6592_v46  ;;  %v7599_v32 = vld [vmem:[%s8035_s24 + $0x30] sm:$0xf] }
  0xf0   : > { %2066 = vrot.lane.b32.xlu0 %v8334_v30, %s7744_s19  ;;  %2180 = vrot.lane.b32.xlu1 %v8377_v4, %s7747_s20  ;;  %v8670_v16 = vpop.permute.xlu1 %1864  ;;  %v1249_v30 = vld [vmem:[#allocation2 + $0xf0] sm:$0xc] }
  0xf1   : > { %12194 = vst [vmem:[#allocation24_spill] sm:$0xff] %v8670_v16  ;;  %v6631_v6 = vrot.slane %v1249_v30, 10 }
  0xf2   : > { %v8672_v41 = vpop.permute.xlu0 %1938 }
  0xf3   : > { %v1491_v30 = vsel %vm8361_vm11, %v6631_v6, %v1490_v25  ;;  %v2870_v25 = vld [vmem:[#allocation2 + $0x38] sm:$0xf]  ;;  %v3090_v6 = vrot.slane %v1283_v40, 7  ;;  %v7600_v40 = vld [vmem:[%s8035_s24 + $0x34] sm:$0xf] }
  0xf4   : > { %2104 = vrot.lane.b32.xlu0 %v8674_v1, %s7745_s22  ;;  %1990 = vrot.lane.b32.xlu1 %v8607_v17, %s7742_s27  ;;  %v3159_v29 = vrot.slane %v2870_v25, 5 }
  0xf5   : > { %7099 = vmatmul.mubr.msk.bf16.gmra.mrb[8].mxu0 %vm905_vm14, %v6593_v56  ;;  %v3092_v50 = vrot.slane %v3090_v6, 4 }
  0xf6   : > { %v8685_v14 = vpop.permute.xlu0 %1942  ;;  %v8687_v51 = vpop.permute.xlu1 %1868 }
  0xf7   : > { %12196 = vst [vmem:[#allocation26_spill] sm:$0xff] %v8687_v51 }
  0xf8   : > { %2142 = vrot.lane.b32.xlu0 %v8219_v19, %s7746_s15  ;;  %2028 = vrot.lane.b32.xlu1 %v8259_v8, %s7743_s16  ;;  %v1494_v8 = vsel %vm8361_vm11, %v1492_v59, %v1493_v11  ;;  %v1282_v59 = vld [vmem:[#allocation2 + $0x20] sm:$0x8]  ;;  %v1284_v11 = vld [vmem:[#allocation2 + $0x28] sm:$0x7] }
  0xf9   : > { %v8715_v56 = vcombine.low %v1491_v30, %v1494_v8  ;;  %v2869_v8 = vld [vmem:[#allocation2 + $0x34] sm:$0xe]  ;;  %v6758_v17 = vrot.slane %v1282_v59, 11  ;;  %v3093_v63 = vrot.slane %v1284_v11, 7  ;;  %v2866_v59 = vld [vmem:[#allocation2 + $0x24] sm:$0xe] }
  0xfa   : > { %v8695_v10 = vpop.permute.xlu0 %1946  ;;  %v8700_v51 = vpop.permute.xlu1 %1872  ;;  %v6761_v25 = vrot.slane %v2869_v8, 9  ;;  %v7603_v8 = vld [vmem:[%s8035_s24 + $0x40] sm:$0xf] }
  0xfb   : > { %12197 = vst [vmem:[#allocation27_spill] sm:$0xff] %v8700_v51  ;;  %12199 = vst [vmem:[#allocation29_spill] sm:$0xff] %v8715_v56  ;;  %v6594_v51 = vcombine.low %v7599_v32, %v7600_v40  ;;  %v3161_v32 = vrot.slane %v3159_v29, 4  ;;  %v3162_v40 = vrot.slane %v2871_v31, 5  ;;  %v2868_v31 = vld [vmem:[#allocation2 + $0x2c] sm:$0x1] }
  0xfc   : > { %2182 = vrot.lane.b32.xlu0 %v8343_v38, %s7747_s20  ;;  %2068 = vrot.lane.b32.xlu1 %v8377_v4, %s7744_s19  ;;  %v3101_v4 = vsel %vm8039_vm6, %v3099_v5, %v3100_v21  ;;  %v2867_v21 = vld [vmem:[#allocation2 + $0x28] sm:$0xf]  ;;  %v3155_v28 = vrot.slane %v2868_v31, 5  ;;  %v1216_v31 = vld [vmem:[#allocation2 + $0x40] sm:$0xc] }
  0xfd   : > { %7102 = vmatprep.mubr.msk.bf16.mxu0 %vm905_vm14, %v6594_v51  ;;  %v6811_v5 = vcombine.low %v3098_v20, %v3101_v4  ;;  %v3094_v51 = vsel %vm8039_vm6, %v3092_v50, %v3093_v63  ;;  %v3152_v11 = vrot.slane %v2867_v21, 5  ;;  %v3160_v20 = vsel %vm8052_vm8, %v6761_v25, %v3159_v29 }
  0xfe   : > { %v8711_v46 = vpop.permute.xlu0 %1950  ;;  %v8713_v55 = vpop.permute.xlu1 %1940  ;;  %v3163_v4 = vsel %vm8052_vm8, %v3161_v32, %v3162_v40  ;;  %v6760_v21 = vrot.slane %v2866_v59, 9  ;;  %v3009_v29 = vrot.slane %v7607_v37, 5  ;;  %v2828_v40 = vld [vmem:[#allocation2 + $0x70] sm:$0xe]  ;;  %v1254_v59 = vld [vmem:[#allocation2 + $0x108] sm:$0x3] }
  0xff   : > { %12198 = vst [vmem:[#allocation28_spill] sm:$0xff] %v8711_v46  ;;  %v6813_v32 = vcombine.low %v3160_v20, %v3163_v4  ;;  %v6747_v20 = vrot.slane %v2828_v40, 9  ;;  %v7614_v46 = vld [vmem:[%s8035_s24 + $0x5c] sm:$0xf] }
 0x100   : > { %1992 = vrot.lane.b32.xlu0 %v8674_v1, %s7742_s27  ;;  %2106 = vrot.lane.b32.xlu1 %v8715_v56, %s7745_s22  ;;  %v7601_v1 = vld [vmem:[%s8035_s24 + $0x38] sm:$0xf]  ;;  %v3153_v37 = vsel %vm8052_vm8, %v6760_v21, %v3152_v11  ;;  %v3011_v4 = vrot.slane %v3009_v29, 4 }
 0x101   : > { %v6595_v16 = vcombine.low %v7601_v1, %v7602_v35  ;;  %v3091_v1 = vsel %vm8039_vm6, %v6758_v17, %v3090_v6  ;;  %v7604_v17 = vld [vmem:[%s8035_s24 + $0x44] sm:$0xf] }
 0x102   : > { %v8727_v30 = vpop.permute.xlu0 %1954  ;;  %v8732_v27 = vpop.permute.xlu1 %1944  ;;  %v6596_v6 = vcombine.low %v7603_v8, %v7604_v17  ;;  %v6810_v50 = vcombine.low %v3091_v1, %v3094_v51  ;;  %v2829_v1 = vld [vmem:[#allocation2 + $0x78] sm:$0x1]  ;;  %v1252_v51 = vld [vmem:[#allocation2 + $0x100] sm:$0xc]  ;;  %v7608_v8 = vld [vmem:[#allocation2 + $0x104] sm:$0xf] }
 0x103   : > { %12200 = vst [vmem:[#allocation30_spill] sm:$0xff] %v8727_v30  ;;  %7103 = vmatmul.mubr.msk.bf16.gmra.mrb[12].mxu0 %vm905_vm14, %v6595_v16  ;;  %v3154_v30 = vrot.slane %v3152_v11, 4  ;;  %v3012_v17 = vrot.slane %v2829_v1, 5  ;;  %v6632_v21 = vrot.slane %v1252_v51, 10  ;;  %v6620_v1 = vrot.slane %v1216_v31, 10 }
 0x104   : > { %1994 = vrot.lane.b32.xlu0 %v8715_v56, %s7742_s27  ;;  %2144 = vrot.lane.b32.xlu1 %v8290_v42, %s7746_s15  ;;  %v7606_v56 = vld [vmem:[%s8035_s24 + $0x4c] sm:$0xf] }
 0x105   : > { %7106 = vmatprep.mubr.msk.bf16.mxu0 %vm905_vm14, %v6596_v6  ;;  %v1218_v6 = vld [vmem:[#allocation2 + $0x48] sm:$0x3]  ;;  %v3013_v31 = vsel %vm8052_vm8, %v3011_v4, %v3012_v17 }
 0x106   : > { %v8739_v35 = vpop.permute.xlu0 %1958  ;;  %v8745_v16 = vpop.permute.xlu1 %1948  ;;  %v1416_v51 = vrot.slane %v1218_v6, 6  ;;  %v3005_v6 = vrot.slane %v2827_v54, 5  ;;  %v7549_v54 = vld [vmem:[%s12015_s6] sm:$0xff]  }
 0x107   : > { %12201 = vst [vmem:[#allocation31_spill] sm:$0xff] %v8739_v35  ;;  %v7605_v35 = vld [vmem:[%s8035_s24 + $0x48] sm:$0xf]  ;;  %7164 = vmatprep.subr.bf16.mxu0 %v7549_v54 }
 0x108   : > { %3490 = vrot.lane.b32.xlu0 %v6811_v5, %s7740_s25  ;;  %2184 = vrot.lane.b32.xlu1 %v8387_v18, %s7747_s20  ;;  %v6597_v5 = vcombine.low %v7605_v35, %v7606_v56  ;;  %v1497_v56 = vrot.slane %v7608_v8, 6 }
 0x109   : > { %7165 = vmatpush3.bf16.msra.mxu0 %v7549_v54 }
 0x10a   : > { %v8756_v63 = vpop.permute.xlu0 %1962  ;;  %v8761_v25 = vpop.permute.xlu1 %1952  ;;  %v1499_v12 = vrot.slane %v1497_v56, 4 }
 0x10b   : > { %12202 = vst [vmem:[#allocation32_spill] sm:$0xff] %v8756_v63  ;;  %12203 = vst [vmem:[#allocation33_spill] sm:$0xff] %v8761_v25  ;;  %7107 = vmatmul.mubr.msk.bf16.gmra.mrb[16].mxu0 %vm905_vm14, %v6597_v5  ;;  %v7609_v5 = vld [vmem:[#allocation2 + $0x44] sm:$0xf]  ;;  %v2826_v25 = vld [vmem:[#allocation2 + $0x60] sm:$0xe] }
 0x10c   : > { %2032 = vrot.lane.b32.xlu0 %v8290_v42, %s7743_s16  ;;  %3488 = vrot.lane.b32.xlu1 %v6810_v50, %s7740_s25  ;;  %v3156_v42 = vsel %vm8052_vm8, %v3154_v30, %v3155_v28  ;;  %v1413_v63 = vrot.slane %v7609_v5, 6  ;;  %v7610_v50 = vld [vmem:[#allocation2 + $0x64] sm:$0xf]  ;;  %v7611_v28 = vld [vmem:[%s8035_s24 + $0x50] sm:$0xf] }
 0x10d   : > { %v3002_v11 = vrot.slane %v7610_v50, 5  ;;  %v7612_v30 = vld [vmem:[%s8035_s24 + $0x54] sm:$0xf]  ;;  %v6812_v5 = vcombine.low %v3153_v37, %v3156_v42  ;;  %v6599_v50 = vcombine.low %v7613_v3, %v7614_v46  ;;  %v1257_v37 = vld [vmem:[#allocation2 + $0x118] sm:$0x3]  ;;  %v6746_v3 = vrot.slane %v2826_v25, 9 }
 0x10e   : > { %v8767_v35 = vpop.permute.xlu0 %1966  ;;  %v8773_v8 = vpop.permute.xlu1 %1956  ;;  %v6598_v40 = vcombine.low %v7611_v28, %v7612_v30  ;;  %v3010_v28 = vsel %vm8052_vm8, %v6747_v20, %v3009_v29  ;;  %v1498_v29 = vsel %vm8361_vm11, %v6632_v21, %v1497_v56  ;;  %v2883_v25 = vld [vmem:[#allocation2 + $0x7c] sm:$0x1]  ;;  %v8812_v30 = vsel %vm8361_vm11, %v6620_v1, %v1413_v63 }
 0x10f   : > { %12204 = vst [vmem:[#allocation34_spill] sm:$0xff] %v8767_v35  ;;  %12205 = vst [vmem:[#allocation35_spill] sm:$0xff] %v8773_v8  ;;  %v1500_v35 = vrot.slane %v1254_v59, 6  ;;  %v1255_v59 = vld [vmem:[#allocation2 + $0x110] sm:$0xc]  ;;  %v3004_v46 = vrot.slane %v3002_v11, 4  ;;  %v8805_v17 = vcombine.low %v3010_v28, %v3013_v31 }
 0x110   : > { %3542 = vrot.lane.b32.xlu0 %v6813_v32, %s7741_s26  ;;  %2030 = vrot.lane.b32.xlu1 %v8219_v19, %s7743_s16  ;;  %v8782_v32 = vld [vmem:[#allocation2 + $0x78] sm:$0xf]  ;;  %v1415_v19 = vrot.slane %v1413_v63, 4  ;;  %v6633_v56 = vrot.slane %v1255_v59, 10  ;;  %v1506_v21 = vrot.slane %v1504_v44, 4  ;;  %v3003_v63 = vsel %vm8052_vm8, %v6746_v3, %v3002_v11 }
 0x111   : > { %7110 = vmatprep.mubr.msk.bf16.mxu0 %vm905_vm14, %v6598_v40  ;;  %v3187_v45 = vrot.slane %v8782_v32, 5  ;;  %v1501_v20 = vsel %vm8361_vm11, %v1499_v12, %v1500_v35  ;;  %12208 = vst [vmem:[#allocation38_spill] sm:$0xff] %v8805_v17  ;;  %v1507_v40 = vrot.slane %v1257_v37, 6  ;;  %v8816_v35 = vld [vmem:[#allocation2 + $0x50] sm:$0xc]  ;;  %v3006_v1 = vsel %vm8052_vm8, %v3004_v46, %v3005_v6 }
 0x112   : > { %v8780_v8 = vpop.permute.xlu0 %1976  ;;  %v8792_v42 = vpop.permute.xlu1 %1960  ;;  %v1417_v12 = vsel %vm8361_vm11, %v1415_v19, %v1416_v51  ;;  %v8829_v51 = vld [vmem:[#allocation2 + $0x68] sm:$0xf]  ;;  %v8831_v59 = vld [vmem:[#allocation2 + $0x58] sm:$0x3]  ;;  %v3190_v19 = vrot.slane %v2883_v25, 5  ;;  %v8835_v3 = vcombine.low %v1498_v29, %v1501_v20  ;;  %v1505_v25 = vsel %vm8361_vm11, %v6633_v56, %v1504_v44 }
 0x113   : > { %12206 = vst [vmem:[#allocation36_spill] sm:$0xff] %v8792_v42  ;;  %7111 = vmatmul.mubr.msk.bf16.gmra.mrb[20].mxu0 %vm905_vm14, %v6599_v50  ;;  %v3189_v31 = vrot.slane %v3187_v45, 4  ;;  %v7616_v37 = vld [vmem:[%s8035_s24 + $0x60] sm:$0xf]  ;;  %v7617_v32 = vld [vmem:[%s8035_s24 + $0x64] sm:$0xf]  ;;  %v1508_v29 = vsel %vm8361_vm11, %v1506_v21, %v1507_v40  ;;  %v6660_v54 = vcombine.low %v8812_v30, %v1417_v12 }
 0x114   : > { %2072 = vrot.lane.b32.xlu0 %v8387_v18, %s7744_s19  ;;  %3540 = vrot.lane.b32.xlu1 %v6812_v5, %s7741_s26  ;;  %v2881_v18 = vld [vmem:[#allocation2 + $0x74] sm:$0xe]  ;;  %v6600_v11 = vcombine.low %v7616_v37, %v7617_v32  ;;  %12210 = vst [vmem:[#allocation40_spill] sm:$0xff] %v8835_v3  ;;  %v8841_v6 = vld [vmem:[#allocation2 + $0xa8] sm:$0xf]  ;;  %v8859_v37 = vcombine.low %v3003_v63, %v3006_v1 }
 0x115   : > { %v8818_v5 = vld [vmem:[#allocation2 + $0x54] sm:$0xf]  ;;  %v6765_v28 = vrot.slane %v2881_v18, 9  ;;  %v7550_v18 = vld [vmem:[%s12015_s6 + $0x8] sm:$0xff]   ;;  %v2878_v20 = vld [vmem:[#allocation2 + $0x64] sm:$0xe]  ;;  %v3191_v40 = vsel %vm8052_vm8, %v3189_v31, %v3190_v19  ;;  %v8873_v1 = vcombine.low %v1505_v25, %v1508_v29  ;;  %v2204_v19 = vsel %vm905_vm14, %v6660_v54, %v8534_v52 }
 0x116   : > { %v8803_v4 = vpop.permute.xlu0 %2014  ;;  %v8821_v50 = vpop.permute.xlu1 %1964  ;;  %7114 = vmatprep.mubr.msk.bf16.mxu0 %vm905_vm14, %v6600_v11  ;;  %12212 = vst [vmem:[#allocation42_spill] sm:$0xff] %v8859_v37  ;;  %v2880_v44 = vld [vmem:[#allocation2 + $0x6c] sm:$0x1]  ;;  %v12213_v56 = vrot.slane %v8818_v5, 6  ;;  %v2890_v12 = vld [vmem:[#allocation2 + $0xa4] sm:$0xe]  ;;  %7166 = vmatprep.subr.bf16.mxu0 %v7550_v18  ;;  %v6602_v54 = vcombine.low %v8603_v48, %v8618_v13 }
 0x117   : > { %12207 = vst [vmem:[#allocation37_spill] sm:$0xff] %v8803_v4  ;;  %12209 = vst [vmem:[#allocation39_spill] sm:$0xff] %v8821_v50  ;;  %v7619_v50 = vld [vmem:[%s8035_s24 + $0x6c] sm:$0xf]  ;;  %v3188_v30 = vsel %vm8052_vm8, %v6765_v28, %v3187_v45  ;;  %v3208_v63 = vrot.slane %v8841_v6, 5  ;;  %v6764_v11 = vrot.slane %v2878_v20, 9  ;;  %7167 = vmatpush3.bf16.msra.mxu0 %v7550_v18  ;;  %v2252_v20 = vsel %vm2250_vm15, %v2204_v19, %v8672_v41 }
 0x118   : > { %3586 = vrot.lane.b32.xlu0 %v8805_v17, %s7742_s27  ;;  %2070 = vrot.lane.b32.xlu1 %v8343_v38, %s7744_s19  ;;  %v7618_v17 = vld [vmem:[%s8035_s24 + $0x68] sm:$0xf]  ;;  %v3180_v38 = vrot.slane %v8829_v51, 5  ;;  %v8866_v21 = vrot.slane %v12213_v56, 4  ;;  %v2892_v51 = vld [vmem:[#allocation2 + $0xac] sm:$0x1]  ;;  %v8888_v25 = vcombine.low %v3188_v30, %v3191_v40  ;;  %v6603_v41 = vcombine.low %v8630_v24, %v8641_v36 }
 0x119   : > { %v6601_v42 = vcombine.low %v7618_v17, %v7619_v50  ;;  %12214 = vst [vmem:[#allocation43_spill] sm:$0xff] %v8873_v1  ;;  %v8877_v56 = vld [vmem:[#allocation2 + $0xb8] sm:$0xf]  ;;  %v7551_v45 = vld [vmem:[%s12015_s6 + $0x10] sm:$0xff]   ;;  %v3183_v31 = vrot.slane %v2880_v44, 5  ;;  %v6768_v29 = vrot.slane %v2890_v12, 9 }
 0x11a   : > { %v8839_v46 = vpop.permute.xlu0 %2054  ;;  %v8857_v50 = vpop.permute.xlu1 %1968  ;;  %v3182_v28 = vrot.slane %v3180_v38, 4  ;;  %v3211_v18 = vrot.slane %v2892_v51, 5  ;;  %7168 = vmatprep.subr.bf16.mxu0 %v7551_v45  ;;  %v3210_v32 = vrot.slane %v3208_v63, 4  ;;  %v2893_v17 = vld [vmem:[#allocation2 + $0xb4] sm:$0xe]  ;;  %v3215_v44 = vrot.slane %v8877_v56, 5 }
 0x11b   : > { %12211 = vst [vmem:[#allocation41_spill] sm:$0xff] %v8857_v50  ;;  %7115 = vmatmul.mubr.msk.bf16.gmra.mrb[24].mxu0 %vm905_vm14, %v6601_v42  ;;  %v2285_v50 = vsel %vm2283_vm0, %v2252_v20, %v8780_v8  ;;  %v3181_v40 = vsel %vm8052_vm8, %v6764_v11, %v3180_v38  ;;  %v2895_v12 = vld [vmem:[#allocation2 + $0xbc] sm:$0x1]  ;;  %v7620_v24 = vld [vmem:[#allocation2 + $0xa4] sm:$0xf]  ;;  %v6769_v11 = vrot.slane %v2893_v17, 9 }
 0x11c   : > { %2146 = vrot.lane.b32.xlu0 %v8254_v2, %s7746_s15  ;;  %3584 = vrot.lane.b32.xlu1 %v8859_v37, %s7742_s27  ;;  %v7552_v48 = vld [vmem:[%s12015_s6 + $0x18] sm:$0xff]   ;;  %v2318_v13 = vsel %vm2316_vm1, %v2285_v50, %v8803_v4  ;;  %v3184_v8 = vsel %vm8052_vm8, %v3182_v28, %v3183_v31  ;;  %v3030_v36 = vrot.slane %v7620_v24, 5  ;;  %v3209_v50 = vsel %vm8052_vm8, %v6768_v29, %v3208_v63  ;;  %v2835_v17 = vld [vmem:[#allocation2 + $0xa8] sm:$0x1] }
 0x11d   : > { %7169 = vmatpush3.bf16.msra.mxu0 %v7551_v45  ;;  %7118 = vmatprep.mubr.msk.bf16.mxu0 %vm905_vm14, %v6602_v54  ;;  %v2351_v38 = vsel %vm2349_vm2, %v2318_v13, %v8839_v46  ;;  %v2834_v45 = vld [vmem:[#allocation2 + $0xa0] sm:$0xe]  ;;  %v3212_v28 = vsel %vm8052_vm8, %v3210_v32, %v3211_v18  ;;  %v3217_v46 = vrot.slane %v3215_v44, 4  ;;  %v3218_v31 = vrot.slane %v2895_v12, 5  ;;  %v2837_v24 = vld [vmem:[#allocation2 + $0xb8] sm:$0x1] }
 0x11e   : > { %v2093_v42 = vpop.permute.xlu0 %2092  ;;  %v8884_v6 = vpop.permute.xlu1 %1978  ;;  %7170 = vmatprep.subr.bf16.mxu0 %v7552_v48  ;;  %v8926_v20 = vcombine.low %v3181_v40, %v3184_v8  ;;  %v12216_v29 = vrot.slane %v8818_v5, 6  ;;  %v12217_v32 = vrot.slane %v8816_v35, 10  ;;  %v12218_v54 = vrot.slane %v8831_v59, 6  ;;  %v7621_v35 = vld [vmem:[#allocation2 + $0xb4] sm:$0xf] }
 0x11f   : > { %v2384_v56 = vsel %vm2382_vm3, %v2351_v38, %v2093_v42  ;;  %v7553_v42 = vld [vmem:[%s12015_s6 + $0x20] ss:$0 sps:$4 sm:$0xff]   ;;  %v6750_v5 = vrot.slane %v2834_v45, 9  ;;  %v3032_v59 = vrot.slane %v3030_v36, 4  ;;  %v3033_v8 = vrot.slane %v2835_v17, 5 }
 0x120   : > { %2148 = vrot.lane.b32.xlu0 %v8308_v7, %s7746_s15  ;;  %2108 = vrot.lane.b32.xlu1 %v8835_v3, %s7745_s22  ;;  %v1421_v18 = vsel %vm8361_vm11, %v12217_v32, %v12216_v29  ;;  %v4062_v13 = vsel %vm12112_vm13, %v7553_v42, 0  ;;  %v2836_v38 = vld [vmem:[#allocation2 + $0xb0] sm:$0xe]  ;;  %v2876_v45 = vld [vmem:[#allocation2 + $0x58] sm:$0xf]  ;;  %v3040_v29 = vrot.slane %v2837_v24, 5 }
 0x121   : > { %7171 = vmatpush3.bf16.msra.mxu0 %v7552_v48  ;;  %v3037_v48 = vrot.slane %v7621_v35, 5 }
 0x122   : > { %v2131_v30 = vpop.permute.xlu0 %2130  ;;  %v8913_v51 = vpop.permute.xlu1 %2016  ;;  %7256 = vmatprep.subr.msk.bf16.mxu0 %vm12112_vm13, %v7553_v42 }
 0x123   : > { %12215 = vst [vmem:[#allocation44_spill] sm:$0xff] %v8913_v51  ;;  %7119 = vmatmul.mubr.msk.bf16.gmra.mrb[28].mxu0 %vm905_vm14, %v6603_v41  ;;  %v2417_v19 = vsel %vm2415_vm4, %v2384_v56, %v2131_v30  ;;  %v1424_v30 = vsel %vm8361_vm11, %v8866_v21, %v12218_v54  ;;  %v8946_v41 = vcombine.low %v3209_v50, %v3212_v28  ;;  %v3039_v17 = vrot.slane %v3037_v48, 4  ;;  %v2877_v54 = vld [vmem:[#allocation2 + $0x5c] sm:$0x1] }
 0x124   : > { %3630 = vrot.lane.b32.xlu0 %v8888_v25, %s7744_s19  ;;  %2110 = vrot.lane.b32.xlu1 %v8873_v1, %s7745_s22  ;;  %v3216_v21 = vsel %vm8052_vm8, %v6769_v11, %v3215_v44  ;;  %v3219_v56 = vsel %vm8052_vm8, %v3217_v46, %v3218_v31  ;;  %v3031_v11 = vsel %vm8052_vm8, %v6750_v5, %v3030_v36  ;;  %v3173_v31 = vrot.slane %v2876_v45, 5  ;;  %v2874_v45 = vld [vmem:[#allocation2 + $0x4c] sm:$0x1] }
 0x125   : > { %7173 = vmatpush3.bf16.msra.mxu0 %v4062_v13  ;;  %v8958_v44 = vcombine.low %v3216_v21, %v3219_v56  ;;  %v3034_v46 = vsel %vm8052_vm8, %v3032_v59, %v3033_v8  ;;  %v3041_v59 = vsel %vm8052_vm8, %v3039_v17, %v3040_v29  ;;  %v3176_v24 = vrot.slane %v2877_v54, 5 }
 0x126   : > { %v2171_v63 = vpop.permute.xlu0 %2170  ;;  %v2057_v12 = vpop.permute.xlu1 %2056  ;;  %v8974_v35 = vcombine.low %v3031_v11, %v3034_v46  ;;  %v3169_v54 = vrot.slane %v2874_v45, 5  ;;  %v2830_v45 = vld [vmem:[#allocation2 + $0x80] sm:$0xe] }
 0x127   : > { %v2450_v40 = vsel %vm12140_vm5, %v2417_v19, %v2171_v63  ;;  %v6661_v19 = vcombine.low %v1421_v18, %v1424_v30  ;;  %v6751_v63 = vrot.slane %v2836_v38, 9  ;;  %12219 = vst [vmem:[#allocation45_spill] sm:$0xff] %v8958_v44  ;;  %v2875_v18 = vld [vmem:[#allocation2 + $0x54] sm:$0xe]  ;;  %v3175_v38 = vrot.slane %v3173_v31, 4 }
 0x128   : > { %2188 = vrot.lane.b32.xlu0 %v8398_v33, %s7747_s20  ;;  %7132 = vmatprep.mubr.msk.bf16.mxu1 %vm12113_vm7, %v2450_v40  ;;  %v2873_v40 = vld [vmem:[#allocation2 + $0x48] sm:$0xf]  ;;  %12221 = vst [vmem:[#allocation47_spill] sm:$0xff] %v8974_v35 }
 0x129   : > { %3628 = vrot.lane.b32.xlu1 %v8926_v20, %s7744_s19  ;;  %v2207_v42 = vsel %vm905_vm14, %v6661_v19, %v8546_v0  ;;  %v3038_v13 = vsel %vm8052_vm8, %v6751_v63, %v3037_v48  ;;  %v3166_v56 = vrot.slane %v2873_v40, 5  ;;  %v2872_v19 = vld [vmem:[#allocation2 + $0x44] sm:$0xe]  ;;  %v3177_v46 = vsel %vm8052_vm8, %v3175_v38, %v3176_v24  ;;  %v12257_v0 = vld [vmem:[#allocation35_spill] sm:$0xff] }
 0x12a   : > { %v1981_v50 = vpop.permute.xlu0 %1980  ;;  %v2095_v28 = vpop.permute.xlu1 %2094  ;;  %v2254_v30 = vsel %vm2250_vm15, %v2207_v42, %v8713_v55  ;;  %v6763_v55 = vrot.slane %v2875_v18, 9  ;;  %v8989_v29 = vcombine.low %v3038_v13, %v3041_v59  ;;  %v6762_v42 = vrot.slane %v2872_v19, 9  ;;  %v2833_v13 = vld [vmem:[#allocation2 + $0x98] sm:$0x1] }
 0x12b   : > { %v2287_v36 = vsel %vm2283_vm0, %v2254_v30, %v8884_v6  ;;  %v3168_v18 = vrot.slane %v3166_v56, 4  ;;  %v7622_v30 = vld [vmem:[#allocation2 + $0x94] sm:$0xf] }
 0x12c   : > { %3726 = vrot.lane.b32.xlu0 %v8946_v41, %s7747_s20  ;;  %v2320_v8 = vsel %vm2316_vm1, %v2287_v36, %v8913_v51  ;;  %12222 = vst [vmem:[#allocation48_spill] sm:$0xff] %v8989_v29  ;;  %v3023_v40 = vrot.slane %v7622_v30, 5 }
 0x12d   : > { %2186 = vrot.lane.b32.xlu1 %v8354_v49, %s7747_s20  ;;  %v2353_v6 = vsel %vm2349_vm2, %v2320_v8, %v2057_v12  ;;  %v3174_v12 = vsel %vm8052_vm8, %v6763_v55, %v3173_v31  ;;  %v3170_v38 = vsel %vm8052_vm8, %v3168_v18, %v3169_v54  ;;  %v1260_v18 = vld [vmem:[#allocation2 + $0x128] sm:$0x3] }
 0x12e   : > { %v8968_v32 = vpop.permute.xlu0 %2018  ;;  %v2133_v5 = vpop.permute.xlu1 %2132  ;;  %v2386_v48 = vsel %vm2382_vm3, %v2353_v6, %v2095_v28  ;;  %v6815_v31 = vcombine.low %v3174_v12, %v3177_v46  ;;  %v3025_v6 = vrot.slane %v3023_v40, 4  ;;  %v2831_v46 = vld [vmem:[#allocation2 + $0x88] sm:$0x1] }
 0x12f   : > { %12220 = vst [vmem:[#allocation46_spill] sm:$0xff] %v8968_v32  ;;  %v2419_v63 = vsel %vm2415_vm4, %v2386_v48, %v2133_v5  ;;  %v2832_v5 = vld [vmem:[#allocation2 + $0x90] sm:$0xe]  ;;  %v3026_v48 = vrot.slane %v2833_v13, 5 }
 0x130   : > { %3728 = vrot.lane.b32.xlu0 %v8958_v44, %s7747_s20  ;;  %v6749_v24 = vrot.slane %v2832_v5, 9 }
 0x131   : > { %3672 = vrot.lane.b32.xlu1 %v8974_v35, %s7745_s22 }
 0x132   : > { %v2059_v21 = vpop.permute.xlu0 %2058  ;;  %v2173_v17 = vpop.permute.xlu1 %2172  ;;  %v3024_v5 = vsel %vm8052_vm8, %v6749_v24, %v3023_v40 }
 0x133   : > { %v2452_v11 = vsel %vm12140_vm5, %v2419_v63, %v2173_v17  ;;  %v7623_v63 = vld [vmem:[#allocation2 + $0x84] sm:$0xf] }
 0x134   : > { %2034 = vrot.lane.b32.xlu0 %v8254_v2, %s7743_s16  ;;  %7133 = vmatmul.mubr.msk.bf16.vlgmr.msra.gmra.mrb[0].mxu1 %vm12113_vm7, %v2452_v11  ;;  %v2210_v2 = vsel %vm905_vm14, %v8381_v9, %v8563_v47  ;;  %v3167_v9 = vsel %vm8052_vm8, %v6762_v42, %v3166_v56  ;;  %v3016_v17 = vrot.slane %v7623_v63, 5  ;;  %v7624_v56 = vld [vmem:[#allocation2 + $0x124] sm:$0xf]  ;;  %v2888_v42 = vld [vmem:[#allocation2 + $0x98] sm:$0xf] }
 0x135   : > { %3674 = vrot.lane.b32.xlu1 %v8989_v29, %s7745_s22  ;;  %v2256_v59 = vsel %vm2250_vm15, %v2210_v2, %v8685_v14  ;;  %v1258_v14 = vld [vmem:[#allocation2 + $0x120] sm:$0xc]  ;;  %v1511_v11 = vrot.slane %v7624_v56, 6  ;;  %v6814_v54 = vcombine.low %v3167_v9, %v3170_v38  ;;  %v3201_v9 = vrot.slane %v2888_v42, 5  ;;  %v2887_v63 = vld [vmem:[#allocation2 + $0x94] sm:$0xe] }
 0x136   : > { %v2097_v28 = vpop.permute.xlu0 %2096  ;;  %v9004_v36 = vpop.permute.xlu1 %1982  ;;  %v2289_v8 = vsel %vm2283_vm0, %v2256_v59, %v1981_v50  ;;  %v6634_v13 = vrot.slane %v1258_v14, 10  ;;  %v7625_v56 = vld [vmem:[#allocation2 + $0x134] sm:$0xf]  ;;  %v2885_v42 = vld [vmem:[#allocation2 + $0x88] sm:$0xf] }
 0x137   : > { %v1513_v38 = vrot.slane %v1511_v11, 4 }
 0x138   : > { %2036 = vrot.lane.b32.xlu0 %v8308_v7, %s7743_s16  ;;  %v2322_v7 = vsel %vm2316_vm1, %v2289_v8, %v8968_v32  ;;  %v3018_v8 = vrot.slane %v3016_v17, 4 }
 0x139   : > { %1996 = vrot.lane.b32.xlu1 %v8835_v3, %s7742_s27  ;;  %v2355_v50 = vsel %vm2349_vm2, %v2322_v7, %v2059_v21  ;;  %v3019_v7 = vrot.slane %v2831_v46, 5 }
 0x13a   : > { %v9013_v55 = vpop.permute.xlu0 %2134  ;;  %v9022_v19 = vpop.permute.xlu1 %2020  ;;  %v2388_v12 = vsel %vm2382_vm3, %v2355_v50, %v2097_v28  ;;  %v3027_v28 = vsel %vm8052_vm8, %v3025_v6, %v3026_v48  ;;  %v1514_v50 = vrot.slane %v1260_v18, 6  ;;  %v1261_v6 = vld [vmem:[#allocation2 + $0x130] sm:$0xc]  ;;  %v1263_v48 = vld [vmem:[#allocation2 + $0x138] sm:$0x3]  ;;  %v6767_v18 = vrot.slane %v2887_v63, 9 }
 0x13b   : > { %12223 = vst [vmem:[#allocation49_spill] sm:$0xff] %v9022_v19  ;;  %v2421_v21 = vsel %vm2415_vm4, %v2388_v12, %v9013_v55  ;;  %v1518_v12 = vrot.slane %v7625_v56, 6  ;;  %v9041_v24 = vcombine.low %v3024_v5, %v3027_v28  ;;  %v3020_v46 = vsel %vm8052_vm8, %v3018_v8, %v3019_v7  ;;  %v2897_v5 = vld [vmem:[#allocation2 + $0xc8] sm:$0xf] }
 0x13c   : > { %3546 = vrot.lane.b32.xlu0 %v6815_v31, %s7741_s26  ;;  %v6748_v31 = vrot.slane %v2830_v45, 9  ;;  %v2889_v45 = vld [vmem:[#allocation2 + $0x9c] sm:$0x1]  ;;  %v6635_v28 = vrot.slane %v1261_v6, 10  ;;  %v2213_v8 = vsel %vm905_vm14, %v8483_v61, %v8579_v53  ;;  %v2886_v61 = vld [vmem:[#allocation2 + $0x8c] sm:$0x1] }
 0x13d   : > { %1998 = vrot.lane.b32.xlu1 %v8873_v1, %s7742_s27  ;;  %12224 = vst [vmem:[#allocation50_spill] sm:$0xff] %v9041_v24  ;;  %v2258_v63 = vsel %vm2250_vm15, %v2213_v8, %v8732_v27  ;;  %v3222_v27 = vrot.slane %v2897_v5, 5 }
 0x13e   : > { %v2175_v30 = vpop.permute.xlu0 %2174  ;;  %v2061_v59 = vpop.permute.xlu1 %2060 }
 0x13f   : > { %v2454_v2 = vsel %vm12140_vm5, %v2421_v21, %v2175_v30  ;;  %v3203_v21 = vrot.slane %v3201_v9, 4  ;;  %v1512_v30 = vsel %vm8361_vm11, %v6634_v13, %v1511_v11  ;;  %v2884_v13 = vld [vmem:[#allocation2 + $0x84] sm:$0xe] }
 0x140   : > { %2076 = vrot.lane.b32.xlu0 %v8398_v33, %s7744_s19  ;;  %7136 = vmatprep.mubr.msk.bf16.mxu1 %vm12113_vm7, %v2454_v2  ;;  %v3017_v33 = vsel %vm8052_vm8, %v6748_v31, %v3016_v17  ;;  %v1515_v2 = vsel %vm8361_vm11, %v1513_v38, %v1514_v50  ;;  %v1520_v17 = vrot.slane %v1518_v12, 4  ;;  %v1521_v31 = vrot.slane %v1263_v48, 6 }
 0x141   : > { %3544 = vrot.lane.b32.xlu1 %v6814_v54, %s7741_s26  ;;  %v3204_v54 = vrot.slane %v2889_v45, 5  ;;  %v9062_v11 = vcombine.low %v3017_v33, %v3020_v46  ;;  %v3194_v38 = vrot.slane %v2885_v42, 5  ;;  %v2291_v50 = vsel %vm2283_vm0, %v2258_v63, %v9004_v36  ;;  %v2896_v33 = vld [vmem:[#allocation2 + $0xc4] sm:$0xe]  ;;  %v2898_v36 = vld [vmem:[#allocation2 + $0xcc] sm:$0x1] }
 0x142   : > { %v9039_v40 = vpop.permute.xlu0 %1984  ;;  %v2099_v14 = vpop.permute.xlu1 %2098  ;;  %v9074_v6 = vcombine.low %v1512_v30, %v1515_v2  ;;  %v2324_v48 = vsel %vm2316_vm1, %v2291_v50, %v9022_v19  ;;  %v1519_v46 = vsel %vm8361_vm11, %v6635_v28, %v1518_v12  ;;  %v1522_v42 = vsel %vm8361_vm11, %v1520_v17, %v1521_v31  ;;  %v2899_v50 = vld [vmem:[#allocation2 + $0xd4] sm:$0xe]  ;;  %v1327_v19 = vld [vmem:[#allocation2 + $0x178] sm:$0x7] }
 0x143   : > { %12226 = vst [vmem:[#allocation52_spill] sm:$0xff] %v9062_v11  ;;  %v3205_v56 = vsel %vm8052_vm8, %v3203_v21, %v3204_v54  ;;  %v2357_v8 = vsel %vm2349_vm2, %v2324_v48, %v2061_v59  ;;  %v2900_v21 = vld [vmem:[#allocation2 + $0xd8] sm:$0xf]  ;;  %v3196_v30 = vrot.slane %v3194_v38, 4  ;;  %v3197_v2 = vrot.slane %v2886_v61, 5 }
 0x144   : > { %3590 = vrot.lane.b32.xlu0 %v9041_v24, %s7742_s27  ;;  %12227 = vst [vmem:[#allocation53_spill] sm:$0xff] %v9074_v6  ;;  %v2390_v54 = vsel %vm2382_vm3, %v2357_v8, %v2099_v14  ;;  %v6770_v59 = vrot.slane %v2896_v33, 9  ;;  %v3224_v17 = vrot.slane %v3222_v27, 4  ;;  %v3225_v31 = vrot.slane %v2898_v36, 5  ;;  %v2901_v61 = vld [vmem:[#allocation2 + $0xdc] sm:$0x1] }
 0x145   : > { %2074 = vrot.lane.b32.xlu1 %v8354_v49, %s7744_s19  ;;  %v3202_v49 = vsel %vm8052_vm8, %v6767_v18, %v3201_v9  ;;  %v6766_v18 = vrot.slane %v2884_v13, 9  ;;  %v3229_v13 = vrot.slane %v2900_v21, 5  ;;  %v3198_v48 = vsel %vm8052_vm8, %v3196_v30, %v3197_v2  ;;  %v2838_v8 = vld [vmem:[#allocation2 + $0xc0] sm:$0xe]  ;;  %v7626_v21 = vld [vmem:[#allocation2 + $0xc4] sm:$0xf] }
 0x146   : > { %v9058_v7 = vpop.permute.xlu0 %2022  ;;  %v9066_v45 = vpop.permute.xlu1 %2136  ;;  %v9086_v5 = vcombine.low %v3202_v49, %v3205_v56  ;;  %v9096_v49 = vcombine.low %v1519_v46, %v1522_v42  ;;  %v2216_v33 = vsel %vm905_vm14, %v8476_v62, %v8557_v60  ;;  %v3223_v46 = vsel %vm8052_vm8, %v6770_v59, %v3222_v27 }
 0x147   : > { %12225 = vst [vmem:[#allocation51_spill] sm:$0xff] %v9058_v7  ;;  %v2423_v12 = vsel %vm2415_vm4, %v2390_v54, %v9066_v45  ;;  %v3195_v56 = vsel %vm8052_vm8, %v6766_v18, %v3194_v38  ;;  %v3044_v54 = vrot.slane %v7626_v21, 5  ;;  %v3226_v38 = vsel %vm8052_vm8, %v3224_v17, %v3225_v31  ;;  %v2839_v18 = vld [vmem:[#allocation2 + $0xc8] sm:$0x1] }
 0x148   : > { %2150 = vrot.lane.b32.xlu0 %v8279_v34, %s7746_s15  ;;  %12228 = vst [vmem:[#allocation54_spill] sm:$0xff] %v9096_v49  ;;  %v2260_v42 = vsel %vm2250_vm15, %v2216_v33, %v8695_v10  ;;  %v6771_v30 = vrot.slane %v2899_v50, 9  ;;  %v3231_v2 = vrot.slane %v3229_v13, 4  ;;  %v3232_v62 = vrot.slane %v2901_v61, 5  ;;  %v7627_v50 = vld [vmem:[#allocation2 + $0xd4] sm:$0xf] }
 0x149   : > { %3588 = vrot.lane.b32.xlu1 %v9062_v11, %s7742_s27  ;;  %v6752_v59 = vrot.slane %v2838_v8, 9  ;;  %v3047_v31 = vrot.slane %v2839_v18, 5  ;;  %v3051_v61 = vrot.slane %v7627_v50, 5  ;;  %v2840_v33 = vld [vmem:[#allocation2 + $0xd0] sm:$0xe] }
 0x14a   : > { %v2063_v9 = vpop.permute.xlu0 %2062  ;;  %v2177_v28 = vpop.permute.xlu1 %2176  ;;  %v3230_v21 = vsel %vm8052_vm8, %v6771_v30, %v3229_v13  ;;  %v6753_v13 = vrot.slane %v2840_v33, 9 }
 0x14b   : > { %v2456_v63 = vsel %vm12140_vm5, %v2423_v12, %v2177_v28  ;;  %v2293_v12 = vsel %vm2283_vm0, %v2260_v42, %v9039_v40  ;;  %v9117_v28 = vcombine.low %v3195_v56, %v3198_v48  ;;  %v9128_v40 = vcombine.low %v3223_v46, %v3226_v38  ;;  %v2841_v38 = vld [vmem:[#allocation2 + $0xd8] sm:$0x1] }
 0x14c   : > { %2152 = vrot.lane.b32.xlu0 %v8321_v22, %s7746_s15  ;;  %7137 = vmatmul.mubr.msk.bf16.gmra.mrb[4].mxu1 %vm12113_vm7, %v2456_v63  ;;  %v2326_v27 = vsel %vm2316_vm1, %v2293_v12, %v9058_v7  ;;  %v3046_v48 = vrot.slane %v3044_v54, 4  ;;  %v3045_v30 = vsel %vm8052_vm8, %v6752_v59, %v3044_v54  ;;  %v3054_v12 = vrot.slane %v2841_v38, 5 }
 0x14d   : > { %2112 = vrot.lane.b32.xlu1 %v9074_v6, %s7745_s22  ;;  %v2359_v10 = vsel %vm2349_vm2, %v2326_v27, %v2063_v9  ;;  %v3233_v9 = vsel %vm8052_vm8, %v3231_v2, %v3232_v62  ;;  %v3053_v62 = vrot.slane %v3051_v61, 4  ;;  %v2219_v59 = vsel %vm905_vm14, %v8511_v58, %v8590_v43 }
 0x14e   : > { %v2101_v14 = vpop.permute.xlu0 %2100  ;;  %v1987_v36 = vpop.permute.xlu1 %1986  ;;  %v3048_v2 = vsel %vm8052_vm8, %v3046_v48, %v3047_v31  ;;  %v2262_v48 = vsel %vm2250_vm15, %v2219_v59, %v8745_v16  ;;  %v12236_v59 = vld [vmem:[#allocation28_spill] sm:$0xff] }
 0x14f   : > { %v2392_v56 = vsel %vm2382_vm3, %v2359_v10, %v2101_v14  ;;  %v9143_v14 = vcombine.low %v3230_v21, %v3233_v9  ;;  %v9151_v50 = vcombine.low %v3045_v30, %v3048_v2  ;;  %v3055_v54 = vsel %vm8052_vm8, %v3053_v62, %v3054_v12  ;;  %v9177_v9 = vld [vmem:[#allocation2 + $0x144] sm:$0xf]  ;;  %v1321_v30 = vld [vmem:[#allocation2 + $0x148] sm:$0x7]  ;;  %v9192_v2 = vld [vmem:[#allocation2 + $0x154] sm:$0xf] }
 0x150   : > { %3634 = vrot.lane.b32.xlu0 %v9086_v5, %s7744_s19  ;;  %v2295_v33 = vsel %vm2283_vm0, %v2262_v48, %v1987_v36  ;;  %v12235_v62 = vld [vmem:[#allocation7_spill] sm:$0xff] }
 0x151   : > { %2114 = vrot.lane.b32.xlu1 %v9096_v49, %s7745_s22  ;;  %12231 = vst [vmem:[#allocation57_spill] sm:$0xff] %v9151_v50  ;;  %v2222_v12 = vsel %vm905_vm14, %v12235_v62, %v8571_v26 }
 0x152   : > { %v9119_v63 = vpop.permute.xlu0 %2138  ;;  %v9124_v17 = vpop.permute.xlu1 %2024  ;;  %v2264_v48 = vsel %vm2250_vm15, %v2222_v12, %v12236_v59 }
 0x153   : > { %12229 = vst [vmem:[#allocation55_spill] sm:$0xff] %v9119_v63  ;;  %12230 = vst [vmem:[#allocation56_spill] sm:$0xff] %v9124_v17  ;;  %v2425_v8 = vsel %vm2415_vm4, %v2392_v56, %v9119_v63  ;;  %v3052_v56 = vsel %vm8052_vm8, %v6753_v13, %v3051_v61  ;;  %v2328_v58 = vsel %vm2316_vm1, %v2295_v33, %v9124_v17  ;;  %v1320_v13 = vld [vmem:[#allocation2 + $0x140] sm:$0x8]  ;;  %v1703_v33 = vrot.slane %v9192_v2, 7  ;;  %v12256_v63 = vld [vmem:[#allocation19_spill] sm:$0xff] }
 0x154   : > { %2192 = vrot.lane.b32.xlu0 %v8468_v39, %s7747_s20  ;;  %v9171_v61 = vcombine.low %v3052_v56, %v3055_v54  ;;  %v1699_v54 = vrot.slane %v1321_v30, 7 }
 0x155   : > { %3632 = vrot.lane.b32.xlu1 %v9117_v28, %s7744_s19  ;;  %v1705_v26 = vrot.slane %v1703_v33, 4 }
 0x156   : > { %v2179_v46 = vpop.permute.xlu0 %2178  ;;  %v2065_v18 = vpop.permute.xlu1 %2064  ;;  %12234 = vst [vmem:[#allocation60_spill] sm:$0xff] %v9171_v61 }
 0x157   : > { %v2458_v42 = vsel %vm12140_vm5, %v2425_v8, %v2179_v46  ;;  %v2361_v8 = vsel %vm2349_vm2, %v2328_v58, %v2065_v18 }
 0x158   : > { %3730 = vrot.lane.b32.xlu0 %v9128_v40, %s7747_s20  ;;  %7140 = vmatprep.mubr.msk.bf16.mxu1 %vm12113_vm7, %v2458_v42 }
 0x159   : > { %2190 = vrot.lane.b32.xlu1 %v8368_v23, %s7747_s20 }
 0x15a   : > { %v1989_v27 = vpop.permute.xlu0 %1988  ;;  %v2103_v10 = vpop.permute.xlu1 %2102 }
 0x15b   : > { %v2394_v36 = vsel %vm2382_vm3, %v2361_v8, %v2103_v10  ;;  %v2297_v58 = vsel %vm2283_vm0, %v2264_v48, %v1989_v27  ;;  %v1266_v27 = vld [vmem:[#allocation2 + $0x148] sm:$0x3] }
 0x15c   : > { %3732 = vrot.lane.b32.xlu0 %v9143_v14, %s7747_s20 }
 0x15d   : > { %3676 = vrot.lane.b32.xlu1 %v9151_v50, %s7745_s22 }
 0x15e   : > { %v9164_v31 = vpop.permute.xlu0 %2026  ;;  %v9169_v21 = vpop.permute.xlu1 %2140 }
 0x15f   : > { %12232 = vst [vmem:[#allocation58_spill] sm:$0xff] %v9164_v31  ;;  %12233 = vst [vmem:[#allocation59_spill] sm:$0xff] %v9169_v21  ;;  %v2427_v46 = vsel %vm2415_vm4, %v2394_v36, %v9169_v21  ;;  %v1322_v36 = vld [vmem:[#allocation2 + $0x150] sm:$0x8] }
 0x160   : > { %2038 = vrot.lane.b32.xlu0 %v8279_v34, %s7743_s16  ;;  %v1696_v34 = vrot.slane %v9177_v9, 7  ;;  %v1326_v21 = vld [vmem:[#allocation2 + $0x170] sm:$0x8] }
 0x161   : > { %3678 = vrot.lane.b32.xlu1 %v9171_v61, %s7745_s22 }
 0x162   : > { %v2067_v16 = vpop.permute.xlu0 %2066  ;;  %v2181_v38 = vpop.permute.xlu1 %2180  ;;  %v1698_v56 = vrot.slane %v1696_v34, 4 }
 0x163   : > { %v2460_v42 = vsel %vm12140_vm5, %v2427_v46, %v2181_v38  ;;  %v1323_v46 = vld [vmem:[#allocation2 + $0x158] sm:$0x7]  ;;  %v1264_v38 = vld [vmem:[#allocation2 + $0x140] sm:$0xc] }
 0x164   : > { %2040 = vrot.lane.b32.xlu0 %v8321_v22, %s7743_s16  ;;  %7141 = vmatmul.mubr.msk.bf16.gmra.mrb[8].mxu1 %vm12113_vm7, %v2460_v42  ;;  %v6654_v22 = vrot.slane %v1320_v13, 11  ;;  %v1678_v42 = vrot.slane %v9177_v9, 6  ;;  %v1700_v59 = vsel %vm8039_vm6, %v1698_v56, %v1699_v54  ;;  %v1269_v54 = vld [vmem:[#allocation2 + $0x158] sm:$0x3] }
 0x165   : > { %2000 = vrot.lane.b32.xlu1 %v9074_v6, %s7742_s27  ;;  %v9359_v6 = vld [vmem:[#allocation2 + $0x174] sm:$0xf] }
 0x166   : > { %v2105_v18 = vpop.permute.xlu0 %2104  ;;  %v9197_v10 = vpop.permute.xlu1 %1990  ;;  %v1697_v12 = vsel %vm8039_vm6, %v6654_v22, %v1696_v34  ;;  %v1680_v43 = vrot.slane %v1678_v42, 4  ;;  %v1681_v34 = vrot.slane %v1266_v27, 6  ;;  %v1685_v22 = vrot.slane %v9192_v2, 6 }
 0x168   : > { %3550 = vrot.lane.b32.xlu0 %v8888_v25, %s7741_s26  ;;  %v2330_v25 = vsel %vm2316_vm1, %v2297_v58, %v9164_v31  ;;  %v6655_v58 = vrot.slane %v1322_v36, 11  ;;  %v1706_v31 = vrot.slane %v1323_v46, 7 }
 0x169   : > { %2002 = vrot.lane.b32.xlu1 %v9096_v49, %s7742_s27  ;;  %v2363_v13 = vsel %vm2349_vm2, %v2330_v25, %v2067_v16  ;;  %v2821_v49 = vld [vmem:[#allocation2 + $0x38] sm:$0x1] }
 0x16a   : > { %v9207_v8 = vpop.permute.xlu0 %2142  ;;  %v9213_v30 = vpop.permute.xlu1 %2028  ;;  %v2396_v48 = vsel %vm2382_vm3, %v2363_v13, %v2105_v18  ;;  %v9231_v18 = vcombine.low %v1697_v12, %v1700_v59  ;;  %v1704_v36 = vsel %vm8039_vm6, %v6655_v58, %v1703_v33  ;;  %v1707_v46 = vsel %vm8039_vm6, %v1705_v26, %v1706_v31  ;;  %v2902_v33 = vld [vmem:[#allocation2 + $0xe4] sm:$0xe]  ;;  %v12240_v58 = vld [vmem:[#allocation20_spill] sm:$0xff] }
 0x16b   : > { %12237 = vst [vmem:[#allocation7_spill] sm:$0xff] %v9207_v8  ;;  %12238 = vst [vmem:[#allocation28_spill] sm:$0xff] %v9213_v30  ;;  %v2429_v16 = vsel %vm2415_vm4, %v2396_v48, %v9207_v8  ;;  %v1687_v59 = vrot.slane %v1685_v22, 4  ;;  %v1688_v48 = vrot.slane %v1269_v54, 6  ;;  %v9247_v26 = vcombine.low %v1704_v36, %v1707_v46 }
 0x16c   : > { %2080 = vrot.lane.b32.xlu0 %v8468_v39, %s7744_s19  ;;  %v6652_v39 = vrot.slane %v1264_v38, 10  ;;  %v2903_v38 = vld [vmem:[#allocation2 + $0xe8] sm:$0xf]  ;;  %v2984_v1 = vrot.slane %v2821_v49, 5 }
 0x16d   : > { %3548 = vrot.lane.b32.xlu1 %v8926_v20, %s7741_s26  ;;  %v1267_v20 = vld [vmem:[#allocation2 + $0x150] sm:$0xc]  ;;  %v3236_v31 = vrot.slane %v2903_v38, 5  ;;  %v1689_v36 = vsel %vm8361_vm11, %v1687_v59, %v1688_v48  ;;  %v2905_v59 = vld [vmem:[#allocation2 + $0xf4] sm:$0xe] }
 0x16e   : > { %v2183_v25 = vpop.permute.xlu0 %2182  ;;  %v2069_v56 = vpop.permute.xlu1 %2068  ;;  %v1679_v27 = vsel %vm8361_vm11, %v6652_v39, %v1678_v42  ;;  %v6653_v12 = vrot.slane %v1267_v20, 10  ;;  %v2906_v39 = vld [vmem:[#allocation2 + $0xf8] sm:$0xf]  ;;  %v2907_v48 = vld [vmem:[#allocation2 + $0xfc] sm:$0x1] }
 0x16f   : > { %v2462_v24 = vsel %vm12140_vm5, %v2429_v16, %v2183_v25  ;;  %v12241_v25 = vld [vmem:[#allocation10_spill] sm:$0xff] }
 0x170   : > { %3594 = vrot.lane.b32.xlu0 %v8989_v29, %s7742_s27  ;;  %7144 = vmatprep.mubr.msk.bf16.mxu1 %vm12113_vm7, %v2462_v24  ;;  %v1682_v24 = vsel %vm8361_vm11, %v1680_v43, %v1681_v34  ;;  %v2225_v29 = vsel %vm905_vm14, %v12241_v25, %v12240_v58  ;;  %v12242_v34 = vld [vmem:[#allocation33_spill] sm:$0xff]  ;;  %v1686_v54 = vsel %vm8361_vm11, %v6653_v12, %v1685_v22  ;;  %v3243_v58 = vrot.slane %v2906_v39, 5  ;;  %v2842_v39 = vld [vmem:[#allocation2 + $0xe0] sm:$0xe] }
 0x171   : > { %2078 = vrot.lane.b32.xlu1 %v8368_v23, %s7744_s19  ;;  %v2904_v23 = vld [vmem:[#allocation2 + $0xec] sm:$0x1]  ;;  %v9254_v43 = vcombine.low %v1679_v27, %v1682_v24  ;;  %v2266_v20 = vsel %vm2250_vm15, %v2225_v29, %v12242_v34  ;;  %v6772_v27 = vrot.slane %v2902_v33, 9  ;;  %v3238_v24 = vrot.slane %v3236_v31, 4  ;;  %v1357_v34 = vld [vmem:[#allocation2 + $0x158] sm:$0xf] }
 0x172   : > { %v9239_v13 = vpop.permute.xlu0 %1992  ;;  %v2107_v16 = vpop.permute.xlu1 %2106  ;;  %v2299_v46 = vsel %vm2283_vm0, %v2266_v20, %v9197_v10  ;;  %v3239_v25 = vrot.slane %v2904_v23, 5  ;;  %v9275_v12 = vcombine.low %v1686_v54, %v1689_v36  ;;  %v7628_v20 = vld [vmem:[#allocation2 + $0xe4] sm:$0xf] }
 0x173   : > { %v2332_v29 = vsel %vm2316_vm1, %v2299_v46, %v9213_v30  ;;  %v3058_v23 = vrot.slane %v7628_v20, 5  ;;  %v3237_v54 = vsel %vm8052_vm8, %v6772_v27, %v3236_v31  ;;  %v3245_v20 = vrot.slane %v3243_v58, 4 }
 0x174   : > { %2154 = vrot.lane.b32.xlu0 %v9231_v18, %s7746_s15  ;;  %v2365_v22 = vsel %vm2349_vm2, %v2332_v29, %v2069_v56  ;;  %v9285_v56 = vcombine.low %v9192_v2, %v1357_v34  ;;  %v3240_v36 = vsel %vm8052_vm8, %v3238_v24, %v3239_v25  ;;  %v2843_v29 = vld [vmem:[#allocation2 + $0xe8] sm:$0x1]  ;;  %v6754_v31 = vrot.slane %v2842_v39, 9  ;;  %v2844_v25 = vld [vmem:[#allocation2 + $0xf0] sm:$0xe] }
 0x175   : > { %3592 = vrot.lane.b32.xlu1 %v8974_v35, %s7742_s27  ;;  %v2398_v33 = vsel %vm2382_vm3, %v2365_v22, %v2107_v16  ;;  %v6773_v22 = vrot.slane %v2905_v59, 9  ;;  %v1356_v34 = vld [vmem:[#allocation2 + $0x148] sm:$0xf]  ;;  %v3061_v27 = vrot.slane %v2843_v29, 5  ;;  %v3060_v24 = vrot.slane %v3058_v23, 4 }
 0x176   : > { %v9256_v42 = vpop.permute.xlu0 %1994  ;;  %v9266_v38 = vpop.permute.xlu1 %2144  ;;  %v7629_v59 = vld [vmem:[#allocation2 + $0xf4] sm:$0xf]  ;;  %v9310_v11 = vcombine.low %v9177_v9, %v1356_v34  ;;  %v6755_v29 = vrot.slane %v2844_v25, 9 }
 0x177   : > { %12243 = vst [vmem:[#allocation10_spill] sm:$0xff] %v9266_v38  ;;  %v2431_v46 = vsel %vm2415_vm4, %v2398_v33, %v9266_v38  ;;  %v3246_v33 = vrot.slane %v2907_v48, 5  ;;  %v3065_v48 = vrot.slane %v7629_v59, 5 }
 0x178   : > { %2156 = vrot.lane.b32.xlu0 %v9247_v26, %s7746_s15 }
 0x179   : > { %2116 = vrot.lane.b32.xlu1 %v9254_v43, %s7745_s22 }
 0x17a   : > { %v9277_v10 = vpop.permute.xlu0 %3490  ;;  %v2185_v35 = vpop.permute.xlu1 %2184 }
 0x17b   : > { %12244 = vst [vmem:[#allocation33_spill] sm:$0xff] %v9277_v10  ;;  %v2464_v16 = vsel %vm12140_vm5, %v2431_v46, %v2185_v35  ;;  %v9301_v35 = vcombine.low %v3237_v54, %v3240_v36  ;;  %v3244_v46 = vsel %vm8052_vm8, %v6773_v22, %v3243_v58  ;;  %v2845_v54 = vld [vmem:[#allocation2 + $0xf8] sm:$0x1]  ;;  %v3059_v58 = vsel %vm8052_vm8, %v6754_v31, %v3058_v23 }
 0x17c   : > { %3638 = vrot.lane.b32.xlu0 %v8958_v44, %s7744_s19  ;;  %7145 = vmatmul.mubr.msk.bf16.gmra.mrb[12].mxu1 %vm12113_vm7, %v2464_v16  ;;  %v3247_v16 = vsel %vm8052_vm8, %v3245_v20, %v3246_v33  ;;  %v3062_v22 = vsel %vm8052_vm8, %v3060_v24, %v3061_v27  ;;  %v3067_v20 = vrot.slane %v3065_v48, 4  ;;  %v3068_v9 = vrot.slane %v2845_v54, 5  ;;  %v1272_v44 = vld [vmem:[#allocation2 + $0x168] sm:$0x3] }
 0x17d   : > { %2118 = vrot.lane.b32.xlu1 %v9275_v12, %s7745_s22  ;;  %12247 = vst [vmem:[#allocation63_spill] sm:$0xff] %v9301_v35  ;;  %v9318_v59 = vcombine.low %v3244_v46, %v3247_v16  ;;  %v9330_v60 = vcombine.low %v3059_v58, %v3062_v22  ;;  %v3066_v23 = vsel %vm8052_vm8, %v6755_v29, %v3065_v48  ;;  %v9348_v46 = vld [vmem:[#allocation2 + $0x164] sm:$0xf]  ;;  %v7631_v48 = vld [vmem:[#allocation2 + $0x34] sm:$0xf] }
 0x17e   : > { %v9295_v2 = vpop.permute.xlu0 %2032  ;;  %v9297_v30 = vpop.permute.xlu1 %3488  ;;  %v3069_v31 = vsel %vm8052_vm8, %v3067_v20, %v3068_v9  ;;  %v7630_v16 = vld [vmem:[#allocation2 + $0x24] sm:$0xf]  ;;  %v2981_v29 = vrot.slane %v7631_v48, 5  ;;  %v2818_v22 = vld [vmem:[#allocation2 + $0x20] sm:$0xe] }
 0x17f   : > { %12245 = vst [vmem:[#allocation61_spill] sm:$0xff] %v9295_v2  ;;  %12246 = vst [vmem:[#allocation62_spill] sm:$0xff] %v9297_v30  ;;  %v9344_v25 = vcombine.low %v3066_v23, %v3069_v31  ;;  %v2974_v54 = vrot.slane %v7630_v16, 5  ;;  %v2819_v20 = vld [vmem:[#allocation2 + $0x28] sm:$0x1]  ;;  %v1734_v31 = vrot.slane %v9348_v46, 7 }
 0x180   : > { %2196 = vrot.lane.b32.xlu0 %v9285_v56, %s7747_s20  ;;  %12249 = vst [vmem:[#allocation65_spill] sm:$0xff] %v9318_v59  ;;  %12250 = vst [vmem:[#allocation66_spill] sm:$0xff] %v9330_v60  ;;  %v2820_v9 = vld [vmem:[#allocation2 + $0x30] sm:$0xe]  ;;  %v1325_v16 = vld [vmem:[#allocation2 + $0x168] sm:$0x7] }
 0x181   : > { %3636 = vrot.lane.b32.xlu1 %v8946_v41, %s7744_s19  ;;  %12251 = vst [vmem:[#allocation67_spill] sm:$0xff] %v9344_v25  ;;  %v6742_v48 = vrot.slane %v2818_v22, 9  ;;  %v2976_v38 = vrot.slane %v2974_v54, 4  ;;  %v2977_v17 = vrot.slane %v2819_v20, 5  ;;  %v6743_v7 = vrot.slane %v2820_v9, 9  ;;  %v12252_v22 = vld [vmem:[#allocation16_spill] sm:$0xff] }
 0x182   : > { %v9312_v39 = vpop.permute.xlu0 %3542  ;;  %v9314_v36 = vpop.permute.xlu1 %2030  ;;  %v2983_v53 = vrot.slane %v2981_v29, 4  ;;  %v1737_v3 = vrot.slane %v1325_v16, 7  ;;  %v12254_v9 = vld [vmem:[#allocation30_spill] sm:$0xff] }
 0x183   : > { %12248 = vst [vmem:[#allocation64_spill] sm:$0xff] %v9314_v36  ;;  %v2978_v16 = vsel %vm8052_vm8, %v2976_v38, %v2977_v17 }
 0x184   : > { %3734 = vrot.lane.b32.xlu0 %v9301_v35, %s7747_s20  ;;  %v12253_v35 = vld [vmem:[#allocation14_spill] sm:$0xff] }
 0x185   : > { %2194 = vrot.lane.b32.xlu1 %v9310_v11, %s7747_s20  ;;  %v2228_v20 = vsel %vm905_vm14, %v12253_v35, %v12252_v22  ;;  %v1270_v22 = vld [vmem:[#allocation2 + $0x160] sm:$0xc] }
 0x186   : > { %v9326_v33 = vpop.permute.xlu0 %2072  ;;  %v9328_v34 = vpop.permute.xlu1 %3540  ;;  %v2268_v49 = vsel %vm2250_vm15, %v2228_v20, %v12254_v9  ;;  %v2982_v9 = vsel %vm8052_vm8, %v6743_v7, %v2981_v29  ;;  %v1719_v29 = vrot.slane %v1272_v44, 6 }
 0x188   : > { %3736 = vrot.lane.b32.xlu0 %v9318_v59, %s7747_s20  ;;  %v1741_v59 = vrot.slane %v9359_v6, 7 }
 0x189   : > { %3680 = vrot.lane.b32.xlu1 %v9330_v60, %s7745_s22 }
 0x18a   : > { %v9340_v27 = vpop.permute.xlu0 %3586  ;;  %v9342_v24 = vpop.permute.xlu1 %2070 }
 0x18c   : > { %2042 = vrot.lane.b32.xlu0 %v9231_v18, %s7743_s16  ;;  %v1324_v18 = vld [vmem:[#allocation2 + $0x160] sm:$0x8] }
 0x18d   : > { %3682 = vrot.lane.b32.xlu1 %v9344_v25, %s7745_s22  ;;  %v6658_v37 = vrot.slane %v1324_v18, 11  ;;  %v12255_v18 = vld [vmem:[#allocation22_spill] sm:$0xff] }
 0x18e   : > { %v9352_v58 = vpop.permute.xlu0 %2146  ;;  %v9354_v23 = vpop.permute.xlu1 %3584  ;;  %v2231_v32 = vsel %vm905_vm14, %v12256_v63, %v12255_v18  ;;  %v2985_v63 = vsel %vm8052_vm8, %v2983_v53, %v2984_v1  ;;  %v1744_v18 = vrot.slane %v1327_v19, 7  ;;  %v2301_v53 = vsel %vm2283_vm0, %v2268_v49, %v9239_v13  ;;  %v1275_v13 = vld [vmem:[#allocation2 + $0x178] sm:$0x3] }
 0x18f   : > { %v2270_v20 = vsel %vm2250_vm15, %v2231_v32, %v12257_v0  ;;  %v6656_v32 = vrot.slane %v1270_v22, 10  ;;  %v6795_v19 = vcombine.low %v2982_v9, %v2985_v63 }
 0x190   : > { %2044 = vrot.lane.b32.xlu0 %v9247_v26, %s7743_s16  ;;  %v1736_v26 = vrot.slane %v1734_v31, 4  ;;  %v2303_v0 = vsel %vm2283_vm0, %v2270_v20, %v9256_v42  ;;  %v2334_v42 = vsel %vm2316_vm1, %v2301_v53, %v9314_v36  ;;  %s11471_s16 = sld [smem:[#allocation3 + $0x4]] }
 0x191   : > { %2004 = vrot.lane.b32.xlu1 %v9254_v43, %s7742_s27  ;;  %v1716_v43 = vrot.slane %v9348_v46, 6  ;;  %v2336_v1 = vsel %vm2316_vm1, %v2303_v0, %v9295_v2 }
 0x192   : > { %v9363_v8 = vpop.permute.xlu0 %2148  ;;  %v2109_v47 = vpop.permute.xlu1 %2108  ;;  %v1738_v38 = vsel %vm8039_vm6, %v1736_v26, %v1737_v3  ;;  %v2369_v44 = vsel %vm2349_vm2, %v2336_v1, %v9326_v33  ;;  %v2367_v26 = vsel %vm2349_vm2, %v2334_v42, %v9342_v24  ;;  %v1280_v1 = vld [vmem:[#allocation2 + $0x14] sm:$0xf] }
 0x193   : > { %v1718_v7 = vrot.slane %v1716_v43, 4  ;;  %v2400_v33 = vsel %vm2382_vm3, %v2367_v26, %v2109_v47  ;;  %v1717_v20 = vsel %vm8361_vm11, %v6656_v32, %v1716_v43 }
 0x194   : > { %3554 = vrot.lane.b32.xlu0 %v9086_v5, %s7741_s26  ;;  %v2975_v5 = vsel %vm8052_vm8, %v6742_v48, %v2974_v54  ;;  %v1735_v54 = vsel %vm8039_vm6, %v6658_v37, %v1734_v31  ;;  %v1743_v48 = vrot.slane %v1741_v59, 4  ;;  %v1273_v31 = vld [vmem:[#allocation2 + $0x170] sm:$0xc]  ;;  %v2433_v0 = vsel %vm2415_vm4, %v2400_v33, %v9352_v58 }
 0x195   : > { %2006 = vrot.lane.b32.xlu1 %v9275_v12, %s7742_s27  ;;  %v6659_v12 = vrot.slane %v1326_v21, 11  ;;  %v6794_v37 = vcombine.low %v2975_v5, %v2978_v16  ;;  %v1723_v21 = vrot.slane %v9359_v6, 6  ;;  %v9419_v16 = vld [vmem:[#allocation2 + $0x4] sm:$0xf]  ;;  %v1720_v24 = vsel %vm8361_vm11, %v1718_v7, %v1719_v29  ;;  %v1278_v29 = vld [vmem:[#allocation2 + $0x8] sm:$0x7] }
 0x196   : > { %v9383_v35 = vpop.permute.xlu0 %3630  ;;  %v2111_v17 = vpop.permute.xlu1 %2110  ;;  %v1745_v5 = vsel %vm8039_vm6, %v1743_v48, %v1744_v18  ;;  %v6657_v63 = vrot.slane %v1273_v31, 10  ;;  %v1726_v18 = vrot.slane %v1275_v13, 6  ;;  %v6714_v53 = vcombine.low %v1717_v20, %v1720_v24  ;;  %v7632_v24 = vld [vmem:[#allocation2 + $0x104] sm:$0xf] }
 0x197   : > { %v2402_v22 = vsel %vm2382_vm3, %v2369_v44, %v2111_v17  ;;  %v3760_v9 = vsel %vm905_vm14, %v6794_v37, %v9297_v30 }
 0x198   : > { %2084 = vrot.lane.b32.xlu0 %v9285_v56, %s7744_s19  ;;  %v6716_v56 = vcombine.low %v1735_v54, %v1738_v38  ;;  %v1725_v54 = vrot.slane %v1723_v21, 4  ;;  %v3793_v17 = vsel %vm2250_vm15, %v3760_v9, %v9328_v34  ;;  %v2435_v47 = vsel %vm2415_vm4, %v2402_v22, %v9363_v8  ;;  %v1276_v34 = vld [vmem:[#allocation2] sm:$0x8] }
 0x199   : > { %3552 = vrot.lane.b32.xlu1 %v9117_v28, %s7741_s26  ;;  %v1742_v28 = vsel %vm8039_vm6, %v6659_v12, %v1741_v59  ;;  %v4446_v38 = vrot.slane %v9419_v16, 7  ;;  %v3763_v12 = vsel %vm905_vm14, %v6795_v19, %v9277_v10  ;;  %v3825_v48 = vsel %vm2283_vm0, %v3793_v17, %v9354_v23  ;;  %v2846_v17 = vld [vmem:[#allocation2 + $0x100] sm:$0xe]  ;;  %v4399_v10 = vld [vmem:[#allocation2 + $0x9c] sm:$0x3] }
 0x19a   : > { %v2189_v3 = vpop.permute.xlu0 %2188  ;;  %v6717_v43 = vcombine.low %v1742_v28, %v1745_v5  ;;  %v1724_v23 = vsel %vm8361_vm11, %v6657_v63, %v1723_v21  ;;  %v3856_v19 = vsel %vm2316_vm1, %v3825_v48, %v8803_v4  ;;  %v1727_v42 = vsel %vm8361_vm11, %v1725_v54, %v1726_v18  ;;  %v1359_v21 = vld [vmem:[#allocation2 + $0x178] sm:$0xf]  ;;  %v1279_v28 = vld [vmem:[#allocation2 + $0x10] sm:$0x8] }
 0x19b   : > { %v3629_v49 = vpop.permute.xlu1 %3628  ;;  %v2468_v32 = vsel %vm12140_vm5, %v2435_v47, %v2189_v3  ;;  %v3795_v3 = vsel %vm2250_vm15, %v3763_v12, %v9312_v39  ;;  %v6868_v44 = vrot.slane %v1276_v34, 11  ;;  %v4448_v26 = vrot.slane %v4446_v38, 4  ;;  %v2847_v47 = vld [vmem:[#allocation2 + $0x108] sm:$0x1] }
 0x19c   : > { %3598 = vrot.lane.b32.xlu0 %v9171_v61, %s7742_s27  ;;  %v3873_v31 = vsel %vm2349_vm2, %v3856_v19, %v3629_v49  ;;  %v4449_v39 = vrot.slane %v1278_v29, 7  ;;  %v4453_v5 = vrot.slane %v1280_v1, 7  ;;  %v6715_v33 = vcombine.low %v1724_v23, %v1727_v42  ;;  %v2912_v49 = vld [vmem:[#allocation2 + $0x118] sm:$0xf]  ;;  %v2913_v29 = vld [vmem:[#allocation2 + $0x11c] sm:$0x1] }
 0x19d   : > { %2082 = vrot.lane.b32.xlu1 %v9310_v11, %s7744_s19  ;;  %v3072_v9 = vrot.slane %v7632_v24, 5  ;;  %v6719_v18 = vcombine.low %v9359_v6, %v1359_v21  ;;  %v4447_v12 = vsel %vm8039_vm6, %v6868_v44, %v4446_v38  ;;  %v3075_v38 = vrot.slane %v2847_v47, 5  ;;  %v1358_v1 = vld [vmem:[#allocation2 + $0x168] sm:$0xf]  ;;  %v7633_v19 = vld [vmem:[#allocation2 + $0x114] sm:$0xf] }
 0x19e   : > { %v3727_v59 = vpop.permute.xlu0 %3726  ;;  %v4450_v48 = vsel %vm8039_vm6, %v4448_v26, %v4449_v39  ;;  %v3079_v42 = vrot.slane %v7633_v19, 5  ;;  %v3260_v39 = vrot.slane %v2913_v29, 5  ;;  %v4382_v29 = vld [vmem:[#allocation2 + $0x18] sm:$0xf] }
 0x19f   : > { %v2187_v11 = vpop.permute.xlu1 %2186 }
 0x1a0   : > { %2158 = vrot.lane.b32.xlu0 %v6716_v56, %s7746_s15  ;;  %v2466_v7 = vsel %vm12140_vm5, %v2433_v0, %v2187_v11  ;;  %v3827_v56 = vsel %vm2283_vm0, %v3795_v3, %v9340_v27  ;;  %v1281_v27 = vld [vmem:[#allocation2 + $0x18] sm:$0x7]  ;;  %v4455_v11 = vrot.slane %v4453_v5, 4  ;;  %v3074_v3 = vrot.slane %v3072_v9, 4 }
 0x1a1   : > { %3596 = vrot.lane.b32.xlu1 %v9151_v50, %s7742_s27  ;;  %7148 = vmatprep.mubr.msk.bf16.mxu1 %vm12113_vm7, %v2466_v7  ;;  %v3857_v63 = vsel %vm2316_vm1, %v3827_v56, %v8913_v51  ;;  %v4456_v0 = vrot.slane %v1281_v27, 7  ;;  %v2911_v7 = vld [vmem:[#allocation2 + $0x114] sm:$0xe]  ;;  %v3081_v47 = vrot.slane %v3079_v42, 4  ;;  %v12302_v51 = vld [vmem:[#allocation39_spill] sm:$0xff] }
 0x1a2   : > { %v3729_v37 = vpop.permute.xlu0 %3728  ;;  %7149 = vmatmul.mubr.msk.bf16.gmra.mrb[16].mxu1 %vm12113_vm7, %v2468_v32  ;;  %v3257_v32 = vrot.slane %v2912_v49, 5  ;;  %v3076_v49 = vsel %vm8052_vm8, %v3074_v3, %v3075_v38 }
 0x1a3   : > { %v3673_v13 = vpop.permute.xlu1 %3672  ;;  %v4457_v21 = vsel %vm8039_vm6, %v4455_v11, %v4456_v0 }
 0x1a4   : > { %2160 = vrot.lane.b32.xlu0 %v6717_v43, %s7746_s15  ;;  %v3905_v22 = vsel %vm2382_vm3, %v3873_v31, %v3673_v13  ;;  %v2909_v31 = vld [vmem:[#allocation2 + $0x108] sm:$0xf]  ;;  %v2848_v13 = vld [vmem:[#allocation2 + $0x110] sm:$0xe]  ;;  %v3259_v26 = vrot.slane %v3257_v32, 4 }
 0x1a5   : > { %v3936_v16 = vsel %vm2415_vm4, %v3905_v22, %v9013_v55  ;;  %2120 = vrot.lane.b32.xlu1 %v6714_v53, %s7745_s22  ;;  %v3875_v55 = vsel %vm2349_vm2, %v3857_v63, %v9383_v35  ;;  %v6756_v53 = vrot.slane %v2846_v17, 9  ;;  %v2849_v22 = vld [vmem:[#allocation2 + $0x118] sm:$0x1]  ;;  %v3250_v27 = vrot.slane %v2909_v31, 5  ;;  %v4379_v17 = vld [vmem:[#allocation2 + $0x8] sm:$0xf] }
 0x1a6   : > { %v9464_v20 = vpop.permute.xlu0 %2034  ;;  %v3955_v54 = vsel %vm12140_vm5, %v3936_v16, %v3727_v59  ;;  %v6869_v59 = vrot.slane %v1279_v28, 11  ;;  %v6718_v28 = vcombine.low %v9348_v46, %v1358_v1  ;;  %v6757_v24 = vrot.slane %v2848_v13, 9 }
 0x1a7   : > { %12258 = vst [vmem:[#allocation14_spill] sm:$0xff] %v9464_v20  ;;  %v3675_v43 = vpop.permute.xlu1 %3674  ;;  %7174 = vmatprep.mubr.msk.bf16.mxu0 %vm12113_vm7, %v3955_v54  ;;  %v3082_v46 = vrot.slane %v2849_v22, 5  ;;  %v4494_v11 = vrot.slane %v4379_v17, 6  ;;  %v4501_v31 = vrot.slane %v4382_v29, 6  ;;  %v2822_v22 = vld [vmem:[#allocation2 + $0x40] sm:$0xe] }
 0x1a8   : > { %3642 = vrot.lane.b32.xlu0 %v9143_v14, %s7744_s19  ;;  %v3907_v6 = vsel %vm2382_vm3, %v3875_v55, %v3675_v43  ;;  %v4454_v56 = vsel %vm8039_vm6, %v6869_v59, %v4453_v5  ;;  %v3073_v5 = vsel %vm8052_vm8, %v6756_v53, %v3072_v9  ;;  %v3261_v43 = vsel %vm8052_vm8, %v3259_v26, %v3260_v39  ;;  %v4381_v26 = vld [vmem:[#allocation2 + $0x14] sm:$0xc]  ;;  %v4383_v39 = vld [vmem:[#allocation2 + $0x1c] sm:$0x3] }
 0x1a9   : > { %v3937_v35 = vsel %vm2415_vm4, %v3907_v6, %v9066_v45  ;;  %2122 = vrot.lane.b32.xlu1 %v6715_v33, %s7745_s22  ;;  %v6916_v45 = vcombine.low %v4447_v12, %v4450_v48  ;;  %v2908_v33 = vld [vmem:[#allocation2 + $0x104] sm:$0xe]  ;;  %v6917_v54 = vcombine.low %v4454_v56, %v4457_v21  ;;  %v3252_v48 = vrot.slane %v3250_v27, 4  ;;  %v7557_v29 = vld [vmem:[#allocation2 + $0x70] sm:$0xff]  }
 0x1aa   : > { %v9483_v34 = vpop.permute.xlu0 %2036  ;;  %v3957_v23 = vsel %vm12140_vm5, %v3937_v35, %v3729_v37  ;;  %v6775_v37 = vrot.slane %v2911_v7, 9  ;;  %v6774_v12 = vrot.slane %v2908_v33, 9  ;;  %v4378_v6 = vld [vmem:[#allocation2 + $0x4] sm:$0xc]  ;;  %v9513_v0 = vcombine.low %v3073_v5, %v3076_v49 }
 0x1ab   : > { %12259 = vst [vmem:[#allocation30_spill] sm:$0xff] %v9483_v34  ;;  %v9486_v44 = vpop.permute.xlu1 %1996  ;;  %7175 = vmatmul.mubr.msk.bf16.vlgmr.msra.gmra.mrb[32].mxu0 %vm12113_vm7, %v3957_v23  ;;  %v3080_v53 = vsel %vm8052_vm8, %v6757_v24, %v3079_v42  ;;  %v3083_v38 = vsel %vm8052_vm8, %v3081_v47, %v3082_v46  ;;  %v6870_v3 = vrot.slane %v4378_v6, 10  ;;  %v7634_v42 = vld [vmem:[#allocation2 + $0x44] sm:$0xf]  ;;  %v4504_v17 = vrot.slane %v4383_v39, 6 }
 0x1ac   : > { %2200 = vrot.lane.b32.xlu0 %v6719_v18, %s7747_s20  ;;  %v2910_v18 = vld [vmem:[#allocation2 + $0x10c] sm:$0x1]  ;;  %v3258_v55 = vsel %vm8052_vm8, %v6775_v37, %v3257_v32  ;;  %12260 = vst [vmem:[#allocation19_spill] sm:$0xff] %v9513_v0  ;;  %v3251_v1 = vsel %vm8052_vm8, %v6774_v12, %v3250_v27  ;;  %v9532_v13 = vcombine.low %v3080_v53, %v3083_v38  ;;  %v2988_v21 = vrot.slane %v7634_v42, 5  ;;  %v7556_v49 = vld [vmem:[#allocation2 + $0x60] sm:$0xff]   ;;  %v12265_v42 = vld [vmem:[#allocation29_spill] sm:$0xff] }
 0x1ad   : > { %3640 = vrot.lane.b32.xlu1 %v9128_v40, %s7744_s19  ;;  %v3253_v59 = vrot.slane %v2910_v18, 5  ;;  %v9518_v7 = vcombine.low %v3258_v55, %v3261_v43  ;;  %v4380_v32 = vld [vmem:[#allocation2 + $0xc] sm:$0x3]  ;;  %v4495_v5 = vsel %vm8361_vm11, %v6870_v3, %v4494_v11  ;;  %v4503_v18 = vrot.slane %v4501_v31, 4  ;;  %v2824_v12 = vld [vmem:[#allocation2 + $0x50] sm:$0xe] }
 0x1ae   : > { %v9497_v16 = vpop.permute.xlu0 %3546  ;;  %v4497_v56 = vrot.slane %v4380_v32, 6  ;;  %12261 = vst [vmem:[#allocation35_spill] sm:$0xff] %v9532_v13  ;;  %v6744_v47 = vrot.slane %v2822_v22, 9  ;;  %v2990_v46 = vrot.slane %v2988_v21, 4  ;;  %v2825_v6 = vld [vmem:[#allocation2 + $0x58] sm:$0x1] }
 0x1af   : > { %v9503_v63 = vpop.permute.xlu1 %1998  ;;  %v3254_v19 = vsel %vm8052_vm8, %v3252_v48, %v3253_v59  ;;  %v7635_v48 = vld [vmem:[#allocation2 + $0x54] sm:$0xf]  ;;  %v4505_v38 = vsel %vm8361_vm11, %v4503_v18, %v4504_v17  ;;  %v7636_v39 = vld [vmem:[#allocation2 + $0x68] sm:$0xf] }
 0x1b0   : > { %4820 = vrot.lane.b32.xlu0 %v6916_v45, %s7740_s25  ;;  %v4496_v45 = vrot.slane %v4494_v11, 4  ;;  %v9540_v33 = vcombine.low %v3251_v1, %v3254_v19  ;;  %v2995_v59 = vrot.slane %v7635_v48, 5  ;;  %v2989_v1 = vsel %vm8052_vm8, %v6744_v47, %v2988_v21  ;;  %v12269_v48 = vld [vmem:[#allocation31_spill] sm:$0xff] }
 0x1b1   : > { %2198 = vrot.lane.b32.xlu1 %v6718_v28, %s7747_s20  ;;  %v2823_v28 = vld [vmem:[#allocation2 + $0x48] sm:$0x1]  ;;  %v6745_v19 = vrot.slane %v2824_v12, 9  ;;  %v4536_v22 = vrot.slane %v7636_v39, 6  ;;  %v2850_v39 = vld [vmem:[#allocation2 + $0x120] sm:$0xe] }
 0x1b2   : > { %v9511_v9 = vpop.permute.xlu0 %2076  ;;  %v4498_v24 = vsel %vm8361_vm11, %v4496_v45, %v4497_v56  ;;  %v2991_v55 = vrot.slane %v2823_v28, 5  ;;  %v12264_v56 = vld [vmem:[#allocation24_spill] sm:$0xff]  ;;  %v2998_v28 = vrot.slane %v2825_v6, 5 }
 0x1b3   : > { %v9515_v35 = vpop.permute.xlu1 %3544  ;;  %v6918_v11 = vcombine.low %v4495_v5, %v4498_v24  ;;  %v4392_v5 = vld [vmem:[#allocation2 + $0x64] sm:$0xc]  ;;  %v12267_v24 = vld [vmem:[#allocation25_spill] sm:$0xff] }
 0x1b4   : > { %4822 = vrot.lane.b32.xlu0 %v6917_v54, %s7740_s25  ;;  %v6871_v54 = vrot.slane %v4381_v26, 10  ;;  %v2992_v3 = vsel %vm8052_vm8, %v2990_v46, %v2991_v55  ;;  %v2237_v26 = vsel %vm905_vm14, %v12265_v42, %v12264_v56  ;;  %v4393_v46 = vld [vmem:[#allocation2 + $0x6c] sm:$0x3]  ;;  %v7637_v55 = vld [vmem:[#allocation2 + $0x124] sm:$0xf] }
 0x1b5   : > { %3684 = vrot.lane.b32.xlu1 %v9513_v0, %s7745_s22  ;;  %v3272_v12 = vrot.slane %v7637_v55, 5  ;;  %v6796_v42 = vcombine.low %v2989_v1, %v2992_v3  ;;  %v4538_v1 = vrot.slane %v4536_v22, 4  ;;  %v4539_v3 = vrot.slane %v4393_v46, 6  ;;  %v4395_v46 = vld [vmem:[#allocation2 + $0x7c] sm:$0x3] }
 0x1b6   : > { %v9526_v23 = vpop.permute.xlu0 %3590  ;;  %v4502_v53 = vsel %vm8361_vm11, %v6871_v54, %v4501_v31  ;;  %v2997_v31 = vrot.slane %v2995_v59, 4  ;;  %v12268_v54 = vld [vmem:[#allocation36_spill] sm:$0xff]  ;;  %v6776_v55 = vrot.slane %v2850_v39, 9 }
 0x1b7   : > { %v9534_v37 = vpop.permute.xlu1 %2074  ;;  %v2274_v18 = vsel %vm2250_vm15, %v2237_v26, %v12268_v54  ;;  %v6919_v17 = vcombine.low %v4502_v53, %v4505_v38  ;;  %v6876_v38 = vrot.slane %v4392_v5, 10  ;;  %v7638_v54 = vld [vmem:[#allocation2 + $0x78] sm:$0xf]  ;;  %v3274_v5 = vrot.slane %v3272_v12, 4 }
 0x1b8   : > { %3740 = vrot.lane.b32.xlu0 %v9518_v7, %s7747_s20  ;;  %v2307_v6 = vsel %vm2283_vm0, %v2274_v18, %v9503_v63  ;;  %v2999_v63 = vsel %vm8052_vm8, %v2997_v31, %v2998_v28  ;;  %v4543_v18 = vrot.slane %v7638_v54, 6  ;;  %v2852_v54 = vld [vmem:[#allocation2 + $0x130] sm:$0xe] }
 0x1b9   : > { %3686 = vrot.lane.b32.xlu1 %v9532_v13, %s7745_s22 }
 0x1ba   : > { %v9542_v27 = vpop.permute.xlu0 %2150 }
 0x1bb   : > { %12262 = vst [vmem:[#allocation68_spill] sm:$0xff] %v9542_v27  ;;  %v9548_v43 = vpop.permute.xlu1 %3588 }
 0x1bc   : > { %4934 = vrot.lane.b32.xlu0 %v7556_v49, %s7742_s27  ;;  %v12266_v49 = vld [vmem:[#allocation18_spill] sm:$0xff] }
 0x1bd   : > { %3738 = vrot.lane.b32.xlu1 %v9540_v33, %s7747_s20  ;;  %v2234_v21 = vsel %vm905_vm14, %v12267_v24, %v12266_v49  ;;  %v2851_v24 = vld [vmem:[#allocation2 + $0x128] sm:$0x1] }
 0x1be   : > { %v9553_v32 = vpop.permute.xlu0 %2152 }
 0x1bf   : > { %12263 = vst [vmem:[#allocation69_spill] sm:$0xff] %v9553_v32  ;;  %v2113_v45 = vpop.permute.xlu1 %2112 }
 0x1c0   : > { %4936 = vrot.lane.b32.xlu0 %v7557_v29, %s7742_s27  ;;  %v2272_v29 = vsel %vm2250_vm15, %v2234_v21, %v12269_v48  ;;  %v7570_v21 = vld [vmem:[%s12017_s8] sm:$0xff]   ;;  %v3275_v48 = vrot.slane %v2851_v24, 5 }
 0x1c1   : > { %4872 = vrot.lane.b32.xlu1 %v6918_v11, %s7741_s26  ;;  %v2305_v26 = vsel %vm2283_vm0, %v2272_v29, %v9486_v44  ;;  %v2996_v11 = vsel %vm8052_vm8, %v6745_v19, %v2995_v59  ;;  %v2340_v44 = vsel %vm2316_vm1, %v2307_v6, %v9483_v34  ;;  %v4394_v19 = vld [vmem:[#allocation2 + $0x74] sm:$0xc]  ;;  %7206 = vmatprep.subr.bf16.mxu1 %v7570_v21 }
 0x1c2   : > { %v9573_v47 = vpop.permute.xlu0 %3634  ;;  %v3765_v29 = vsel %vm905_vm14, %v6796_v42, %v8534_v52  ;;  %v2338_v31 = vsel %vm2316_vm1, %v2305_v26, %v9464_v20  ;;  %v2373_v28 = vsel %vm2349_vm2, %v2340_v44, %v9511_v9  ;;  %v7639_v6 = vld [vmem:[#allocation2 + $0x134] sm:$0xf]  ;;  %7207 = vmatpush3.bf16.msra.mxu1 %v7570_v21  ;;  %v4537_v42 = vsel %vm8361_vm11, %v6876_v38, %v4536_v22  ;;  %v2853_v26 = vld [vmem:[#allocation2 + $0x138] sm:$0x1]  ;;  %v7571_v9 = vld [vmem:[%s12017_s8 + $0x8] sm:$0xff]  }
 0x1c3   : > { %v2115_v53 = vpop.permute.xlu1 %2114  ;;  %v3279_v56 = vrot.slane %v7639_v6, 5  ;;  %v2371_v39 = vsel %vm2349_vm2, %v2338_v31, %v9534_v37  ;;  %v6877_v37 = vrot.slane %v4394_v19, 10  ;;  %v7558_v31 = vld [vmem:[#allocation2 + $0xc0] sm:$0xff]   ;;  %v4546_v22 = vrot.slane %v4395_v46, 6  ;;  %7208 = vmatprep.subr.bf16.mxu1 %v7571_v9 }
 0x1c4   : > { %3600 = vrot.lane.b32.xlu0 %v9330_v60, %s7742_s27  ;;  %v2406_v24 = vsel %vm2382_vm3, %v2373_v28, %v2115_v53  ;;  %v2404_v21 = vsel %vm2382_vm3, %v2371_v39, %v2113_v45  ;;  %v9612_v53 = vld [vmem:[#allocation2 + $0x128] sm:$0xf]  ;;  %v3273_v38 = vsel %vm8052_vm8, %v6776_v55, %v3272_v12  ;;  %v3276_v28 = vsel %vm8052_vm8, %v3274_v5, %v3275_v48  ;;  %v2914_v5 = vld [vmem:[#allocation2 + $0x124] sm:$0xe]  ;;  %v7573_v48 = vld [vmem:[%s12017_s8 + $0x10] sm:$0xff]  }
 0x1c5   : > { %4874 = vrot.lane.b32.xlu1 %v6919_v17, %s7741_s26  ;;  %v6797_v17 = vcombine.low %v2996_v11, %v2999_v63  ;;  %v4540_v11 = vsel %vm8361_vm11, %v4538_v1, %v4539_v3  ;;  %v4545_v63 = vrot.slane %v4543_v18, 4  ;;  %v6777_v45 = vrot.slane %v2852_v54, 9  ;;  %v7645_v20 = vld [vmem:[#allocation2 + $0x144] sm:$0xf] }
 0x1c6   : > { %v2193_v59 = vpop.permute.xlu0 %2192  ;;  %v3797_v1 = vsel %vm2250_vm15, %v3765_v29, %v9515_v35  ;;  %v2439_v3 = vsel %vm2415_vm4, %v2406_v24, %v9553_v32  ;;  %v3281_v19 = vrot.slane %v3279_v56, 4  ;;  %v3282_v6 = vrot.slane %v2853_v26, 5  ;;  %7209 = vmatpush3.bf16.msra.mxu1 %v7571_v9  ;;  %v12270_v29 = vld [vmem:[#allocation9_spill] sm:$0xff]  ;;  %v12296_v32 = vld [vmem:[#allocation40_spill] sm:$0xff] }
 0x1c7   : > { %v3633_v60 = vpop.permute.xlu1 %3632  ;;  %v2437_v12 = vsel %vm2415_vm4, %v2404_v21, %v9542_v27  ;;  %v2472_v55 = vsel %vm12140_vm5, %v2439_v3, %v2193_v59  ;;  %v3312_v35 = vrot.slane %v9612_v53, 5  ;;  %v3767_v54 = vsel %vm905_vm14, %v6797_v17, %v12270_v29  ;;  %v2916_v59 = vld [vmem:[#allocation2 + $0x12c] sm:$0x1]  ;;  %v12271_v26 = vld [vmem:[#allocation45_spill] sm:$0xff]  ;;  %v7559_v53 = vld [vmem:[#allocation2 + $0xd0] sm:$0xff]   ;;  %7210 = vmatprep.subr.bf16.mxu1 %v7573_v48 }
 0x1c8   : > { %3602 = vrot.lane.b32.xlu0 %v9344_v25, %s7742_s27  ;;  %v9637_v39 = vcombine.low %v4537_v42, %v4540_v11  ;;  %v4544_v24 = vsel %vm8361_vm11, %v6877_v37, %v4543_v18  ;;  %v4547_v21 = vsel %vm8361_vm11, %v4545_v63, %v4546_v22  ;;  %v3280_v17 = vsel %vm8052_vm8, %v6777_v45, %v3279_v56  ;;  %v2918_v42 = vld [vmem:[#allocation2 + $0x138] sm:$0xf]  ;;  %v12272_v11 = vld [vmem:[#allocation46_spill] sm:$0xff] }
 0x1c9   : > { %3556 = vrot.lane.b32.xlu1 %v8946_v41, %s7741_s26  ;;  %v3829_v41 = vsel %vm2283_vm0, %v3797_v1, %v9548_v43  ;;  %v3799_v18 = vsel %vm2250_vm15, %v3767_v54, %v9497_v16  ;;  %v3283_v1 = vsel %vm8052_vm8, %v3281_v19, %v3282_v6  ;;  %v6780_v3 = vrot.slane %v2914_v5, 9  ;;  %v12273_v6 = vld [vmem:[#allocation55_spill] sm:$0xff] }
 0x1ca   : > { %v3731_v44 = vpop.permute.xlu0 %3730  ;;  %v3858_v37 = vsel %vm2316_vm1, %v3829_v41, %v12272_v11  ;;  %v3831_v63 = vsel %vm2283_vm0, %v3799_v18, %v9526_v23  ;;  %v3315_v16 = vrot.slane %v2916_v59, 5  ;;  %7211 = vmatpush3.bf16.msra.mxu1 %v7573_v48  ;;  %v3319_v19 = vrot.slane %v2918_v42, 5  ;;  %v7640_v59 = vld [vmem:[#allocation2 + $0xc8] sm:$0xf] }
 0x1cb   : > { %v2191_v46 = vpop.permute.xlu1 %2190  ;;  %v3877_v22 = vsel %vm2349_vm2, %v3858_v37, %v3633_v60  ;;  %v9669_v60 = vcombine.low %v4544_v24, %v4547_v21  ;;  %v9676_v54 = vcombine.low %v3280_v17, %v3283_v1  ;;  %v4405_v21 = vld [vmem:[#allocation2 + $0xcc] sm:$0x3]  ;;  %v3313_v42 = vsel %vm8052_vm8, %v6780_v3, %v3312_v35  ;;  %v7576_v17 = vld [vmem:[%s12017_s8 + $0x20] ss:$0 sps:$4 sm:$0xff]  }
 0x1cc   : > { %5046 = vrot.lane.b32.xlu0 %v7558_v31, %s7745_s22  ;;  %v2470_v43 = vsel %vm12140_vm5, %v2437_v12, %v2191_v46  ;;  %v9646_v31 = vcombine.low %v3273_v38, %v3276_v28  ;;  %v3314_v38 = vrot.slane %v3312_v35, 4  ;;  %v7575_v28 = vld [vmem:[%s12017_s8 + $0x18] sm:$0xff]   ;;  %v2917_v46 = vld [vmem:[#allocation2 + $0x134] sm:$0xe]  ;;  %v3321_v37 = vrot.slane %v3319_v19, 4 }
 0x1cd   : > { %3558 = vrot.lane.b32.xlu1 %v12271_v26, %s7741_s26  ;;  %7152 = vmatprep.mubr.msk.bf16.mxu1 %vm12113_vm7, %v2470_v43  ;;  %v2919_v12 = vld [vmem:[#allocation2 + $0x13c] sm:$0x1]  ;;  %v4404_v43 = vld [vmem:[#allocation2 + $0xc4] sm:$0xc]  ;;  %v4578_v26 = vrot.slane %v7640_v59, 6 }
 0x1ce   : > { %v3733_v9 = vpop.permute.xlu0 %3732  ;;  %7153 = vmatmul.mubr.msk.bf16.gmra.mrb[20].mxu1 %vm12113_vm7, %v2472_v55  ;;  %7212 = vmatprep.subr.bf16.mxu1 %v7575_v28  ;;  %v12275_v55 = vld [vmem:[#allocation49_spill] sm:$0xff]  ;;  %v3322_v1 = vrot.slane %v2919_v12, 5  ;;  %v6882_v3 = vrot.slane %v4404_v43, 10  ;;  %v7642_v59 = vld [vmem:[#allocation2 + $0x28] sm:$0xf] }
 0x1cf   : > { %v3677_v56 = vpop.permute.xlu1 %3676  ;;  %v3859_v5 = vsel %vm2316_vm1, %v3831_v63, %v12275_v55  ;;  %7213 = vmatpush3.bf16.msra.mxu1 %v7575_v28  ;;  %v12276_v63 = vld [vmem:[#allocation59_spill] sm:$0xff] }
 0x1d0   : > { %5048 = vrot.lane.b32.xlu0 %v7559_v53, %s7745_s22  ;;  %v3909_v45 = vsel %vm2382_vm3, %v3877_v22, %v3677_v56  ;;  %v3879_v53 = vsel %vm2349_vm2, %v3859_v5, %v9573_v47  ;;  %v6781_v47 = vrot.slane %v2917_v46, 9  ;;  %7257 = vmatprep.subr.msk.bf16.mxu1 %vm12112_vm13, %v7576_v17  ;;  %v5442_v56 = vsel %vm12112_vm13, %v7576_v17, 0  ;;  %v4406_v5 = vld [vmem:[#allocation2 + $0xd4] sm:$0xc] }
 0x1d1   : > { %v3938_v41 = vsel %vm2415_vm4, %v3909_v45, %v12273_v6  ;;  %4984 = vrot.lane.b32.xlu1 %v9637_v39, %s7744_s19  ;;  %v4581_v45 = vrot.slane %v4405_v21, 6  ;;  %v6883_v17 = vrot.slane %v4406_v5, 10  ;;  %v12300_v6 = vld [vmem:[#allocation43_spill] sm:$0xff] }
 0x1d2   : > { %v9671_v23 = vpop.permute.xlu0 %2038  ;;  %v3959_v48 = vsel %vm12140_vm5, %v3938_v41, %v3731_v44  ;;  %v3316_v44 = vsel %vm8052_vm8, %v3314_v38, %v3315_v16  ;;  %v4580_v16 = vrot.slane %v4578_v26, 4  ;;  %v7641_v41 = vld [vmem:[#allocation2 + $0xd8] sm:$0xf]  ;;  %v3320_v43 = vsel %vm8052_vm8, %v6781_v47, %v3319_v19  ;;  %v4384_v47 = vld [vmem:[#allocation2 + $0x24] sm:$0xc] }
 0x1d3   : > { %12274 = vst [vmem:[#allocation29_spill] sm:$0xff] %v9671_v23  ;;  %v3679_v24 = vpop.permute.xlu1 %3678  ;;  %7178 = vmatprep.mubr.msk.bf16.mxu0 %vm12113_vm7, %v3959_v48  ;;  %v4585_v46 = vrot.slane %v7641_v41, 6  ;;  %v9705_v12 = vcombine.low %v3313_v42, %v3316_v44  ;;  %v4407_v48 = vld [vmem:[#allocation2 + $0xdc] sm:$0x3]  ;;  %7215 = vmatpush3.bf16.msra.mxu1 %v5442_v56  ;;  %v4579_v42 = vsel %vm8361_vm11, %v6882_v3, %v4578_v26  ;;  %v7643_v56 = vld [vmem:[#allocation2 + $0x38] sm:$0xf] }
 0x1d4   : > { %3688 = vrot.lane.b32.xlu0 %v9646_v31, %s7745_s22  ;;  %v3911_v18 = vsel %vm2382_vm3, %v3879_v53, %v3679_v24  ;;  %v4508_v53 = vrot.slane %v7642_v59, 6  ;;  %v12278_v24 = vld [vmem:[#allocation63_spill] sm:$0xff]  ;;  %v4582_v44 = vsel %vm8361_vm11, %v4580_v16, %v4581_v45  ;;  %v4588_v19 = vrot.slane %v4407_v48, 6  ;;  %v12279_v41 = vld [vmem:[#allocation65_spill] sm:$0xff]  ;;  %v9731_v45 = vpop.f32.mrb[0].mxu0 }
 0x1d5   : > { %v3939_v22 = vsel %vm2415_vm4, %v3911_v18, %v12276_v63  ;;  %4986 = vrot.lane.b32.xlu1 %v9669_v60, %s7744_s19  ;;  %v4587_v18 = vrot.slane %v4585_v46, 4  ;;  %v9727_v26 = vcombine.low %v4579_v42, %v4582_v44  ;;  %v6872_v16 = vrot.slane %v4384_v47, 10  ;;  %12280 = vst [vmem:[#allocation36_spill] sm:$0xff] %v9731_v45  ;;  %v9737_v59 = vpop.f32.mrb[1].mxu0  ;;  %v4386_v42 = vld [vmem:[#allocation2 + $0x34] sm:$0xc] }
 0x1d6   : > { %v9695_v35 = vpop.permute.xlu0 %2040  ;;  %v3961_v38 = vsel %vm12140_vm5, %v3939_v22, %v3733_v9  ;;  %v3323_v9 = vsel %vm8052_vm8, %v3321_v37, %v3322_v1  ;;  %v4385_v1 = vld [vmem:[#allocation2 + $0x2c] sm:$0x3]  ;;  %v4586_v5 = vsel %vm8361_vm11, %v6883_v17, %v4585_v46  ;;  %12281 = vst [vmem:[#allocation31_spill] sm:$0xff] %v9737_v59  ;;  %v4387_v44 = vld [vmem:[#allocation2 + $0x3c] sm:$0x3]  ;;  %v9743_v45 = vpop.f32.mrb[2].mxu0 }
 0x1d7   : > { %12277 = vst [vmem:[#allocation25_spill] sm:$0xff] %v9695_v35  ;;  %v9700_v28 = vpop.permute.xlu1 %2000  ;;  %7179 = vmatmul.mubr.msk.bf16.gmra.mrb[36].mxu0 %vm12113_vm7, %v3961_v38  ;;  %v9723_v37 = vcombine.low %v3320_v43, %v3323_v9  ;;  %v4515_v38 = vrot.slane %v7643_v56, 6  ;;  %v4589_v48 = vsel %vm8361_vm11, %v4587_v18, %v4588_v19  ;;  %v4510_v43 = vrot.slane %v4508_v53, 4  ;;  %v7644_v47 = vld [vmem:[#allocation2 + $0x88] sm:$0xf]  ;;  %12282 = vst [vmem:[#allocation45_spill] sm:$0xff] %v9743_v45 }
 0x1d8   : > { %3690 = vrot.lane.b32.xlu0 %v9676_v54, %s7745_s22  ;;  %v4511_v9 = vrot.slane %v4385_v1, 6  ;;  %v4550_v29 = vrot.slane %v7644_v47, 6  ;;  %v9747_v46 = vcombine.low %v4586_v5, %v4589_v48  ;;  %v4509_v18 = vsel %vm8361_vm11, %v6872_v16, %v4508_v53  ;;  %v7560_v19 = vld [vmem:[#allocation2 + $0x80] sm:$0xff]   ;;  %v9753_v59 = vpop.f32.mrb[3].mxu0  ;;  %v4397_v5 = vld [vmem:[#allocation2 + $0x8c] sm:$0x3] }
 0x1d9   : > { %3644 = vrot.lane.b32.xlu1 %v12278_v24, %s7744_s19  ;;  %v4396_v1 = vld [vmem:[#allocation2 + $0x84] sm:$0xc]  ;;  %12284 = vst [vmem:[#allocation65_spill] sm:$0xff] %v9753_v59  ;;  %v6873_v47 = vrot.slane %v4386_v42, 10  ;;  %v4517_v49 = vrot.slane %v4515_v38, 4  ;;  %v4518_v45 = vrot.slane %v4387_v44, 6 }
 0x1da   : > { %v9713_v21 = vpop.permute.xlu0 %3550  ;;  %12283 = vst [vmem:[#allocation63_spill] sm:$0xff] %v9747_v46  ;;  %v4512_v25 = vsel %vm8361_vm11, %v4510_v43, %v4511_v9  ;;  %v9757_v52 = vpop.f32.mrb[4].mxu0  ;;  %v7561_v53 = vld [vmem:[#allocation2 + $0x90] sm:$0xff]   ;;  %v6878_v16 = vrot.slane %v4396_v1, 10  ;;  %v4552_v55 = vrot.slane %v4550_v29, 4  ;;  %v3286_v59 = vrot.slane %v7645_v20, 5 }
 0x1db   : > { %v9719_v22 = vpop.permute.xlu1 %2002  ;;  %12285 = vst [vmem:[#allocation70_spill] sm:$0xff] %v9757_v52  ;;  %v9762_v48 = vpop.f32.mrb[5].mxu0  ;;  %v6920_v43 = vcombine.low %v4509_v18, %v4512_v25  ;;  %v7646_v42 = vld [vmem:[#allocation2 + $0x98] sm:$0xf]  ;;  %v2854_v52 = vld [vmem:[#allocation2 + $0x140] sm:$0xe]  ;;  %v4516_v1 = vsel %vm8361_vm11, %v6873_v47, %v4515_v38  ;;  %v4519_v20 = vsel %vm8361_vm11, %v4517_v49, %v4518_v45 }
 0x1dc   : > { %3742 = vrot.lane.b32.xlu0 %v9705_v12, %s7747_s20  ;;  %12286 = vst [vmem:[#allocation71_spill] sm:$0xff] %v9762_v48  ;;  %v9764_v11 = vpop.f32.mrb[6].mxu0  ;;  %v4557_v44 = vrot.slane %v7646_v42, 6  ;;  %v4553_v48 = vrot.slane %v4397_v5, 6  ;;  %v6778_v42 = vrot.slane %v2854_v52, 9  ;;  %v6921_v49 = vcombine.low %v4516_v1, %v4519_v20  ;;  %v12298_v1 = vld [vmem:[#allocation42_spill] sm:$0xff] }
 0x1dd   : > { %3646 = vrot.lane.b32.xlu1 %v12279_v41, %s7744_s19  ;;  %12287 = vst [vmem:[#allocation72_spill] sm:$0xff] %v9764_v11  ;;  %v9770_v61 = vpop.f32.mrb[7].mxu0  ;;  %v4398_v11 = vld [vmem:[#allocation2 + $0x94] sm:$0xc] }
 0x1de   : > { %v9729_v3 = vpop.permute.xlu0 %2080  ;;  %12289 = vst [vmem:[#allocation74_spill] sm:$0xff] %v9770_v61  ;;  %v9776_v50 = vpop.f32.mrb[8].mxu0  ;;  %v3288_v61 = vrot.slane %v3286_v59, 4  ;;  %v6879_v47 = vrot.slane %v4398_v11, 10  ;;  %v4559_v5 = vrot.slane %v4557_v44, 4  ;;  %v4554_v52 = vsel %vm8361_vm11, %v4552_v55, %v4553_v48  ;;  %v12301_v48 = vld [vmem:[#allocation32_spill] sm:$0xff] }
 0x1df   : > { %v9739_v56 = vpop.permute.xlu1 %3548  ;;  %12290 = vst [vmem:[#allocation75_spill] sm:$0xff] %v9776_v50  ;;  %v9783_v18 = vpop.f32.mrb[9].mxu0  ;;  %v4560_v50 = vrot.slane %v4399_v10, 6  ;;  %v7647_v10 = vld [vmem:[#allocation2 + $0x154] sm:$0xf] }
 0x1e0   : > { %3744 = vrot.lane.b32.xlu0 %v9723_v37, %s7747_s20  ;;  %12291 = vst [vmem:[#allocation76_spill] sm:$0xff] %v9783_v18  ;;  %v9785_v38 = vpop.f32.mrb[10].mxu0 }
 0x1e1   : > { %5106 = vrot.lane.b32.xlu1 %v9727_v26, %s7747_s20  ;;  %12292 = vst [vmem:[#allocation77_spill] sm:$0xff] %v9785_v38  ;;  %v9790_v63 = vpop.f32.mrb[11].mxu0 }
 0x1e2   : > { %v9749_v17 = vpop.permute.xlu0 %3594  ;;  %12294 = vst [vmem:[#allocation79_spill] sm:$0xff] %v9790_v63  ;;  %v7104_v18 = vpop.f32.mrb[12].mxu0  ;;  %v3293_v63 = vrot.slane %v7647_v10, 5 }
 0x1e3   : > { %v9759_v34 = vpop.permute.xlu1 %2078 }
 0x1e4   : > { %4938 = vrot.lane.b32.xlu0 %v7560_v19, %s7742_s27  ;;  %v2855_v19 = vld [vmem:[#allocation2 + $0x148] sm:$0x1] }
 0x1e5   : > { %5108 = vrot.lane.b32.xlu1 %v9747_v46, %s7747_s20  ;;  %v3289_v30 = vrot.slane %v2855_v19, 5  ;;  %v12295_v19 = vld [vmem:[#allocation21_spill] sm:$0xff]  ;;  %v12348_v46 = vld [vmem:[#allocation27_spill] sm:$0xff] }
 0x1e6   : > { %v9768_v9 = vpop.permute.xlu0 %2154  ;;  %v2240_v38 = vsel %vm905_vm14, %v12296_v32, %v12295_v19  ;;  %v3287_v32 = vsel %vm8052_vm8, %v6778_v42, %v3286_v59  ;;  %v2856_v19 = vld [vmem:[#allocation2 + $0x150] sm:$0xe]  ;;  %v9828_v59 = vsel %vm8361_vm11, %v4559_v5, %v4560_v50 }
 0x1e7   : > { %12288 = vst [vmem:[#allocation73_spill] sm:$0xff] %v9768_v9  ;;  %v9778_v25 = vpop.permute.xlu1 %3592  ;;  %v2276_v2 = vsel %vm2250_vm15, %v2240_v38, %v12301_v48 }
 0x1e8   : > { %4940 = vrot.lane.b32.xlu0 %v7561_v53, %s7742_s27  ;;  %v4551_v53 = vsel %vm8361_vm11, %v6878_v16, %v4550_v29  ;;  %v1040_v29 = vpop.f32.mrb[13].mxu0  ;;  %v12299_v16 = vld [vmem:[#allocation26_spill] sm:$0xff]  ;;  %v2309_v42 = vsel %vm2283_vm0, %v2276_v2, %v9700_v28  ;;  %v9850_v2 = vstv %s9781_s21 }
 0x1e9   : > { %4876 = vrot.lane.b32.xlu1 %v6920_v43, %s7741_s26  ;;  %v12297_v43 = vld [vmem:[#allocation12_spill] sm:$0xff]  ;;  %v2243_v55 = vsel %vm905_vm14, %v12300_v6, %v12299_v16  ;;  %v9820_v27 = vcombine.low %v4551_v53, %v4554_v52  ;;  %v9824_v6 = vsel %vm8361_vm11, %v6879_v47, %v4557_v44  ;;  %v9839_v44 = vld [vmem:[#allocation2 + $0x148] sm:$0xf]  ;;  %v6779_v52 = vrot.slane %v2856_v19, 9  ;;  %12305 = vst [vmem:[#allocation43_spill] sm:$0xff] %v9850_v2 }
 0x1ea   : > { %v9788_v45 = vpop.permute.xlu0 %2156  ;;  %v9802_v20 = vsel %vm905_vm14, %v12298_v1, %v12297_v43  ;;  %v3290_v1 = vsel %vm8052_vm8, %v3288_v61, %v3289_v30  ;;  %v7105_v43 = vpop.f32.mrb[14].mxu0  ;;  %v2857_v61 = vld [vmem:[#allocation2 + $0x158] sm:$0x1] }
 0x1eb   : > { %12293 = vst [vmem:[#allocation78_spill] sm:$0xff] %v9788_v45  ;;  %v2117_v11 = vpop.permute.xlu1 %2116  ;;  %12303 = vst [vmem:[#allocation40_spill] sm:$0xff] %v9820_v27  ;;  %v1043_v30 = vpop.f32.mrb[15].mxu0  ;;  %v9847_v53 = vcombine.low %v3287_v32, %v3290_v1  ;;  %v7562_v32 = vld [vmem:[#allocation2 + $0xe0] sm:$0xff]  }
 0x1ec   : > { %3604 = vrot.lane.b32.xlu0 %v9513_v0, %s7742_s27  ;;  %v2278_v0 = vsel %vm2250_vm15, %v2243_v55, %v12302_v51  ;;  %v9833_v51 = vld [vmem:[%s12012_s3] ss:$0 sm:$0xff]  ;;  %v9843_v47 = vpop.f32.mrb[16].mxu0  ;;  %v3295_v55 = vrot.slane %v3293_v63, 4 }
 0x1ed   : > { %4878 = vrot.lane.b32.xlu1 %v6921_v49, %s7741_s26  ;;  %v2311_v38 = vsel %vm2283_vm0, %v2278_v0, %v9719_v22  ;;  %v1049_v49 = vadd.f32 %v7104_v18, %v9833_v51  ;;  %v1041_v50 = vadd.f32 %v9833_v51, %v1040_v29  ;;  %12304 = vst [vmem:[#allocation42_spill] sm:$0xff] %v9843_v47  ;;  %v9852_v28 = vpop.f32.mrb[17].mxu0  ;;  %v3296_v0 = vrot.slane %v2857_v61, 5 }
 0x1ee   : > { %v9818_v10 = vpop.permute.xlu0 %3638  ;;  %12306 = vst [vmem:[#allocation32_spill] sm:$0xff] %v9852_v28  ;;  %v9855_v18 = vpop.f32.mrb[18].mxu0  ;;  %v2342_v29 = vsel %vm2316_vm1, %v2309_v42, %v9671_v23  ;;  %v2344_v48 = vsel %vm2316_vm1, %v2311_v38, %v9695_v35  ;;  %v9869_v28 = vld [vmem:[#allocation2 + $0x144] sm:$0xe]  ;;  %v1052_v38 = vadd.f32 %v7105_v43, %v9833_v51 }
 0x1ef   : > { %v2119_v5 = vpop.permute.xlu1 %2118  ;;  %vm1133_vm9 = vcmp.ge.f32.partialorder %v1049_v49, 0.0  ;;  %v1166_v22 = vmul.f32 %v9850_v2, %v1049_v49  ;;  %vm1131_vm10 = vcmp.ge.f32.partialorder %v1041_v50, 0.0  ;;  %12307 = vst [vmem:[#allocation39_spill] sm:$0xff] %v9855_v18  ;;  %v1164_v61 = vmul.f32 %v9850_v2, %v1041_v50  ;;  %v9865_v47 = vpop.f32.mrb[19].mxu0 }
 0x1f0   : > { %3606 = vrot.lane.b32.xlu0 %v9532_v13, %s7742_s27  ;;  %12308 = vst [vmem:[#allocation80_spill] sm:$0xff] %v9865_v47  ;;  %v2377_v18 = vsel %vm2349_vm2, %v2344_v48, %v9729_v3  ;;  %v1044_v13 = vadd.f32 %v9833_v51, %v1043_v30  ;;  %v2375_v1 = vsel %vm2349_vm2, %v2342_v29, %v9759_v34  ;;  %v2922_v48 = vld [vmem:[#allocation2 + $0x14c] sm:$0x1]  ;;  %vm1134_vm12 = vcmp.ge.f32.partialorder %v1052_v38, 0.0  ;;  %v9901_v29 = vld [vmem:[#allocation2 + $0x158] sm:$0xf] }
 0x1f1   : > { %3560 = vrot.lane.b32.xlu1 %v9128_v40, %s7741_s26  ;;  %v9871_v42 = vsel %vm1133_vm9, %v1049_v49, %v1166_v22  ;;  %v9875_v40 = vpop.f32.mrb[20].mxu0  ;;  %v2410_v16 = vsel %vm2382_vm3, %v2377_v18, %v2119_v5  ;;  %v3294_v3 = vsel %vm8052_vm8, %v6779_v52, %v3293_v63  ;;  %v9884_v49 = vsel %vm1131_vm10, %v1041_v50, %v1164_v61  ;;  %v7563_v63 = vld [vmem:[#allocation2 + $0xf0] sm:$0xff]  }
 0x1f2   : > { %v2197_v19 = vpop.permute.xlu0 %2196  ;;  %12309 = vst [vmem:[#allocation81_spill] sm:$0xff] %v9871_v42  ;;  %12310 = vst [vmem:[#allocation82_spill] sm:$0xff] %v9875_v40  ;;  %v9886_v43 = vpop.f32.mrb[21].mxu0  ;;  %v2408_v30 = vsel %vm2382_vm3, %v2375_v1, %v2117_v11  ;;  %v1167_v22 = vmul.f32 %v9850_v2, %v1052_v38  ;;  %vm1132_vm9 = vcmp.ge.f32.partialorder %v1044_v13, 0.0  ;;  %v3297_v50 = vsel %vm8052_vm8, %v3295_v55, %v3296_v0 }
 0x1f3   : > { %v3637_v35 = vpop.permute.xlu1 %3636  ;;  %12311 = vst [vmem:[#allocation83_spill] sm:$0xff] %v9884_v49  ;;  %12312 = vst [vmem:[#allocation84_spill] sm:$0xff] %v9886_v43  ;;  %v9890_v34 = vpop.f32.mrb[22].mxu0  ;;  %v6782_v52 = vrot.slane %v9869_v28, 9  ;;  %v12314_v18 = vrot.slane %v9839_v44, 5  ;;  %v2443_v61 = vsel %vm2415_vm4, %v2410_v16, %v9788_v45  ;;  %v3329_v42 = vrot.slane %v2922_v48, 5 }
 0x1f4   : > { %5050 = vrot.lane.b32.xlu0 %v7562_v32, %s7745_s22  ;;  %12313 = vst [vmem:[#allocation85_spill] sm:$0xff] %v9890_v34  ;;  %v1165_v32 = vmul.f32 %v9850_v2, %v1044_v13  ;;  %v9904_v1 = vpop.f32.mrb[23].mxu0  ;;  %v9912_v55 = vsel %vm1134_vm12, %v1052_v38, %v1167_v22  ;;  %v2441_v49 = vsel %vm2415_vm4, %v2408_v30, %v9768_v9  ;;  %v3333_v38 = vrot.slane %v9901_v29, 5  ;;  %v12322_v22 = vld [vmem:[#allocation38_spill] sm:$0xff]  ;;  %v7648_v30 = vld [vmem:[#allocation2 + $0xe8] sm:$0xf] }
 0x1f5   : > { %3562 = vrot.lane.b32.xlu1 %v9143_v14, %s7741_s26  ;;  %v3328_v11 = vrot.slane %v12314_v18, 4  ;;  %12315 = vst [vmem:[#allocation86_spill] sm:$0xff] %v9904_v1  ;;  %v3801_v14 = vsel %vm2250_vm15, %v9802_v20, %v9739_v56  ;;  %12316 = vst [vmem:[#allocation87_spill] sm:$0xff] %v9912_v55  ;;  %v9914_v28 = vpop.f32.mrb[24].mxu0  ;;  %v2476_v34 = vsel %vm12140_vm5, %v2443_v61, %v2197_v19  ;;  %v2925_v29 = vld [vmem:[#allocation2 + $0x15c] sm:$0x1] }
 0x1f6   : > { %v9894_v5 = vpop.permute.xlu0 %3734  ;;  %12317 = vst [vmem:[#allocation88_spill] sm:$0xff] %v9914_v28  ;;  %v3833_v0 = vsel %vm2283_vm0, %v3801_v14, %v9778_v25  ;;  %v9923_v56 = vsel %vm1132_vm9, %v1044_v13, %v1165_v32  ;;  %v9925_v20 = vpop.f32.mrb[25].mxu0  ;;  %v12321_v25 = vld [vmem:[#allocation15_spill] sm:$0xff]  ;;  %v9939_v13 = vcombine.low %v9824_v6, %v9828_v59  ;;  %v4408_v55 = vld [vmem:[#allocation2 + $0xe4] sm:$0xc] }
 0x1f7   : > { %v2195_v18 = vpop.permute.xlu1 %2194  ;;  %12318 = vst [vmem:[#allocation89_spill] sm:$0xff] %v9923_v56  ;;  %12319 = vst [vmem:[#allocation90_spill] sm:$0xff] %v9925_v20  ;;  %v9929_v48 = vpop.f32.mrb[26].mxu0  ;;  %v3771_v14 = vsel %vm905_vm14, %v12322_v22, %v12321_v25  ;;  %v4409_v6 = vld [vmem:[#allocation2 + $0xec] sm:$0x3] }
 0x1f8   : > { %5052 = vrot.lane.b32.xlu0 %v7563_v63, %s7745_s22  ;;  %v2474_v16 = vsel %vm12140_vm5, %v2441_v49, %v2195_v18  ;;  %12320 = vst [vmem:[#allocation91_spill] sm:$0xff] %v9929_v48  ;;  %12323 = vst [vmem:[#allocation38_spill] sm:$0xff] %v9939_v13  ;;  %v4592_v49 = vrot.slane %v7648_v30, 6  ;;  %v2923_v63 = vld [vmem:[#allocation2 + $0x154] sm:$0xe]  ;;  %v9941_v32 = vpop.f32.mrb[27].mxu0  ;;  %v3803_v61 = vsel %vm2250_vm15, %v3771_v14, %v9713_v21 }
 0x1f9   : > { %4988 = vrot.lane.b32.xlu1 %v9820_v27, %s7744_s19  ;;  %7156 = vmatprep.mubr.msk.bf16.mxu1 %vm12113_vm7, %v2474_v16  ;;  %12324 = vst [vmem:[#allocation92_spill] sm:$0xff] %v9941_v32  ;;  %v12325_v18 = vld [vmem:[#allocation51_spill] sm:$0xff]  ;;  %v9948_v16 = vcombine.low %v3294_v3, %v3297_v50  ;;  %v9950_v59 = vld [vmem:[#allocation2 + $0xf8] sm:$0xf]  ;;  %v9953_v56 = vpop.f32.mrb[28].mxu0  ;;  %v3835_v48 = vsel %vm2283_vm0, %v3803_v61, %v9749_v17  ;;  %v12326_v3 = vrot.slane %v9839_v44, 5 }
 0x1fa   : > { %v3737_v19 = vpop.permute.xlu0 %3736  ;;  %v3860_v22 = vsel %vm2316_vm1, %v3833_v0, %v12325_v18  ;;  %7157 = vmatmul.mubr.msk.bf16.gmra.mrb[24].mxu1 %vm12113_vm7, %v2476_v34  ;;  %v4599_v30 = vrot.slane %v9950_v59, 6  ;;  %v3330_v50 = vsel %vm8052_vm8, %v3328_v11, %v3329_v42  ;;  %v9966_v0 = vpop.f32.mrb[29].mxu0  ;;  %v4410_v17 = vld [vmem:[#allocation2 + $0xf4] sm:$0xc]  ;;  %v6783_v61 = vrot.slane %v2923_v63, 9  ;;  %v12327_v32 = vld [vmem:[#allocation7_spill] sm:$0xff] }
 0x1fb   : > { %v3881_v21 = vsel %vm2349_vm2, %v3860_v22, %v3637_v35  ;;  %v3681_v14 = vpop.permute.xlu1 %3680  ;;  %v3327_v34 = vsel %vm8052_vm8, %v6782_v52, %v12326_v3  ;;  %v3335_v35 = vrot.slane %v3333_v38, 4  ;;  %v3336_v22 = vrot.slane %v2925_v29, 5  ;;  %v9969_v28 = vpop.f32.mrb[30].mxu0  ;;  %v4411_v20 = vld [vmem:[#allocation2 + $0xfc] sm:$0x3]  ;;  %v12329_v63 = vld [vmem:[#allocation56_spill] sm:$0xff] }
 0x1fc   : > { %3692 = vrot.lane.b32.xlu0 %v9847_v53, %s7745_s22  ;;  %v3913_v59 = vsel %vm2382_vm3, %v3881_v21, %v3681_v14  ;;  %v6884_v42 = vrot.slane %v4408_v55, 10  ;;  %v4594_v11 = vrot.slane %v4592_v49, 4  ;;  %v4595_v3 = vrot.slane %v4409_v6, 6  ;;  %v1107_v40 = vpop.f32.mrb[31].mxu0  ;;  %v7650_v21 = vld [vmem:[%s8035_s24] sm:$0xf] }
 0x1fd   : > { %v3940_v44 = vsel %vm2415_vm4, %v3913_v59, %v12327_v32  ;;  %4990 = vrot.lane.b32.xlu1 %v9939_v13, %s7744_s19  ;;  %v5702_v14 = vunpack.c.l.bf16 %v7650_v21  ;;  %v3861_v29 = vsel %vm2316_vm1, %v3835_v48, %v12329_v63  ;;  %v9987_v55 = vcombine.low %v3327_v34, %v3330_v50  ;;  %v7651_v50 = vld [vmem:[#allocation2 + $0x48] sm:$0xf] }
 0x1fe   : > { %v9975_v52 = vpop.permute.xlu0 %2042  ;;  %v3963_v1 = vsel %vm12140_vm5, %v3940_v44, %v9894_v5  ;;  %v3883_v59 = vsel %vm2349_vm2, %v3861_v29, %v9818_v10  ;;  %v6885_v6 = vrot.slane %v4410_v17, 10  ;;  %v4601_v47 = vrot.slane %v4599_v30, 4 }
 0x1ff   : > { %12328 = vst [vmem:[#allocation93_spill] sm:$0xff] %v9975_v52  ;;  %v3683_v43 = vpop.permute.xlu1 %3682  ;;  %7182 = vmatprep.mubr.msk.bf16.mxu0 %vm12113_vm7, %v3963_v1  ;;  %12330 = vst [vmem:[#allocation94_spill] sm:$0xff] %v9987_v55  ;;  %v4602_v48 = vrot.slane %v4411_v20, 6  ;;  %v3334_v5 = vsel %vm8052_vm8, %v6783_v61, %v3333_v38  ;;  %v3337_v10 = vsel %vm8052_vm8, %v3335_v35, %v3336_v22  ;;  %v12331_v1 = vld [vmem:[#allocation10_spill] sm:$0xff]  ;;  %v4522_v17 = vrot.slane %v7651_v50, 6 }
 0x200   : > { %3694 = vrot.lane.b32.xlu0 %v9948_v16, %s7745_s22  ;;  %v3915_v21 = vsel %vm2382_vm3, %v3883_v59, %v3683_v43  ;;  %v4593_v43 = vsel %vm8361_vm11, %v6884_v42, %v4592_v49  ;;  %v4596_v20 = vsel %vm8361_vm11, %v4594_v11, %v4595_v3  ;;  %v4388_v61 = vld [vmem:[#allocation2 + $0x44] sm:$0xc]  ;;  %v4389_v35 = vld [vmem:[#allocation2 + $0x4c] sm:$0x3]  ;;  %v7652_v22 = vld [vmem:[#allocation2 + $0x58] sm:$0xf]  ;;  %v10016_v49 = vcombine.low %v3334_v5, %v3337_v10 }
 0x201   : > { %v3941_v44 = vsel %vm2415_vm4, %v3915_v21, %v12331_v1  ;;  %3648 = vrot.lane.b32.xlu1 %v9540_v33, %s7744_s19  ;;  %v4529_v29 = vrot.slane %v7652_v22, 6  ;;  %v10008_v59 = vld [vmem:[%s8035_s24 + $0x4] sm:$0xf]  ;;  %v4390_v42 = vld [vmem:[#allocation2 + $0x54] sm:$0xc]  ;;  %v10021_v3 = vcombine.low %v4593_v43, %v4596_v20  ;;  %v4603_v50 = vsel %vm8361_vm11, %v4601_v47, %v4602_v48 }
 0x202   : > { %v10000_v34 = vpop.permute.xlu0 %2044  ;;  %v3965_v38 = vsel %vm12140_vm5, %v3941_v44, %v3737_v19  ;;  %12333 = vst [vmem:[#allocation96_spill] sm:$0xff] %v10016_v49  ;;  %v4391_v11 = vld [vmem:[#allocation2 + $0x5c] sm:$0x3]  ;;  %v10019_v19 = vsel %vm905_vm14, %v5702_v14, 0.0  ;;  %v4600_v44 = vsel %vm8361_vm11, %v6885_v6, %v4599_v30  ;;  %v6874_v5 = vrot.slane %v4388_v61, 10 }
 0x203   : > { %12332 = vst [vmem:[#allocation95_spill] sm:$0xff] %v10000_v34  ;;  %v10011_v25 = vpop.permute.xlu1 %2004  ;;  %7183 = vmatmul.mubr.msk.bf16.gmra.mrb[40].mxu0 %vm12113_vm7, %v3965_v38  ;;  %12334 = vst [vmem:[#allocation97_spill] sm:$0xff] %v10021_v3  ;;  %v4524_v10 = vrot.slane %v4522_v17, 4  ;;  %v4525_v22 = vrot.slane %v4389_v35, 6  ;;  %v1113_v14 = vadd.f32 %v9953_v56, %v9833_v51  ;;  %v10036_v43 = vld [vmem:[%s12014_s5] ss:$0 sm:$0xff]  ;;  %v1105_v48 = vadd.f32 %v9833_v51, %v9966_v0 }
 0x204   : > { %3746 = vrot.lane.b32.xlu0 %v9987_v55, %s7747_s20  ;;  %v6875_v30 = vrot.slane %v4390_v42, 10  ;;  %v4531_v6 = vrot.slane %v4529_v29, 4  ;;  %v4532_v47 = vrot.slane %v4391_v11, 6  ;;  %v1116_v56 = vadd.f32 %v9969_v28, %v9833_v51  ;;  %v7564_v28 = vld [vmem:[#allocation2 + $0xa0] sm:$0xff]   ;;  %v10141_v55 = vld [vmem:[%s8035_s24 + $0xc] sm:$0xf] }
 0x205   : > { %3650 = vrot.lane.b32.xlu1 %v9518_v7, %s7744_s19  ;;  %vm1149_vm10 = vcmp.ge.f32.partialorder %v1113_v14, 0.0  ;;  %v1182_v61 = vmul.f32 %v9850_v2, %v1113_v14  ;;  %v10048_v35 = vadd.f32 %v9833_v51, %v1107_v40  ;;  %v10051_v21 = vstv %s9990_s28 }
 0x206   : > { %v10029_v38 = vpop.permute.xlu0 %3554  ;;  %v10053_v11 = vcombine.low %v4600_v44, %v4603_v50  ;;  %vm1147_vm12 = vcmp.ge.f32.partialorder %v1105_v48, 0.0  ;;  %v1180_v0 = vmul.f32 %v9850_v2, %v1105_v48  ;;  %v4523_v51 = vsel %vm8361_vm11, %v6874_v5, %v4522_v17 }
 0x207   : > { %v10040_v20 = vpop.permute.xlu1 %2006  ;;  %v7134_v42 = vpop.f32.mrb[0].mxu1  ;;  %v4526_v40 = vsel %vm8361_vm11, %v4524_v10, %v4525_v22  ;;  %v10066_v44 = vsel %vm1149_vm10, %v1113_v14, %v1182_v61  ;;  %vm1150_vm9 = vcmp.ge.f32.partialorder %v1116_v56, 0.0  ;;  %v1183_v22 = vmul.f32 %v9850_v2, %v1116_v56  ;;  %v7565_v61 = vld [vmem:[#allocation2 + $0xb0] sm:$0xff]  }
 0x208   : > { %3748 = vrot.lane.b32.xlu0 %v10016_v49, %s7747_s20  ;;  %12335 = vst [vmem:[#allocation98_spill] sm:$0xff] %v10053_v11  ;;  %v2603_v63 = vadd.f32 %v7134_v42, %v10036_v43  ;;  %v2594_v18 = vpop.f32.mrb[1].mxu1  ;;  %12336 = vst [vmem:[#allocation99_spill] sm:$0xff] %v10066_v44  ;;  %v10071_v42 = vsel %vm8361_vm11, %v6875_v30, %v4529_v29  ;;  %v10073_v32 = vsel %vm1147_vm12, %v1105_v48, %v1180_v0 }
 0x209   : > { %5110 = vrot.lane.b32.xlu1 %v10021_v3, %s7747_s20  ;;  %v2595_v50 = vadd.f32 %v10036_v43, %v2594_v18  ;;  %v7135_v1 = vpop.f32.mrb[2].mxu1  ;;  %12337 = vst [vmem:[#allocation100_spill] sm:$0xff] %v10073_v32  ;;  %v4533_v18 = vsel %vm8361_vm11, %v4531_v6, %v4532_v47  ;;  %v6922_v30 = vcombine.low %v4523_v51, %v4526_v40  ;;  %v12339_v47 = vunpack.c.l.bf16 %v10008_v59  ;;  %v7657_v32 = vld [vmem:[#allocation2 + $0x174] sm:$0xf] }
 0x20a   : > { %v10059_v23 = vpop.permute.xlu0 %2084  ;;  %v2756_v45 = vmul.f32 %v10051_v21, %v2603_v63  ;;  %v2606_v17 = vadd.f32 %v7135_v1, %v10036_v43  ;;  %v2597_v10 = vpop.f32.mrb[3].mxu1  ;;  %vm2723_vm10 = vcmp.ge.f32.partialorder %v2603_v63, 0.0  ;;  %v10091_v6 = vsel %vm1150_vm9, %v1116_v56, %v1183_v22 }
 0x20b   : > { %v10077_v5 = vpop.permute.xlu1 %3552  ;;  %v2754_v29 = vmul.f32 %v10051_v21, %v2595_v50  ;;  %v2598_v14 = vadd.f32 %v10036_v43, %v2597_v10  ;;  %vm2721_vm12 = vcmp.ge.f32.partialorder %v2595_v50, 0.0  ;;  %12338 = vst [vmem:[#allocation101_spill] sm:$0xff] %v10091_v6  ;;  %v5735_v0 = vsel %vm905_vm14, %v12339_v47, 0.0  ;;  %v7656_v6 = vld [vmem:[#allocation2 + $0x164] sm:$0xf] }
 0x20c   : > { %4942 = vrot.lane.b32.xlu0 %v7564_v28, %s7742_s27  ;;  %vm2724_vm13 = vcmp.ge.f32.partialorder %v2606_v17, 0.0  ;;  %v2757_v1 = vmul.f32 %v10051_v21, %v2606_v17  ;;  %v6923_v40 = vcombine.low %v10071_v42, %v4533_v18  ;;  %v10098_v28 = vsel %vm2723_vm10, %v2603_v63, %v2756_v45  ;;  %v4400_v45 = vld [vmem:[#allocation2 + $0xa4] sm:$0xc]  ;;  %v7654_v63 = vld [vmem:[#allocation2 + $0xa8] sm:$0xf] }
 0x20d   : > { %5112 = vrot.lane.b32.xlu1 %v10053_v11, %s7747_s20  ;;  %vm2722_vm7 = vcmp.ge.f32.partialorder %v2598_v14, 0.0  ;;  %v2755_v51 = vmul.f32 %v10051_v21, %v2598_v14  ;;  %12340 = vst [vmem:[#allocation102_spill] sm:$0xff] %v10098_v28  ;;  %vm1148_vm9 = vcmp.ge.f32.partialorder %v10048_v35, 0.0  ;;  %v1181_v59 = vmul.f32 %v9850_v2, %v10048_v35  ;;  %v10126_v2 = vld [vmem:[%s8035_s24 + $0x10] sm:$0xf] }
 0x20e   : > { %v10088_v48 = vpop.permute.xlu0 %3598  ;;  %v10100_v10 = vsel %vm2724_vm13, %v2606_v17, %v2757_v1  ;;  %v10109_v56 = vsel %vm2721_vm12, %v2595_v50, %v2754_v29  ;;  %v4564_v17 = vrot.slane %v7654_v63, 6  ;;  %v4402_v50 = vld [vmem:[#allocation2 + $0xb4] sm:$0xc]  ;;  %v7655_v29 = vld [vmem:[#allocation2 + $0xb8] sm:$0xf]  ;;  %v3350_v22 = vrot.slane %v7656_v6, 5 }
 0x20f   : > { %12341 = vst [vmem:[#allocation103_spill] sm:$0xff] %v10100_v10  ;;  %v10102_v44 = vpop.permute.xlu1 %2082  ;;  %12342 = vst [vmem:[#allocation104_spill] sm:$0xff] %v10109_v56  ;;  %v10113_v42 = vsel %vm2722_vm7, %v2598_v14, %v2755_v51  ;;  %v4571_v47 = vrot.slane %v7655_v29, 6  ;;  %v10123_v14 = vsel %vm1148_vm9, %v10048_v35, %v1181_v59  ;;  %v4403_v51 = vld [vmem:[#allocation2 + $0xbc] sm:$0x3]  ;;  %v3357_v18 = vrot.slane %v7657_v32, 5 }
 0x210   : > { %4944 = vrot.lane.b32.xlu0 %v7565_v61, %s7742_s27  ;;  %12343 = vst [vmem:[#allocation105_spill] sm:$0xff] %v10113_v42  ;;  %v4401_v61 = vld [vmem:[#allocation2 + $0xac] sm:$0x3]  ;;  %12344 = vst [vmem:[#allocation106_spill] sm:$0xff] %v10123_v14  ;;  %v2858_v63 = vld [vmem:[#allocation2 + $0x160] sm:$0xe]  ;;  %v5736_v28 = vadd.f32 %v5735_v0, %v10019_v19 }
 0x211   : > { %4880 = vrot.lane.b32.xlu1 %v6922_v30, %s7741_s26  ;;  %v7659_v10 = vld [vmem:[%s8035_s24 + $0x8] sm:$0xf]  ;;  %v2860_v35 = vld [vmem:[#allocation2 + $0x170] sm:$0xe]  ;;  %v2861_v59 = vld [vmem:[#allocation2 + $0x178] sm:$0x1] }
 0x212   : > { %v10118_v1 = vpop.permute.xlu0 %2158  ;;  %v5704_v56 = vunpack.c.l.bf16 %v7659_v10  ;;  %v2859_v6 = vld [vmem:[#allocation2 + $0x168] sm:$0x1]  ;;  %v6880_v14 = vrot.slane %v4400_v45, 10  ;;  %v4566_v42 = vrot.slane %v4564_v17, 4  ;;  %v4567_v32 = vrot.slane %v4401_v61, 6  ;;  %v12351_v45 = vld [vmem:[#allocation41_spill] sm:$0xff] }
 0x213   : > { %v10131_v29 = vpop.permute.xlu1 %3596  ;;  %v6881_v9 = vrot.slane %v4402_v50, 10  ;;  %v10135_v11 = vld [vmem:[#allocation2 + $0x168] sm:$0xf]  ;;  %v4573_v0 = vrot.slane %v4571_v47, 4  ;;  %v4574_v10 = vrot.slane %v4403_v51, 6  ;;  %v6784_v30 = vrot.slane %v2858_v63, 9 }
 0x214   : > { %3608 = vrot.lane.b32.xlu0 %v9646_v31, %s7742_s27  ;;  %12345 = vst [vmem:[#allocation107_spill] sm:$0xff] %v10135_v11  ;;  %v3352_v13 = vrot.slane %v3350_v22, 4  ;;  %v3353_v27 = vrot.slane %v2859_v6, 5  ;;  %v6785_v31 = vrot.slane %v2860_v35, 9  ;;  %v3359_v3 = vrot.slane %v3357_v18, 4  ;;  %v12346_v61 = vld [vmem:[#allocation23_spill] sm:$0xff] }
 0x215   : > { %4882 = vrot.lane.b32.xlu1 %v6923_v40, %s7741_s26  ;;  %v3360_v49 = vrot.slane %v2861_v59, 5  ;;  %v12347_v50 = vld [vmem:[#allocation53_spill] sm:$0xff]  ;;  %v12349_v40 = vld [vmem:[#allocation54_spill] sm:$0xff]  ;;  %v3408_v63 = vrot.slane %v10135_v11, 5  ;;  %v5737_v6 = vsel %vm905_vm14, %v5704_v56, 0.0  ;;  %v4568_v11 = vsel %vm8361_vm11, %v4566_v42, %v4567_v32  ;;  %v12352_v32 = vld [vmem:[#allocation11_spill] sm:$0xff] }
 0x216   : > { %v10138_v19 = vpop.permute.xlu0 %2160  ;;  %v2246_v62 = vsel %vm905_vm14, %v12347_v50, %v12346_v61  ;;  %v2249_v36 = vsel %vm905_vm14, %v12349_v40, %v12348_v46  ;;  %v10152_v51 = vld [vmem:[#allocation2 + $0x100] sm:$0xff]   ;;  %v4565_v50 = vsel %vm8361_vm11, %v6880_v14, %v4564_v17  ;;  %v2928_v40 = vld [vmem:[#allocation2 + $0x16c] sm:$0x1]  ;;  %v4572_v56 = vsel %vm8361_vm11, %v6881_v9, %v4571_v47  ;;  %v10186_v9 = vld [vmem:[#allocation2 + $0x178] sm:$0xf] }
 0x217   : > { %v2121_v4 = vpop.permute.xlu1 %2120  ;;  %v12350_v35 = vld [vmem:[#allocation34_spill] sm:$0xff]  ;;  %v2282_v61 = vsel %vm2250_vm15, %v2249_v36, %v12351_v45  ;;  %v3351_v36 = vsel %vm8052_vm8, %v6784_v30, %v3350_v22  ;;  %v10180_v14 = vsel %vm8052_vm8, %v6785_v31, %v3357_v18  ;;  %v10184_v42 = vsel %vm8052_vm8, %v3359_v3, %v3360_v49  ;;  %v12354_v3 = vld [vmem:[#allocation17_spill] sm:$0xff] }
 0x218   : > { %3610 = vrot.lane.b32.xlu0 %v9676_v54, %s7742_s27  ;;  %v2280_v59 = vsel %vm2250_vm15, %v2246_v62, %v12350_v35  ;;  %v2926_v46 = vld [vmem:[#allocation2 + $0x164] sm:$0xe]  ;;  %v4575_v62 = vsel %vm8361_vm11, %v4573_v0, %v4574_v10  ;;  %v2315_v17 = vsel %vm2283_vm0, %v2282_v61, %v10040_v20  ;;  %v10192_v20 = vld [vmem:[#allocation2 + $0x110] sm:$0xff]   ;;  %v3411_v30 = vrot.slane %v2928_v40, 5 }
 0x219   : > { %3564 = vrot.lane.b32.xlu1 %v12278_v24, %s7741_s26  ;;  %v3354_v24 = vsel %vm8052_vm8, %v3352_v13, %v3353_v27  ;;  %v2313_v47 = vsel %vm2283_vm0, %v2280_v59, %v10011_v25  ;;  %v6790_v27 = vrot.slane %v2926_v46, 9  ;;  %v3410_v13 = vrot.slane %v3408_v63, 4  ;;  %v12353_v0 = vld [vmem:[#allocation52_spill] sm:$0xff]  ;;  %v12355_v10 = vld [vmem:[#allocation50_spill] sm:$0xff]  ;;  %v10202_v25 = vld [vmem:[#allocation2 + $0x108] sm:$0xf] }
 0x21a   : > { %v10164_v54 = vpop.permute.xlu0 %3642  ;;  %v10194_v18 = vadd.f32 %v5737_v6, %v5736_v28  ;;  %v3773_v49 = vsel %vm905_vm14, %v12353_v0, %v12352_v32  ;;  %v3775_v31 = vsel %vm905_vm14, %v12355_v10, %v12354_v3  ;;  %v12137_v45 = vrot.slane %v10202_v25, 6  ;;  %v10213_v61 = vld [vmem:[#allocation2 + $0x104] sm:$0xc]  ;;  %v10215_v46 = vld [vmem:[#allocation2 + $0x10c] sm:$0x3] }
 0x21b   : > { %v2123_v22 = vpop.permute.xlu1 %2122  ;;  %v2348_v35 = vsel %vm2316_vm1, %v2315_v17, %v10000_v34  ;;  %v10209_v28 = vcombine.low %v4565_v50, %v4568_v11  ;;  %v10211_v59 = vcombine.low %v4572_v56, %v4575_v62  ;;  %v3415_v40 = vrot.slane %v10186_v9, 5  ;;  %v2929_v11 = vld [vmem:[#allocation2 + $0x174] sm:$0xe] }
 0x21c   : > { %5054 = vrot.lane.b32.xlu0 %v10152_v51, %s7745_s22  ;;  %v2346_v0 = vsel %vm2316_vm1, %v2313_v47, %v9975_v52  ;;  %v2381_v17 = vsel %vm2349_vm2, %v2348_v35, %v10059_v23  ;;  %v6836_v10 = vcombine.low %v3351_v36, %v3354_v24  ;;  %v10233_v47 = vsel %vm8052_vm8, %v6790_v27, %v3408_v63  ;;  %v2931_v36 = vld [vmem:[#allocation2 + $0x17c] sm:$0x1] }
 0x21d   : > { %3566 = vrot.lane.b32.xlu1 %v12279_v41, %s7741_s26  ;;  %v6837_v41 = vcombine.low %v10180_v14, %v10184_v42  ;;  %v2379_v50 = vsel %vm2349_vm2, %v2346_v0, %v10102_v44  ;;  %v2414_v56 = vsel %vm2382_vm3, %v2381_v17, %v2123_v22  ;;  %v10237_v23 = vsel %vm8052_vm8, %v3410_v13, %v3411_v30  ;;  %v10249_v13 = vld [vmem:[#allocation2 + $0x118] sm:$0xf] }
 0x21e   : > { %v2201_v6 = vpop.permute.xlu0 %2200  ;;  %v2412_v24 = vsel %vm2382_vm3, %v2379_v50, %v2121_v4  ;;  %v6886_v44 = vrot.slane %v10213_v61, 10  ;;  %v4620_v42 = vrot.slane %v12137_v45, 4  ;;  %v4621_v22 = vrot.slane %v10215_v46, 6 }
 0x21f   : > { %v10227_v62 = vpop.permute.xlu1 %3640  ;;  %v7138_v14 = vpop.f32.mrb[4].mxu1  ;;  %v6791_v30 = vrot.slane %v2929_v11, 9  ;;  %v3417_v0 = vrot.slane %v3415_v40, 4  ;;  %v2447_v46 = vsel %vm2415_vm4, %v2414_v56, %v10138_v19  ;;  %v6842_v50 = vcombine.low %v10233_v47, %v10237_v23 }
 0x220   : > { %5056 = vrot.lane.b32.xlu0 %v10192_v20, %s7745_s22  ;;  %v2619_v35 = vadd.f32 %v7138_v14, %v10036_v43  ;;  %v2610_v63 = vpop.f32.mrb[5].mxu1  ;;  %v3418_v14 = vrot.slane %v2931_v36, 5  ;;  %v2445_v4 = vsel %vm2415_vm4, %v2412_v24, %v10118_v1  ;;  %v2480_v11 = vsel %vm12140_vm5, %v2447_v46, %v2201_v6  ;;  %v4414_v24 = vld [vmem:[#allocation2 + $0x114] sm:$0xc] }
 0x221   : > { %4992 = vrot.lane.b32.xlu1 %v10209_v28, %s7744_s19  ;;  %v2611_v61 = vadd.f32 %v10036_v43, %v2610_v63  ;;  %v7139_v17 = vpop.f32.mrb[6].mxu1  ;;  %vm12356_vm12 = vcmask 588800   ;;  %v3805_v36 = vsel %vm2250_vm15, %v3773_v49, %v10077_v5 }
 0x222   : > { %v10247_v27 = vpop.permute.xlu0 %4820  ;;  %v2760_v45 = vmul.f32 %v10051_v21, %v2619_v35  ;;  %v2622_v3 = vadd.f32 %v7139_v17, %v10036_v43  ;;  %v2613_v34 = vpop.f32.mrb[7].mxu1  ;;  %vm2727_vm13 = vcmp.ge.f32.partialorder %v2619_v35, 0.0 }
 0x223   : > { %v2199_v32 = vpop.permute.xlu1 %2198  ;;  %v2758_v56 = vmul.f32 %v10051_v21, %v2611_v61  ;;  %v2614_v47 = vadd.f32 %v10036_v43, %v2613_v34  ;;  %vm2725_vm7 = vcmp.ge.f32.partialorder %v2611_v61, 0.0  ;;  %v3807_v34 = vsel %vm2250_vm15, %v3775_v31, %v10029_v38  ;;  %v4415_v38 = vld [vmem:[#allocation2 + $0x11c] sm:$0x3] }
 0x224   : > { %3696 = vrot.lane.b32.xlu0 %v6836_v10, %s7745_s22  ;;  %v2478_v63 = vsel %vm12140_vm5, %v2445_v4, %v2199_v32  ;;  %vm2728_vm10 = vcmp.ge.f32.partialorder %v2622_v3, 0.0  ;;  %v2761_v23 = vmul.f32 %v10051_v21, %v2622_v3  ;;  %v3416_v10 = vsel %vm8052_vm8, %v6791_v30, %v3415_v40  ;;  %vm12357_vm5 = vmmov %vm12356_vm12 }
 0x225   : > { %4994 = vrot.lane.b32.xlu1 %v10211_v59, %s7744_s19  ;;  %7160 = vmatprep.mubr.msk.bf16.mxu1 %vm12356_vm12, %v2478_v63  ;;  %vm2726_vm9 = vcmp.ge.f32.partialorder %v2614_v47, 0.0  ;;  %v2759_v32 = vmul.f32 %v10051_v21, %v2614_v47  ;;  %v3837_v4 = vsel %vm2283_vm0, %v3805_v36, %v10131_v29  ;;  %v3839_v17 = vsel %vm2283_vm0, %v3807_v34, %v10088_v48 }
 0x226   : > { %v10270_v6 = vpop.permute.xlu0 %4822  ;;  %7161 = vmatmul.mubr.msk.bf16.gmra.mrb[28].mxu1 %vm12357_vm5, %v2480_v11  ;;  %v10285_v40 = vsel %vm2727_vm13, %v2619_v35, %v2760_v45  ;;  %v10287_v30 = vsel %vm2728_vm10, %v2622_v3, %v2761_v23  ;;  %v10291_v49 = vsel %vm2725_vm7, %v2611_v61, %v2758_v56  ;;  %v3419_v48 = vsel %vm8052_vm8, %v3417_v0, %v3418_v14  ;;  %v12363_v11 = vld [vmem:[#allocation58_spill] sm:$0xff]  ;;  %v12364_v0 = vld [vmem:[#allocation28_spill] sm:$0xff]  ;;  %vm12371_vm7 = vmmov %vm12356_vm12 }
 0x227   : > { %12358 = vst [vmem:[#allocation23_spill] sm:$0xff] %v10285_v40  ;;  %12359 = vst [vmem:[#allocation53_spill] sm:$0xff] %v10287_v30  ;;  %v3685_v5 = vpop.permute.xlu1 %3684  ;;  %v10295_v46 = vsel %vm2726_vm9, %v2614_v47, %v2759_v32  ;;  %v12362_v45 = vrot.slane %v10202_v25, 6  ;;  %v4622_v35 = vsel %vm8361_vm11, %v4620_v42, %v4621_v22  ;;  %v6887_v61 = vrot.slane %v4414_v24, 10 }
 0x228   : > { %3698 = vrot.lane.b32.xlu0 %v6837_v41, %s7745_s22  ;;  %12360 = vst [vmem:[#allocation27_spill] sm:$0xff] %v10291_v49  ;;  %12361 = vst [vmem:[#allocation54_spill] sm:$0xff] %v10295_v46  ;;  %v3862_v56 = vsel %vm2316_vm1, %v3837_v4, %v12363_v11  ;;  %v3863_v14 = vsel %vm2316_vm1, %v3839_v17, %v12364_v0  ;;  %v12365_v63 = vrot.slane %v10249_v13, 6  ;;  %v12366_v23 = vunpack.c.l.bf16 %v10141_v55  ;;  %v7663_v17 = vld [vmem:[%s8035_s24 + $0x14] sm:$0xf]  ;;  %v7568_v49 = vld [vmem:[#allocation2] sm:$0xff]  }
 0x229   : > { %3652 = vrot.lane.b32.xlu1 %v9705_v12, %s7744_s19  ;;  %v4619_v41 = vsel %vm8361_vm11, %v6886_v44, %v12362_v45  ;;  %v4628_v12 = vrot.slane %v4415_v38, 6  ;;  %v3885_v44 = vsel %vm2349_vm2, %v3862_v56, %v10227_v62  ;;  %v3887_v42 = vsel %vm2349_vm2, %v3863_v14, %v10164_v54  ;;  %vm12372_vm10 = vmmov %vm12371_vm7  ;;  %v4419_v46 = vld [vmem:[#allocation2 + $0x13c] sm:$0x3] }
 0x22a   : > { %v3741_v3 = vpop.permute.xlu0 %3740  ;;  %v4627_v47 = vrot.slane %v12365_v63, 4  ;;  %v5739_v25 = vsel %vm905_vm14, %v12366_v23, 0.0  ;;  %v6843_v36 = vcombine.low %v3416_v10, %v3419_v48  ;;  %v3917_v34 = vsel %vm2382_vm3, %v3885_v44, %v3685_v5  ;;  %v7666_v44 = vld [vmem:[%s8035_s24 + $0x20] sm:$0xf] }
 0x22b   : > { %v3687_v22 = vpop.permute.xlu1 %3686  ;;  %v10327_v55 = vcombine.low %v4619_v41, %v4622_v35  ;;  %v5740_v62 = vadd.f32 %v5739_v25, %v10194_v18  ;;  %v12367_v4 = vmov %v12365_v63  ;;  %v12368_v5 = vunpack.c.l.bf16 %v10126_v2  ;;  %v7665_v63 = vld [vmem:[#allocation2 + $0xc0] sm:$0xff]  }
 0x22c   : > { %3750 = vrot.lane.b32.xlu0 %v6842_v50, %s7747_s20  ;;  %v3919_v32 = vsel %vm2382_vm3, %v3887_v42, %v3687_v22  ;;  %v4626_v50 = vsel %vm8361_vm11, %v6887_v61, %v12367_v4  ;;  %v4629_v10 = vsel %vm8361_vm11, %v4627_v47, %v4628_v12  ;;  %v3942_v18 = vsel %vm2415_vm4, %v3917_v34, %v9352_v58  ;;  %v5805_v47 = vld [vmem:[%s12019_s10] sm:$0xf]  ;;  %v10365_v12 = vld [vmem:[#allocation2 + $0x184] sm:$0xf]  ;;  %v7668_v4 = vld [vmem:[#allocation2 + $0xd0] sm:$0xff]  }
 0x22d   : > { %3654 = vrot.lane.b32.xlu1 %v9723_v37, %s7744_s19  ;;  %v3943_v54 = vsel %vm2415_vm4, %v3919_v32, %v9363_v8  ;;  %v5707_v37 = vunpack.c.l.bf16 %v7663_v17  ;;  %v5741_v38 = vsel %vm905_vm14, %v12368_v5, 0.0  ;;  %vm12369_vm5 = vcmask 523264   ;;  %v7669_v5 = vld [vmem:[%s8035_s24 + $0x24] sm:$0xf] }
 0x22e   : > { %v10329_v24 = vpop.permute.xlu0 %4934  ;;  %v3969_v45 = vsel %vm12369_vm5, %v3943_v54, %v3741_v3  ;;  %vm12370_vm13 = vmmov %vm12369_vm5  ;;  %v10352_v41 = vcombine.low %v4626_v50, %v4629_v10  ;;  %v5742_v35 = vadd.f32 %v5741_v38, %v5740_v62  ;;  %v7664_v3 = vld [vmem:[%s8035_s24 + $0x18] sm:$0xf]  ;;  %v12141_v23 = vmov 0.0   ;;  %v10379_v50 = vld [vmem:[#allocation2 + $0x180] sm:$0xe] }
 0x22f   : > { %v3739_v48 = vpop.permute.xlu1 %3738  ;;  %v5743_v61 = vsel %vm905_vm14, %v5707_v37, 0.0  ;;  %v5708_v56 = vunpack.c.l.bf16 %v7664_v3  ;;  %7248 = vmatprep.subr.bf16.mxu0 %v12141_v23  ;;  %vm12373_vm12 = vcmask 1043456   ;;  %v5710_v42 = vunpack.c.l.bf16 %v7666_v44  ;;  %v10382_v37 = vld [vmem:[#allocation2 + $0x194] sm:$0xf] }
 0x230   : > { %3752 = vrot.lane.b32.xlu0 %v6843_v36, %s7747_s20  ;;  %v3967_v13 = vsel %vm12370_vm13, %v3942_v18, %v3739_v48  ;;  %v5811_v25 = vsel %vm12373_vm12, %v5805_v47, 0  ;;  %v7667_v36 = vld [vmem:[%s8035_s24 + $0x1c] sm:$0xf]  ;;  %v5744_v32 = vadd.f32 %v5743_v61, %v5742_v35  ;;  %v12142_v10 = vrot.slane %v10365_v12, 5  ;;  %v10391_v35 = vld [vmem:[#allocation2 + $0x188] sm:$0x1] }
 0x231   : > { %5114 = vrot.lane.b32.xlu1 %v10327_v55, %s7747_s20  ;;  %7186 = vmatprep.mubr.msk.bf16.mxu0 %vm12371_vm7, %v3967_v13  ;;  %v5709_v34 = vunpack.c.l.bf16 %v7667_v36  ;;  %v5745_v62 = vsel %vm905_vm14, %v5708_v56, 0.0  ;;  %v5711_v38 = vunpack.c.l.bf16 %v7669_v5  ;;  %v5749_v48 = vsel %vm905_vm14, %v5710_v42, 0.0  ;;  %v2865_v5 = vld [vmem:[#allocation2 + $0x198] sm:$0x1] }
 0x232   : > { %v10354_v2 = vpop.permute.xlu0 %4936  ;;  %7187 = vmatmul.mubr.msk.bf16.gmra.mrb[44].mxu0 %vm12372_vm10, %v3969_v45  ;;  %v5746_v61 = vadd.f32 %v5745_v62, %v5744_v32  ;;  %v6786_v47 = vrot.slane %v10379_v50, 9  ;;  %v3366_v36 = vrot.slane %v12142_v10, 4  ;;  %v2864_v32 = vld [vmem:[#allocation2 + $0x190] sm:$0xe]  ;;  %v3367_v50 = vrot.slane %v10391_v35, 5 }
 0x233   : > { %v10359_v14 = vpop.permute.xlu1 %4872  ;;  %7249 = vmatpush3.bf16.msra.mxu0 %v5811_v25  ;;  %v5747_v3 = vsel %vm905_vm14, %v5709_v34, 0.0  ;;  %v3371_v34 = vrot.slane %v10382_v37, 5  ;;  %v6787_v23 = vrot.slane %v2864_v32, 9  ;;  %v4417_v10 = vld [vmem:[#allocation2 + $0x12c] sm:$0x3]  ;;  %v5751_v11 = vsel %vm905_vm14, %v5711_v38, 0.0 }
 0x234   : > { %4946 = vrot.lane.b32.xlu0 %v7665_v63, %s7742_s27  ;;  %v5748_v31 = vadd.f32 %v5747_v3, %v5746_v61  ;;  %v7671_v61 = vld [vmem:[#allocation2 + $0x138] sm:$0xf]  ;;  %vm12390_vm10 = vcmask 523264   ;;  %vm12391_vm12 = vcmask 588800  }
 0x235   : > { %5116 = vrot.lane.b32.xlu1 %v10352_v41, %s7747_s20  ;;  %v4639_v3 = vrot.slane %v7671_v61, 6 }
 0x236   : > { %v10372_v22 = vpop.permute.xlu0 %3600 }
 0x237   : > { %v10376_v54 = vpop.permute.xlu1 %4874  ;;  %v7142_v17 = vpop.f32.mrb[8].mxu1 }
 0x238   : > { %4948 = vrot.lane.b32.xlu0 %v7668_v4, %s7742_s27  ;;  %v2635_v18 = vadd.f32 %v7142_v17, %v10036_v43  ;;  %v2626_v45 = vpop.f32.mrb[9].mxu1 }
 0x239   : > { %4884 = vrot.lane.b32.xlu1 %v9637_v39, %s7741_s26  ;;  %v2627_v56 = vadd.f32 %v10036_v43, %v2626_v45  ;;  %v7143_v63 = vpop.f32.mrb[10].mxu1  ;;  %v7670_v45 = vld [vmem:[#allocation2 + $0x128] sm:$0xf] }
 0x23a   : > { %v10389_v13 = vpop.permute.xlu0 %3602  ;;  %v2764_v25 = vmul.f32 %v10051_v21, %v2635_v18  ;;  %v2638_v44 = vadd.f32 %v7143_v63, %v10036_v43  ;;  %v2629_v39 = vpop.f32.mrb[11].mxu1  ;;  %vm2731_vm9 = vcmp.ge.f32.partialorder %v2635_v18, 0.0  ;;  %v4632_v63 = vrot.slane %v7670_v45, 6 }
 0x23b   : > { %v10398_v42 = vpop.permute.xlu1 %3556  ;;  %v2762_v62 = vmul.f32 %v10051_v21, %v2627_v56  ;;  %v2630_v4 = vadd.f32 %v10036_v43, %v2629_v39  ;;  %vm2729_vm5 = vcmp.ge.f32.partialorder %v2627_v56, 0.0  ;;  %v4416_v39 = vld [vmem:[#allocation2 + $0x124] sm:$0xc]  ;;  %v3373_v45 = vrot.slane %v3371_v34, 4 }
 0x23c   : > { %3612 = vrot.lane.b32.xlu0 %v9847_v53, %s7742_s27  ;;  %vm2732_vm13 = vcmp.ge.f32.partialorder %v2638_v44, 0.0  ;;  %v2765_v17 = vmul.f32 %v10051_v21, %v2638_v44  ;;  %v10415_v35 = vsel %vm2731_vm9, %v2635_v18, %v2764_v25  ;;  %v6888_v52 = vrot.slane %v4416_v39, 10  ;;  %v10441_v18 = vld [vmem:[%s8035_s24 + $0x28] sm:$0xf]  ;;  %vm12395_vm9 = vmmov %vm12390_vm10 }
 0x23d   : > { %4886 = vrot.lane.b32.xlu1 %v9669_v60, %s7741_s26  ;;  %vm2730_vm7 = vcmp.ge.f32.partialorder %v2630_v4, 0.0  ;;  %v2763_v29 = vmul.f32 %v10051_v21, %v2630_v4  ;;  %12374 = vst [vmem:[#allocation34_spill] sm:$0xff] %v10415_v35  ;;  %v10423_v60 = vld [vmem:[#allocation2 + $0x120] sm:$0xff]   ;;  %v10426_v32 = vsel %vm2729_vm5, %v2627_v56, %v2762_v62  ;;  %v4634_v56 = vrot.slane %v4632_v63, 4 }
 0x23e   : > { %v10411_v53 = vpop.permute.xlu0 %5046  ;;  %v10417_v40 = vsel %vm2732_vm13, %v2638_v44, %v2765_v17  ;;  %12376 = vst [vmem:[#allocation52_spill] sm:$0xff] %v10426_v32  ;;  %v3374_v44 = vrot.slane %v2865_v5, 5  ;;  %v4418_v17 = vld [vmem:[#allocation2 + $0x134] sm:$0xc]  ;;  %v4635_v62 = vrot.slane %v4417_v10, 6  ;;  %v12378_v5 = vrot.slane %v10365_v12, 5  ;;  %vm12396_vm13 = vmmov %vm12395_vm9 }
 0x23f   : > { %12375 = vst [vmem:[#allocation41_spill] sm:$0xff] %v10417_v40  ;;  %v10419_v30 = vpop.permute.xlu1 %3558  ;;  %v10431_v25 = vsel %vm2730_vm7, %v2630_v4, %v2763_v29  ;;  %v5750_v4 = vadd.f32 %v5749_v48, %v5748_v31  ;;  %v3368_v10 = vsel %vm8052_vm8, %v3366_v36, %v3367_v50  ;;  %v6889_v38 = vrot.slane %v4418_v17, 10  ;;  %v10454_v32 = vld [vmem:[#allocation2 + $0x188] sm:$0xf]  ;;  %v7569_v48 = vld [vmem:[#allocation2 + $0x10] sm:$0xff]   ;;  %v12379_v29 = vld [vmem:[#allocation13_spill] sm:$0xff] }
 0x240   : > { %3614 = vrot.lane.b32.xlu0 %v9948_v16, %s7742_s27  ;;  %12377 = vst [vmem:[#allocation50_spill] sm:$0xff] %v10431_v25  ;;  %v3365_v16 = vsel %vm8052_vm8, %v6786_v47, %v12378_v5  ;;  %v4641_v39 = vrot.slane %v4639_v3, 4  ;;  %v4642_v40 = vrot.slane %v4419_v46, 6  ;;  %v5140_v31 = vsel %vm905_vm14, %v7568_v49, %v10247_v27  ;;  %v12380_v47 = vld [vmem:[#allocation47_spill] sm:$0xff] }
 0x241   : > { %3568 = vrot.lane.b32.xlu1 %v9540_v33, %s7741_s26  ;;  %v10450_v33 = vld [vmem:[#allocation2 + $0x130] sm:$0xff]   ;;  %v3777_v5 = vsel %vm905_vm14, %v12380_v47, %v12379_v29  ;;  %v10463_v25 = vsel %vm8052_vm8, %v6787_v23, %v3371_v34  ;;  %v10467_v36 = vsel %vm8052_vm8, %v3373_v45, %v3374_v44  ;;  %v5173_v46 = vsel %vm2250_vm15, %v5140_v31, %v10359_v14  ;;  %v1328_v31 = vld [vmem:[#allocation2 + $0x180] sm:$0x8]  ;;  %v2932_v47 = vld [vmem:[#allocation2 + $0x184] sm:$0xe] }
 0x242   : > { %v10437_v61 = vpop.permute.xlu0 %5048  ;;  %v3809_v50 = vsel %vm2250_vm15, %v3777_v5, %v10398_v42  ;;  %v4633_v49 = vsel %vm8361_vm11, %v6888_v52, %v4632_v63  ;;  %v4636_v23 = vsel %vm8361_vm11, %v4634_v56, %v4635_v62  ;;  %v10479_v34 = vadd.f32 %v5751_v11, %v5750_v4  ;;  %v12381_v45 = vld [vmem:[#allocation20_spill] sm:$0xff]  ;;  %v10494_v56 = vld [vmem:[#allocation2 + $0x198] sm:$0xf] }
 0x243   : > { %v4985_v35 = vpop.permute.xlu1 %4984  ;;  %v12382_v44 = vld [vmem:[#allocation48_spill] sm:$0xff]  ;;  %v6838_v14 = vcombine.low %v3365_v16, %v3368_v10  ;;  %v3422_v42 = vrot.slane %v10454_v32, 5  ;;  %v4640_v52 = vsel %vm8361_vm11, %v6889_v38, %v4639_v3  ;;  %v4643_v11 = vsel %vm8361_vm11, %v4641_v39, %v4642_v40  ;;  %v2934_v16 = vld [vmem:[#allocation2 + $0x18c] sm:$0x1]  ;;  %v1330_v3 = vld [vmem:[#allocation2 + $0x188] sm:$0x7] }
 0x244   : > { %5058 = vrot.lane.b32.xlu0 %v10423_v60, %s7745_s22  ;;  %v3779_v17 = vsel %vm905_vm14, %v12382_v44, %v12381_v45  ;;  %v3382_v63 = vrot.slane %v10365_v12, 7  ;;  %v5143_v62 = vsel %vm905_vm14, %v7569_v48, %v10270_v6  ;;  %v5205_v4 = vsel %vm2283_vm0, %v5173_v46, %v10329_v24  ;;  %v7682_v45 = vld [vmem:[#allocation2 + $0xf0] sm:$0xff]  }
 0x245   : > { %3570 = vrot.lane.b32.xlu1 %v9518_v7, %s7741_s26  ;;  %v6839_v7 = vcombine.low %v10463_v25, %v10467_v36  ;;  %v3841_v25 = vsel %vm2283_vm0, %v3809_v50, %v10372_v22  ;;  %v10502_v10 = vcombine.low %v4633_v49, %v4636_v23  ;;  %v5175_v40 = vsel %vm2250_vm15, %v5143_v62, %v10376_v54  ;;  %v2935_v22 = vld [vmem:[#allocation2 + $0x194] sm:$0xe]  ;;  %v12383_v50 = vld [vmem:[#allocation37_spill] sm:$0xff] }
 0x246   : > { %v3689_v27 = vpop.permute.xlu0 %3688  ;;  %v3811_v12 = vsel %vm2250_vm15, %v3779_v17, %v10419_v30  ;;  %v6788_v6 = vrot.slane %v1328_v31, 11  ;;  %v6792_v39 = vrot.slane %v2932_v47, 9  ;;  %v10510_v48 = vcombine.low %v4640_v52, %v4643_v11  ;;  %v12384_v23 = vld [vmem:[#allocation64_spill] sm:$0xff]  ;;  %v2937_v31 = vld [vmem:[#allocation2 + $0x19c] sm:$0x1] }
 0x247   : > { %v4987_v5 = vpop.permute.xlu1 %4986  ;;  %v3424_v24 = vrot.slane %v3422_v42, 4  ;;  %v3425_v36 = vrot.slane %v2934_v16, 5  ;;  %v3429_v46 = vrot.slane %v10494_v56, 5  ;;  %v5236_v49 = vsel %vm2316_vm1, %v5205_v4, %v12383_v50  ;;  %v12385_v4 = vld [vmem:[#allocation63_spill] sm:$0xff]  ;;  %v12387_v50 = vld [vmem:[#allocation68_spill] sm:$0xff] }
 0x248   : > { %5060 = vrot.lane.b32.xlu0 %v10450_v33, %s7745_s22  ;;  %v3864_v30 = vsel %vm2316_vm1, %v3841_v25, %v12384_v23  ;;  %v3384_v44 = vrot.slane %v3382_v63, 4  ;;  %v3385_v17 = vrot.slane %v1330_v3, 7  ;;  %v5207_v47 = vsel %vm2283_vm0, %v5175_v40, %v10354_v2 }
 0x249   : > { %4996 = vrot.lane.b32.xlu1 %v9727_v26, %s7744_s19  ;;  %v3843_v52 = vsel %vm2283_vm0, %v3811_v12, %v10389_v13  ;;  %v5253_v11 = vsel %vm2349_vm2, %v5236_v49, %v4985_v35  ;;  %v10529_v3 = vsel %vm8039_vm6, %v6788_v6, %v3382_v63  ;;  %v3423_v2 = vsel %vm8052_vm8, %v6792_v39, %v3422_v42  ;;  %v12389_v6 = vld [vmem:[#allocation61_spill] sm:$0xff] }
 0x24a   : > { %v3691_v38 = vpop.permute.xlu0 %3690  ;;  %v6793_v40 = vrot.slane %v2935_v22, 9  ;;  %v3426_v35 = vsel %vm8052_vm8, %v3424_v24, %v3425_v36  ;;  %v3431_v12 = vrot.slane %v3429_v46, 4  ;;  %v5285_v49 = vsel %vm2382_vm3, %v5253_v11, %v10411_v53 }
 0x24b   : > { %v3645_v54 = vpop.permute.xlu1 %3644  ;;  %v10550_v53 = vsel %vm8039_vm6, %v3384_v44, %v3385_v17  ;;  %v3389_v22 = vrot.slane %v10382_v37, 7  ;;  %v6844_v11 = vcombine.low %v3423_v2, %v3426_v35  ;;  %v12393_v44 = vld [vmem:[#allocation55_spill] sm:$0xff]  ;;  %v12394_v37 = vld [vmem:[#allocation69_spill] sm:$0xff] }
 0x24c   : > { %3700 = vrot.lane.b32.xlu0 %v6838_v14, %s7745_s22  ;;  %v3889_v16 = vsel %vm2349_vm2, %v3864_v30, %v3645_v54  ;;  %v12388_v54 = vld [vmem:[#allocation44_spill] sm:$0xff]  ;;  %v5316_v17 = vsel %vm2415_vm4, %v5285_v49, %v12393_v44  ;;  %v1333_v49 = vld [vmem:[#allocation2 + $0x198] sm:$0x7] }
 0x24d   : > { %v3921_v62 = vsel %vm2382_vm3, %v3889_v16, %v3689_v27  ;;  %4998 = vrot.lane.b32.xlu1 %v12385_v4, %s7744_s19  ;;  %v3432_v27 = vrot.slane %v2937_v31, 5  ;;  %v5237_v30 = vsel %vm2316_vm1, %v5207_v47, %v12388_v54  ;;  %v3865_v16 = vsel %vm2316_vm1, %v3843_v52, %v12389_v6  ;;  %v12392_v52 = vld [vmem:[#allocation94_spill] sm:$0xff]  ;;  %v1331_v54 = vld [vmem:[#allocation2 + $0x190] sm:$0x8] }
 0x24e   : > { %v3743_v25 = vpop.permute.xlu0 %3742  ;;  %v3944_v13 = vsel %vm2415_vm4, %v3921_v62, %v12387_v50  ;;  %v5255_v39 = vsel %vm2349_vm2, %v5237_v30, %v4987_v5  ;;  %v3430_v62 = vsel %vm8052_vm8, %v6793_v40, %v3429_v46 }
 0x24f   : > { %v3647_v63 = vpop.permute.xlu1 %3646  ;;  %v3971_v42 = vsel %vm12390_vm10, %v3944_v13, %v3743_v25  ;;  %v7146_v36 = vpop.f32.mrb[12].mxu1  ;;  %v3433_v30 = vsel %vm8052_vm8, %v3431_v12, %v3432_v27  ;;  %vm12397_vm8 = vmmov %vm12391_vm12  ;;  %v12398_v27 = vld [vmem:[#allocation96_spill] sm:$0xff] }
 0x250   : > { %3702 = vrot.lane.b32.xlu0 %v6839_v7, %s7745_s22  ;;  %v3891_v24 = vsel %vm2349_vm2, %v3865_v16, %v3647_v63  ;;  %7190 = vmatprep.mubr.msk.bf16.mxu0 %vm12391_vm12, %v3971_v42  ;;  %v2651_v47 = vadd.f32 %v7146_v36, %v10036_v43  ;;  %v2642_v7 = vpop.f32.mrb[13].mxu1  ;;  %v5287_v63 = vsel %vm2382_vm3, %v5255_v39, %v10437_v61  ;;  %vm12399_vm12 = vmmov %vm12397_vm8 }
 0x251   : > { %v3923_v31 = vsel %vm2382_vm3, %v3891_v24, %v3691_v38  ;;  %3656 = vrot.lane.b32.xlu1 %v12392_v52, %s7744_s19  ;;  %v2643_v25 = vadd.f32 %v10036_v43, %v2642_v7  ;;  %v7147_v13 = vpop.f32.mrb[14].mxu1  ;;  %v6789_v24 = vrot.slane %v1331_v54, 11 }
 0x252   : > { %v3745_v5 = vpop.permute.xlu0 %3744  ;;  %v3945_v38 = vsel %vm2415_vm4, %v3923_v31, %v12394_v37  ;;  %v2768_v2 = vmul.f32 %v10051_v21, %v2651_v47  ;;  %v2654_v46 = vadd.f32 %v7147_v13, %v10036_v43  ;;  %v2645_v35 = vpop.f32.mrb[15].mxu1  ;;  %vm2735_vm5 = vcmp.ge.f32.partialorder %v2651_v47, 0.0  ;;  %v12402_v13 = vld [vmem:[#allocation59_spill] sm:$0xff] }
 0x253   : > { %v5107_v40 = vpop.permute.xlu1 %5106  ;;  %v3973_v16 = vsel %vm12395_vm9, %v3945_v38, %v3745_v5  ;;  %v2766_v42 = vmul.f32 %v10051_v21, %v2643_v25  ;;  %v2646_v12 = vadd.f32 %v10036_v43, %v2645_v35  ;;  %vm2733_vm7 = vcmp.ge.f32.partialorder %v2643_v25, 0.0 }
 0x254   : > { %5120 = vrot.lane.b32.xlu0 %v10510_v48, %s7747_s20  ;;  %v5335_v15 = vsel %vm12396_vm13, %v5316_v17, %v5107_v40  ;;  %7191 = vmatmul.mubr.msk.bf16.gmra.mrb[48].mxu0 %vm12397_vm8, %v3973_v16  ;;  %vm2736_vm10 = vcmp.ge.f32.partialorder %v2654_v46, 0.0  ;;  %v2769_v61 = vmul.f32 %v10051_v21, %v2654_v46  ;;  %v3391_v31 = vrot.slane %v3389_v22, 4 }
 0x255   : > { %3658 = vrot.lane.b32.xlu1 %v12398_v27, %s7744_s19  ;;  %7216 = vmatprep.mubr.msk.bf16.mxu1 %vm12399_vm12, %v5335_v15  ;;  %vm2734_vm9 = vcmp.ge.f32.partialorder %v2646_v12, 0.0  ;;  %v2767_v36 = vmul.f32 %v10051_v21, %v2646_v12  ;;  %v3392_v43 = vrot.slane %v1333_v49, 7  ;;  %v10585_v52 = vsel %vm2735_vm5, %v2651_v47, %v2768_v2  ;;  %v7673_v2 = vld [vmem:[%s8035_s24 + $0x2c] sm:$0xf]  ;;  %vm12406_vm5 = vmmov %vm12397_vm8  ;;  %v4420_v27 = vld [vmem:[#allocation2 + $0x144] sm:$0xc] }
 0x256   : > { %v10581_v39 = vpop.permute.xlu0 %4938  ;;  %12400 = vst [vmem:[#allocation28_spill] sm:$0xff] %v10585_v52  ;;  %v10587_v7 = vsel %vm2736_vm10, %v2654_v46, %v2769_v61  ;;  %v5317_v44 = vsel %vm2415_vm4, %v5287_v63, %v12402_v13  ;;  %v6845_v17 = vcombine.low %v3430_v62, %v3433_v30  ;;  %v10593_v38 = vsel %vm2733_vm7, %v2643_v25, %v2766_v42  ;;  %v7674_v42 = vld [vmem:[#allocation2 + $0x148] sm:$0xf]  ;;  %vm12423_vm8 = vmmov %vm12396_vm13 }
 0x257   : > { %12401 = vst [vmem:[#allocation47_spill] sm:$0xff] %v10587_v7  ;;  %v5109_v5 = vpop.permute.xlu1 %5108  ;;  %12403 = vst [vmem:[#allocation48_spill] sm:$0xff] %v10593_v38  ;;  %v10597_v40 = vsel %vm2734_vm9, %v2646_v12, %v2767_v36  ;;  %v5713_v46 = vunpack.c.l.bf16 %v7673_v2  ;;  %v12405_v35 = vunpack.c.l.bf16 %v10441_v18  ;;  %v6840_v62 = vcombine.low %v10529_v3, %v10550_v53  ;;  %v7675_v12 = vld [vmem:[%s8035_s24 + $0x30] sm:$0xf] }
 0x258   : > { %3754 = vrot.lane.b32.xlu0 %v6844_v11, %s7747_s20  ;;  %12404 = vst [vmem:[#allocation37_spill] sm:$0xff] %v10597_v40  ;;  %v5337_v47 = vsel %vm12396_vm13, %v5317_v44, %v5109_v5  ;;  %v3390_v30 = vsel %vm8039_vm6, %v6789_v24, %v3389_v22  ;;  %v3393_v18 = vsel %vm8039_vm6, %v3391_v31, %v3392_v43  ;;  %v4646_v15 = vrot.slane %v7674_v42, 6  ;;  %v4421_v24 = vld [vmem:[#allocation2 + $0x14c] sm:$0x3]  ;;  %v7676_v31 = vld [vmem:[#allocation2 + $0xe0] sm:$0xff]   ;;  %v12412_v38 = vld [vmem:[#allocation16_spill] sm:$0xff] }
 0x259   : > { %v5753_v63 = vsel %vm905_vm14, %v12405_v35, 0.0  ;;  %5118 = vrot.lane.b32.xlu1 %v10502_v10, %s7747_s20  ;;  %7217 = vmatmul.mubr.msk.bf16.vlgmr.msra.gmra.mrb[32].mxu1 %vm12406_vm5, %v5337_v47  ;;  %v5714_v61 = vunpack.c.l.bf16 %v7675_v12  ;;  %v5755_v3 = vsel %vm905_vm14, %v5713_v46, 0.0  ;;  %v6841_v53 = vcombine.low %v3390_v30, %v3393_v18  ;;  %v7677_v44 = vld [vmem:[%s8035_s24 + $0x34] sm:$0xf]  ;;  %v12407_v35 = vld [vmem:[#allocation97_spill] sm:$0xff]  ;;  %vm12424_vm7 = vmmov %vm12406_vm5 }
 0x25a   : > { %v10611_v25 = vpop.permute.xlu0 %4940  ;;  %v5754_v49 = vadd.f32 %v5753_v63, %v10479_v34  ;;  %v6890_v43 = vrot.slane %v4420_v27, 10  ;;  %v4648_v5 = vrot.slane %v4646_v15, 4  ;;  %v4649_v13 = vrot.slane %v4421_v24, 6  ;;  %v10636_v63 = vld [vmem:[#allocation2 + $0x140] sm:$0xff]   ;;  %v7678_v42 = vld [vmem:[%s8035_s24 + $0x38] sm:$0xf]  ;;  %vm12427_vm5 = vmmov %vm12423_vm8 }
 0x25b   : > { %v10617_v16 = vpop.permute.xlu1 %4876  ;;  %v5757_v47 = vsel %vm905_vm14, %v5714_v61, 0.0  ;;  %v5716_v12 = vunpack.c.l.bf16 %v7678_v42  ;;  %v12408_v61 = vld [vmem:[#allocation40_spill] sm:$0xff]  ;;  %v7681_v11 = vld [vmem:[%s8035_s24 + $0x40] sm:$0xf]  ;;  %v12413_v40 = vld [vmem:[#allocation57_spill] sm:$0xff] }
 0x25c   : > { %3756 = vrot.lane.b32.xlu0 %v6845_v17, %s7747_s20  ;;  %v5756_v34 = vadd.f32 %v5755_v3, %v5754_v49  ;;  %v5715_v17 = vunpack.c.l.bf16 %v7677_v44  ;;  %v4647_v30 = vsel %vm8361_vm11, %v6890_v43, %v4646_v15  ;;  %v4650_v18 = vsel %vm8361_vm11, %v4648_v5, %v4649_v13  ;;  %v7679_v15 = vld [vmem:[%s8035_s24 + $0x3c] sm:$0xf]  ;;  %v12409_v5 = vld [vmem:[#allocation38_spill] sm:$0xff]  ;;  %v4422_v44 = vld [vmem:[#allocation2 + $0x154] sm:$0xc] }
 0x25d   : > { %3710 = vrot.lane.b32.xlu1 %v6840_v62, %s7746_s15  ;;  %v10650_v27 = vcombine.low %v4647_v30, %v4650_v18  ;;  %v5717_v24 = vunpack.c.l.bf16 %v7679_v15  ;;  %v5761_v43 = vsel %vm905_vm14, %v5716_v12, 0.0  ;;  %v5718_v30 = vunpack.c.l.bf16 %v7681_v11  ;;  %v7547_v18 = vld [vmem:[#allocation2 + $0x30] sm:$0xff]  }
 0x25e   : > { %v10624_v22 = vpop.permute.xlu0 %3604  ;;  %v5758_v62 = vadd.f32 %v5757_v47, %v5756_v34  ;;  %v5759_v49 = vsel %vm905_vm14, %v5715_v17, 0.0  ;;  %v7546_v34 = vld [vmem:[#allocation2 + $0x20] sm:$0xff]   ;;  %v4423_v17 = vld [vmem:[#allocation2 + $0x15c] sm:$0x3]  ;;  %v7680_v47 = vld [vmem:[#allocation2 + $0x158] sm:$0xf] }
 0x25f   : > { %v10626_v36 = vpop.permute.xlu1 %4878  ;;  %v4653_v42 = vrot.slane %v7680_v47, 6  ;;  %v5763_v15 = vsel %vm905_vm14, %v5717_v24, 0.0  ;;  %v3781_v47 = vsel %vm905_vm14, %v12413_v40, %v12412_v38  ;;  %v4434_v38 = vld [vmem:[#allocation2 + $0x1ac] sm:$0x3] }
 0x260   : > { %4950 = vrot.lane.b32.xlu0 %v7676_v31, %s7742_s27  ;;  %v5760_v31 = vadd.f32 %v5759_v49, %v5758_v62  ;;  %v4424_v62 = vld [vmem:[#allocation2 + $0x164] sm:$0xc]  ;;  %v4425_v49 = vld [vmem:[#allocation2 + $0x16c] sm:$0x3] }
 0x261   : > { %3712 = vrot.lane.b32.xlu1 %v6841_v53, %s7746_s15  ;;  %v4655_v24 = vrot.slane %v4653_v42, 4  ;;  %v6894_v6 = vrot.slane %v4424_v62, 10  ;;  %v7683_v62 = vld [vmem:[%s8035_s24 + $0x44] sm:$0xf] }
 0x262   : > { %v10632_v2 = vpop.permute.xlu0 %3606  ;;  %v5762_v12 = vadd.f32 %v5761_v43, %v5760_v31  ;;  %v6891_v31 = vrot.slane %v4422_v44, 10  ;;  %v4656_v43 = vrot.slane %v4423_v17, 6  ;;  %v12416_v44 = vld [vmem:[#allocation60_spill] sm:$0xff] }
 0x263   : > { %v3561_v46 = vpop.permute.xlu1 %3560 }
 0x264   : > { %5000 = vrot.lane.b32.xlu0 %v12407_v35, %s7744_s19 }
 0x265   : > { %4888 = vrot.lane.b32.xlu1 %v12408_v61, %s7741_s26  ;;  %v12410_v61 = vld [vmem:[#allocation107_spill] sm:$0xff] }
 0x266   : > { %v10646_v3 = vpop.permute.xlu0 %5050  ;;  %v4694_v54 = vrot.slane %v12410_v61, 6  ;;  %v3813_v61 = vsel %vm2250_vm15, %v3781_v47, %v3561_v46  ;;  %v12415_v46 = vld [vmem:[#allocation22_spill] sm:$0xff]  ;;  %v5764_v47 = vadd.f32 %v5763_v15, %v5762_v12 }
 0x267   : > { %v3563_v53 = vpop.permute.xlu1 %3562  ;;  %v3783_v17 = vsel %vm905_vm14, %v12416_v44, %v12415_v46  ;;  %v12418_v12 = vld [vmem:[#allocation46_spill] sm:$0xff] }
 0x268   : > { %5062 = vrot.lane.b32.xlu0 %v10636_v63, %s7745_s22  ;;  %v4696_v23 = vrot.slane %v4694_v54, 4  ;;  %v12419_v44 = vld [vmem:[#allocation14_spill] sm:$0xff] }
 0x269   : > { %4890 = vrot.lane.b32.xlu1 %v12409_v5, %s7741_s26  ;;  %v12411_v5 = vld [vmem:[#allocation62_spill] sm:$0xff] }
 0x26a   : > { %v10656_v13 = vpop.permute.xlu0 %5052  ;;  %v5145_v7 = vsel %vm905_vm14, %v7546_v34, %v12411_v5  ;;  %v4697_v34 = vrot.slane %v4425_v49, 6  ;;  %v12414_v5 = vld [vmem:[#allocation33_spill] sm:$0xff]  ;;  %v5719_v49 = vunpack.c.l.bf16 %v7683_v62 }
 0x26b   : > { %v4989_v52 = vpop.permute.xlu1 %4988  ;;  %v5177_v11 = vsel %vm2250_vm15, %v5145_v7, %v10617_v16  ;;  %v5147_v50 = vsel %vm905_vm14, %v7547_v18, %v12414_v5  ;;  %v3845_v16 = vsel %vm2283_vm0, %v3813_v61, %v10624_v22  ;;  %v5765_v18 = vsel %vm905_vm14, %v5718_v30, 0.0  ;;  %v12421_v62 = vld [vmem:[#allocation73_spill] sm:$0xff] }
 0x26c   : > { %5122 = vrot.lane.b32.xlu0 %v10650_v27, %s7747_s20  ;;  %v5209_v7 = vsel %vm2283_vm0, %v5177_v11, %v10581_v39  ;;  %v12417_v39 = vld [vmem:[#allocation98_spill] sm:$0xff]  ;;  %v10690_v11 = vld [vmem:[#allocation2 + $0x150] sm:$0xff]   ;;  %v4654_v22 = vsel %vm8361_vm11, %v6891_v31, %v4653_v42  ;;  %v10698_v61 = vsel %vm8361_vm11, %v6894_v6, %v4694_v54  ;;  %v10702_v30 = vsel %vm8361_vm11, %v4696_v23, %v4697_v34  ;;  %v10713_v31 = vld [vmem:[%s8035_s24 + $0x48] sm:$0xf] }
 0x26d   : > { %4952 = vrot.lane.b32.xlu1 %v7682_v45, %s7742_s27  ;;  %v5179_v45 = vsel %vm2250_vm15, %v5147_v50, %v10626_v36  ;;  %v4657_v36 = vsel %vm8361_vm11, %v4655_v24, %v4656_v43  ;;  %v5238_v15 = vsel %vm2316_vm1, %v5209_v7, %v12418_v12  ;;  %v3866_v42 = vsel %vm2316_vm1, %v3845_v16, %v12419_v44  ;;  %v12420_v16 = vld [vmem:[#allocation49_spill] sm:$0xff] }
 0x26e   : > { %v3693_v29 = vpop.permute.xlu0 %3692  ;;  %v5720_v6 = vunpack.c.l.bf16 %v10713_v31  ;;  %v5257_v54 = vsel %vm2349_vm2, %v5238_v15, %v4989_v52  ;;  %v10723_v34 = vcombine.low %v4654_v22, %v4657_v36  ;;  %v6954_v7 = vcombine.low %v10698_v61, %v10702_v30  ;;  %v10732_v52 = vld [vmem:[%s12014_s5] ss:$0 sm:$0xff] }
 0x26f   : > { %v4991_v40 = vpop.permute.xlu1 %4990  ;;  %v5767_v22 = vsel %vm905_vm14, %v5719_v49, 0.0  ;;  %v12422_v61 = vld [vmem:[#allocation30_spill] sm:$0xff] }
 0x270   : > { %4892 = vrot.lane.b32.xlu0 %v10209_v28, %s7741_s26  ;;  %v3815_v28 = vsel %vm2250_vm15, %v3783_v17, %v3563_v53  ;;  %v5211_v53 = vsel %vm2283_vm0, %v5179_v45, %v10611_v25  ;;  %v5766_v45 = vadd.f32 %v5765_v18, %v5764_v47  ;;  %v5289_v18 = vsel %vm2382_vm3, %v5257_v54, %v10646_v3  ;;  %v7579_v15 = vld [vmem:[#allocation2 + $0x160] sm:$0xff]  }
 0x271   : > { %5002 = vrot.lane.b32.xlu1 %v12417_v39, %s7744_s19  ;;  %v3847_v23 = vsel %vm2283_vm0, %v3815_v28, %v10632_v2  ;;  %v5239_v2 = vsel %vm2316_vm1, %v5211_v53, %v12420_v16 }
 0x272   : > { %v3695_v50 = vpop.permute.xlu0 %3694  ;;  %v3867_v30 = vsel %vm2316_vm1, %v3847_v23, %v12422_v61 }
 0x273   : > { %v3649_v5 = vpop.permute.xlu1 %3648 }
 0x274   : > { %4954 = vrot.lane.b32.xlu0 %v10152_v51, %s7742_s27  ;;  %v3893_v25 = vsel %vm2349_vm2, %v3866_v42, %v3649_v5  ;;  %v5259_v5 = vsel %vm2349_vm2, %v5239_v2, %v4991_v40 }
 0x275   : > { %v3925_v43 = vsel %vm2382_vm3, %v3893_v25, %v3693_v29  ;;  %5064 = vrot.lane.b32.xlu1 %v10690_v11, %s7745_s22  ;;  %v7150_v24 = vpop.f32.mrb[16].mxu1 }
 0x276   : > { %v3747_v51 = vpop.permute.xlu0 %3746  ;;  %v2667_v29 = vadd.f32 %v10732_v52, %v7150_v24  ;;  %v2658_v17 = vpop.f32.mrb[17].mxu1  ;;  %v3946_v28 = vsel %vm2415_vm4, %v3925_v43, %v12421_v62  ;;  %v12425_v24 = vld [vmem:[#allocation78_spill] sm:$0xff] }
 0x277   : > { %v2659_v47 = vadd.f32 %v10732_v52, %v2658_v17  ;;  %v3651_v36 = vpop.permute.xlu1 %3650  ;;  %v7151_v53 = vpop.f32.mrb[18].mxu1  ;;  %v3975_v12 = vsel %vm12423_vm8, %v3946_v28, %v3747_v51  ;;  %v12426_v17 = vld [vmem:[#allocation7_spill] sm:$0xff]  ;;  %vm12430_vm8 = vmmov %vm12427_vm5 }
 0x278   : > { %5004 = vrot.lane.b32.xlu0 %v10327_v55, %s7744_s19  ;;  %v2772_v49 = vmul.f32 %v10051_v21, %v2667_v29  ;;  %v3895_v42 = vsel %vm2349_vm2, %v3867_v30, %v3651_v36  ;;  %v2670_v3 = vadd.f32 %v10732_v52, %v7151_v53  ;;  %v2661_v54 = vpop.f32.mrb[19].mxu1  ;;  %7194 = vmatprep.mubr.msk.bf16.mxu0 %vm12424_vm7, %v3975_v12  ;;  %vm2739_vm10 = vcmp.ge.f32.partialorder %v2667_v29, 0.0 }
 0x279   : > { %v2770_v23 = vmul.f32 %v10051_v21, %v2659_v47  ;;  %v3927_v25 = vsel %vm2382_vm3, %v3895_v42, %v3695_v50  ;;  %v2662_v43 = vadd.f32 %v10732_v52, %v2661_v54  ;;  %5124 = vrot.lane.b32.xlu1 %v10723_v34, %s7747_s20  ;;  %vm2737_vm12 = vcmp.ge.f32.partialorder %v2659_v47, 0.0  ;;  %v10777_v42 = vld [vmem:[%s12016_s7] ss:$0 sm:$0xff] }
 0x27a   : > { %v3749_v55 = vpop.permute.xlu0 %3748  ;;  %vm2740_vm9 = vcmp.ge.f32.partialorder %v2670_v3, 0.0  ;;  %v2773_v40 = vmul.f32 %v10051_v21, %v2670_v3  ;;  %v3947_v51 = vsel %vm2415_vm4, %v3927_v25, %v12425_v24  ;;  %v5318_v50 = vsel %vm2415_vm4, %v5289_v18, %v12426_v17  ;;  %v4426_v18 = vld [vmem:[#allocation2 + $0x174] sm:$0xc] }
 0x27b   : > { %vm2738_vm13 = vcmp.ge.f32.partialorder %v2662_v43, 0.0  ;;  %v2771_v16 = vmul.f32 %v10051_v21, %v2662_v43  ;;  %v5111_v2 = vpop.permute.xlu1 %5110  ;;  %v3977_v28 = vsel %vm12427_vm5, %v3947_v51, %v3749_v55  ;;  %v5291_v36 = vsel %vm2382_vm3, %v5259_v5, %v10656_v13  ;;  %v12432_v55 = vld [vmem:[#allocation10_spill] sm:$0xff]  ;;  %v7582_v13 = vld [vmem:[#allocation2 + $0x170] sm:$0xff]  }
 0x27c   : > { %5066 = vrot.lane.b32.xlu0 %v7579_v15, %s7745_s22  ;;  %v10769_v30 = vsel %vm2739_vm10, %v2667_v29, %v2772_v49  ;;  %v10771_v53 = vsel %vm2740_vm9, %v2670_v3, %v2773_v40  ;;  %v5339_v12 = vsel %vm12430_vm8, %v5318_v50, %v5111_v2  ;;  %7195 = vmatmul.mubr.msk.bf16.gmra.mrb[52].mxu0 %vm12424_vm7, %v3977_v28  ;;  %vm12431_vm10 = vmmov %vm12424_vm7  ;;  %v4701_v49 = vrot.slane %v10186_v9, 6  ;;  %v7686_v50 = vld [vmem:[%s8035_s24 + $0x4c] sm:$0xf]  ;;  %v7583_v3 = vld [vmem:[#allocation2 + $0x180] sm:$0xff]  }
 0x27d   : > { %12428 = vst [vmem:[#allocation63_spill] sm:$0xff] %v10769_v30  ;;  %12429 = vst [vmem:[#allocation6_spill] sm:$0xff] %v10771_v53  ;;  %v10781_v15 = vsel %vm2737_vm12, %v2659_v47, %v2770_v23  ;;  %v10785_v29 = vsel %vm2738_vm13, %v2662_v43, %v2771_v16  ;;  %4894 = vrot.lane.b32.xlu1 %v10211_v59, %s7741_s26  ;;  %7220 = vmatprep.mubr.msk.bf16.mxu1 %vm12431_vm10, %v5339_v12  ;;  %v10796_v54 = vstv %s10737_s17  ;;  %v4427_v23 = vld [vmem:[#allocation2 + $0x17c] sm:$0x3]  ;;  %v12437_v30 = vld [vmem:[#allocation8_spill] sm:$0xff] }
 0x27e   : > { %v10790_v5 = vpop.permute.xlu0 %4942  ;;  %v7176_v47 = vpop.f32.mrb[32].mxu0  ;;  %v5319_v59 = vsel %vm2415_vm4, %v5291_v36, %v12432_v55  ;;  %v6895_v51 = vrot.slane %v4426_v18, 10  ;;  %v5768_v16 = vadd.f32 %v5767_v22, %v5766_v45  ;;  %vm12433_vm12 = vmmov %vm12427_vm5  ;;  %v5721_v28 = vunpack.c.l.bf16 %v7686_v50  ;;  %v12438_v53 = vld [vmem:[#allocation18_spill] sm:$0xff] }
 0x27f   : > { %v4107_v25 = vadd.f32 %v7176_v47, %v10777_v42  ;;  %v5113_v43 = vpop.permute.xlu1 %5112  ;;  %v4098_v40 = vpop.f32.mrb[33].mxu0  ;;  %v5769_v12 = vsel %vm905_vm14, %v5720_v6, 0.0  ;;  %vm12434_vm9 = vmmov %vm12424_vm7  ;;  %v4703_v22 = vrot.slane %v4701_v49, 4  ;;  %v4704_v18 = vrot.slane %v4427_v23, 6 }
 0x280   : > { %5126 = vrot.lane.b32.xlu0 %v6954_v7, %s7747_s20  ;;  %v5341_v9 = vsel %vm12433_vm12, %v5319_v59, %v5113_v43  ;;  %v4099_v2 = vadd.f32 %v10777_v42, %v4098_v40  ;;  %v7177_v17 = vpop.f32.mrb[34].mxu0  ;;  %v4708_v43 = vrot.slane %v10454_v32, 6  ;;  %v5770_v59 = vadd.f32 %v5769_v12, %v5768_v16  ;;  %v4428_v40 = vld [vmem:[#allocation2 + $0x184] sm:$0xc]  ;;  %v4429_v12 = vld [vmem:[#allocation2 + $0x18c] sm:$0x3]  ;;  %vm12446_vm10 = vmmov %vm12433_vm12 }
 0x281   : > { %v4260_v47 = vmul.f32 %v10796_v54, %v4107_v25  ;;  %v4110_v36 = vadd.f32 %v7177_v17, %v10777_v42  ;;  %4956 = vrot.lane.b32.xlu1 %v10192_v20, %s7742_s27  ;;  %v4101_v7 = vpop.f32.mrb[35].mxu0  ;;  %7221 = vmatmul.mubr.msk.bf16.gmra.mrb[36].mxu1 %vm12434_vm9, %v5341_v9  ;;  %vm4227_vm13 = vcmp.ge.f32.partialorder %v4107_v25, 0.0  ;;  %v7687_v9 = vld [vmem:[%s8035_s24 + $0x50] sm:$0xf]  ;;  %v5771_v50 = vsel %vm905_vm14, %v5721_v28, 0.0  ;;  %vm12448_vm12 = vmmov %vm12434_vm9 }
 0x282   : > { %v10813_v45 = vpop.permute.xlu0 %4944  ;;  %v4258_v31 = vmul.f32 %v10796_v54, %v4099_v2  ;;  %v4102_v6 = vadd.f32 %v10777_v42, %v4101_v7  ;;  %vm4225_vm5 = vcmp.ge.f32.partialorder %v4099_v2, 0.0  ;;  %v5722_v17 = vunpack.c.l.bf16 %v7687_v9  ;;  %vm12449_vm9 = vmmov %vm12446_vm10 }
 0x283   : > { %vm4228_vm8 = vcmp.ge.f32.partialorder %v4110_v36, 0.0  ;;  %v4261_v55 = vmul.f32 %v10796_v54, %v4110_v36  ;;  %v10819_v20 = vpop.permute.xlu1 %4880  ;;  %v10827_v32 = vsel %vm4227_vm13, %v4107_v25, %v4260_v47  ;;  %v4702_v16 = vsel %vm8361_vm11, %v6895_v51, %v4701_v49  ;;  %vm12450_vm13 = vmmov %vm12449_vm9 }
 0x284   : > { %4896 = vrot.lane.b32.xlu0 %v9727_v26, %s7741_s26  ;;  %vm4226_vm7 = vcmp.ge.f32.partialorder %v4102_v6, 0.0  ;;  %v4259_v23 = vmul.f32 %v10796_v54, %v4102_v6  ;;  %12435 = vst [vmem:[#allocation44_spill] sm:$0xff] %v10827_v32  ;;  %v10838_v9 = vsel %vm4225_vm5, %v4099_v2, %v4258_v31  ;;  %v4705_v47 = vsel %vm8361_vm11, %v4703_v22, %v4704_v18  ;;  %vm12451_vm5 = vmmov %vm12448_vm12 }
 0x285   : > { %v10829_v7 = vsel %vm4228_vm8, %v4110_v36, %v4261_v55  ;;  %5006 = vrot.lane.b32.xlu1 %v10352_v41, %s7744_s19  ;;  %v6896_v49 = vrot.slane %v4428_v40, 10  ;;  %v5772_v51 = vadd.f32 %v5771_v50, %v5770_v59  ;;  %v4710_v2 = vrot.slane %v4708_v43, 4  ;;  %v7688_v55 = vld [vmem:[%s8035_s24 + $0x54] sm:$0xf]  ;;  %v7689_v50 = vld [vmem:[%s8035_s24 + $0x58] sm:$0xf] }
 0x286   : > { %12436 = vst [vmem:[#allocation94_spill] sm:$0xff] %v10829_v7  ;;  %v10833_v26 = vpop.permute.xlu0 %3608  ;;  %v10842_v28 = vsel %vm4226_vm7, %v4102_v6, %v4259_v23  ;;  %v4711_v31 = vrot.slane %v4429_v12, 6  ;;  %v5723_v25 = vunpack.c.l.bf16 %v7688_v55  ;;  %v5773_v6 = vsel %vm905_vm14, %v5722_v17, 0.0  ;;  %v1334_v7 = vld [vmem:[#allocation2 + $0x1a0] sm:$0x8]  ;;  %vm12452_vm7 = vmmov %vm12451_vm5 }
 0x287   : > { %v10848_v36 = vpop.permute.xlu1 %4882  ;;  %v6955_v22 = vcombine.low %v4702_v16, %v4705_v47  ;;  %v4709_v59 = vsel %vm8361_vm11, %v6896_v49, %v4708_v43  ;;  %v5724_v17 = vunpack.c.l.bf16 %v7689_v50  ;;  %v4715_v12 = vrot.slane %v10494_v56, 6  ;;  %v4431_v47 = vld [vmem:[#allocation2 + $0x19c] sm:$0x3]  ;;  %v1335_v49 = vld [vmem:[#allocation2 + $0x1a4] sm:$0xf] }
 0x288   : > { %4958 = vrot.lane.b32.xlu0 %v10423_v60, %s7742_s27  ;;  %v5774_v60 = vadd.f32 %v5773_v6, %v5772_v51  ;;  %v4712_v40 = vsel %vm8361_vm11, %v4710_v2, %v4711_v31  ;;  %v7580_v2 = vld [vmem:[#allocation2 + $0x40] sm:$0xff]   ;;  %v4433_v31 = vld [vmem:[#allocation2 + $0x1a8] sm:$0xf]  ;;  %v7690_v6 = vld [vmem:[%s8035_s24 + $0x5c] sm:$0xf]  ;;  %v4718_v32 = vrot.slane %v4431_v47, 6 }
 0x289   : > { %5068 = vrot.lane.b32.xlu1 %v7582_v13, %s7745_s22  ;;  %v5775_v13 = vsel %vm905_vm14, %v5723_v25, 0.0  ;;  %v6956_v43 = vcombine.low %v4709_v59, %v4712_v40  ;;  %v5725_v50 = vunpack.c.l.bf16 %v7690_v6  ;;  %v5777_v25 = vsel %vm905_vm14, %v5724_v17, 0.0  ;;  %v4432_v40 = vld [vmem:[#allocation2 + $0x1a4] sm:$0xc] }
 0x28a   : > { %v10855_v18 = vpop.permute.xlu0 %3610  ;;  %v5776_v55 = vadd.f32 %v5775_v13, %v5774_v60  ;;  %v4717_v41 = vrot.slane %v4715_v12, 4  ;;  %v1336_v60 = vld [vmem:[#allocation2 + $0x1a8] sm:$0x7]  ;;  %v4722_v13 = vrot.slane %v4433_v31, 6  ;;  %v5149_v17 = vsel %vm905_vm14, %v7580_v2, %v12437_v30 }
 0x28b   : > { %v3565_v23 = vpop.permute.xlu1 %3564  ;;  %v5779_v47 = vsel %vm905_vm14, %v5725_v50, 0.0  ;;  %v6892_v2 = vrot.slane %v1334_v7, 11  ;;  %v5181_v31 = vsel %vm2250_vm15, %v5149_v17, %v10819_v20 }
 0x28c   : > { %5008 = vrot.lane.b32.xlu0 %v10502_v10, %s7744_s19  ;;  %v4430_v10 = vld [vmem:[#allocation2 + $0x194] sm:$0xc]  ;;  %v5778_v6 = vadd.f32 %v5777_v25, %v5776_v55  ;;  %v10893_v55 = vsel %vm8361_vm11, %v4717_v41, %v4718_v32  ;;  %v4669_v25 = vrot.slane %v1336_v60, 7  ;;  %v12441_v32 = vld [vmem:[#allocation67_spill] sm:$0xff]  ;;  %v7692_v41 = vld [vmem:[%s8035_s24 + $0x64] sm:$0xf]  ;;  %v5213_v60 = vsel %vm2283_vm0, %v5181_v31, %v10790_v5 }
 0x28d   : > { %5128 = vrot.lane.b32.xlu1 %v6955_v22, %s7747_s20  ;;  %v6897_v56 = vrot.slane %v4430_v10, 10  ;;  %v7691_v10 = vld [vmem:[%s8035_s24 + $0x60] sm:$0xf]  ;;  %v12444_v31 = vld [vmem:[#allocation51_spill] sm:$0xff] }
 0x28e   : > { %v10866_v16 = vpop.permute.xlu0 %5054  ;;  %v5726_v61 = vunpack.c.l.bf16 %v7691_v10  ;;  %v5780_v10 = vadd.f32 %v5779_v47, %v5778_v6 }
 0x28f   : > { %v3567_v51 = vpop.permute.xlu1 %3566  ;;  %v10889_v30 = vsel %vm8361_vm11, %v6897_v56, %v4715_v12  ;;  %v12440_v56 = vld [vmem:[#allocation24_spill] sm:$0xff] }
 0x290   : > { %5070 = vrot.lane.b32.xlu0 %v7583_v3, %s7745_s22  ;;  %v4666_v3 = vrot.slane %v1335_v49, 7  ;;  %v7581_v49 = vld [vmem:[#allocation2 + $0x50] sm:$0xff]   ;;  %v3787_v7 = vsel %vm905_vm14, %v12441_v32, %v12440_v56  ;;  %v5781_v20 = vsel %vm905_vm14, %v5726_v61, 0.0  ;;  %v6957_v6 = vcombine.low %v10889_v30, %v10893_v55 }
 0x291   : > { %4898 = vrot.lane.b32.xlu1 %v12385_v4, %s7741_s26  ;;  %v12439_v4 = vld [vmem:[#allocation66_spill] sm:$0xff] }
 0x292   : > { %v10874_v22 = vpop.permute.xlu0 %5056  ;;  %v3785_v46 = vsel %vm905_vm14, %v12439_v4, %v12438_v53  ;;  %v4668_v50 = vrot.slane %v4666_v3, 4  ;;  %v4725_v4 = vrot.slane %v4434_v38, 6  ;;  %v5727_v53 = vunpack.c.l.bf16 %v7692_v41 }
 0x293   : > { %v4993_v59 = vpop.permute.xlu1 %4992  ;;  %v3817_v44 = vsel %vm2250_vm15, %v3785_v46, %v3565_v23  ;;  %v6898_v46 = vrot.slane %v4432_v40, 10  ;;  %v12442_v40 = vld [vmem:[#allocation9_spill] sm:$0xff]  ;;  %v3819_v38 = vsel %vm2250_vm15, %v3787_v7, %v3567_v51  ;;  %v10919_v5 = vsel %vm8039_vm6, %v6892_v2, %v4666_v3  ;;  %v7693_v3 = vld [vmem:[%s8035_s24 + $0x68] sm:$0xf]  ;;  %v10956_v7 = vld [vmem:[#allocation2 + $0x1b0] sm:$0x8] }
 0x294   : > { %5130 = vrot.lane.b32.xlu0 %v6956_v43, %s7747_s20  ;;  %v3849_v12 = vsel %vm2283_vm0, %v3817_v44, %v10833_v26  ;;  %v7584_v44 = vld [vmem:[#allocation2 + $0x190] sm:$0xff]   ;;  %v10923_v17 = vsel %vm8039_vm6, %v4668_v50, %v4669_v25  ;;  %v5728_v55 = vunpack.c.l.bf16 %v7693_v3  ;;  %v5782_v2 = vadd.f32 %v5781_v20, %v5780_v10  ;;  %v12445_v20 = vld [vmem:[#allocation25_spill] sm:$0xff] }
 0x295   : > { %4960 = vrot.lane.b32.xlu1 %v10450_v33, %s7742_s27  ;;  %v4724_v33 = vrot.slane %v4722_v13, 4  ;;  %v10927_v51 = vsel %vm8361_vm11, %v6898_v46, %v4722_v13  ;;  %v3851_v13 = vsel %vm2283_vm0, %v3819_v38, %v10855_v18  ;;  %v5240_v50 = vsel %vm2316_vm1, %v5213_v60, %v12444_v31  ;;  %v7585_v60 = vld [vmem:[#allocation2 + $0x1a0] sm:$0xff]  }
 0x296   : > { %v3697_v43 = vpop.permute.xlu0 %3696  ;;  %v5783_v46 = vsel %vm905_vm14, %v5727_v53, 0.0  ;;  %v6952_v32 = vcombine.low %v10919_v5, %v10923_v17  ;;  %v7694_v53 = vld [vmem:[%s8035_s24 + $0x6c] sm:$0xf]  ;;  %v5785_v17 = vsel %vm905_vm14, %v5728_v55, 0.0 }
 0x297   : > { %v4995_v23 = vpop.permute.xlu1 %4994  ;;  %v5729_v41 = vunpack.c.l.bf16 %v7694_v53 }
 0x298   : > { %4900 = vrot.lane.b32.xlu0 %v12407_v35, %s7741_s26  ;;  %v5151_v35 = vsel %vm905_vm14, %v7581_v49, %v12442_v40  ;;  %v12443_v49 = vld [vmem:[#allocation29_spill] sm:$0xff] }
 0x299   : > { %5010 = vrot.lane.b32.xlu1 %v10510_v48, %s7744_s19  ;;  %v5183_v61 = vsel %vm2250_vm15, %v5151_v35, %v10848_v36  ;;  %v10929_v48 = vld [vmem:[#allocation2 + $0x1b4] sm:$0xf]  ;;  %v3868_v30 = vsel %vm2316_vm1, %v3849_v12, %v12443_v49  ;;  %v10937_v36 = vsel %vm8361_vm11, %v4724_v33, %v4725_v4  ;;  %v5261_v33 = vsel %vm2349_vm2, %v5240_v50, %v4993_v59  ;;  %v1339_v50 = vld [vmem:[#allocation2 + $0x1b8] sm:$0x7] }
 0x29a   : > { %v3699_v26 = vpop.permute.xlu0 %3698  ;;  %v4673_v12 = vrot.slane %v10929_v48, 7  ;;  %v3869_v59 = vsel %vm2316_vm1, %v3851_v13, %v12445_v20  ;;  %v6958_v40 = vcombine.low %v10927_v51, %v10937_v36  ;;  %v5784_v35 = vadd.f32 %v5783_v46, %v5782_v2 }
 0x29b   : > { %v3653_v47 = vpop.permute.xlu1 %3652  ;;  %v5293_v38 = vsel %vm2382_vm3, %v5261_v33, %v10866_v16  ;;  %v6893_v16 = vrot.slane %v10956_v7, 11 }
 0x29c   : > { %4962 = vrot.lane.b32.xlu0 %v10636_v63, %s7742_s27  ;;  %v3897_v25 = vsel %vm2349_vm2, %v3868_v30, %v3653_v47  ;;  %v5215_v63 = vsel %vm2283_vm0, %v5183_v61, %v10813_v45  ;;  %v10979_v2 = vrot.slane %v4673_v12, 4 }
 0x29d   : > { %v3929_v4 = vsel %vm2382_vm3, %v3897_v25, %v3697_v43  ;;  %5072 = vrot.lane.b32.xlu1 %v7584_v44, %s7745_s22  ;;  %v12447_v44 = vld [vmem:[#allocation56_spill] sm:$0xff] }
 0x29e   : > { %v3751_v10 = vpop.permute.xlu0 %3750  ;;  %v3948_v18 = vsel %vm2415_vm4, %v3929_v4, %v10118_v1  ;;  %v5241_v61 = vsel %vm2316_vm1, %v5215_v63, %v12447_v44  ;;  %v5320_v63 = vsel %vm2415_vm4, %v5293_v38, %v9352_v58  ;;  %v7696_v38 = vld [vmem:[%s8035_s24 + $0x74] sm:$0xf] }
 0x29f   : > { %v3655_v45 = vpop.permute.xlu1 %3654  ;;  %v3979_v43 = vsel %vm12446_vm10, %v3948_v18, %v3751_v10  ;;  %v5786_v10 = vadd.f32 %v5785_v17, %v5784_v35  ;;  %v11005_v35 = vld [vmem:[#allocation2 + $0x1b8] sm:$0xf]  ;;  %v5731_v44 = vunpack.c.l.bf16 %v7696_v38 }
 0x2a0   : > { %5012 = vrot.lane.b32.xlu0 %v10650_v27, %s7744_s19  ;;  %v3899_v5 = vsel %vm2349_vm2, %v3869_v59, %v3655_v45  ;;  %7198 = vmatprep.mubr.msk.bf16.mxu0 %vm12448_vm12, %v3979_v43  ;;  %v5263_v27 = vsel %vm2349_vm2, %v5241_v61, %v4995_v23  ;;  %v7695_v23 = vld [vmem:[%s8035_s24 + $0x70] sm:$0xf]  ;;  %v4676_v43 = vrot.slane %v1339_v50, 7 }
 0x2a1   : > { %v3931_v47 = vsel %vm2382_vm3, %v3899_v5, %v3699_v26  ;;  %5132 = vrot.lane.b32.xlu1 %v6957_v6, %s7747_s20  ;;  %v7154_v30 = vpop.f32.mrb[20].mxu1  ;;  %v5730_v25 = vunpack.c.l.bf16 %v7695_v23  ;;  %v5787_v26 = vsel %vm905_vm14, %v5729_v41, 0.0  ;;  %v5295_v18 = vsel %vm2382_vm3, %v5263_v27, %v10874_v22 }
 0x2a2   : > { %v3753_v3 = vpop.permute.xlu0 %3752  ;;  %v2683_v13 = vadd.f32 %v10732_v52, %v7154_v30  ;;  %v2674_v31 = vpop.f32.mrb[21].mxu1  ;;  %v3949_v55 = vsel %vm2415_vm4, %v3931_v47, %v10138_v19  ;;  %v5788_v17 = vadd.f32 %v5787_v26, %v5786_v10 }
 0x2a3   : > { %v2675_v6 = vadd.f32 %v10732_v52, %v2674_v31  ;;  %v5115_v46 = vpop.permute.xlu1 %5114  ;;  %v7155_v33 = vpop.f32.mrb[22].mxu1  ;;  %v3981_v4 = vsel %vm12449_vm9, %v3949_v55, %v3753_v3  ;;  %v5789_v3 = vsel %vm905_vm14, %v5730_v25, 0.0  ;;  %v4435_v25 = vld [vmem:[#allocation2 + $0x1b4] sm:$0xc] }
 0x2a4   : > { %5074 = vrot.lane.b32.xlu0 %v7585_v60, %s7745_s22  ;;  %v2776_v7 = vmul.f32 %v10051_v21, %v2683_v13  ;;  %v5343_v53 = vsel %vm12450_vm13, %v5320_v63, %v5115_v46  ;;  %v2686_v41 = vadd.f32 %v10732_v52, %v7155_v33  ;;  %v2677_v45 = vpop.f32.mrb[23].mxu1  ;;  %7199 = vmatmul.mubr.msk.bf16.gmra.mrb[56].mxu0 %vm12451_vm5, %v3981_v4  ;;  %vm2743_vm8 = vcmp.ge.f32.partialorder %v2683_v13, 0.0  ;;  %v4437_v63 = vld [vmem:[#allocation2 + $0x1bc] sm:$0x3] }
 0x2a5   : > { %v2774_v58 = vmul.f32 %v10051_v21, %v2675_v6  ;;  %v2678_v59 = vadd.f32 %v10732_v52, %v2677_v45  ;;  %4902 = vrot.lane.b32.xlu1 %v12417_v39, %s7741_s26  ;;  %7224 = vmatprep.mubr.msk.bf16.mxu1 %vm12452_vm7, %v5343_v53  ;;  %vm2741_vm10 = vcmp.ge.f32.partialorder %v2675_v6, 0.0  ;;  %v5321_v39 = vsel %vm2415_vm4, %v5295_v18, %v9363_v8 }
 0x2a6   : > { %v11002_v22 = vpop.permute.xlu0 %4946  ;;  %vm2744_vm12 = vcmp.ge.f32.partialorder %v2686_v41, 0.0  ;;  %v2777_v60 = vmul.f32 %v10051_v21, %v2686_v41  ;;  %v11013_v27 = vsel %vm2743_vm8, %v2683_v13, %v2776_v7  ;;  %v5790_v33 = vadd.f32 %v5789_v3, %v5788_v17  ;;  %v7697_v7 = vld [vmem:[%s8035_s24 + $0x78] sm:$0xf] }
 0x2a7   : > { %vm2742_vm9 = vcmp.ge.f32.partialorder %v2678_v59, 0.0  ;;  %v2775_v61 = vmul.f32 %v10051_v21, %v2678_v59  ;;  %v5117_v5 = vpop.permute.xlu1 %5116  ;;  %v11020_v31 = vsel %vm2741_vm10, %v2675_v6, %v2774_v58  ;;  %v4677_v18 = vsel %vm8039_vm6, %v10979_v2, %v4676_v43 }
 0x2a8   : > { %5084 = vrot.lane.b32.xlu0 %v6952_v32, %s7746_s15  ;;  %v11015_v47 = vsel %vm2744_vm12, %v2686_v41, %v2777_v60  ;;  %v5345_v30 = vsel %vm12450_vm13, %v5321_v39, %v5117_v5  ;;  %v4729_v32 = vrot.slane %v11005_v35, 6  ;;  %v5732_v53 = vunpack.c.l.bf16 %v7697_v7  ;;  %v12454_v60 = vld [vmem:[#allocation104_spill] sm:$0xff] }
 0x2a9   : > { %v11024_v50 = vsel %vm2742_vm9, %v2678_v59, %v2775_v61  ;;  %4964 = vrot.lane.b32.xlu1 %v10690_v11, %s7742_s27  ;;  %7225 = vmatmul.mubr.msk.bf16.gmra.mrb[40].mxu1 %vm12451_vm5, %v5345_v30  ;;  %v4674_v11 = vsel %vm8039_vm6, %v6893_v16, %v4673_v12  ;;  %v5791_v41 = vsel %vm905_vm14, %v5731_v44, 0.0  ;;  %v7586_v12 = vld [vmem:[#allocation2 + $0x1b0] sm:$0xff]   ;;  %v6899_v16 = vrot.slane %v4435_v25, 10  ;;  %s7749_s27 = smov 4   ;;  %v7698_v61 = vld [vmem:[%s8035_s24 + $0x7c] sm:$0xf]  ;;  %vm12469_vm9 = vmmov %vm12451_vm5 }
 0x2aa   : > { %v11029_v8 = vpop.permute.xlu0 %4948  ;;  %v7180_v23 = vpop.f32.mrb[36].mxu0  ;;  %v4731_v45 = vrot.slane %v4729_v32, 4  ;;  %v4732_v58 = vrot.slane %v4437_v63, 6  ;;  %v5792_v38 = vadd.f32 %v5791_v41, %v5790_v33  ;;  %v5733_v5 = vunpack.c.l.bf16 %v7698_v61  ;;  %s6584_s24 = sld [smem:[#allocation3 + $0x3]] }
 0x2ab   : > { %v4123_v26 = vadd.f32 %v7180_v23, %v10777_v42  ;;  %v11035_v6 = vpop.permute.xlu1 %4884  ;;  %v4114_v46 = vpop.f32.mrb[37].mxu0  ;;  %v5793_v39 = vsel %vm905_vm14, %v5732_v53, 0.0  ;;  %v6953_v3 = vcombine.low %v4674_v11, %v4677_v18  ;;  %v4730_v25 = vsel %vm8361_vm11, %v6899_v16, %v4729_v32  ;;  %v12457_v16 = vld [vmem:[#allocation15_spill] sm:$0xff] }
 0x2ac   : > { %5134 = vrot.lane.b32.xlu0 %v6958_v40, %s7747_s20  ;;  %v4115_v4 = vadd.f32 %v10777_v42, %v4114_v46  ;;  %v7181_v10 = vpop.f32.mrb[38].mxu0  ;;  %v12456_v11 = vpack.i.bf16 %v10842_v28, %v10838_v9  ;;  %v5794_v32 = vadd.f32 %v5793_v39, %v5792_v38  ;;  %v7700_v9 = vld [vmem:[#allocation2 + $0x60] sm:$0xff]   ;;  %v12458_v28 = vld [vmem:[#allocation12_spill] sm:$0xff] }
 0x2ad   : > { %v4264_v51 = vmul.f32 %v10796_v54, %v4123_v26  ;;  %v4126_v48 = vadd.f32 %v7181_v10, %v10777_v42  ;;  %5014 = vrot.lane.b32.xlu1 %v10723_v34, %s7744_s19  ;;  %v4117_v36 = vpop.f32.mrb[39].mxu0  ;;  %vm4231_vm8 = vcmp.ge.f32.partialorder %v4123_v26, 0.0  ;;  %v12453_v34 = vld [vmem:[#allocation105_spill] sm:$0xff] }
 0x2ae   : > { %v11055_v40 = vpop.permute.xlu0 %3612  ;;  %v4262_v14 = vmul.f32 %v10796_v54, %v4115_v4  ;;  %v4118_v2 = vadd.f32 %v10777_v42, %v4117_v36  ;;  %vm4229_vm6 = vcmp.ge.f32.partialorder %v4115_v4, 0.0  ;;  %v12455_v35 = vpack.i.bf16 %v12453_v34, %v12454_v60 }
 0x2af   : > { %vm4232_vm7 = vcmp.ge.f32.partialorder %v4126_v48, 0.0  ;;  %v4265_v59 = vmul.f32 %v10796_v54, %v4126_v48  ;;  %v4887_v43 = vpop.permute.xlu1 %4886  ;;  %v11068_v17 = vsel %vm4231_vm8, %v4123_v26, %v4264_v51  ;;  %v4733_v26 = vsel %vm8361_vm11, %v4731_v45, %v4732_v58  ;;  %vm12467_vm11 = vmmov %vm12450_vm13 }
 0x2b0   : > { %7299 = vrot.lane.b32.xlu0 %v12455_v35, %s7749_s27  ;;  %vm4230_vm10 = vcmp.ge.f32.partialorder %v4118_v2, 0.0  ;;  %v4263_v44 = vmul.f32 %v10796_v54, %v4118_v2  ;;  %v11076_v46 = vsel %vm4229_vm6, %v4115_v4, %v4262_v14  ;;  %v5795_v4 = vsel %vm905_vm14, %v5733_v5, 0.0  ;;  %vm12468_vm12 = vmmov %vm12467_vm11 }
 0x2b1   : > { %v11070_v30 = vsel %vm4232_vm7, %v4126_v48, %v4265_v59  ;;  %5076 = vrot.lane.b32.xlu1 %v7586_v12, %s7745_s22  ;;  %v6959_v18 = vcombine.low %v4730_v25, %v4733_v26  ;;  %v5796_v51 = vadd.f32 %v5795_v4, %v5794_v32  ;;  %v7699_v12 = vld [vmem:[#allocation2 + $0x70] sm:$0xff]   ;;  %v5153_v14 = vsel %vm905_vm14, %v7700_v9, %v12458_v28  ;;  %v12462_v25 = vld [vmem:[#allocation58_spill] sm:$0xff]  ;;  %vm12470_vm13 = vmmov %vm12451_vm5  ;;  %s6987_s22 = sshll.u32 %s12604_s30, 4 }
 0x2b2   : > { %v3615_v23 = vpop.permute.xlu0 %3614  ;;  %v11080_v33 = vsel %vm4230_vm10, %v4118_v2, %v4263_v44  ;;  %v5155_v45 = vsel %vm905_vm14, %v7699_v12, %v12457_v16  ;;  %v12459_v58 = vpack.i.bf16 %v10785_v29, %v10781_v15  ;;  %v5185_v34 = vsel %vm2250_vm15, %v5153_v14, %v11035_v6  ;;  %v12460_v15 = vld [vmem:[#allocation21_spill] sm:$0xff]  ;;  %v12461_v29 = vld [vmem:[#allocation19_spill] sm:$0xff]  ;;  %v12466_v14 = vld [vmem:[#allocation68_spill] sm:$0xff] }
 0x2b3   : > { %v3569_v7 = vpop.permute.xlu1 %3568  ;;  %v5797_v36 = vrot.slane %v5796_v51, 4  ;;  %v5187_v2 = vsel %vm2250_vm15, %v5155_v45, %v4887_v43  ;;  %v5217_v44 = vsel %vm2283_vm0, %v5185_v34, %v11002_v22  ;;  %vm12472_vm8 = vmmov %vm12467_vm11 }
 0x2b4   : > { %7309 = vrot.lane.b32.xlu0 %v12456_v11, %s7740_s25  ;;  %v5219_v38 = vsel %vm2283_vm0, %v5187_v2, %v11029_v8  ;;  %v5242_v6 = vsel %vm2316_vm1, %v5217_v44, %v12462_v25  ;;  %vm12473_vm10 = vmmov %vm12469_vm9 }
 0x2b5   : > { %5086 = vrot.lane.b32.xlu1 %v6953_v3, %s7746_s15  ;;  %v5798_v35 = vadd.f32 %v5797_v36, %v5796_v51  ;;  %v5243_v43 = vsel %vm2316_vm1, %v5219_v38, %v12364_v0  ;;  %v3789_v3 = vsel %vm905_vm14, %v12461_v29, %v12460_v15  ;;  %v12464_v51 = vld [vmem:[#allocation35_spill] sm:$0xff] }
 0x2b6   : > { %v5059_v53 = vpop.permute.xlu0 %5058  ;;  %v3821_v8 = vsel %vm2250_vm15, %v3789_v3, %v3569_v7 }
 0x2b7   : > { %v3571_v41 = vpop.permute.xlu1 %3570  ;;  %v5799_v39 = vrot.slane %v5798_v35, 2  ;;  %v3853_v12 = vsel %vm2283_vm0, %v3821_v8, %v11055_v40 }
 0x2b9   : > { %5136 = vrot.lane.b32.xlu1 %v6959_v18, %s7747_s20  ;;  %v5800_v0 = vadd.f32 %v5799_v39, %v5798_v35  ;;  %v12463_v18 = vld [vmem:[#allocation26_spill] sm:$0xff] }
 0x2ba   : > { %v5061_v57 = vpop.permute.xlu0 %5060  ;;  %v3791_v36 = vsel %vm905_vm14, %v12464_v51, %v12463_v18 }
 0x2bb   : > { %v4997_v48 = vpop.permute.xlu1 %4996  ;;  %v3823_v45 = vsel %vm2250_vm15, %v3791_v36, %v3571_v41  ;;  %v5801_v34 = vrot.slane %v5800_v0, 1 }
 0x2bc   : > { %v5265_v11 = vsel %vm2349_vm2, %v5242_v6, %v4997_v48  ;;  %v12465_v48 = vld [vmem:[#allocation93_spill] sm:$0xff]  ;;  %v3855_v40 = vsel %vm2283_vm0, %v3823_v45, %v3615_v23 }
 0x2bd   : > { %7304 = vrot.lane.b32.xlu1 %v12459_v58, %s7749_s27  ;;  %v5297_v16 = vsel %vm2382_vm3, %v5265_v11, %v5059_v53  ;;  %v5802_v29 = vadd.f32 %v5801_v34, %v5800_v0  ;;  %v7701_v34 = vld [vmem:[#allocation2 + $0x80] sm:$0xff]  }
 0x2be   : > { %v3701_v59 = vpop.permute.xlu0 %3700  ;;  %v5322_v2 = vsel %vm2415_vm4, %v5297_v16, %v12466_v14 }
 0x2bf   : > { %v4999_v60 = vpop.permute.xlu1 %4998  ;;  %v5803_v45 = vmul.f32 0.00390625, %v5802_v29 }
 0x2c0   : > { %v5267_v26 = vsel %vm2349_vm2, %v5243_v43, %v4999_v60  ;;  %v12471_v43 = vld [vmem:[#allocation95_spill] sm:$0xff] }
 0x2c1   : > { %v5299_v32 = vsel %vm2382_vm3, %v5267_v26, %v5061_v57  ;;  %v3870_v57 = vsel %vm2316_vm1, %v3853_v12, %v12465_v48  ;;  %v3871_v39 = vsel %vm2316_vm1, %v3855_v40, %v12471_v43  ;;  %v12475_v40 = vld [vmem:[#allocation11_spill] sm:$0xff] }
 0x2c2   : > { %v3703_v61 = vpop.permute.xlu0 %3702  ;;  %v5323_v7 = vsel %vm2415_vm4, %v5299_v32, %v12394_v37 }
 0x2c3   : > { %v3657_v5 = vpop.permute.xlu1 %3656 }
 0x2c4   : > { %v3901_v53 = vsel %vm2349_vm2, %v3870_v57, %v3657_v5 }
 0x2c5   : > { %v3933_v44 = vsel %vm2382_vm3, %v3901_v53, %v3701_v59  ;;  %v5157_v53 = vsel %vm905_vm14, %v7701_v34, %v12475_v40 }
 0x2c6   : > { %v5121_v22 = vpop.permute.xlu0 %5120 }
 0x2c7   : > { %v3659_v4 = vpop.permute.xlu1 %3658  ;;  %v5349_v58 = vsel %vm12467_vm11, %v5323_v7, %v5121_v22 }
 0x2c8   : > { %v3903_v3 = vsel %vm2349_vm2, %v3871_v39, %v3659_v4 }
 0x2c9   : > { %v3935_v0 = vsel %vm2382_vm3, %v3903_v3, %v3703_v61  ;;  %v5804_v3 = vpack.c.bf16 %v5803_v45, %v5803_v45 }
 0x2ca   : > { %v3755_v9 = vpop.permute.xlu0 %3754 }
 0x2cb   : > { %v5119_v28 = vpop.permute.xlu1 %5118 }
 0x2cc   : > { %v5347_v41 = vsel %vm12468_vm12, %v5322_v2, %v5119_v28  ;;  %vm12474_vm12 = vmmov %vm12472_vm8 }
 0x2cd   : > { %v7158_v60 = vpop.f32.mrb[24].mxu1  ;;  %7228 = vmatprep.mubr.msk.bf16.mxu1 %vm12469_vm9, %v5347_v41 }
 0x2ce   : > { %v3757_v37 = vpop.permute.xlu0 %3756  ;;  %v2699_v35 = vadd.f32 %v10732_v52, %v7158_v60  ;;  %v2690_v38 = vpop.f32.mrb[25].mxu1  ;;  %7229 = vmatmul.mubr.msk.bf16.gmra.mrb[44].mxu1 %vm12470_vm13, %v5349_v58  ;;  %vm7750_vm13 = vmmov 0  }
 0x2cf   : > { %v2691_v23 = vadd.f32 %v10732_v52, %v2690_v38  ;;  %v11143_v15 = vpop.permute.xlu1 %3710  ;;  %v7159_v5 = vpop.f32.mrb[26].mxu1 }
 0x2d0   : > { %v2780_v25 = vmul.f32 %v10051_v21, %v2699_v35  ;;  %v3951_v6 = vsel %vm2415_vm4, %v3933_v44, %v11143_v15  ;;  %v2702_v26 = vadd.f32 %v10732_v52, %v7159_v5  ;;  %v2693_v8 = vpop.f32.mrb[27].mxu1  ;;  %vm2747_vm5 = vcmp.ge.f32.partialorder %v2699_v35, 0.0 }
 0x2d1   : > { %v2778_v59 = vmul.f32 %v10051_v21, %v2691_v23  ;;  %v3983_v11 = vsel %vm12472_vm8, %v3951_v6, %v3755_v9  ;;  %v2694_v22 = vadd.f32 %v10732_v52, %v2693_v8  ;;  %vm2745_vm6 = vcmp.ge.f32.partialorder %v2691_v23, 0.0  ;;  %v12477_v8 = vld [vmem:[#allocation64_spill] sm:$0xff] }
 0x2d2   : > { %v4951_v32 = vpop.permute.xlu0 %4950  ;;  %vm2748_vm7 = vcmp.ge.f32.partialorder %v2702_v26, 0.0  ;;  %v2781_v4 = vmul.f32 %v10051_v21, %v2702_v26  ;;  %7202 = vmatprep.mubr.msk.bf16.mxu0 %vm12473_vm10, %v3983_v11  ;;  %v11159_v36 = vsel %vm2747_vm5, %v2699_v35, %v2780_v25  ;;  %v12476_v35 = vmov 0.0   ;;  %vm12478_vm10 = vmmov %vm12474_vm12 }
 0x2d3   : > { %vm2746_vm11 = vcmp.ge.f32.partialorder %v2694_v22, 0.0  ;;  %v2779_v18 = vmul.f32 %v10051_v21, %v2694_v22  ;;  %v11157_v51 = vpop.permute.xlu1 %3712  ;;  %v11165_v9 = vsel %vm2745_vm6, %v2691_v23, %v2778_v59 }
 0x2d4   : > { %v11161_v12 = vsel %vm2748_vm7, %v2702_v26, %v2781_v4  ;;  %v3953_v16 = vsel %vm2415_vm4, %v3935_v0, %v11157_v51 }
 0x2d5   : > { %v11169_v57 = vsel %vm2746_vm11, %v2694_v22, %v2779_v18  ;;  %v3985_v61 = vsel %vm12474_vm12, %v3953_v16, %v3757_v37  ;;  %vm12479_vm11 = vmmov %vm12469_vm9 }
 0x2d6   : > { %v5001_v28 = vpop.permute.xlu0 %5000  ;;  %v7184_v2 = vpop.f32.mrb[40].mxu0  ;;  %7203 = vmatmul.mubr.msk.bf16.gmra.mrb[60].mxu0 %vm12469_vm9, %v3985_v61  ;;  %vm12483_vm12 = vmmov %vm12478_vm10 }
 0x2d7   : > { %v4139_v58 = vadd.f32 %v7184_v2, %v10777_v42  ;;  %v4889_v41 = vpop.permute.xlu1 %4888  ;;  %v4130_v60 = vpop.f32.mrb[41].mxu0  ;;  %7250 = vmatprep.mubr.msk.bf16.mxu0 %vm7750_vm13, %v12476_v35  ;;  %vm12485_vm13 = vmmov %vm12478_vm10 }
 0x2d8   : > { %v5189_v37 = vsel %vm2250_vm15, %v5157_v53, %v4889_v41  ;;  %v4131_v38 = vadd.f32 %v10777_v42, %v4130_v60  ;;  %v7185_v44 = vpop.f32.mrb[42].mxu0  ;;  %v7702_v41 = vld [vmem:[#allocation2 + $0x90] sm:$0xff]   ;;  %v12480_v60 = vld [vmem:[#allocation17_spill] sm:$0xff] }
 0x2d9   : > { %v4268_v39 = vmul.f32 %v10796_v54, %v4139_v58  ;;  %v5221_v23 = vsel %vm2283_vm0, %v5189_v37, %v4951_v32  ;;  %v4142_v5 = vadd.f32 %v7185_v44, %v10777_v42  ;;  %v4133_v29 = vpop.f32.mrb[43].mxu0  ;;  %vm4235_vm5 = vcmp.ge.f32.partialorder %v4139_v58, 0.0 }
 0x2da   : > { %v5063_v25 = vpop.permute.xlu0 %5062  ;;  %v4266_v6 = vmul.f32 %v10796_v54, %v4131_v38  ;;  %v4134_v26 = vadd.f32 %v10777_v42, %v4133_v29  ;;  %v5244_v59 = vsel %vm2316_vm1, %v5221_v23, %v12477_v8  ;;  %vm4233_vm8 = vcmp.ge.f32.partialorder %v4131_v38, 0.0 }
 0x2db   : > { %vm4236_vm6 = vcmp.ge.f32.partialorder %v4142_v5, 0.0  ;;  %v4269_v11 = vmul.f32 %v10796_v54, %v4142_v5  ;;  %v4891_v22 = vpop.permute.xlu1 %4890  ;;  %v5269_v4 = vsel %vm2349_vm2, %v5244_v59, %v5001_v28  ;;  %v11191_v0 = vsel %vm4235_vm5, %v4139_v58, %v4268_v39  ;;  %vm12486_vm5 = vmmov %vm12469_vm9 }
 0x2dc   : > { %vm4234_vm7 = vcmp.ge.f32.partialorder %v4134_v26, 0.0  ;;  %v4267_v32 = vmul.f32 %v10796_v54, %v4134_v26  ;;  %v5301_v16 = vsel %vm2382_vm3, %v5269_v4, %v5063_v25  ;;  %v11196_v61 = vsel %vm4233_vm8, %v4131_v38, %v4266_v6  ;;  %v7703_v25 = vld [vmem:[#allocation2 + $0xa0] sm:$0xff]   ;;  %v12482_v6 = vld [vmem:[#allocation13_spill] sm:$0xff] }
 0x2dd   : > { %v11193_v18 = vsel %vm4236_vm6, %v4142_v5, %v4269_v11  ;;  %v5324_v40 = vsel %vm2415_vm4, %v5301_v16, %v12421_v62  ;;  %v5159_v35 = vsel %vm905_vm14, %v7702_v41, %v12480_v60  ;;  %v12481_v62 = vld [vmem:[#allocation61_spill] sm:$0xff] }
 0x2de   : > { %v5123_v45 = vpop.permute.xlu0 %5122  ;;  %v11200_v34 = vsel %vm4234_vm7, %v4134_v26, %v4267_v32  ;;  %7251 = vmatmul.mubr.msk.bf16.vlgmr.msra.gmra.mrb[64].mxu0 %vm905_vm14, %v5804_v3  ;;  %v5191_v38 = vsel %vm2250_vm15, %v5159_v35, %v4891_v22  ;;  %v5161_v26 = vsel %vm905_vm14, %v7703_v25, %v12482_v6 }
 0x2df   : > { %v4953_v58 = vpop.permute.xlu1 %4952  ;;  %v5351_v53 = vsel %vm12478_vm10, %v5324_v40, %v5123_v45  ;;  %v12484_v45 = vld [vmem:[#allocation14_spill] sm:$0xff] }
 0x2e0   : > { %7232 = vmatprep.mubr.msk.bf16.mxu1 %vm12479_vm11, %v5351_v53  ;;  %v5223_v44 = vsel %vm2283_vm0, %v5191_v38, %v4953_v58  ;;  %vm12492_vm11 = vmmov %vm12483_vm12 }
 0x2e1   : > { %v5245_v5 = vsel %vm2316_vm1, %v5223_v44, %v12481_v62  ;;  %v7704_v44 = vld [vmem:[#allocation2 + $0xb0] sm:$0xff]  }
 0x2e2   : > { %v4893_v37 = vpop.permute.xlu0 %4892 }
 0x2e3   : > { %v5003_v39 = vpop.permute.xlu1 %5002  ;;  %v5193_v59 = vsel %vm2250_vm15, %v5161_v26, %v4893_v37  ;;  %v12488_v26 = vld [vmem:[#allocation30_spill] sm:$0xff] }
 0x2e4   : > { %v5271_v29 = vsel %vm2349_vm2, %v5245_v5, %v5003_v39  ;;  %v12487_v39 = vld [vmem:[#allocation20_spill] sm:$0xff] }
 0x2e6   : > { %v4955_v23 = vpop.permute.xlu0 %4954 }
 0x2e7   : > { %v5065_v3 = vpop.permute.xlu1 %5064  ;;  %v5225_v11 = vsel %vm2283_vm0, %v5193_v59, %v4955_v23  ;;  %v5163_v23 = vsel %vm905_vm14, %v7704_v44, %v12487_v39 }
 0x2e8   : > { %v5303_v8 = vsel %vm2382_vm3, %v5271_v29, %v5065_v3  ;;  %v5246_v40 = vsel %vm2316_vm1, %v5225_v11, %v12484_v45 }
 0x2e9   : > { %v5325_v4 = vsel %vm2415_vm4, %v5303_v8, %v12425_v24 }
 0x2ea   : > { %v5005_v22 = vpop.permute.xlu0 %5004 }
 0x2eb   : > { %v5125_v32 = vpop.permute.xlu1 %5124  ;;  %v5273_v58 = vsel %vm2349_vm2, %v5246_v40, %v5005_v22 }
 0x2ec   : > { %v5353_v16 = vsel %vm12483_vm12, %v5325_v4, %v5125_v32  ;;  %v7705_v4 = vld [vmem:[#allocation2 + $0xc0] sm:$0xff]   ;;  %vm12493_vm12 = vmmov %vm12486_vm5 }
 0x2ed   : > { %7233 = vmatmul.mubr.msk.bf16.gmra.mrb[48].mxu1 %vm12469_vm9, %v5353_v16  ;;  %v12489_v16 = vld [vmem:[#allocation16_spill] sm:$0xff]  ;;  %vm12494_vm9 = vmmov %vm12492_vm11 }
 0x2ee   : > { %v5067_v53 = vpop.permute.xlu0 %5066  ;;  %v5165_v45 = vsel %vm905_vm14, %v7705_v4, %v12489_v16 }
 0x2ef   : > { %v5305_v41 = vsel %vm2382_vm3, %v5273_v58, %v5067_v53  ;;  %v4895_v60 = vpop.permute.xlu1 %4894 }
 0x2f0   : > { %v5326_v35 = vsel %vm2415_vm4, %v5305_v41, %v10118_v1  ;;  %v5195_v5 = vsel %vm2250_vm15, %v5163_v23, %v4895_v60 }
 0x2f2   : > { %v5127_v37 = vpop.permute.xlu0 %5126 }
 0x2f3   : > { %v5355_v38 = vsel %vm12485_vm13, %v5326_v35, %v5127_v37  ;;  %v4957_v24 = vpop.permute.xlu1 %4956  ;;  %vm12495_vm13 = vmmov %vm12486_vm5 }
 0x2f4   : > { %7236 = vmatprep.mubr.msk.bf16.mxu1 %vm12486_vm5, %v5355_v38  ;;  %v5227_v29 = vsel %vm2283_vm0, %v5195_v5, %v4957_v24 }
 0x2f5   : > { %v5247_v1 = vsel %vm2316_vm1, %v5227_v29, %v12488_v26 }
 0x2f6   : > { %v4897_v62 = vpop.permute.xlu0 %4896 }
 0x2f7   : > { %v5007_v3 = vpop.permute.xlu1 %5006  ;;  %v5197_v41 = vsel %vm2250_vm15, %v5165_v45, %v4897_v62 }
 0x2f8   : > { %v5275_v11 = vsel %vm2349_vm2, %v5247_v1, %v5007_v3 }
 0x2f9   : > { %v7162_v25 = vpop.f32.mrb[28].mxu1 }
 0x2fa   : > { %v4959_v6 = vpop.permute.xlu0 %4958  ;;  %v2715_v8 = vadd.f32 %v10732_v52, %v7162_v25  ;;  %v2706_v59 = vpop.f32.mrb[29].mxu1 }
 0x2fb   : > { %v2707_v22 = vadd.f32 %v10732_v52, %v2706_v59  ;;  %v5069_v32 = vpop.permute.xlu1 %5068  ;;  %v7163_v40 = vpop.f32.mrb[30].mxu1  ;;  %v5229_v24 = vsel %vm2283_vm0, %v5197_v41, %v4959_v6 }
 0x2fc   : > { %v2784_v58 = vmul.f32 %v10051_v21, %v2715_v8  ;;  %v5307_v53 = vsel %vm2382_vm3, %v5275_v11, %v5069_v32  ;;  %v2718_v60 = vadd.f32 %v10732_v52, %v7163_v40  ;;  %v2709_v35 = vpop.f32.mrb[31].mxu1  ;;  %vm2751_vm8 = vcmp.ge.f32.partialorder %v2715_v8, 0.0 }
 0x2fd   : > { %v2782_v37 = vmul.f32 %v10051_v21, %v2707_v22  ;;  %v2710_v38 = vadd.f32 %v10732_v52, %v2709_v35  ;;  %vm2749_vm6 = vcmp.ge.f32.partialorder %v2707_v22, 0.0  ;;  %v5327_v62 = vsel %vm2415_vm4, %v5307_v53, %v10138_v19 }
 0x2fe   : > { %v5009_v44 = vpop.permute.xlu0 %5008  ;;  %vm2752_vm7 = vcmp.ge.f32.partialorder %v2718_v60, 0.0  ;;  %v2785_v39 = vmul.f32 %v10051_v21, %v2718_v60  ;;  %v11255_v29 = vsel %vm2751_vm8, %v2715_v8, %v2784_v58  ;;  %v5248_v25 = vsel %vm2316_vm1, %v5229_v24, %v12443_v49 }
 0x2ff   : > { %vm2750_vm10 = vcmp.ge.f32.partialorder %v2710_v38, 0.0  ;;  %v2783_v23 = vmul.f32 %v10051_v21, %v2710_v38  ;;  %v5129_v5 = vpop.permute.xlu1 %5128  ;;  %12490 = vst [vmem:[#allocation55_spill] sm:$0xff] %v11255_v29  ;;  %v11262_v6 = vsel %vm2749_vm6, %v2707_v22, %v2782_v37  ;;  %v5277_v21 = vsel %vm2349_vm2, %v5248_v25, %v5009_v44  ;;  %v7706_v37 = vld [vmem:[#allocation2 + $0xd0] sm:$0xff]  }
 0x300   : > { %v11257_v3 = vsel %vm2752_vm7, %v2718_v60, %v2785_v39  ;;  %v5357_v52 = vsel %vm12492_vm11, %v5327_v62, %v5129_v5  ;;  %vm12501_vm11 = vmmov %vm12493_vm12 }
 0x301   : > { %12491 = vst [vmem:[#allocation69_spill] sm:$0xff] %v11257_v3  ;;  %v11266_v1 = vsel %vm2750_vm10, %v2710_v38, %v2783_v23  ;;  %7237 = vmatmul.mubr.msk.bf16.gmra.mrb[52].mxu1 %vm12493_vm12, %v5357_v52  ;;  %v12496_v38 = vld [vmem:[#allocation22_spill] sm:$0xff]  ;;  %vm12499_vm10 = vmmov %vm12494_vm9 }
 0x302   : > { %v5071_v19 = vpop.permute.xlu0 %5070  ;;  %vm12502_vm12 = vmmov %vm12494_vm9 }
 0x303   : > { %v5309_v59 = vsel %vm2382_vm3, %v5277_v21, %v5071_v19  ;;  %v4899_v11 = vpop.permute.xlu1 %4898 }
 0x304   : > { %v5328_v49 = vsel %vm2415_vm4, %v5309_v59, %v11143_v15  ;;  %v5167_v15 = vsel %vm905_vm14, %v7706_v37, %v12496_v38 }
 0x305   : > { %v7188_v32 = vpop.f32.mrb[44].mxu0  ;;  %v5199_v23 = vsel %vm2250_vm15, %v5167_v15, %v4899_v11 }
 0x306   : > { %v5131_v22 = vpop.permute.xlu0 %5130  ;;  %v4155_v4 = vadd.f32 %v7188_v32, %v10777_v42  ;;  %v4146_v16 = vpop.f32.mrb[45].mxu0 }
 0x307   : > { %v5359_v45 = vsel %vm12494_vm9, %v5328_v49, %v5131_v22  ;;  %v4147_v40 = vadd.f32 %v10777_v42, %v4146_v16  ;;  %v4961_v58 = vpop.permute.xlu1 %4960  ;;  %v7189_v53 = vpop.f32.mrb[46].mxu0  ;;  %vm12503_vm9 = vmmov %vm12501_vm11 }
 0x308   : > { %7240 = vmatprep.mubr.msk.bf16.mxu1 %vm12495_vm13, %v5359_v45  ;;  %v4272_v41 = vmul.f32 %v10796_v54, %v4155_v4  ;;  %v4158_v60 = vadd.f32 %v7189_v53, %v10777_v42  ;;  %v4149_v35 = vpop.f32.mrb[47].mxu0  ;;  %vm4239_vm5 = vcmp.ge.f32.partialorder %v4155_v4, 0.0  ;;  %v5231_v62 = vsel %vm2283_vm0, %v5199_v23, %v4961_v58  ;;  %vm12505_vm13 = vmmov %vm12503_vm9 }
 0x309   : > { %v4270_v24 = vmul.f32 %v10796_v54, %v4147_v40  ;;  %v4150_v44 = vadd.f32 %v10777_v42, %v4149_v35  ;;  %vm4237_vm8 = vcmp.ge.f32.partialorder %v4147_v40, 0.0  ;;  %v5249_v22 = vsel %vm2316_vm1, %v5231_v62, %v12445_v20  ;;  %v12500_v35 = vld [vmem:[#allocation18_spill] sm:$0xff] }
 0x30a   : > { %v4901_v39 = vpop.permute.xlu0 %4900  ;;  %vm4240_vm6 = vcmp.ge.f32.partialorder %v4158_v60, 0.0  ;;  %v4273_v5 = vmul.f32 %v10796_v54, %v4158_v60  ;;  %v11289_v21 = vsel %vm4239_vm5, %v4155_v4, %v4272_v41 }
 0x30b   : > { %vm4238_vm7 = vcmp.ge.f32.partialorder %v4150_v44, 0.0  ;;  %v4271_v52 = vmul.f32 %v10796_v54, %v4150_v44  ;;  %v5011_v25 = vpop.permute.xlu1 %5010  ;;  %12497 = vst [vmem:[#allocation96_spill] sm:$0xff] %v11289_v21  ;;  %v11293_v59 = vsel %vm4237_vm8, %v4147_v40, %v4270_v24 }
 0x30c   : > { %v11291_v19 = vsel %vm4240_vm6, %v4158_v60, %v4273_v5  ;;  %v5279_v16 = vsel %vm2349_vm2, %v5249_v22, %v5011_v25  ;;  %v7707_v60 = vld [vmem:[#allocation2 + $0xe0] sm:$0xff]  }
 0x30d   : > { %12498 = vst [vmem:[#allocation59_spill] sm:$0xff] %v11291_v19  ;;  %v11297_v11 = vsel %vm4238_vm7, %v4150_v44, %v4271_v52  ;;  %v5169_v37 = vsel %vm905_vm14, %v7707_v60, %v12500_v35 }
 0x30e   : > { %v4963_v32 = vpop.permute.xlu0 %4962  ;;  %v5201_v20 = vsel %vm2250_vm15, %v5169_v37, %v4901_v39  ;;  %v7708_v39 = vld [vmem:[#allocation2 + $0xf0] sm:$0xff]  }
 0x30f   : > { %v5073_v4 = vpop.permute.xlu1 %5072  ;;  %v5233_v15 = vsel %vm2283_vm0, %v5201_v20, %v4963_v32  ;;  %v5171_v32 = vsel %vm905_vm14, %v7708_v39, %v12440_v56 }
 0x310   : > { %v5311_v45 = vsel %vm2382_vm3, %v5279_v16, %v5073_v4  ;;  %v5250_v23 = vsel %vm2316_vm1, %v5233_v15, %v12465_v48 }
 0x311   : > { %v5329_v53 = vsel %vm2415_vm4, %v5311_v45, %v11157_v51 }
 0x312   : > { %v5013_v58 = vpop.permute.xlu0 %5012 }
 0x313   : > { %v5133_v40 = vpop.permute.xlu1 %5132  ;;  %v5281_v51 = vsel %vm2349_vm2, %v5250_v23, %v5013_v58 }
 0x314   : > { %v5361_v41 = vsel %vm12499_vm10, %v5329_v53, %v5133_v40 }
 0x315   : > { %7241 = vmatmul.mubr.msk.bf16.gmra.mrb[56].mxu1 %vm12501_vm11, %v5361_v41  ;;  %v11329_v41 = vld [vmem:[%s12016_s7] ss:$0 sm:$0xff] }
 0x316   : > { %v5075_v38 = vpop.permute.xlu0 %5074 }
 0x317   : > { %v4903_v24 = vpop.permute.xlu1 %4902  ;;  %v5313_v62 = vsel %vm2382_vm3, %v5281_v51, %v5075_v38 }
 0x318   : > { %v5203_v48 = vsel %vm2250_vm15, %v5171_v32, %v4903_v24  ;;  %v11341_v24 = vstv %s6584_s24 }
 0x31a   : > { %v5085_v44 = vpop.permute.xlu0 %5084 }
 0x31b   : > { %v4965_v5 = vpop.permute.xlu1 %4964  ;;  %v5331_v52 = vsel %vm2415_vm4, %v5313_v62, %v5085_v44 }
 0x31c   : > { %v5235_v45 = vsel %vm2283_vm0, %v5203_v48, %v4965_v5 }
 0x31d   : > { %v5251_v53 = vsel %vm2316_vm1, %v5235_v45, %v12471_v43  ;;  %v11339_v43 = vld [vmem:[%s12018_s9] ss:$0 sm:$0xff]  ;;  %vm12504_vm1 = vmmov %vm12499_vm10 }
 0x31e   : > { %v5135_v25 = vpop.permute.xlu0 %5134 }
 0x31f   : > { %v5363_v22 = vsel %vm12502_vm12, %v5331_v52, %v5135_v25  ;;  %v5015_v16 = vpop.permute.xlu1 %5014 }
 0x320   : > { %7244 = vmatprep.mubr.msk.bf16.mxu1 %vm12503_vm9, %v5363_v22  ;;  %v5283_v56 = vsel %vm2349_vm2, %v5251_v53, %v5015_v16 }
 0x323   : > { %v5077_v4 = vpop.permute.xlu1 %5076 }
 0x324   : > { %v5315_v20 = vsel %vm2382_vm3, %v5283_v56, %v5077_v4 }
 0x327   : > { %v5087_v58 = vpop.permute.xlu1 %5086  ;;  %v7192_v40 = vpop.f32.mrb[48].mxu0 }
 0x328   : > { %v4171_v60 = vadd.f32 %v11329_v41, %v7192_v40  ;;  %v4162_v35 = vpop.f32.mrb[49].mxu0  ;;  %v5333_v51 = vsel %vm2415_vm4, %v5315_v20, %v5087_v58 }
 0x329   : > { %v4163_v37 = vadd.f32 %v11329_v41, %v4162_v35  ;;  %v7193_v38 = vpop.f32.mrb[50].mxu0 }
 0x32a   : > { %v4276_v15 = vmul.f32 %v10796_v54, %v4171_v60  ;;  %v4174_v44 = vadd.f32 %v11329_v41, %v7193_v38  ;;  %v4165_v23 = vpop.f32.mrb[51].mxu0  ;;  %vm4243_vm0 = vcmp.ge.f32.partialorder %v4171_v60, 0.0 }
 0x32b   : > { %v5137_v5 = vpop.permute.xlu1 %5136  ;;  %v4274_v62 = vmul.f32 %v10796_v54, %v4163_v37  ;;  %v4166_v52 = vadd.f32 %v11329_v41, %v4165_v23  ;;  %vm4241_vm2 = vcmp.ge.f32.partialorder %v4163_v37, 0.0 }
 0x32c   : > { %v5365_v25 = vsel %vm12504_vm1, %v5333_v51, %v5137_v5  ;;  %v7218_v22 = vpop.f32.mrb[32].mxu1  ;;  %vm4244_vm3 = vcmp.ge.f32.partialorder %v4174_v44, 0.0  ;;  %v4277_v16 = vmul.f32 %v10796_v54, %v4174_v44  ;;  %v11352_v48 = vsel %vm4243_vm0, %v4171_v60, %v4276_v15 }
 0x32d   : > { %v5487_v39 = vadd.f32 %v7218_v22, %v11339_v43  ;;  %v5478_v32 = vpop.f32.mrb[33].mxu1  ;;  %7245 = vmatmul.mubr.msk.bf16.gmra.mrb[60].mxu1 %vm12505_vm13, %v5365_v25  ;;  %vm4242_vm5 = vcmp.ge.f32.partialorder %v4166_v52, 0.0  ;;  %v4275_v4 = vmul.f32 %v10796_v54, %v4166_v52  ;;  %v4306_v35 = vsel %vm4241_vm2, %v4163_v37, %v4274_v62 }
 0x32e   : > { %v5479_v45 = vadd.f32 %v11339_v43, %v5478_v32  ;;  %v11355_v58 = vsel %vm4244_vm3, %v4174_v44, %v4277_v16  ;;  %v7219_v40 = vpop.f32.mrb[34].mxu1 }
 0x32f   : > { %v5640_v53 = vmul.f32 %v11341_v24, %v5487_v39  ;;  %v5490_v38 = vadd.f32 %v7219_v40, %v11339_v43  ;;  %v5481_v20 = vpop.f32.mrb[35].mxu1  ;;  %vm5607_vm4 = vcmp.ge.f32.partialorder %v5487_v39, 0.0  ;;  %v4307_v51 = vsel %vm4242_vm5, %v4166_v52, %v4275_v4 }
 0x330   : > { %v5638_v23 = vmul.f32 %v11341_v24, %v5479_v45  ;;  %v5482_v60 = vadd.f32 %v11339_v43, %v5481_v20  ;;  %vm5605_vm8 = vcmp.ge.f32.partialorder %v5479_v45, 0.0  ;;  %v7313_v44 = vpack.i.bf16 %v4307_v51, %v4306_v35 }
 0x331   : > { %vm5608_vm6 = vcmp.ge.f32.partialorder %v5490_v38, 0.0  ;;  %v5641_v15 = vmul.f32 %v11341_v24, %v5490_v38  ;;  %v11365_v5 = vsel %vm5607_vm4, %v5487_v39, %v5640_v53 }
 0x332   : > { %vm5606_vm7 = vcmp.ge.f32.partialorder %v5482_v60, 0.0  ;;  %v5639_v37 = vmul.f32 %v11341_v24, %v5482_v60  ;;  %7314 = vrot.lane.b32.xlu1 %v7313_v44, %s7740_s25  ;;  %v5670_v25 = vsel %vm5605_vm8, %v5479_v45, %v5638_v23 }
 0x333   : > { %v11367_v62 = vsel %vm5608_vm6, %v5490_v38, %v5641_v15 }
 0x334   : > { %v5671_v22 = vsel %vm5606_vm7, %v5482_v60, %v5639_v37 }
 0x335   : > { %v7318_v16 = vpack.i.bf16 %v5671_v22, %v5670_v25 }
 0x337   : > { %7319 = vrot.lane.b32.xlu0 %v7318_v16, %s7751_s23 }
 0x34f   : > { %v7196_v32 = vpop.f32.mrb[52].mxu0 }
 0x350   : > { %v4187_v4 = vadd.f32 %v11329_v41, %v7196_v32  ;;  %v4178_v40 = vpop.f32.mrb[53].mxu0 }
 0x351   : > { %v4179_v39 = vadd.f32 %v11329_v41, %v4178_v40  ;;  %v7197_v53 = vpop.f32.mrb[54].mxu0 }
 0x352   : > { %v4280_v35 = vmul.f32 %v10796_v54, %v4187_v4  ;;  %v4190_v38 = vadd.f32 %v11329_v41, %v7197_v53  ;;  %v4181_v45 = vpop.f32.mrb[55].mxu0  ;;  %vm4247_vm10 = vcmp.ge.f32.partialorder %v4187_v4, 0.0 }
 0x353   : > { %v4278_v20 = vmul.f32 %v10796_v54, %v4179_v39  ;;  %v4182_v23 = vadd.f32 %v11329_v41, %v4181_v45  ;;  %vm4245_vm11 = vcmp.ge.f32.partialorder %v4179_v39, 0.0 }
 0x354   : > { %v7222_v51 = vpop.f32.mrb[36].mxu1  ;;  %vm4248_vm12 = vcmp.ge.f32.partialorder %v4190_v38, 0.0  ;;  %v4281_v60 = vmul.f32 %v10796_v54, %v4190_v38  ;;  %v11382_v25 = vsel %vm4247_vm10, %v4187_v4, %v4280_v35 }
 0x355   : > { %v5503_v15 = vadd.f32 %v7222_v51, %v11339_v43  ;;  %v5494_v44 = vpop.f32.mrb[37].mxu1  ;;  %vm4246_vm9 = vcmp.ge.f32.partialorder %v4182_v23, 0.0  ;;  %v4279_v37 = vmul.f32 %v10796_v54, %v4182_v23  ;;  %v11388_v53 = vsel %vm4245_vm11, %v4179_v39, %v4278_v20 }
 0x356   : > { %v5495_v22 = vadd.f32 %v11339_v43, %v5494_v44  ;;  %v11385_v16 = vsel %vm4248_vm12, %v4190_v38, %v4281_v60  ;;  %v7223_v32 = vpop.f32.mrb[38].mxu1 }
 0x357   : > { %v5644_v40 = vmul.f32 %v11341_v24, %v5503_v15  ;;  %v5506_v51 = vadd.f32 %v7223_v32, %v11339_v43  ;;  %v5497_v42 = vpop.f32.mrb[39].mxu1  ;;  %vm5611_vm0 = vcmp.ge.f32.partialorder %v5503_v15, 0.0  ;;  %v11394_v4 = vsel %vm4246_vm9, %v4182_v23, %v4279_v37 }
 0x358   : > { %v5642_v26 = vmul.f32 %v11341_v24, %v5495_v22  ;;  %v5498_v35 = vadd.f32 %v11339_v43, %v5497_v42  ;;  %vm5609_vm1 = vcmp.ge.f32.partialorder %v5495_v22, 0.0 }
 0x359   : > { %vm5612_vm2 = vcmp.ge.f32.partialorder %v5506_v51, 0.0  ;;  %v5645_v38 = vmul.f32 %v11341_v24, %v5506_v51  ;;  %v11401_v60 = vsel %vm5611_vm0, %v5503_v15, %v5644_v40 }
 0x35a   : > { %vm5610_vm3 = vcmp.ge.f32.partialorder %v5498_v35, 0.0  ;;  %v5643_v20 = vmul.f32 %v11341_v24, %v5498_v35  ;;  %v11405_v32 = vsel %vm5609_vm1, %v5495_v22, %v5642_v26 }
 0x35b   : > { %v11403_v44 = vsel %vm5612_vm2, %v5506_v51, %v5645_v38 }
 0x35c   : > { %v11409_v42 = vsel %vm5610_vm3, %v5498_v35, %v5643_v20 }
 0x377   : > { %v7200_v49 = vpop.f32.mrb[56].mxu0 }
 0x378   : > { %v4203_v8 = vadd.f32 %v11329_v41, %v7200_v49  ;;  %v4194_v2 = vpop.f32.mrb[57].mxu0 }
 0x379   : > { %v4195_v7 = vadd.f32 %v11329_v41, %v4194_v2  ;;  %v7201_v15 = vpop.f32.mrb[58].mxu0 }
 0x37a   : > { %v4284_v40 = vmul.f32 %v10796_v54, %v4203_v8  ;;  %v4206_v26 = vadd.f32 %v11329_v41, %v7201_v15  ;;  %v4197_v22 = vpop.f32.mrb[59].mxu0  ;;  %vm4251_vm13 = vcmp.ge.f32.partialorder %v4203_v8, 0.0 }
 0x37b   : > { %v4282_v51 = vmul.f32 %v10796_v54, %v4195_v7  ;;  %v4198_v35 = vadd.f32 %v11329_v41, %v4197_v22  ;;  %vm4249_vm5 = vcmp.ge.f32.partialorder %v4195_v7, 0.0 }
 0x37c   : > { %v7226_v38 = vpop.f32.mrb[40].mxu1  ;;  %vm4252_vm4 = vcmp.ge.f32.partialorder %v4206_v26, 0.0  ;;  %v4285_v20 = vmul.f32 %v10796_v54, %v4206_v26  ;;  %v11422_v23 = vsel %vm4251_vm13, %v4203_v8, %v4284_v40 }
 0x37d   : > { %v5519_v49 = vadd.f32 %v7226_v38, %v11339_v43  ;;  %v5510_v28 = vpop.f32.mrb[41].mxu1  ;;  %vm4250_vm8 = vcmp.ge.f32.partialorder %v4198_v35, 0.0  ;;  %v4283_v2 = vmul.f32 %v10796_v54, %v4198_v35  ;;  %v11428_v45 = vsel %vm4249_vm5, %v4195_v7, %v4282_v51 }
 0x37e   : > { %v5511_v15 = vadd.f32 %v11339_v43, %v5510_v28  ;;  %v11425_v14 = vsel %vm4252_vm4, %v4206_v26, %v4285_v20  ;;  %v7227_v63 = vpop.f32.mrb[42].mxu1 }
 0x37f   : > { %v5648_v22 = vmul.f32 %v11341_v24, %v5519_v49  ;;  %v5522_v38 = vadd.f32 %v7227_v63, %v11339_v43  ;;  %v5513_v55 = vpop.f32.mrb[43].mxu1  ;;  %vm5615_vm6 = vcmp.ge.f32.partialorder %v5519_v49, 0.0  ;;  %v11434_v8 = vsel %vm4250_vm8, %v4198_v35, %v4283_v2 }
 0x380   : > { %v5646_v10 = vmul.f32 %v11341_v24, %v5511_v15  ;;  %v5514_v28 = vadd.f32 %v11339_v43, %v5513_v55  ;;  %vm5613_vm7 = vcmp.ge.f32.partialorder %v5511_v15, 0.0 }
 0x381   : > { %vm5616_vm10 = vcmp.ge.f32.partialorder %v5522_v38, 0.0  ;;  %v5649_v40 = vmul.f32 %v11341_v24, %v5522_v38  ;;  %v11441_v51 = vsel %vm5615_vm6, %v5519_v49, %v5648_v22 }
 0x382   : > { %vm5614_vm11 = vcmp.ge.f32.partialorder %v5514_v28, 0.0  ;;  %v5647_v26 = vmul.f32 %v11341_v24, %v5514_v28  ;;  %v11445_v20 = vsel %vm5613_vm7, %v5511_v15, %v5646_v10 }
 0x383   : > { %v11443_v63 = vsel %vm5616_vm10, %v5522_v38, %v5649_v40 }
 0x384   : > { %v11449_v55 = vsel %vm5614_vm11, %v5514_v28, %v5647_v26 }
 0x3a1   : > { %v7230_v37 = vpop.f32.mrb[44].mxu1 }
 0x3a2   : > { %v5535_v7 = vadd.f32 %v7230_v37, %v11339_v43  ;;  %v5526_v52 = vpop.f32.mrb[45].mxu1 }
 0x3a3   : > { %v5527_v39 = vadd.f32 %v11339_v43, %v5526_v52  ;;  %v7231_v49 = vpop.f32.mrb[46].mxu1 }
 0x3a4   : > { %v5652_v22 = vmul.f32 %v11341_v24, %v5535_v7  ;;  %v5538_v10 = vadd.f32 %v7231_v49, %v11339_v43  ;;  %v5529_v15 = vpop.f32.mrb[47].mxu1  ;;  %vm5619_vm12 = vcmp.ge.f32.partialorder %v5535_v7, 0.0 }
 0x3a5   : > { %v5650_v38 = vmul.f32 %v11341_v24, %v5527_v39  ;;  %v5530_v28 = vadd.f32 %v11339_v43, %v5529_v15  ;;  %vm5617_vm9 = vcmp.ge.f32.partialorder %v5527_v39, 0.0 }
 0x3a6   : > { %vm5620_vm0 = vcmp.ge.f32.partialorder %v5538_v10, 0.0  ;;  %v5653_v40 = vmul.f32 %v11341_v24, %v5538_v10  ;;  %v11461_v26 = vsel %vm5619_vm12, %v5535_v7, %v5652_v22  ;;  %v5857_v7 = vlaneseq }
 0x3a7   : > { %vm5618_vm1 = vcmp.ge.f32.partialorder %v5530_v28, 0.0  ;;  %v5651_v37 = vmul.f32 %v11341_v24, %v5530_v28  ;;  %12506 = vst [vmem:[#allocation97_spill] sm:$0xff] %v11461_v26  ;;  %v11465_v35 = vsel %vm5617_vm9, %v5527_v39, %v5650_v38 }
 0x3a8   : > { %v11463_v52 = vsel %vm5620_vm0, %v5538_v10, %v5653_v40  ;;  %12508 = vst [vmem:[#allocation38_spill] sm:$0xff] %v11465_v35  ;;  %v5858_v49 = vshrl.u32 %v5857_v7, 7 }
 0x3a9   : > { %12507 = vst [vmem:[#allocation40_spill] sm:$0xff] %v11463_v52  ;;  %v11469_v2 = vsel %vm5618_vm1, %v5530_v28, %v5651_v37  ;;  %v7204_v13 = vpop.f32.mrb[60].mxu0 }
 0x3aa   : > { %12509 = vst [vmem:[#allocation107_spill] sm:$0xff] %v11469_v2  ;;  %v4219_v56 = vadd.f32 %v11329_v41, %v7204_v13  ;;  %v4210_v21 = vpop.f32.mrb[61].mxu0  ;;  %v5859_v3 = vsub.s32 0, %v5858_v49  ;;  %v12513_v49 = vpack.i.bf16 %v11355_v58, %v11352_v48 }
 0x3ab   : > { %v4211_v22 = vadd.f32 %v11329_v41, %v4210_v21  ;;  %v7205_v10 = vpop.f32.mrb[62].mxu0  ;;  %v5806_v21 = vld [vmem:[%s12020_s11] sm:$0x1] }
 0x3ac   : > { %v4213_v39 = vpop.f32.mrb[63].mxu0  ;;  %v4288_v38 = vmul.f32 %v10796_v54, %v4219_v56  ;;  %v4222_v28 = vadd.f32 %v11329_v41, %v7205_v10  ;;  %vm4255_vm2 = vcmp.ge.f32.partialorder %v4219_v56, 0.0 }
 0x3ad   : > { %v4214_v40 = vadd.f32 %v11329_v41, %v4213_v39  ;;  %v4286_v37 = vmul.f32 %v10796_v54, %v4211_v22  ;;  %vm4253_vm3 = vcmp.ge.f32.partialorder %v4211_v22, 0.0  ;;  %v5854_v39 = vstv %s11471_s16 }
 0x3ae   : > { %vm4256_vm13 = vcmp.ge.f32.partialorder %v4222_v28, 0.0  ;;  %v4289_v13 = vmul.f32 %v10796_v54, %v4222_v28  ;;  %v11486_v26 = vsel %vm4255_vm2, %v4219_v56, %v4288_v38 }
 0x3af   : > { %vm4254_vm5 = vcmp.ge.f32.partialorder %v4214_v40, 0.0  ;;  %v4287_v15 = vmul.f32 %v10796_v54, %v4214_v40  ;;  %v11491_v52 = vsel %vm4253_vm3, %v4211_v22, %v4286_v37  ;;  %v12510_v22 = vld [vmem:[#allocation6_spill] sm:$0xff]  ;;  %v12511_v37 = vld [vmem:[#allocation63_spill] sm:$0xff] }
 0x3b0   : > { %v11488_v10 = vsel %vm4256_vm13, %v4222_v28, %v4289_v13  ;;  %v12512_v7 = vpack.i.bf16 %v12510_v22, %v12511_v37 }
 0x3b1   : > { %v5847_v41 = vpop.f32.mrb[64].mxu0  ;;  %v11495_v19 = vsel %vm4254_vm5, %v4214_v40, %v4287_v15 }
 0x3b2   : > { %v5848_v35 = vadd.f32 %v5847_v41, %v5806_v21  ;;  %v7252_v2 = vpop.f32.mrb[65].mxu0  ;;  %v7493_v29 = vpack.i.bf16 %v11495_v19, %v11491_v52  ;;  %v12557_v19 = vld [vmem:[#allocation107_spill] sm:$0xff] }
 0x3b3   : > { %v5850_v54 = vpop.f32.mrb[66].mxu0 }
 0x3b4   : > { %vm5853_vm4 = vcmp.ge.f32.partialorder %v5848_v35, 0.0  ;;  %v5855_v56 = vmul.f32 %v5854_v39, %v5848_v35  ;;  %v7253_v38 = vpop.f32.mrb[67].mxu0 }
 0x3b6   : > { %v5856_v28 = vsel %vm5853_vm4, %v5848_v35, %v5855_v56 }
 0x3b7   : > { %v5860_v13 = vrot.slane %v5856_v28, %v5859_v3 }
 0x3b9   : > { %6246 = vrot.lane.b32.xlu0 %v5860_v13, %s7741_s26 }
 0x3bd   : > { %7334 = vrot.lane.b32.xlu0 %v12512_v7, %s7749_s27 }
 0x3c0   : > { %v7234_v15 = vpop.f32.mrb[48].mxu1 }
 0x3c1   : > { %v5551_v2 = vadd.f32 %v7234_v15, %v11339_v43  ;;  %v5542_v40 = vpop.f32.mrb[49].mxu1  ;;  %7344 = vrot.lane.b32.xlu0 %v12513_v49, %s7740_s25  ;;  %v12514_v15 = vpack.i.bf16 %v11024_v50, %v11020_v31  ;;  %v12516_v49 = vld [vmem:[#allocation102_spill] sm:$0xff] }
 0x3c2   : > { %v5543_v21 = vadd.f32 %v11339_v43, %v5542_v40  ;;  %v7235_v35 = vpop.f32.mrb[50].mxu1  ;;  %v12515_v40 = vld [vmem:[#allocation103_spill] sm:$0xff] }
 0x3c3   : > { %v5656_v3 = vmul.f32 %v11341_v24, %v5551_v2  ;;  %v5554_v41 = vadd.f32 %v7235_v35, %v11339_v43  ;;  %v5545_v39 = vpop.f32.mrb[51].mxu1  ;;  %vm5623_vm8 = vcmp.ge.f32.partialorder %v5551_v2, 0.0  ;;  %v12517_v35 = vpack.i.bf16 %v12515_v40, %v12516_v49  ;;  %v12524_v40 = vld [vmem:[#allocation27_spill] sm:$0xff] }
 0x3c4   : > { %v5654_v7 = vmul.f32 %v11341_v24, %v5543_v21  ;;  %v5546_v54 = vadd.f32 %v11339_v43, %v5545_v39  ;;  %vm5621_vm6 = vcmp.ge.f32.partialorder %v5543_v21, 0.0 }
 0x3c5   : > { %vm5624_vm7 = vcmp.ge.f32.partialorder %v5554_v41, 0.0  ;;  %v5657_v56 = vmul.f32 %v11341_v24, %v5554_v41  ;;  %v5688_v58 = vsel %vm5623_vm8, %v5551_v2, %v5656_v3  ;;  %v12518_v2 = vpack.i.bf16 %v11394_v4, %v11388_v53  ;;  %v12520_v3 = vld [vmem:[#allocation44_spill] sm:$0xff] }
 0x3c6   : > { %vm5622_vm10 = vcmp.ge.f32.partialorder %v5546_v54, 0.0  ;;  %v5655_v48 = vmul.f32 %v11341_v24, %v5546_v54  ;;  %v5686_v28 = vsel %vm5621_vm6, %v5543_v21, %v5654_v7  ;;  %v12519_v21 = vld [vmem:[#allocation94_spill] sm:$0xff]  ;;  %v12522_v53 = vpack.i.bf16 %v11367_v62, %v11365_v5 }
 0x3c7   : > { %v5689_v38 = vsel %vm5624_vm7, %v5554_v41, %v5657_v56  ;;  %v12521_v41 = vpack.i.bf16 %v12519_v21, %v12520_v3  ;;  %v12526_v21 = vpack.i.bf16 %v11080_v33, %v11076_v46  ;;  %v12527_v3 = vpack.i.bf16 %v11015_v47, %v11013_v27 }
 0x3c8   : > { %v7353_v13 = vpack.i.bf16 %v5689_v38, %v5688_v58  ;;  %v5687_v22 = vsel %vm5622_vm10, %v5546_v54, %v5655_v48  ;;  %vm6402_vm7 = vcmask 162816  }
 0x3c9   : > { %v7323_v37 = vpack.i.bf16 %v5687_v22, %v5686_v28 }
 0x3ca   : > { %7354 = vrot.lane.b32.xlu0 %v7353_v13, %s7751_s23 }
 0x3cb   : > { %7324 = vrot.lane.b32.xlu1 %v7323_v37, %s7751_s23 }
 0x3ce   : > { %7364 = vrot.lane.b32.xlu0 %v12514_v15, %s7749_s27  ;;  %v12523_v15 = vld [vmem:[#allocation54_spill] sm:$0xff] }
 0x3cf   : > { %7329 = vrot.lane.b32.xlu1 %v12517_v35, %s7749_s27  ;;  %v12525_v49 = vpack.i.bf16 %v12523_v15, %v12524_v40  ;;  %v12536_v15 = vpack.i.bf16 %v11434_v8, %v11428_v45  ;;  %v12537_v40 = vld [vmem:[#allocation50_spill] sm:$0xff]  ;;  %v12542_v45 = vpack.i.bf16 %v11449_v55, %v11445_v20 }
 0x3d0   : > { %v12545_v8 = vld [vmem:[#allocation34_spill] sm:$0xff] }
 0x3d2   : > { %7374 = vrot.lane.b32.xlu0 %v12518_v2, %s7740_s25 }
 0x3d3   : > { %7339 = vrot.lane.b32.xlu1 %v12521_v41, %s7740_s25  ;;  %v12528_v41 = vpack.i.bf16 %v11409_v42, %v11405_v32 }
 0x3d4   : > { %v7238_v39 = vpop.f32.mrb[52].mxu1 }
 0x3d5   : > { %v5567_v7 = vadd.f32 %v7238_v39, %v11339_v43  ;;  %v5558_v31 = vpop.f32.mrb[53].mxu1  ;;  %v12529_v39 = vpack.i.bf16 %v11385_v16, %v11382_v25  ;;  %v12533_v25 = vpack.i.bf16 %v11070_v30, %v11068_v17  ;;  %v12535_v17 = vpack.i.bf16 %v11403_v44, %v11401_v60  ;;  %v12544_v44 = vld [vmem:[#allocation41_spill] sm:$0xff] }
 0x3d6   : > { %v5559_v50 = vadd.f32 %v11339_v43, %v5558_v31  ;;  %v7239_v54 = vpop.f32.mrb[54].mxu1  ;;  %v12531_v31 = vld [vmem:[#allocation23_spill] sm:$0xff]  ;;  %v12543_v60 = vpack.i.bf16 %v11425_v14, %v11422_v23  ;;  %v12547_v14 = vpack.i.bf16 %v11193_v18, %v11191_v0  ;;  %v12549_v0 = vpack.i.bf16 %v11443_v63, %v11441_v51 }
 0x3d7   : > { %v5660_v56 = vmul.f32 %v11341_v24, %v5567_v7  ;;  %v5570_v48 = vadd.f32 %v7239_v54, %v11339_v43  ;;  %v5561_v58 = vpop.f32.mrb[55].mxu1  ;;  %7349 = vrot.lane.b32.xlu1 %v12522_v53, %s7751_s23  ;;  %vm5627_vm11 = vcmp.ge.f32.partialorder %v5567_v7, 0.0  ;;  %v12555_v51 = vld [vmem:[#allocation55_spill] sm:$0xff] }
 0x3d8   : > { %v5658_v4 = vmul.f32 %v11341_v24, %v5559_v50  ;;  %v5562_v38 = vadd.f32 %v11339_v43, %v5561_v58  ;;  %vm5625_vm12 = vcmp.ge.f32.partialorder %v5559_v50, 0.0 }
 0x3d9   : > { %vm5628_vm9 = vcmp.ge.f32.partialorder %v5570_v48, 0.0  ;;  %v5661_v28 = vmul.f32 %v11341_v24, %v5570_v48  ;;  %v5692_v22 = vsel %vm5627_vm11, %v5567_v7, %v5660_v56  ;;  %v12530_v7 = vld [vmem:[#allocation53_spill] sm:$0xff] }
 0x3da   : > { %vm5626_vm0 = vcmp.ge.f32.partialorder %v5562_v38, 0.0  ;;  %v5659_v13 = vmul.f32 %v11341_v24, %v5562_v38  ;;  %v5690_v5 = vsel %vm5625_vm12, %v5559_v50, %v5658_v4  ;;  %v12532_v46 = vpack.i.bf16 %v12530_v7, %v12531_v31 }
 0x3db   : > { %v5693_v37 = vsel %vm5628_vm9, %v5570_v48, %v5661_v28  ;;  %7359 = vrot.lane.b32.xlu1 %v12525_v49, %s7749_s27  ;;  %v12534_v28 = vpack.i.bf16 %v11169_v57, %v11165_v9  ;;  %v12538_v49 = vld [vmem:[#allocation52_spill] sm:$0xff]  ;;  %v12540_v9 = vpack.i.bf16 %v11200_v34, %v11196_v61  ;;  %v12541_v57 = vpack.i.bf16 %v11161_v12, %v11159_v36 }
 0x3dc   : > { %v7413_v62 = vpack.i.bf16 %v5693_v37, %v5692_v22  ;;  %v5691_v35 = vsel %vm5626_vm0, %v5562_v38, %v5659_v13  ;;  %v12546_v61 = vpack.i.bf16 %v12544_v44, %v12545_v8  ;;  %v12548_v31 = vpack.i.bf16 %v11266_v1, %v11262_v6  ;;  %v12554_v1 = vld [vmem:[#allocation69_spill] sm:$0xff] }
 0x3dd   : > { %v7383_v2 = vpack.i.bf16 %v5691_v35, %v5690_v5  ;;  %v12539_v5 = vpack.i.bf16 %v12537_v40, %v12538_v49  ;;  %v12553_v6 = vpack.i.bf16 %v11297_v11, %v11293_v59  ;;  %v12556_v63 = vpack.i.bf16 %v12554_v1, %v12555_v51  ;;  %v11674_v11 = vld [vmem:[%s12021_s12] sm:$0xf] }
 0x3de   : > { %7086 = vmatprep.mubr.msk.bf16.mxu1 %vm6402_vm7, %v11674_v11  ;;  %vm6249_vm12 = vcmask 31744   ;;  %vm6314_vm9 = vcmask 97280  }
 0x3df   : > { %7384 = vrot.lane.b32.xlu0 %v7383_v2, %s7751_s23  ;;  %7369 = vrot.lane.b32.xlu1 %v12526_v21, %s7740_s25 }
 0x3e3   : > { %7394 = vrot.lane.b32.xlu0 %v12527_v3, %s7749_s27  ;;  %7379 = vrot.lane.b32.xlu1 %v12528_v41, %s7751_s23 }
 0x3e7   : > { %7404 = vrot.lane.b32.xlu0 %v12529_v39, %s7740_s25  ;;  %7389 = vrot.lane.b32.xlu1 %v12532_v46, %s7749_s27 }
 0x3e8   : > { %v7242_v33 = vpop.f32.mrb[56].mxu1 }
 0x3e9   : > { %v5583_v50 = vadd.f32 %v7242_v33, %v11339_v43  ;;  %v5574_v27 = vpop.f32.mrb[57].mxu1 }
 0x3ea   : > { %v5575_v47 = vadd.f32 %v11339_v43, %v5574_v27  ;;  %v7243_v54 = vpop.f32.mrb[58].mxu1 }
 0x3eb   : > { %v5664_v32 = vmul.f32 %v11341_v24, %v5583_v50  ;;  %v5586_v42 = vadd.f32 %v7243_v54, %v11339_v43  ;;  %v5577_v56 = vpop.f32.mrb[59].mxu1  ;;  %7414 = vrot.lane.b32.xlu0 %v7413_v62, %s7751_s23  ;;  %7399 = vrot.lane.b32.xlu1 %v12533_v25, %s7740_s25  ;;  %vm5631_vm1 = vcmp.ge.f32.partialorder %v5583_v50, 0.0  ;;  %v12561_v54 = vld [vmem:[#allocation47_spill] sm:$0xff]  ;;  %v11686_v25 = vld [vmem:[%s12012_s3] ss:$0 sm:$0xff] }
 0x3ec   : > { %v5662_v16 = vmul.f32 %v11341_v24, %v5575_v47  ;;  %v5578_v48 = vadd.f32 %v11339_v43, %v5577_v56  ;;  %vm5629_vm2 = vcmp.ge.f32.partialorder %v5575_v47, 0.0 }
 0x3ed   : > { %vm5632_vm3 = vcmp.ge.f32.partialorder %v5586_v42, 0.0  ;;  %v5665_v58 = vmul.f32 %v11341_v24, %v5586_v42  ;;  %v5696_v4 = vsel %vm5631_vm1, %v5583_v50, %v5664_v32  ;;  %v12551_v50 = vld [vmem:[#allocation48_spill] sm:$0xff] }
 0x3ee   : > { %vm5630_vm13 = vcmp.ge.f32.partialorder %v5578_v48, 0.0  ;;  %v5663_v53 = vmul.f32 %v11341_v24, %v5578_v48  ;;  %v5694_v30 = vsel %vm5629_vm2, %v5575_v47, %v5662_v16  ;;  %v12560_v47 = vpack.i.bf16 %v11488_v10, %v11486_v26  ;;  %v12562_v32 = vld [vmem:[#allocation28_spill] sm:$0xff]  ;;  %v12564_v26 = vld [vmem:[#allocation59_spill] sm:$0xff] }
 0x3ef   : > { %v5697_v38 = vsel %vm5632_vm3, %v5586_v42, %v5665_v58  ;;  %7424 = vrot.lane.b32.xlu0 %v12534_v28, %s7749_s27  ;;  %7409 = vrot.lane.b32.xlu1 %v12535_v17, %s7751_s23  ;;  %v12563_v59 = vpack.i.bf16 %v12561_v54, %v12562_v32  ;;  %v7300_v42 = vpop.permute.xlu0 %7299  ;;  %v12565_v10 = vld [vmem:[#allocation96_spill] sm:$0xff]  ;;  %v12567_v16 = vld [vmem:[#allocation31_spill] sm:$0xff]  ;;  %v12568_v58 = vld [vmem:[#allocation65_spill] sm:$0xff] }
 0x3f0   : > { %v7473_v13 = vpack.i.bf16 %v5697_v38, %v5696_v4  ;;  %v5695_v22 = vsel %vm5630_vm13, %v5578_v48, %v5663_v53  ;;  %v12566_v56 = vpack.i.bf16 %v12564_v26, %v12565_v10  ;;  %v993_v48 = vadd.f32 %v11686_v25, %v12567_v16  ;;  %v12569_v4 = vld [vmem:[#allocation40_spill] sm:$0xff]  ;;  %v12570_v38 = vld [vmem:[#allocation97_spill] sm:$0xff] }
 0x3f1   : > { %v7443_v37 = vpack.i.bf16 %v5695_v22, %v5694_v30  ;;  %v996_v53 = vadd.f32 %v11686_v25, %v12568_v58  ;;  %v12571_v28 = vpack.i.bf16 %v12569_v4, %v12570_v38  ;;  %v6396_v30 = vld [vmem:[%s12022_s13] sm:$0xff]  ;;  %v7302_v49 = vunpack.i.h.bf16 %v7300_v42 }
 0x3f2   : > { %vm1119_vm10 = vcmp.ge.f32.partialorder %v993_v48, 0.0 }
 0x3f3   : > { %7434 = vrot.lane.b32.xlu0 %v12536_v15, %s7740_s25  ;;  %7419 = vrot.lane.b32.xlu1 %v12539_v5, %s7749_s27  ;;  %v7310_v17 = vpop.permute.xlu0 %7309  ;;  %vm1120_vm11 = vcmp.ge.f32.partialorder %v996_v53, 0.0  ;;  %v7301_v5 = vunpack.i.l.bf16 %v7300_v42 }
 0x3f7   : > { %7444 = vrot.lane.b32.xlu0 %v7443_v37, %s7751_s23  ;;  %7429 = vrot.lane.b32.xlu1 %v12540_v9, %s7740_s25  ;;  %v7320_v15 = vpop.permute.xlu0 %7319 }
 0x3f8   : > { %v7321_v44 = vunpack.i.l.bf16 %v7320_v15 }
 0x3fb   : > { %7454 = vrot.lane.b32.xlu0 %v12541_v57, %s7749_s27  ;;  %7439 = vrot.lane.b32.xlu1 %v12542_v45, %s7751_s23  ;;  %v7312_v57 = vunpack.i.h.bf16 %v7310_v17  ;;  %v7311_v45 = vunpack.i.l.bf16 %v7310_v17 }
 0x3ff   : > { %7464 = vrot.lane.b32.xlu0 %v12543_v60, %s7740_s25  ;;  %7449 = vrot.lane.b32.xlu1 %v12546_v61, %s7749_s27  ;;  %v7322_v60 = vunpack.i.h.bf16 %v7320_v15 }
 0x400   : > { %v7246_v34 = vpop.f32.mrb[60].mxu1 }
 0x401   : > { %v5599_v62 = vadd.f32 %v7246_v34, %v11339_v43  ;;  %v5590_v36 = vpop.f32.mrb[61].mxu1 }
 0x402   : > { %v5591_v12 = vadd.f32 %v11339_v43, %v5590_v36  ;;  %v7247_v35 = vpop.f32.mrb[62].mxu1 }
 0x403   : > { %v5668_v20 = vmul.f32 %v11341_v24, %v5599_v62  ;;  %v5602_v55 = vadd.f32 %v7247_v35, %v11339_v43  ;;  %v5593_v2 = vpop.f32.mrb[63].mxu1  ;;  %7474 = vrot.lane.b32.xlu0 %v7473_v13, %s7751_s23  ;;  %7459 = vrot.lane.b32.xlu1 %v12547_v14, %s7740_s25  ;;  %vm5635_vm5 = vcmp.ge.f32.partialorder %v5599_v62, 0.0  ;;  %v12572_v13 = vld [vmem:[#allocation43_spill] sm:$0xff]  ;;  %v12573_v14 = vld [vmem:[#allocation32_spill] sm:$0xff] }
 0x404   : > { %v5666_v23 = vmul.f32 %v11341_v24, %v5591_v12  ;;  %v5594_v21 = vadd.f32 %v11339_v43, %v5593_v2  ;;  %vm5633_vm4 = vcmp.ge.f32.partialorder %v5591_v12, 0.0  ;;  %v1152_v22 = vmul.f32 %v12572_v13, %v993_v48 }
 0x405   : > { %vm5636_vm8 = vcmp.ge.f32.partialorder %v5602_v55, 0.0  ;;  %v5669_v3 = vmul.f32 %v11341_v24, %v5602_v55  ;;  %v5700_v39 = vsel %vm5635_vm5, %v5599_v62, %v5668_v20  ;;  %v1153_v37 = vmul.f32 %v12572_v13, %v996_v53 }
 0x406   : > { %vm5634_vm6 = vcmp.ge.f32.partialorder %v5594_v21, 0.0  ;;  %v5667_v41 = vmul.f32 %v11341_v24, %v5594_v21  ;;  %v5698_v18 = vsel %vm5633_vm4, %v5591_v12, %v5666_v23  ;;  %v12550_v24 = vld [vmem:[#allocation37_spill] sm:$0xff]  ;;  %v1184_v40 = vsel %vm1119_vm10, %v993_v48, %v1152_v22 }
 0x407   : > { %v5701_v7 = vsel %vm5636_vm8, %v5602_v55, %v5669_v3  ;;  %7484 = vrot.lane.b32.xlu0 %v12548_v31, %s7749_s27  ;;  %7469 = vrot.lane.b32.xlu1 %v12549_v0, %s7751_s23  ;;  %v12552_v27 = vpack.i.bf16 %v12550_v24, %v12551_v50  ;;  %v1185_v9 = vsel %vm1120_vm11, %v996_v53, %v1153_v37  ;;  %v12576_v31 = vld [vmem:[#allocation39_spill] sm:$0xff] }
 0x408   : > { %v7533_v43 = vpack.i.bf16 %v5701_v7, %v5700_v39  ;;  %v5699_v46 = vsel %vm5634_vm6, %v5594_v21, %v5667_v41  ;;  %v6251_v8 = vsel %vm6249_vm12, %v1185_v9, %v7302_v49  ;;  %v6250_v61 = vsel %vm6249_vm12, %v1184_v40, %v7301_v5  ;;  %v12574_v21 = vld [vmem:[#allocation80_spill] sm:$0xff]  ;;  %v12575_v39 = vld [vmem:[#allocation42_spill] sm:$0xff] }
 0x409   : > { %v7503_v33 = vpack.i.bf16 %v5699_v46, %v5698_v18  ;;  %v6282_v34 = vsel %vm905_vm14, %v6250_v61, %v7311_v45  ;;  %v6283_v62 = vsel %vm905_vm14, %v6251_v8, %v7312_v57  ;;  %v1057_v23 = vadd.f32 %v11686_v25, %v12573_v14  ;;  %v7305_v18 = vpop.permute.xlu1 %7304  ;;  %v12577_v45 = vld [vmem:[#allocation36_spill] sm:$0xff] }
 0x40a   : > { %v6316_v36 = vsel %vm6314_vm9, %v6283_v62, %v7322_v60  ;;  %v6315_v12 = vsel %vm6314_vm9, %v6282_v34, %v7321_v44  ;;  %v1060_v3 = vadd.f32 %v11686_v25, %v12574_v21  ;;  %v1065_v7 = vadd.f32 %v11686_v25, %v12575_v39  ;;  %v12578_v44 = vld [vmem:[#allocation45_spill] sm:$0xff]  ;;  %v12579_v39 = vld [vmem:[#allocation84_spill] sm:$0xff] }
 0x40b   : > { %7494 = vrot.lane.b32.xlu0 %v7493_v29, %s7740_s25  ;;  %7479 = vrot.lane.b32.xlu1 %v12552_v27, %s7749_s27  ;;  %v12558_v29 = vld [vmem:[#allocation38_spill] sm:$0xff]  ;;  %v1068_v0 = vadd.f32 %v11686_v25, %v12576_v31  ;;  %vm1135_vm0 = vcmp.ge.f32.partialorder %v1057_v23, 0.0  ;;  %v7307_v27 = vunpack.i.h.bf16 %v7305_v18  ;;  %v1001_v60 = vadd.f32 %v11686_v25, %v12577_v45 }
 0x40c   : > { %v12559_v52 = vpack.i.bf16 %v12557_v19, %v12558_v29  ;;  %v1169_v46 = vmul.f32 %v12572_v13, %v1060_v3  ;;  %vm1136_vm1 = vcmp.ge.f32.partialorder %v1060_v3, 0.0  ;;  %vm1137_vm2 = vcmp.ge.f32.partialorder %v1065_v7, 0.0 }
 0x40d   : > { %vm1138_vm3 = vcmp.ge.f32.partialorder %v1068_v0, 0.0  ;;  %v1171_v50 = vmul.f32 %v12572_v13, %v1068_v0  ;;  %v7315_v1 = vpop.permute.xlu1 %7314  ;;  %v1004_v8 = vadd.f32 %v11686_v25, %v12578_v44  ;;  %vm1121_vm13 = vcmp.ge.f32.partialorder %v1001_v60, 0.0 }
 0x40e   : > { %v7317_v54 = vunpack.i.h.bf16 %v7315_v1  ;;  %v7316_v32 = vunpack.i.l.bf16 %v7315_v1 }
 0x40f   : > { %7504 = vrot.lane.b32.xlu0 %v7503_v33, %s7751_s23  ;;  %7489 = vrot.lane.b32.xlu1 %v12553_v6, %s7740_s25  ;;  %v1170_v33 = vmul.f32 %v12572_v13, %v1065_v7  ;;  %v7306_v6 = vunpack.i.l.bf16 %v7305_v18  ;;  %v1203_v42 = vsel %vm1138_vm3, %v1068_v0, %v1171_v50  ;;  %v1155_v14 = vmul.f32 %v12572_v13, %v1004_v8  ;;  %v12580_v18 = vld [vmem:[#allocation70_spill] sm:$0xff]  ;;  %v12582_v50 = vld [vmem:[#allocation71_spill] sm:$0xff] }
 0x410   : > { %vm1122_vm5 = vcmp.ge.f32.partialorder %v1004_v8, 0.0 }
 0x413   : > { %7514 = vrot.lane.b32.xlu0 %v12556_v63, %s7749_s27  ;;  %7499 = vrot.lane.b32.xlu1 %v12559_v52, %s7751_s23  ;;  %v1201_v63 = vsel %vm1136_vm1, %v1060_v3, %v1169_v46 }
 0x414   : > { %v6267_v26 = vsel %vm6249_vm12, %v1201_v63, %v7307_v27  ;;  %v1009_v27 = vadd.f32 %v11686_v25, %v12582_v50 }
 0x415   : > { %v6299_v37 = vsel %vm905_vm14, %v6267_v26, %v7317_v54 }
 0x416   : > { %vm1123_vm6 = vcmp.ge.f32.partialorder %v1009_v27, 0.0 }
 0x417   : > { %7524 = vrot.lane.b32.xlu0 %v12560_v47, %s7740_s25  ;;  %7509 = vrot.lane.b32.xlu1 %v12563_v59, %s7749_s27  ;;  %v1202_v59 = vsel %vm1137_vm2, %v1065_v7, %v1170_v33  ;;  %v1073_v7 = vadd.f32 %v11686_v25, %v12579_v39 }
 0x419   : > { %vm1139_vm4 = vcmp.ge.f32.partialorder %v1073_v7, 0.0 }
 0x41b   : > { %7534 = vrot.lane.b32.xlu0 %v7533_v43, %s7751_s23  ;;  %7519 = vrot.lane.b32.xlu1 %v12566_v56, %s7740_s25  ;;  %v1168_v43 = vmul.f32 %v12572_v13, %v1057_v23  ;;  %s6586_s25 = sld [smem:[#allocation3 + $0x5]] }
 0x41d   : > { %v1200_v51 = vsel %vm1135_vm0, %v1057_v23, %v1168_v43  ;;  %v12581_v43 = vld [vmem:[#allocation86_spill] sm:$0xff] }
 0x41e   : > { %v6266_v10 = vsel %vm6249_vm12, %v1200_v51, %v7306_v6  ;;  %v1076_v46 = vadd.f32 %v11686_v25, %v12581_v43  ;;  %v12583_v6 = vld [vmem:[#allocation74_spill] sm:$0xff] }
 0x41f   : > { %7529 = vrot.lane.b32.xlu1 %v12571_v28, %s7751_s23  ;;  %v6298_v22 = vsel %vm905_vm14, %v6266_v10, %v7316_v32  ;;  %v1012_v1 = vadd.f32 %v11686_v25, %v12583_v6  ;;  %s481_s23 = scalar_lea.vmem %s12023_s14, %s6987_s22 }
 0x420   : > { %vm1140_vm8 = vcmp.ge.f32.partialorder %v1076_v46, 0.0 }
 0x421   : > { %vm1124_vm11 = vcmp.ge.f32.partialorder %v1012_v1, 0.0 }
 0x423   : > { %6399 = vperm.xlu1 %7538, %v6396_v30  }
 0x42b   : > { %v11707_v35 = vpop.permute.xlu0 %6246 }
 0x42c   : > { %v6347_v20 = vsel %vm2250_vm15, %v6315_v12, %v11707_v35  ;;  %v6348_v55 = vsel %vm2250_vm15, %v6316_v36, %v11707_v35 }
 0x42d   : > { %v6379_v2 = vpack.c.bf16 %v6348_v55, %v6347_v20  ;;  %v1154_v55 = vmul.f32 %v12572_v13, %v1001_v60 }
 0x42f   : > { %v7335_v41 = vpop.permute.xlu0 %7334  ;;  %v6407_v20 = vsel %vm6402_vm7, %v6379_v2, 0  ;;  %v11759_v2 = vadd.f32 %v11686_v25, %v12580_v18  ;;  %v1186_v33 = vsel %vm1121_vm13, %v1001_v60, %v1154_v55 }
 0x430   : > { %v7337_v19 = vunpack.i.h.bf16 %v7335_v41  ;;  %v7336_v29 = vunpack.i.l.bf16 %v7335_v41 }
 0x431   : > { %vm1125_vm10 = vcmp.ge.f32.partialorder %v11759_v2, 0.0 }
 0x432   : > { %v6269_v16 = vsel %vm6249_vm12, %v1203_v42, %v7337_v19  ;;  %v6268_v48 = vsel %vm6249_vm12, %v1202_v59, %v7336_v29  ;;  %v1173_v59 = vmul.f32 %v12572_v13, %v1076_v46 }
 0x433   : > { %v7345_v24 = vpop.permute.xlu0 %7344 }
 0x434   : > { %v7347_v52 = vunpack.i.h.bf16 %v7345_v24  ;;  %v7346_v47 = vunpack.i.l.bf16 %v7345_v24  ;;  %v1187_v24 = vsel %vm1122_vm5, %v1004_v8, %v1155_v14 }
 0x436   : > { %v6300_v38 = vsel %vm905_vm14, %v6268_v48, %v7346_v47  ;;  %v6301_v28 = vsel %vm905_vm14, %v6269_v16, %v7347_v52  ;;  %v1172_v47 = vmul.f32 %v12572_v13, %v1073_v7 }
 0x43c   : > { %v7355_v56 = vpop.permute.xlu0 %7354 }
 0x43d   : > { %v7357_v58 = vunpack.i.h.bf16 %v7355_v56  ;;  %v7356_v53 = vunpack.i.l.bf16 %v7355_v56  ;;  %v7325_v4 = vpop.permute.xlu1 %7324 }
 0x43e   : > { %v7327_v17 = vunpack.i.h.bf16 %v7325_v4  ;;  %v7326_v30 = vunpack.i.l.bf16 %v7325_v4  ;;  %v1158_v4 = vmul.f32 %v12572_v13, %v11759_v2 }
 0x43f   : > { %v6333_v15 = vsel %vm6314_vm9, %v6300_v38, %v7356_v53  ;;  %v6334_v40 = vsel %vm6314_vm9, %v6301_v28, %v7357_v58  ;;  %v12584_v38 = vld [vmem:[#allocation72_spill] sm:$0xff] }
 0x440   : > { %v6331_v49 = vsel %vm6314_vm9, %v6298_v22, %v7326_v30  ;;  %v6332_v5 = vsel %vm6314_vm9, %v6299_v37, %v7327_v17  ;;  %v6365_v9 = vsel %vm2250_vm15, %v6333_v15, %v11707_v35  ;;  %v6366_v57 = vsel %vm2250_vm15, %v6334_v40, %v11707_v35  ;;  %v7365_v21 = vpop.permute.xlu0 %7364 }
 0x441   : > { %v7330_v61 = vpop.permute.xlu1 %7329  ;;  %v6363_v34 = vsel %vm2250_vm15, %v6331_v49, %v11707_v35  ;;  %v6364_v62 = vsel %vm2250_vm15, %v6332_v5, %v11707_v35  ;;  %v6388_v12 = vpack.c.bf16 %v6366_v57, %v6365_v9  ;;  %v7367_v56 = vunpack.i.h.bf16 %v7365_v21  ;;  %v12585_v9 = vld [vmem:[#allocation82_spill] sm:$0xff] }
 0x442   : > { %v6387_v36 = vpack.c.bf16 %v6364_v62, %v6363_v34  ;;  %v7332_v3 = vunpack.i.h.bf16 %v7330_v61  ;;  %v7331_v41 = vunpack.i.l.bf16 %v7330_v61  ;;  %v7366_v16 = vunpack.i.l.bf16 %v7365_v21  ;;  %v12586_v21 = vld [vmem:[#allocation85_spill] sm:$0xff] }
 0x443   : > { %v11783_v28 = vadd.f32 %v11686_v25, %v12584_v38  ;;  %v1156_v30 = vmul.f32 %v12572_v13, %v1009_v27  ;;  %v1204_v15 = vsel %vm1139_vm4, %v1073_v7, %v1172_v47  ;;  %v1205_v40 = vsel %vm1140_vm8, %v1076_v46, %v1173_v59 }
 0x444   : > { %7258 = vmatprep.subr.msk.bf16.mxu1 %vm6402_vm7, %v6387_v36  ;;  %v6253_v63 = vsel %vm6249_vm12, %v1187_v24, %v7332_v3  ;;  %v6252_v19 = vsel %vm6249_vm12, %v1186_v33, %v7331_v41  ;;  %v7375_v42 = vpop.permute.xlu0 %7374  ;;  %v1157_v5 = vmul.f32 %v12572_v13, %v1012_v1  ;;  %v1081_v57 = vadd.f32 %v11686_v25, %v12585_v9 }
 0x445   : > { %v7340_v23 = vpop.permute.xlu1 %7339  ;;  %7071 = vmatpush3.bf16.xpose.msra.mxu1 %v6407_v20  ;;  %v7377_v22 = vunpack.i.h.bf16 %v7375_v42  ;;  %v7376_v37 = vunpack.i.l.bf16 %v7375_v42  ;;  %v6271_v45 = vsel %vm6249_vm12, %v1205_v40, %v7367_v56  ;;  %v6270_v60 = vsel %vm6249_vm12, %v1204_v15, %v7366_v16 }
 0x446   : > { %7259 = vmatprep.subr.msk.bf16.mxu1 %vm6402_vm7, %v6388_v12  ;;  %v7342_v31 = vunpack.i.h.bf16 %v7340_v23  ;;  %v7341_v0 = vunpack.i.l.bf16 %v7340_v23  ;;  %v1188_v23 = vsel %vm1123_vm6, %v1009_v27, %v1156_v30  ;;  %v1084_v3 = vadd.f32 %v11686_v25, %v12586_v21  ;;  %v12588_v30 = vld [vmem:[#allocation90_spill] sm:$0xff] }
 0x447   : > { %v6302_v12 = vsel %vm905_vm14, %v6270_v60, %v7376_v37  ;;  %v6303_v20 = vsel %vm905_vm14, %v6271_v45, %v7377_v22  ;;  %v1189_v7 = vsel %vm1124_vm11, %v1012_v1, %v1157_v5  ;;  %vm1141_vm0 = vcmp.ge.f32.partialorder %v1081_v57, 0.0 }
 0x448   : > { %v6284_v54 = vsel %vm905_vm14, %v6252_v19, %v7341_v0  ;;  %v6285_v32 = vsel %vm905_vm14, %v6253_v63, %v7342_v31  ;;  %v1174_v27 = vmul.f32 %v12572_v13, %v1081_v57  ;;  %vm1142_vm1 = vcmp.ge.f32.partialorder %v1084_v3, 0.0 }
 0x449   : > { %v7350_v51 = vpop.permute.xlu1 %7349  ;;  %v1175_v63 = vmul.f32 %v12572_v13, %v1084_v3  ;;  %v1190_v56 = vsel %vm1125_vm10, %v11759_v2, %v1158_v4  ;;  %vm1126_vm2 = vcmp.ge.f32.partialorder %v11783_v28, 0.0  ;;  %v1089_v22 = vadd.f32 %v11686_v25, %v12588_v30 }
 0x44a   : > { %v7352_v29 = vunpack.i.h.bf16 %v7350_v51  ;;  %v7351_v52 = vunpack.i.l.bf16 %v7350_v51  ;;  %v1206_v38 = vsel %vm1141_vm0, %v1081_v57, %v1174_v27 }
 0x44b   : > { %vm1143_vm3 = vcmp.ge.f32.partialorder %v1089_v22, 0.0 }
 0x44c   : > { %v6317_v26 = vsel %vm6314_vm9, %v6284_v54, %v7351_v52  ;;  %v6318_v10 = vsel %vm6314_vm9, %v6285_v32, %v7352_v29 }
 0x44d   : > { %v7360_v48 = vpop.permute.xlu1 %7359  ;;  %v6349_v58 = vsel %vm2250_vm15, %v6317_v26, %v11707_v35  ;;  %v6350_v53 = vsel %vm2250_vm15, %v6318_v10, %v11707_v35  ;;  %v12587_v26 = vld [vmem:[#allocation76_spill] sm:$0xff] }
 0x44e   : > { %v6380_v17 = vpack.c.bf16 %v6350_v53, %v6349_v58  ;;  %v7362_v61 = vunpack.i.h.bf16 %v7360_v48  ;;  %v7361_v34 = vunpack.i.l.bf16 %v7360_v48  ;;  %v11822_v10 = vadd.f32 %v11686_v25, %v12587_v26 }
 0x44f   : > { %v1159_v53 = vmul.f32 %v12572_v13, %v11783_v28 }
 0x450   : > { %v6410_v49 = vsel %vm6402_vm7, %v6380_v17, 0  ;;  %v6255_v46 = vsel %vm6249_vm12, %v1189_v7, %v7362_v61  ;;  %v6254_v33 = vsel %vm6249_vm12, %v1188_v23, %v7361_v34  ;;  %v1207_v17 = vsel %vm1142_vm1, %v1084_v3, %v1175_v63  ;;  %v12589_v34 = vld [vmem:[#allocation92_spill] sm:$0xff] }
 0x451   : > { %v7385_v44 = vpop.permute.xlu0 %7384  ;;  %7073 = vmatpush3.bf16.xpose.msra.mxu1 %v6410_v49  ;;  %v7370_v8 = vpop.permute.xlu1 %7369  ;;  %v1191_v61 = vsel %vm1126_vm2, %v11783_v28, %v1159_v53  ;;  %vm1127_vm5 = vcmp.ge.f32.partialorder %v11822_v10, 0.0 }
 0x452   : > { %v7387_v62 = vunpack.i.h.bf16 %v7385_v44  ;;  %v7386_v36 = vunpack.i.l.bf16 %v7385_v44  ;;  %v7372_v55 = vunpack.i.h.bf16 %v7370_v8  ;;  %v7371_v14 = vunpack.i.l.bf16 %v7370_v8 }
 0x454   : > { %v6335_v41 = vsel %vm6314_vm9, %v6302_v12, %v7386_v36  ;;  %v6336_v39 = vsel %vm6314_vm9, %v6303_v20, %v7387_v62  ;;  %v6286_v6 = vsel %vm905_vm14, %v6254_v33, %v7371_v14  ;;  %v6287_v1 = vsel %vm905_vm14, %v6255_v46, %v7372_v55  ;;  %v12590_v20 = vld [vmem:[#allocation79_spill] sm:$0xff] }
 0x455   : > { %v7395_v31 = vpop.permute.xlu0 %7394  ;;  %v7380_v0 = vpop.permute.xlu1 %7379  ;;  %v6367_v18 = vsel %vm2250_vm15, %v6335_v41, %v11707_v35  ;;  %v6368_v43 = vsel %vm2250_vm15, %v6336_v39, %v11707_v35  ;;  %v1092_v62 = vadd.f32 %v11686_v25, %v12589_v34  ;;  %v1028_v55 = vadd.f32 %v11686_v25, %v12590_v20 }
 0x456   : > { %v7382_v24 = vunpack.i.h.bf16 %v7380_v0  ;;  %v7381_v50 = vunpack.i.l.bf16 %v7380_v0  ;;  %v6389_v51 = vpack.c.bf16 %v6368_v43, %v6367_v18  ;;  %v7397_v52 = vunpack.i.h.bf16 %v7395_v31 }
 0x457   : > { %v7396_v47 = vunpack.i.l.bf16 %v7395_v31  ;;  %v1176_v31 = vmul.f32 %v12572_v13, %v1089_v22  ;;  %vm1144_vm13 = vcmp.ge.f32.partialorder %v1092_v62, 0.0  ;;  %v1177_v46 = vmul.f32 %v12572_v13, %v1092_v62 }
 0x458   : > { %v6319_v19 = vsel %vm6314_vm9, %v6286_v6, %v7381_v50  ;;  %v6320_v29 = vsel %vm6314_vm9, %v6287_v1, %v7382_v24  ;;  %7260 = vmatprep.subr.msk.bf16.mxu1 %vm6402_vm7, %v6389_v51  ;;  %v6273_v37 = vsel %vm6249_vm12, %v1207_v17, %v7397_v52  ;;  %v1160_v52 = vmul.f32 %v12572_v13, %v11822_v10 }
 0x459   : > { %v7405_v54 = vpop.permute.xlu0 %7404  ;;  %v7390_v32 = vpop.permute.xlu1 %7389  ;;  %v6351_v59 = vsel %vm2250_vm15, %v6319_v19, %v11707_v35  ;;  %v6352_v42 = vsel %vm2250_vm15, %v6320_v29, %v11707_v35  ;;  %v6272_v15 = vsel %vm6249_vm12, %v1206_v38, %v7396_v47  ;;  %v12591_v19 = vld [vmem:[#allocation75_spill] sm:$0xff]  ;;  %v12592_v47 = vld [vmem:[#allocation77_spill] sm:$0xff]  ;;  %vm1128_vm4 = vcmp.ge.f32.partialorder %v1028_v55, 0.0 }
 0x45a   : > { %v7407_v16 = vunpack.i.h.bf16 %v7405_v54  ;;  %v7406_v48 = vunpack.i.l.bf16 %v7405_v54  ;;  %v6381_v58 = vpack.c.bf16 %v6352_v42, %v6351_v59  ;;  %v7392_v49 = vunpack.i.h.bf16 %v7390_v32 }
 0x45b   : > { %v7391_v5 = vunpack.i.l.bf16 %v7390_v32  ;;  %v11867_v29 = vadd.f32 %v11686_v25, %v12591_v19  ;;  %v11874_v54 = vadd.f32 %v11686_v25, %v12592_v47  ;;  %v1161_v26 = vmul.f32 %v12572_v13, %v1028_v55 }
 0x45c   : > { %v6413_v40 = vsel %vm6402_vm7, %v6381_v58, 0  ;;  %v6304_v57 = vsel %vm905_vm14, %v6272_v15, %v7406_v48  ;;  %v6305_v60 = vsel %vm905_vm14, %v6273_v37, %v7407_v16  ;;  %v6257_v28 = vsel %vm6249_vm12, %v1191_v61, %v7392_v49  ;;  %v12593_v48 = vld [vmem:[#allocation88_spill] sm:$0xff] }
 0x45d   : > { %v7415_v2 = vpop.permute.xlu0 %7414  ;;  %v7400_v4 = vpop.permute.xlu1 %7399  ;;  %7075 = vmatpush3.bf16.xpose.msra.mxu1 %v6413_v40  ;;  %v6256_v41 = vsel %vm6249_vm12, %v1190_v56, %v7391_v5  ;;  %v1208_v56 = vsel %vm1143_vm3, %v1089_v22, %v1176_v31  ;;  %v1209_v16 = vsel %vm1144_vm13, %v1092_v62, %v1177_v46  ;;  %v1097_v58 = vadd.f32 %v11686_v25, %v12593_v48 }
 0x45e   : > { %v7417_v9 = vunpack.i.h.bf16 %v7415_v2  ;;  %v7416_v45 = vunpack.i.l.bf16 %v7415_v2  ;;  %v7402_v44 = vunpack.i.h.bf16 %v7400_v4  ;;  %v7401_v8 = vunpack.i.l.bf16 %v7400_v4 }
 0x45f   : > { %v1193_v61 = vsel %vm1128_vm4, %v1028_v55, %v1161_v26  ;;  %vm1145_vm8 = vcmp.ge.f32.partialorder %v1097_v58, 0.0  ;;  %vm1129_vm10 = vcmp.ge.f32.partialorder %v11867_v29, 0.0  ;;  %vm1130_vm11 = vcmp.ge.f32.partialorder %v11874_v54, 0.0 }
 0x460   : > { %v6337_v36 = vsel %vm6314_vm9, %v6304_v57, %v7416_v45  ;;  %v6338_v12 = vsel %vm6314_vm9, %v6305_v60, %v7417_v9  ;;  %v6288_v0 = vsel %vm905_vm14, %v6256_v41, %v7401_v8  ;;  %v6289_v18 = vsel %vm905_vm14, %v6257_v28, %v7402_v44  ;;  %v12594_v57 = vld [vmem:[#allocation91_spill] sm:$0xff] }
 0x461   : > { %v7425_v14 = vpop.permute.xlu0 %7424  ;;  %v7410_v23 = vpop.permute.xlu1 %7409  ;;  %v6369_v21 = vsel %vm2250_vm15, %v6337_v36, %v11707_v35  ;;  %v6370_v3 = vsel %vm2250_vm15, %v6338_v12, %v11707_v35  ;;  %v1192_v45 = vsel %vm1127_vm5, %v11822_v10, %v1160_v52  ;;  %v1100_v60 = vadd.f32 %v11686_v25, %v12594_v57 }
 0x462   : > { %v7412_v39 = vunpack.i.h.bf16 %v7410_v23  ;;  %v7411_v7 = vunpack.i.l.bf16 %v7410_v23  ;;  %v6390_v43 = vpack.c.bf16 %v6370_v3, %v6369_v21  ;;  %v7427_v50 = vunpack.i.h.bf16 %v7425_v14 }
 0x463   : > { %v7426_v27 = vunpack.i.l.bf16 %v7425_v14  ;;  %v1178_v23 = vmul.f32 %v12572_v13, %v1097_v58  ;;  %vm1146_vm6 = vcmp.ge.f32.partialorder %v1100_v60, 0.0  ;;  %v1179_v28 = vmul.f32 %v12572_v13, %v1100_v60 }
 0x464   : > { %v6321_v33 = vsel %vm6314_vm9, %v6288_v0, %v7411_v7  ;;  %v6322_v24 = vsel %vm6314_vm9, %v6289_v18, %v7412_v39  ;;  %7261 = vmatprep.subr.msk.bf16.mxu1 %vm6402_vm7, %v6390_v43  ;;  %v6275_v53 = vsel %vm6249_vm12, %v1209_v16, %v7427_v50 }
 0x465   : > { %v7435_v6 = vpop.permute.xlu0 %7434  ;;  %v7420_v1 = vpop.permute.xlu1 %7419  ;;  %v6353_v51 = vsel %vm2250_vm15, %v6321_v33, %v11707_v35  ;;  %v6354_v63 = vsel %vm2250_vm15, %v6322_v24, %v11707_v35  ;;  %v6274_v38 = vsel %vm6249_vm12, %v1208_v56, %v7426_v27  ;;  %v1162_v27 = vmul.f32 %v12572_v13, %v11867_v29 }
 0x466   : > { %v7437_v32 = vunpack.i.h.bf16 %v7435_v6  ;;  %v7436_v59 = vunpack.i.l.bf16 %v7435_v6  ;;  %v6382_v42 = vpack.c.bf16 %v6354_v63, %v6353_v51  ;;  %v7422_v15 = vunpack.i.h.bf16 %v7420_v1 }
 0x467   : > { %v7421_v2 = vunpack.i.l.bf16 %v7420_v1  ;;  %v1210_v6 = vsel %vm1145_vm8, %v1097_v58, %v1178_v23  ;;  %v1211_v1 = vsel %vm1146_vm6, %v1100_v60, %v1179_v28  ;;  %v1163_v51 = vmul.f32 %v12572_v13, %v11874_v54 }
 0x468   : > { %v6416_v37 = vsel %vm6402_vm7, %v6382_v42, 0  ;;  %v6306_v22 = vsel %vm905_vm14, %v6274_v38, %v7436_v59  ;;  %v6307_v49 = vsel %vm905_vm14, %v6275_v53, %v7437_v32  ;;  %v6259_v10 = vsel %vm6249_vm12, %v1193_v61, %v7422_v15 }
 0x469   : > { %v7445_v17 = vpop.permute.xlu0 %7444  ;;  %v7430_v30 = vpop.permute.xlu1 %7429  ;;  %7077 = vmatpush3.bf16.xpose.msra.mxu1 %v6416_v37  ;;  %v6258_v20 = vsel %vm6249_vm12, %v1192_v45, %v7421_v2 }
 0x46a   : > { %v7447_v4 = vunpack.i.h.bf16 %v7445_v17  ;;  %v7446_v40 = vunpack.i.l.bf16 %v7445_v17  ;;  %v7432_v5 = vunpack.i.h.bf16 %v7430_v30  ;;  %v7431_v9 = vunpack.i.l.bf16 %v7430_v30 }
 0x46b   : > { %v1194_v17 = vsel %vm1129_vm10, %v11867_v29, %v1162_v27  ;;  %v1195_v30 = vsel %vm1130_vm11, %v11874_v54, %v1163_v51 }
 0x46c   : > { %v6339_v44 = vsel %vm6314_vm9, %v6306_v22, %v7446_v40  ;;  %v6340_v8 = vsel %vm6314_vm9, %v6307_v49, %v7447_v4  ;;  %v6290_v21 = vsel %vm905_vm14, %v6258_v20, %v7431_v9  ;;  %v6291_v55 = vsel %vm905_vm14, %v6259_v10, %v7432_v5  ;;  %v12595_v20 = vld [vmem:[#allocation106_spill] sm:$0xff] }
 0x46d   : > { %v7455_v34 = vpop.permute.xlu0 %7454  ;;  %v7440_v62 = vpop.permute.xlu1 %7439  ;;  %v6371_v36 = vsel %vm2250_vm15, %v6339_v44, %v11707_v35  ;;  %v6372_v12 = vsel %vm2250_vm15, %v6340_v8, %v11707_v35 }
 0x46e   : > { %v7442_v25 = vunpack.i.h.bf16 %v7440_v62  ;;  %v7441_v14 = vunpack.i.l.bf16 %v7440_v62  ;;  %v6391_v3 = vpack.c.bf16 %v6372_v12, %v6371_v36  ;;  %v7457_v7 = vunpack.i.h.bf16 %v7455_v34 }
 0x46f   : > { %v7456_v31 = vunpack.i.l.bf16 %v7455_v34 }
 0x470   : > { %v6323_v41 = vsel %vm6314_vm9, %v6290_v21, %v7441_v14  ;;  %v6324_v39 = vsel %vm6314_vm9, %v6291_v55, %v7442_v25  ;;  %7262 = vmatprep.subr.msk.bf16.mxu1 %vm6402_vm7, %v6391_v3  ;;  %v6277_v63 = vsel %vm6249_vm12, %v1211_v1, %v7457_v7  ;;  %v12596_v14 = vld [vmem:[#allocation100_spill] sm:$0xff]  ;;  %v12597_v1 = vld [vmem:[#allocation89_spill] sm:$0xff] }
 0x471   : > { %v7465_v0 = vpop.permute.xlu0 %7464  ;;  %v7450_v18 = vpop.permute.xlu1 %7449  ;;  %v6355_v43 = vsel %vm2250_vm15, %v6323_v41, %v11707_v35  ;;  %v6356_v46 = vsel %vm2250_vm15, %v6324_v39, %v11707_v35  ;;  %v6276_v19 = vsel %vm6249_vm12, %v1210_v6, %v7456_v31 }
 0x472   : > { %v7467_v33 = vunpack.i.h.bf16 %v7465_v0  ;;  %v7466_v24 = vunpack.i.l.bf16 %v7465_v0  ;;  %v6383_v50 = vpack.c.bf16 %v6356_v46, %v6355_v43  ;;  %v7452_v59 = vunpack.i.h.bf16 %v7450_v18 }
 0x473   : > { %v7451_v42 = vunpack.i.l.bf16 %v7450_v18 }
 0x474   : > { %v6419_v32 = vsel %vm6402_vm7, %v6383_v50, 0  ;;  %v6308_v16 = vsel %vm905_vm14, %v6276_v19, %v7466_v24  ;;  %v6309_v48 = vsel %vm905_vm14, %v6277_v63, %v7467_v33  ;;  %v6261_v40 = vsel %vm6249_vm12, %v1195_v30, %v7452_v59  ;;  %v12598_v63 = vld [vmem:[#allocation83_spill] sm:$0xff] }
 0x475   : > { %v7475_v52 = vpop.permute.xlu0 %7474  ;;  %v7460_v47 = vpop.permute.xlu1 %7459  ;;  %7079 = vmatpush3.bf16.xpose.msra.mxu1 %v6419_v32  ;;  %v6260_v22 = vsel %vm6249_vm12, %v1194_v17, %v7451_v42 }
 0x476   : > { %v7477_v26 = vunpack.i.h.bf16 %v7475_v52  ;;  %v7476_v56 = vunpack.i.l.bf16 %v7475_v52  ;;  %v7462_v58 = vunpack.i.h.bf16 %v7460_v47  ;;  %v7461_v53 = vunpack.i.l.bf16 %v7460_v47 }
 0x478   : > { %v6341_v13 = vsel %vm6314_vm9, %v6308_v16, %v7476_v56  ;;  %v6342_v38 = vsel %vm6314_vm9, %v6309_v48, %v7477_v26  ;;  %v6292_v29 = vsel %vm905_vm14, %v6260_v22, %v7461_v53  ;;  %v6293_v9 = vsel %vm905_vm14, %v6261_v40, %v7462_v58 }
 0x479   : > { %v7485_v37 = vpop.permute.xlu0 %7484  ;;  %v7470_v15 = vpop.permute.xlu1 %7469  ;;  %v6373_v2 = vsel %vm2250_vm15, %v6341_v13, %v11707_v35  ;;  %v6374_v4 = vsel %vm2250_vm15, %v6342_v38, %v11707_v35 }
 0x47a   : > { %v7472_v49 = vunpack.i.h.bf16 %v7470_v15  ;;  %v7471_v5 = vunpack.i.l.bf16 %v7470_v15  ;;  %v6392_v45 = vpack.c.bf16 %v6374_v4, %v6373_v2  ;;  %v7487_v60 = vunpack.i.h.bf16 %v7485_v37  ;;  %v12599_v15 = vld [vmem:[#allocation101_spill] sm:$0xff] }
 0x47b   : > { %v7486_v44 = vunpack.i.l.bf16 %v7485_v37 }
 0x47c   : > { %v6325_v54 = vsel %vm6314_vm9, %v6292_v29, %v7471_v5  ;;  %v6326_v57 = vsel %vm6314_vm9, %v6293_v9, %v7472_v49  ;;  %7263 = vmatprep.subr.msk.bf16.mxu1 %vm6402_vm7, %v6392_v45  ;;  %v6279_v25 = vsel %vm6249_vm12, %v12595_v20, %v7487_v60  ;;  %v12600_v5 = vld [vmem:[#allocation99_spill] sm:$0xff] }
 0x47d   : > { %v7495_v8 = vpop.permute.xlu0 %7494  ;;  %v7480_v61 = vpop.permute.xlu1 %7479  ;;  %v6357_v34 = vsel %vm2250_vm15, %v6325_v54, %v11707_v35  ;;  %v6358_v62 = vsel %vm2250_vm15, %v6326_v57, %v11707_v35  ;;  %v6278_v23 = vsel %vm6249_vm12, %v12596_v14, %v7486_v44 }
 0x47e   : > { %v7497_v36 = vunpack.i.h.bf16 %v7495_v8  ;;  %v7496_v12 = vunpack.i.l.bf16 %v7495_v8  ;;  %v6384_v10 = vpack.c.bf16 %v6358_v62, %v6357_v34  ;;  %v7482_v28 = vunpack.i.h.bf16 %v7480_v61  ;;  %v12601_v62 = vld [vmem:[#allocation87_spill] sm:$0xff] }
 0x47f   : > { %v7481_v41 = vunpack.i.l.bf16 %v7480_v61 }
 0x480   : > { %v6422_v3 = vsel %vm6402_vm7, %v6384_v10, 0  ;;  %v6310_v31 = vsel %vm905_vm14, %v6278_v23, %v7496_v12  ;;  %v6311_v0 = vsel %vm905_vm14, %v6279_v25, %v7497_v36  ;;  %v6263_v51 = vsel %vm6249_vm12, %v12597_v1, %v7482_v28  ;;  %v12602_v25 = vld [vmem:[#allocation81_spill] sm:$0xff] }
 0x481   : > { %v7505_v21 = vpop.permute.xlu0 %7504  ;;  %v7490_v55 = vpop.permute.xlu1 %7489  ;;  %7081 = vmatpush3.bf16.xpose.msra.mxu1 %v6422_v3  ;;  %v6262_v19 = vsel %vm6249_vm12, %v12598_v63, %v7481_v41 }
 0x482   : > { %v7507_v39 = vunpack.i.h.bf16 %v7505_v21  ;;  %v7506_v7 = vunpack.i.l.bf16 %v7505_v21  ;;  %v7492_v18 = vunpack.i.h.bf16 %v7490_v55  ;;  %v7491_v43 = vunpack.i.l.bf16 %v7490_v55 }
 0x484   : > { %v6343_v46 = vsel %vm6314_vm9, %v6310_v31, %v7506_v7  ;;  %v6344_v33 = vsel %vm6314_vm9, %v6311_v0, %v7507_v39  ;;  %v6294_v32 = vsel %vm905_vm14, %v6262_v19, %v7491_v43  ;;  %v6295_v59 = vsel %vm905_vm14, %v6263_v51, %v7492_v18 }
 0x485   : > { %v7515_v24 = vpop.permute.xlu0 %7514  ;;  %v7500_v50 = vpop.permute.xlu1 %7499  ;;  %v6375_v27 = vsel %vm2250_vm15, %v6343_v46, %v11707_v35  ;;  %v6376_v6 = vsel %vm2250_vm15, %v6344_v33, %v11707_v35  ;;  %v6497_v33 = vstv %s6586_s25 }
 0x486   : > { %v7502_v52 = vunpack.i.h.bf16 %v7500_v50  ;;  %v7501_v47 = vunpack.i.l.bf16 %v7500_v50  ;;  %v6393_v42 = vpack.c.bf16 %v6376_v6, %v6375_v27  ;;  %v7517_v16 = vunpack.i.h.bf16 %v7515_v24 }
 0x487   : > { %v7516_v38 = vunpack.i.l.bf16 %v7515_v24 }
 0x488   : > { %v6327_v26 = vsel %vm6314_vm9, %v6294_v32, %v7501_v47  ;;  %v6328_v56 = vsel %vm6314_vm9, %v6295_v59, %v7502_v52  ;;  %7264 = vmatprep.subr.msk.bf16.mxu1 %vm6402_vm7, %v6393_v42  ;;  %v6281_v2 = vsel %vm6249_vm12, %v12599_v15, %v7517_v16 }
 0x489   : > { %v7525_v48 = vpop.permute.xlu0 %7524  ;;  %v7510_v58 = vpop.permute.xlu1 %7509  ;;  %v6359_v53 = vsel %vm2250_vm15, %v6327_v26, %v11707_v35  ;;  %v6360_v13 = vsel %vm2250_vm15, %v6328_v56, %v11707_v35  ;;  %v6280_v29 = vsel %vm6249_vm12, %v12600_v5, %v7516_v38 }
 0x48a   : > { %v7527_v17 = vunpack.i.h.bf16 %v7525_v48  ;;  %v7526_v30 = vunpack.i.l.bf16 %v7525_v48  ;;  %v6385_v37 = vpack.c.bf16 %v6360_v13, %v6359_v53  ;;  %v7512_v4 = vunpack.i.h.bf16 %v7510_v58 }
 0x48b   : > { %v7511_v9 = vunpack.i.l.bf16 %v7510_v58 }
 0x48c   : > { %v6425_v49 = vsel %vm6402_vm7, %v6385_v37, 0  ;;  %v6312_v57 = vsel %vm905_vm14, %v6280_v29, %v7526_v30  ;;  %v6313_v60 = vsel %vm905_vm14, %v6281_v2, %v7527_v17  ;;  %v6265_v36 = vsel %vm6249_vm12, %v12601_v62, %v7512_v4 }
 0x48d   : > { %v7535_v40 = vpop.permute.xlu0 %7534  ;;  %v7520_v22 = vpop.permute.xlu1 %7519  ;;  %7083 = vmatpush3.bf16.xpose.msra.mxu1 %v6425_v49  ;;  %v6264_v14 = vsel %vm6249_vm12, %v12602_v25, %v7511_v9 }
 0x48e   : > { %v7537_v45 = vunpack.i.h.bf16 %v7535_v40  ;;  %v7536_v54 = vunpack.i.l.bf16 %v7535_v40  ;;  %v7522_v44 = vunpack.i.h.bf16 %v7520_v22  ;;  %v7521_v8 = vunpack.i.l.bf16 %v7520_v22 }
 0x490   : > { %v6345_v61 = vsel %vm6314_vm9, %v6312_v57, %v7536_v54  ;;  %v6346_v34 = vsel %vm6314_vm9, %v6313_v60, %v7537_v45  ;;  %v6296_v3 = vsel %vm905_vm14, %v6264_v14, %v7521_v8  ;;  %v6297_v28 = vsel %vm905_vm14, %v6265_v36, %v7522_v44 }
 0x491   : > { %v6377_v12 = vsel %vm2250_vm15, %v6345_v61, %v11707_v35  ;;  %v6378_v10 = vsel %vm2250_vm15, %v6346_v34, %v11707_v35  ;;  %v7530_v20 = vpop.permute.xlu1 %7529 }
 0x492   : > { %v7532_v23 = vunpack.i.h.bf16 %v7530_v20  ;;  %v7531_v21 = vunpack.i.l.bf16 %v7530_v20  ;;  %v6394_v55 = vpack.c.bf16 %v6378_v10, %v6377_v12 }
 0x494   : > { %v6329_v41 = vsel %vm6314_vm9, %v6296_v3, %v7531_v21  ;;  %v6330_v39 = vsel %vm6314_vm9, %v6297_v28, %v7532_v23  ;;  %7265 = vmatprep.subr.msk.bf16.mxu1 %vm6402_vm7, %v6394_v55 }
 0x495   : > { %v6361_v7 = vsel %vm2250_vm15, %v6329_v41, %v11707_v35  ;;  %v6362_v31 = vsel %vm2250_vm15, %v6330_v39, %v11707_v35 }
 0x496   : > { %v6386_v0 = vpack.c.bf16 %v6362_v31, %v6361_v7 }
 0x498   : > { %v6428_v18 = vsel %vm6402_vm7, %v6386_v0, 0 }
 0x499   : > { %7085 = vmatpush3.bf16.xpose.msra.mxu1 %v6428_v18 }
 0x4a0   : > { %7087 = vmatmul.mubr.msk.bf16.vlgmr.msra.gmra.mrb[64].mxu1 %vm6402_vm7, %v11674_v11 }
 0x4a2   : > { %v6400_v43 = vpop.permute.xlu1 %6399 }
 0x573   : > { %v6488_v46 = vpop.f32.mrb[64].mxu1 }
 0x574   : > { %v6489_v24 = vadd.f32 %v6488_v46, %v6400_v43  ;;  %v6490_v50 = vpop.f32.mrb[65].mxu1 }
 0x575   : > { %v6491_v27 = vadd.f32 %v6490_v50, %v6400_v43  ;;  %v6492_v6 = vpop.f32.mrb[66].mxu1 }
 0x576   : > { %vm6495_vm14 = vcmp.ge.f32.partialorder %v6489_v24, 0.0  ;;  %v6498_v35 = vmul.f32 %v6497_v33, %v6489_v24  ;;  %v6493_v1 = vpop.f32.mrb[67].mxu1 }
 0x577   : > { %vm6496_vm15 = vcmp.ge.f32.partialorder %v6491_v27, 0.0  ;;  %v6499_v51 = vmul.f32 %v6497_v33, %v6491_v27 }
 0x578   : > { %v6500_v63 = vsel %vm6495_vm14, %v6489_v24, %v6498_v35 }
 0x579   : > { %6502 = vst [vmem:[%s481_s23] sm:$0xff] %v6500_v63  ;;  %v6501_v11 = vsel %vm6496_vm15, %v6491_v27, %v6499_v51 }
 0x57a   : > { %6503 = vst [vmem:[%s481_s23 + $0x8] sm:$0xff] %v6501_v11 }
 0x57b PF: > { %s25_s29 = sadd.s32 1, %s7736_s29  }
 0x57c   : > { %p22_p1 = scmp.ge.s32.totalorder %s25_s29, 4  }
 0x57e   :  { %24 = sbr.rel (!%p22_p1) target bundleno = 1 (0x1), region = 112 }
 0x585   :  { %6525 = vsyncpa [#allocation4], 1 }
 0x586   :  { %6527 = vsyncpa [#allocation4 + $0x1], 1 }

</bundles_post_ra>
